<compile_context>
chip_gen: v7x
topology: tpu7x:2x2x1
jax: 0.10.0
libtpu: 0.0.40
codegen_flags: <defaults>
</compile_context>

<pallas_src>
import functools

import jax
import jax.numpy as jnp
from jax.experimental import pallas as pl
from jax.experimental.pallas import tpu as pltpu

_LANE = 128


def _round_up(x, m):
    return ((x + m - 1) // m) * m


# ----------------------------- Pallas kernels --------------------------------

def _conv3x3_stats_kernel(*refs, H: int, W: int, fuse_in: bool):
    """[optional prev-layer BN affine + ReLU on the input slab]
       -> 3x3 'same' conv as 9 rolled+masked MXU matmuls (no padded scratch, no
          strided copies)
       -> lane-dense (HW, Cout_p) output slab + per-image channel sum / sum-sq."""
    if fuse_in:
        x_ref, sc_ref, sh_ref, w_ref, y_ref, sum_ref, ssq_ref = refs
    else:
        x_ref, w_ref, y_ref, sum_ref, ssq_ref = refs
        sc_ref = sh_ref = None

    HW = H * W
    cout_p = y_ref.shape[2]
    n_half = 2 if HW % 16 == 0 else 1          # two row-halves -> 16-vreg live acc
    Hh = HW // n_half
    mxu_dtype = w_ref.dtype

    x = x_ref[0]                               # (HW, Cin_p) lane-dense f32
    if fuse_in:
        # Previous layer's BatchNorm affine + ReLU fused into this conv's input
        # (removes a full activation read+write round trip through HBM).
        x = jnp.maximum(x * sc_ref[...] + sh_ref[...], 0.0)

    # Boundary masks for the 3x3 halo, built once from a 2-D iota.
    p = jax.lax.broadcasted_iota(jnp.int32, (HW, 1), 0)
    col = p % W
    row_ok = {-1: p >= W, 0: None, 1: p < (H - 1) * W}
    col_ok = {-1: col >= 1, 0: None, 1: col < (W - 1)}

    ssum = jnp.zeros((1, cout_p), jnp.float32)
    ssq = jnp.zeros((1, cout_p), jnp.float32)
    for half in range(n_half):
        r0 = half * Hh
        acc = jnp.zeros((Hh, cout_p), jnp.float32)
        for kh in range(3):
            dy = kh - 1
            for kw in range(3):
                dx = kw - 1
                shift = dy * W + dx
                # out[p] = x[p + shift] when (h+dy, w+dx) is in range, else 0
                # (exact zero 'same' padding).  roll -> XLU, where -> VPU.
                src = x if shift == 0 else pltpu.roll(x, (-shift) % HW, axis=0)
                mask = None
                for m in (row_ok[dy], col_ok[dx]):
                    if m is not None:
                        mask = m if mask is None else jnp.logical_and(mask, m)
                if mask is not None:
                    src = jnp.where(mask, src, 0.0)
                lhs = src[r0:r0 + Hh, :].astype(mxu_dtype)
                acc += jnp.dot(lhs, w_ref[kh * 3 + kw],
                               preferred_element_type=jnp.float32)
        # Lane-dense, sublane-aligned store.  Conv bias dropped on purpose: it
        # cancels exactly under training-mode BatchNorm.
        y_ref[0, r0:r0 + Hh, :] = acc
        ssum += jnp.sum(acc, axis=0, keepdims=True)
        ssq += jnp.sum(acc * acc, axis=0, keepdims=True)

    sum_ref[0] = ssum
    ssq_ref[0] = ssq


def _bn_relu_t_kernel(y_ref, sc_ref, sh_ref, o_ref, *, c_out: int):
    """Final BN affine + ReLU fused with the channel slice and the (HW,C)->(C,HW)
    transpose (XLU), so XLA never re-reads/re-writes the channel-padded slab."""
    yt = y_ref[0].T                            # (Cout_p, HW)
    o_ref[0] = jnp.maximum(yt[:c_out, :] * sc_ref[...] + sh_ref[...], 0.0)


# ----------------------------- Wrappers ---------------------------------------

def conv3x3_stats(x_slab, w_kio, H, W, in_scale=None, in_shift=None):
    """x_slab: (N, H*W, Cin_p) lane-dense f32.  w_kio: (9, Cin_p, Cout_p) zero-padded
    HWIO weights (f32 or bf16).  Returns:
      y   : (N, H*W, Cout_p) conv output (pre-BN), lane-dense slab
      ssum: (N, 1, Cout_p)   per-image channel sums
      ssq : (N, 1, Cout_p)   per-image channel sums of squares
    """
    N, HW, cin_p = x_slab.shape
    _, _, cout_p = w_kio.shape
    fuse = in_scale is not None

    kernel = functools.partial(_conv3x3_stats_kernel, H=H, W=W, fuse_in=fuse)

    in_specs = [pl.BlockSpec((1, HW, cin_p), lambda n: (n, 0, 0))]
    args = [x_slab]
    if fuse:
        in_specs += [
            pl.BlockSpec((1, cin_p), lambda n: (0, 0)),
            pl.BlockSpec((1, cin_p), lambda n: (0, 0)),
        ]
        args += [in_scale.reshape(1, cin_p), in_shift.reshape(1, cin_p)]
    in_specs.append(pl.BlockSpec((9, cin_p, cout_p), lambda n: (0, 0, 0)))
    args.append(w_kio)

    flops = 2 * N * HW * 9 * cin_p * cout_p
    bytes_accessed = (4 * N * HW * (cin_p + cout_p)
                      + w_kio.size * w_kio.dtype.itemsize + 8 * N * cout_p)

    return pl.pallas_call(
        kernel,
        out_shape=(
            jax.ShapeDtypeStruct((N, HW, cout_p), jnp.float32),
            jax.ShapeDtypeStruct((N, 1, cout_p), jnp.float32),
            jax.ShapeDtypeStruct((N, 1, cout_p), jnp.float32),
        ),
        grid=(N,),
        in_specs=in_specs,
        out_specs=(
            pl.BlockSpec((1, HW, cout_p), lambda n: (n, 0, 0)),
            pl.BlockSpec((1, 1, cout_p), lambda n: (n, 0, 0)),
            pl.BlockSpec((1, 1, cout_p), lambda n: (n, 0, 0)),
        ),
        compiler_params=pltpu.CompilerParams(dimension_semantics=("parallel",)),
        cost_estimate=pl.CostEstimate(flops=flops, transcendentals=0,
                                      bytes_accessed=bytes_accessed),
    )(*args)


def bn_relu_transpose(y_slab, scale, shift, c_out):
    """(N, HW, Cp) slab -> BN affine + ReLU -> (N, c_out, HW) (slice + transpose
    fused in-kernel)."""
    N, HW, cp = y_slab.shape
    kernel = functools.partial(_bn_relu_t_kernel, c_out=c_out)
    return pl.pallas_call(
        kernel,
        out_shape=jax.ShapeDtypeStruct((N, c_out, HW), jnp.float32),
        grid=(N,),
        in_specs=[
            pl.BlockSpec((1, HW, cp), lambda n: (n, 0, 0)),
            pl.BlockSpec((c_out, 1), lambda n: (0, 0)),
            pl.BlockSpec((c_out, 1), lambda n: (0, 0)),
        ],
        out_specs=pl.BlockSpec((1, c_out, HW), lambda n: (n, 0, 0)),
        compiler_params=pltpu.CompilerParams(dimension_semantics=("parallel",)),
        cost_estimate=pl.CostEstimate(flops=2 * N * HW * c_out, transcendentals=0,
                                      bytes_accessed=4 * N * HW * (cp + c_out)),
    )(y_slab, scale.reshape(c_out, 1), shift.reshape(c_out, 1))


def _pack_weight(w_hwio, cin_p, cout_p, dtype):
    kh, kw, ci, co = w_hwio.shape
    w = w_hwio.astype(jnp.float32).reshape(kh * kw, ci, co)
    w = jnp.pad(w, ((0, 0), (0, cin_p - ci), (0, cout_p - co)))
    return w.astype(dtype)


def _pad_vec(v, c_p):
    return jnp.pad(v.astype(jnp.float32), (0, c_p - v.shape[0]))


def _fold_bn(s, q, gamma, beta, cnt, eps):
    # Biased variance, as PyTorch uses for normalization in training mode.
    # NOTE: E[x^2]-E[x]^2 in f32 is cancellation-prone for very large activation
    # magnitudes; fine here (activations are O(1)).
    m = jnp.sum(s, axis=(0, 1)) / cnt
    v = jnp.maximum(jnp.sum(q, axis=(0, 1)) / cnt - m * m, 0.0)
    scale = gamma / jnp.sqrt(v + eps)
    return scale, beta - m * scale


def double_conv_2d(x_nchw, params, eps=1e-5, mxu_dtype=jnp.float32):
    N, Cin, H, W = x_nchw.shape
    Cmid = params["w1"].shape[-1]
    Cout = params["w2"].shape[-1]
    cin_p = _round_up(Cin, _LANE)
    cmid_p = _round_up(Cmid, _LANE)
    cout_p = _round_up(Cout, _LANE)
    cnt = jnp.float32(N * H * W)

    # NCHW -> NHWC, channel-pad to a 128-lane multiple (tiny), flatten to a
    # lane-dense (N, HW, Cin_p) slab (free reshape: minor dim already 128-wide).
    x = jnp.transpose(x_nchw, (0, 2, 3, 1)).astype(jnp.float32)
    x = jnp.pad(x, ((0, 0), (0, 0), (0, 0), (0, cin_p - Cin)))
    x = x.reshape(N, H * W, cin_p)

    w1 = _pack_weight(params["w1"], cin_p, cmid_p, mxu_dtype)
    w2 = _pack_weight(params["w2"], cmid_p, cout_p, mxu_dtype)
    g1, be1 = _pad_vec(params["gamma1"], cmid_p), _pad_vec(params["beta1"], cmid_p)
    g2, be2 = _pad_vec(params["gamma2"], cout_p), _pad_vec(params["beta2"], cout_p)
    # Conv biases b1/b2 deliberately unused: y - mean(y) is bias-invariant, so they
    # cancel exactly in training-mode BatchNorm.

    # ---- layer 1: conv1 + fused BN1 batch-statistics epilogue ----------------
    y1, s1, q1 = conv3x3_stats(x, w1, H, W)
    sc1, sh1 = _fold_bn(s1, q1, g1, be1, cnt, eps)

    # ---- layer 2: fused (BN1 affine + ReLU) prologue + conv2 + BN2 stats -----
    y2, s2, q2 = conv3x3_stats(y1, w2, H, W, in_scale=sc1, in_shift=sh1)
    sc2, sh2 = _fold_bn(s2, q2, g2, be2, cnt, eps)

    # ---- final BN2 affine + ReLU, fused with channel slice + HWC->CHW --------
    out = bn_relu_transpose(y2, sc2[:Cout], sh2[:Cout], Cout)   # (N, Cout, HW)
    return out.reshape(N, Cout, H, W)


# ----------------------------- Reference (pure JAX) ---------------------------

def double_conv_2d_ref(x_nchw, params, eps=1e-5):
    def conv(x, w_hwio, b):
        w_oihw = jnp.transpose(w_hwio, (3, 2, 0, 1))
        y = jax.lax.conv_general_dilated(
            x, w_oihw, window_strides=(1, 1), padding="SAME",
            dimension_numbers=("NCHW", "OIHW", "NCHW"))
        return y + b[None, :, None, None]

    def bnr(y, g, b):
        m = jnp.mean(y, axis=(0, 2, 3), keepdims=True)
        v = jnp.mean((y - m) ** 2, axis=(0, 2, 3), keepdims=True)
        yn = (y - m) / jnp.sqrt(v + eps)
        return jnp.maximum(yn * g[None, :, None, None] + b[None, :, None, None], 0.0)

    y = bnr(conv(x_nchw, params["w1"], params["b1"]), params["gamma1"], params["beta1"])
    y = bnr(conv(y, params["w2"], params["b2"]), params["gamma2"], params["beta2"])
    return y


# ----------------------------- Main -------------------------------------------

if __name__ == "__main__":
    key = jax.random.PRNGKey(0)
    N, Cin, H, W = 2, 4, 16, 16
    Cmid = 8    # mid_channels defaults to out_channels
    Cout = 8

    ks = jax.random.split(key, 9)
    params = {
        "w1": 0.1 * jax.random.normal(ks[0], (3, 3, Cin, Cmid), jnp.float32),
        "b1": 0.1 * jax.random.normal(ks[1], (Cmid,), jnp.float32),
        "gamma1": 1.0 + 0.1 * jax.random.normal(ks[2], (Cmid,), jnp.float32),
        "beta1": 0.1 * jax.random.normal(ks[3], (Cmid,), jnp.float32),
        "w2": 0.1 * jax.random.normal(ks[4], (3, 3, Cmid, Cout), jnp.float32),
        "b2": 0.1 * jax.random.normal(ks[5], (Cout,), jnp.float32),
        "gamma2": 1.0 + 0.1 * jax.random.normal(ks[6], (Cout,), jnp.float32),
        "beta2": 0.1 * jax.random.normal(ks[7], (Cout,), jnp.float32),
    }
    x = jax.random.normal(ks[8], (N, Cin, H, W), jnp.float32)

    ref = jax.block_until_ready(double_conv_2d_ref(x, params))

    # f32 MXU operands: bit-level parity with the PyTorch/JAX reference.
    out = jax.block_until_ready(jax.jit(double_conv_2d)(x, params))
    assert out.shape == (N, Cout, H, W)
    err = float(jnp.max(jnp.abs(out - ref)))
    assert jnp.allclose(out, ref, atol=1e-4, rtol=1e-4), err

    # bf16 MXU operands (v5e/v6e/v7x perf recommendation); f32 accumulation/stats,
    # so only a small tolerance loosening is needed.
    fn_bf16 = jax.jit(functools.partial(double_conv_2d, mxu_dtype=jnp.bfloat16))
    out_bf = jax.block_until_ready(fn_bf16(x, params))
    assert bool(jnp.all(jnp.isfinite(out_bf)))
    err_bf = float(jnp.max(jnp.abs(out_bf - ref)))
    assert jnp.allclose(out_bf, ref, atol=1e-1, rtol=1e-1), err_bf

    print("KERNEL_OK")
</pallas_src>

<mosaic_0001>
module attributes {stable_mosaic.version = 11 : i64} {
  func.func @_conv3x3_stats_kernel(%arg0: i32, %arg1: memref<1x256x128xf32, #tpu.memory_space<vmem>>, %arg2: memref<9x128x128xf32, #tpu.memory_space<vmem>>, %arg3: memref<1x256x128xf32, #tpu.memory_space<vmem>>, %arg4: memref<1x1x128xf32, #tpu.memory_space<vmem>>, %arg5: memref<1x1x128xf32, #tpu.memory_space<vmem>>) attributes {dimension_semantics = [#tpu.dimension_semantics<parallel>], iteration_bounds = array<i64: 2>, scalar_prefetch = 0 : i64, scratch_operands = 0 : i64, tpu.core_type = #tpu.core_type<tc>, window_params = [{transform_indices = @transform_0, window_bounds = array<i64: 1, 256, 128>}, {pipeline_mode = #tpu.pipeline_mode<synchronous>, transform_indices = @transform_1, window_bounds = array<i64: 9, 128, 128>}, {transform_indices = @transform_2, window_bounds = array<i64: 1, 256, 128>}, {transform_indices = @transform_3, window_bounds = array<i64: 1, 1, 128>}, {transform_indices = @transform_4, window_bounds = array<i64: 1, 1, 128>}]} {
    %c0 = arith.constant 0 : index
    %c0_0 = arith.constant 0 : index
    %c0_1 = arith.constant 0 : index
    %0 = vector.load %arg1[%c0, %c0_0, %c0_1] : memref<1x256x128xf32, #tpu.memory_space<vmem>>, vector<1x256x128xf32>
    %1 = vector.shape_cast %0 : vector<1x256x128xf32> to vector<256x128xf32>
    %2 = tpu.iota {dimensions = array<i32: 0>} : vector<256x1xi32>
    %c16_i32 = arith.constant 16 : i32
    %c0_i32 = arith.constant 0 : i32
    %3 = arith.cmpi eq, %c16_i32, %c0_i32 : i32
    %c1_i32 = arith.constant 1 : i32
    %4 = arith.select %3, %c1_i32, %c16_i32 : i32
    %5 = vector.broadcast %4 : i32 to vector<256x1xi32>
    %6 = arith.remsi %2, %5 : vector<256x1xi32>
    %c0_i32_2 = arith.constant 0 : i32
    %7 = vector.broadcast %c0_i32_2 : i32 to vector<256x1xi32>
    %8 = arith.cmpi ne, %6, %7 : vector<256x1xi32>
    %c0_i32_3 = arith.constant 0 : i32
    %9 = vector.broadcast %c0_i32_3 : i32 to vector<256x1xi32>
    %10 = arith.cmpi slt, %6, %9 : vector<256x1xi32>
    %c0_i32_4 = arith.constant 0 : i32
    %11 = arith.cmpi slt, %4, %c0_i32_4 : i32
    %12 = vector.broadcast %11 : i1 to vector<256x1xi1>
    %13 = vector.broadcast %12 : vector<256x1xi1> to vector<256x1xi1>
    %14 = arith.xori %10, %13 : vector<256x1xi1>
    %15 = arith.andi %14, %8 : vector<256x1xi1>
    %16 = vector.broadcast %4 : i32 to vector<256x1xi32>
    %17 = arith.addi %6, %16 : vector<256x1xi32>
    %18 = arith.select %15, %17, %6 : vector<256x1xi1>, vector<256x1xi32>
    %c16_i32_5 = arith.constant 16 : i32
    %19 = vector.broadcast %c16_i32_5 : i32 to vector<256x1xi32>
    %20 = arith.cmpi sge, %2, %19 : vector<256x1xi32>
    %c240_i32 = arith.constant 240 : i32
    %21 = vector.broadcast %c240_i32 : i32 to vector<256x1xi32>
    %22 = arith.cmpi slt, %2, %21 : vector<256x1xi32>
    %c1_i32_6 = arith.constant 1 : i32
    %23 = vector.broadcast %c1_i32_6 : i32 to vector<256x1xi32>
    %24 = arith.cmpi sge, %18, %23 : vector<256x1xi32>
    %c15_i32 = arith.constant 15 : i32
    %25 = vector.broadcast %c15_i32 : i32 to vector<256x1xi32>
    %26 = arith.cmpi slt, %18, %25 : vector<256x1xi32>
    %cst = arith.constant 0.000000e+00 : f32
    %27 = vector.broadcast %cst : f32 to vector<1x128xf32>
    %cst_7 = arith.constant 0.000000e+00 : f32
    %28 = vector.broadcast %cst_7 : f32 to vector<1x128xf32>
    %cst_8 = arith.constant 0.000000e+00 : f32
    %29 = vector.broadcast %cst_8 : f32 to vector<128x128xf32>
    %c17_i32 = arith.constant 17 : i32
    %30 = tpu.dynamic_rotate %1 by %c17_i32 dim 0 : vector<256x128xf32>, i32 -> vector<256x128xf32>
    %31 = arith.andi %20, %24 : vector<256x1xi1>
    %cst_9 = arith.constant 0.000000e+00 : f32
    %32 = vector.shape_cast %31 : vector<256x1xi1> to vector<256x1xi1>
    %33 = vector.broadcast %32 : vector<256x1xi1> to vector<256x128xi1>
    %34 = vector.broadcast %cst_9 : f32 to vector<256x128xf32>
    %35 = arith.select %33, %30, %34 : vector<256x128xi1>, vector<256x128xf32>
    %36 = vector.extract_strided_slice %35 {offsets = [0, 0], sizes = [128, 128], strides = [1, 1]} : vector<256x128xf32> to vector<128x128xf32>
    %c0_10 = arith.constant 0 : index
    %c0_11 = arith.constant 0 : index
    %c0_12 = arith.constant 0 : index
    %37 = vector.load %arg2[%c0_10, %c0_11, %c0_12] : memref<9x128x128xf32, #tpu.memory_space<vmem>>, vector<1x128x128xf32>
    %38 = vector.shape_cast %37 : vector<1x128x128xf32> to vector<128x128xf32>
    %cst_13 = arith.constant dense<0.000000e+00> : vector<128x128xf32>
    %39 = tpu.matmul %36, %38, %cst_13 {dimension_numbers = #tpu.dot_dimension_numbers<[1], [0], [0], [1], [0, 0, 1, 1], [], []>} : vector<128x128xf32>, vector<128x128xf32>, vector<128x128xf32> -> vector<128x128xf32>
    %40 = arith.addf %29, %39 : vector<128x128xf32>
    %c16_i32_14 = arith.constant 16 : i32
    %41 = tpu.dynamic_rotate %1 by %c16_i32_14 dim 0 : vector<256x128xf32>, i32 -> vector<256x128xf32>
    %cst_15 = arith.constant 0.000000e+00 : f32
    %42 = vector.shape_cast %20 : vector<256x1xi1> to vector<256x1xi1>
    %43 = vector.broadcast %42 : vector<256x1xi1> to vector<256x128xi1>
    %44 = vector.broadcast %cst_15 : f32 to vector<256x128xf32>
    %45 = arith.select %43, %41, %44 : vector<256x128xi1>, vector<256x128xf32>
    %46 = vector.extract_strided_slice %45 {offsets = [0, 0], sizes = [128, 128], strides = [1, 1]} : vector<256x128xf32> to vector<128x128xf32>
    %c1 = arith.constant 1 : index
    %c0_16 = arith.constant 0 : index
    %c0_17 = arith.constant 0 : index
    %47 = vector.load %arg2[%c1, %c0_16, %c0_17] : memref<9x128x128xf32, #tpu.memory_space<vmem>>, vector<1x128x128xf32>
    %48 = vector.shape_cast %47 : vector<1x128x128xf32> to vector<128x128xf32>
    %cst_18 = arith.constant dense<0.000000e+00> : vector<128x128xf32>
    %49 = tpu.matmul %46, %48, %cst_18 {dimension_numbers = #tpu.dot_dimension_numbers<[1], [0], [0], [1], [0, 0, 1, 1], [], []>} : vector<128x128xf32>, vector<128x128xf32>, vector<128x128xf32> -> vector<128x128xf32>
    %50 = arith.addf %40, %49 : vector<128x128xf32>
    %c15_i32_19 = arith.constant 15 : i32
    %51 = tpu.dynamic_rotate %1 by %c15_i32_19 dim 0 : vector<256x128xf32>, i32 -> vector<256x128xf32>
    %52 = arith.andi %20, %26 : vector<256x1xi1>
    %cst_20 = arith.constant 0.000000e+00 : f32
    %53 = vector.shape_cast %52 : vector<256x1xi1> to vector<256x1xi1>
    %54 = vector.broadcast %53 : vector<256x1xi1> to vector<256x128xi1>
    %55 = vector.broadcast %cst_20 : f32 to vector<256x128xf32>
    %56 = arith.select %54, %51, %55 : vector<256x128xi1>, vector<256x128xf32>
    %57 = vector.extract_strided_slice %56 {offsets = [0, 0], sizes = [128, 128], strides = [1, 1]} : vector<256x128xf32> to vector<128x128xf32>
    %c2 = arith.constant 2 : index
    %c0_21 = arith.constant 0 : index
    %c0_22 = arith.constant 0 : index
    %58 = vector.load %arg2[%c2, %c0_21, %c0_22] : memref<9x128x128xf32, #tpu.memory_space<vmem>>, vector<1x128x128xf32>
    %59 = vector.shape_cast %58 : vector<1x128x128xf32> to vector<128x128xf32>
    %cst_23 = arith.constant dense<0.000000e+00> : vector<128x128xf32>
    %60 = tpu.matmul %57, %59, %cst_23 {dimension_numbers = #tpu.dot_dimension_numbers<[1], [0], [0], [1], [0, 0, 1, 1], [], []>} : vector<128x128xf32>, vector<128x128xf32>, vector<128x128xf32> -> vector<128x128xf32>
    %61 = arith.addf %50, %60 : vector<128x128xf32>
    %c1_i32_24 = arith.constant 1 : i32
    %62 = tpu.dynamic_rotate %1 by %c1_i32_24 dim 0 : vector<256x128xf32>, i32 -> vector<256x128xf32>
    %cst_25 = arith.constant 0.000000e+00 : f32
    %63 = vector.shape_cast %24 : vector<256x1xi1> to vector<256x1xi1>
    %64 = vector.broadcast %63 : vector<256x1xi1> to vector<256x128xi1>
    %65 = vector.broadcast %cst_25 : f32 to vector<256x128xf32>
    %66 = arith.select %64, %62, %65 : vector<256x128xi1>, vector<256x128xf32>
    %67 = vector.extract_strided_slice %66 {offsets = [0, 0], sizes = [128, 128], strides = [1, 1]} : vector<256x128xf32> to vector<128x128xf32>
    %c3 = arith.constant 3 : index
    %c0_26 = arith.constant 0 : index
    %c0_27 = arith.constant 0 : index
    %68 = vector.load %arg2[%c3, %c0_26, %c0_27] : memref<9x128x128xf32, #tpu.memory_space<vmem>>, vector<1x128x128xf32>
    %69 = vector.shape_cast %68 : vector<1x128x128xf32> to vector<128x128xf32>
    %cst_28 = arith.constant dense<0.000000e+00> : vector<128x128xf32>
    %70 = tpu.matmul %67, %69, %cst_28 {dimension_numbers = #tpu.dot_dimension_numbers<[1], [0], [0], [1], [0, 0, 1, 1], [], []>} : vector<128x128xf32>, vector<128x128xf32>, vector<128x128xf32> -> vector<128x128xf32>
    %71 = arith.addf %61, %70 : vector<128x128xf32>
    %72 = vector.extract_strided_slice %1 {offsets = [0, 0], sizes = [128, 128], strides = [1, 1]} : vector<256x128xf32> to vector<128x128xf32>
    %c4 = arith.constant 4 : index
    %c0_29 = arith.constant 0 : index
    %c0_30 = arith.constant 0 : index
    %73 = vector.load %arg2[%c4, %c0_29, %c0_30] : memref<9x128x128xf32, #tpu.memory_space<vmem>>, vector<1x128x128xf32>
    %74 = vector.shape_cast %73 : vector<1x128x128xf32> to vector<128x128xf32>
    %cst_31 = arith.constant dense<0.000000e+00> : vector<128x128xf32>
    %75 = tpu.matmul %72, %74, %cst_31 {dimension_numbers = #tpu.dot_dimension_numbers<[1], [0], [0], [1], [0, 0, 1, 1], [], []>} : vector<128x128xf32>, vector<128x128xf32>, vector<128x128xf32> -> vector<128x128xf32>
    %76 = arith.addf %71, %75 : vector<128x128xf32>
    %c255_i32 = arith.constant 255 : i32
    %77 = tpu.dynamic_rotate %1 by %c255_i32 dim 0 : vector<256x128xf32>, i32 -> vector<256x128xf32>
    %cst_32 = arith.constant 0.000000e+00 : f32
    %78 = vector.shape_cast %26 : vector<256x1xi1> to vector<256x1xi1>
    %79 = vector.broadcast %78 : vector<256x1xi1> to vector<256x128xi1>
    %80 = vector.broadcast %cst_32 : f32 to vector<256x128xf32>
    %81 = arith.select %79, %77, %80 : vector<256x128xi1>, vector<256x128xf32>
    %82 = vector.extract_strided_slice %81 {offsets = [0, 0], sizes = [128, 128], strides = [1, 1]} : vector<256x128xf32> to vector<128x128xf32>
    %c5 = arith.constant 5 : index
    %c0_33 = arith.constant 0 : index
    %c0_34 = arith.constant 0 : index
    %83 = vector.load %arg2[%c5, %c0_33, %c0_34] : memref<9x128x128xf32, #tpu.memory_space<vmem>>, vector<1x128x128xf32>
    %84 = vector.shape_cast %83 : vector<1x128x128xf32> to vector<128x128xf32>
    %cst_35 = arith.constant dense<0.000000e+00> : vector<128x128xf32>
    %85 = tpu.matmul %82, %84, %cst_35 {dimension_numbers = #tpu.dot_dimension_numbers<[1], [0], [0], [1], [0, 0, 1, 1], [], []>} : vector<128x128xf32>, vector<128x128xf32>, vector<128x128xf32> -> vector<128x128xf32>
    %86 = arith.addf %76, %85 : vector<128x128xf32>
    %c241_i32 = arith.constant 241 : i32
    %87 = tpu.dynamic_rotate %1 by %c241_i32 dim 0 : vector<256x128xf32>, i32 -> vector<256x128xf32>
    %88 = arith.andi %22, %24 : vector<256x1xi1>
    %cst_36 = arith.constant 0.000000e+00 : f32
    %89 = vector.shape_cast %88 : vector<256x1xi1> to vector<256x1xi1>
    %90 = vector.broadcast %89 : vector<256x1xi1> to vector<256x128xi1>
    %91 = vector.broadcast %cst_36 : f32 to vector<256x128xf32>
    %92 = arith.select %90, %87, %91 : vector<256x128xi1>, vector<256x128xf32>
    %93 = vector.extract_strided_slice %92 {offsets = [0, 0], sizes = [128, 128], strides = [1, 1]} : vector<256x128xf32> to vector<128x128xf32>
    %c6 = arith.constant 6 : index
    %c0_37 = arith.constant 0 : index
    %c0_38 = arith.constant 0 : index
    %94 = vector.load %arg2[%c6, %c0_37, %c0_38] : memref<9x128x128xf32, #tpu.memory_space<vmem>>, vector<1x128x128xf32>
    %95 = vector.shape_cast %94 : vector<1x128x128xf32> to vector<128x128xf32>
    %cst_39 = arith.constant dense<0.000000e+00> : vector<128x128xf32>
    %96 = tpu.matmul %93, %95, %cst_39 {dimension_numbers = #tpu.dot_dimension_numbers<[1], [0], [0], [1], [0, 0, 1, 1], [], []>} : vector<128x128xf32>, vector<128x128xf32>, vector<128x128xf32> -> vector<128x128xf32>
    %97 = arith.addf %86, %96 : vector<128x128xf32>
    %c240_i32_40 = arith.constant 240 : i32
    %98 = tpu.dynamic_rotate %1 by %c240_i32_40 dim 0 : vector<256x128xf32>, i32 -> vector<256x128xf32>
    %cst_41 = arith.constant 0.000000e+00 : f32
    %99 = vector.shape_cast %22 : vector<256x1xi1> to vector<256x1xi1>
    %100 = vector.broadcast %99 : vector<256x1xi1> to vector<256x128xi1>
    %101 = vector.broadcast %cst_41 : f32 to vector<256x128xf32>
    %102 = arith.select %100, %98, %101 : vector<256x128xi1>, vector<256x128xf32>
    %103 = vector.extract_strided_slice %102 {offsets = [0, 0], sizes = [128, 128], strides = [1, 1]} : vector<256x128xf32> to vector<128x128xf32>
    %c7 = arith.constant 7 : index
    %c0_42 = arith.constant 0 : index
    %c0_43 = arith.constant 0 : index
    %104 = vector.load %arg2[%c7, %c0_42, %c0_43] : memref<9x128x128xf32, #tpu.memory_space<vmem>>, vector<1x128x128xf32>
    %105 = vector.shape_cast %104 : vector<1x128x128xf32> to vector<128x128xf32>
    %cst_44 = arith.constant dense<0.000000e+00> : vector<128x128xf32>
    %106 = tpu.matmul %103, %105, %cst_44 {dimension_numbers = #tpu.dot_dimension_numbers<[1], [0], [0], [1], [0, 0, 1, 1], [], []>} : vector<128x128xf32>, vector<128x128xf32>, vector<128x128xf32> -> vector<128x128xf32>
    %107 = arith.addf %97, %106 : vector<128x128xf32>
    %c239_i32 = arith.constant 239 : i32
    %108 = tpu.dynamic_rotate %1 by %c239_i32 dim 0 : vector<256x128xf32>, i32 -> vector<256x128xf32>
    %109 = arith.andi %22, %26 : vector<256x1xi1>
    %cst_45 = arith.constant 0.000000e+00 : f32
    %110 = vector.shape_cast %109 : vector<256x1xi1> to vector<256x1xi1>
    %111 = vector.broadcast %110 : vector<256x1xi1> to vector<256x128xi1>
    %112 = vector.broadcast %cst_45 : f32 to vector<256x128xf32>
    %113 = arith.select %111, %108, %112 : vector<256x128xi1>, vector<256x128xf32>
    %114 = vector.extract_strided_slice %113 {offsets = [0, 0], sizes = [128, 128], strides = [1, 1]} : vector<256x128xf32> to vector<128x128xf32>
    %c8 = arith.constant 8 : index
    %c0_46 = arith.constant 0 : index
    %c0_47 = arith.constant 0 : index
    %115 = vector.load %arg2[%c8, %c0_46, %c0_47] : memref<9x128x128xf32, #tpu.memory_space<vmem>>, vector<1x128x128xf32>
    %116 = vector.shape_cast %115 : vector<1x128x128xf32> to vector<128x128xf32>
    %cst_48 = arith.constant dense<0.000000e+00> : vector<128x128xf32>
    %117 = tpu.matmul %114, %116, %cst_48 {dimension_numbers = #tpu.dot_dimension_numbers<[1], [0], [0], [1], [0, 0, 1, 1], [], []>} : vector<128x128xf32>, vector<128x128xf32>, vector<128x128xf32> -> vector<128x128xf32>
    %118 = arith.addf %107, %117 : vector<128x128xf32>
    %c0_49 = arith.constant 0 : index
    %c0_50 = arith.constant 0 : index
    %c0_51 = arith.constant 0 : index
    %119 = vector.load %arg3[%c0_49, %c0_50, %c0_51] : memref<1x256x128xf32, #tpu.memory_space<vmem>>, vector<1x128x128xf32>
    %120 = vector.shape_cast %119 : vector<1x128x128xf32> to vector<128x128xf32>
    %121 = vector.shape_cast %118 : vector<128x128xf32> to vector<1x128x128xf32>
    tpu.vector_store %arg3[%c0_49, %c0_50, %c0_51], %121 {strides = array<i32>} : memref<1x256x128xf32, #tpu.memory_space<vmem>>, vector<1x128x128xf32>,
    %cst_52 = arith.constant dense<0.000000e+00> : vector<128xf32>
    %122 = vector.multi_reduction <add>, %118, %cst_52 [0] : vector<128x128xf32> to vector<128xf32>
    %123 = vector.shape_cast %122 : vector<128xf32> to vector<1x128xf32>
    %124 = arith.addf %27, %123 : vector<1x128xf32>
    %125 = arith.mulf %118, %118 : vector<128x128xf32>
    %cst_53 = arith.constant dense<0.000000e+00> : vector<128xf32>
    %126 = vector.multi_reduction <add>, %125, %cst_53 [0] : vector<128x128xf32> to vector<128xf32>
    %127 = vector.shape_cast %126 : vector<128xf32> to vector<1x128xf32>
    %128 = arith.addf %28, %127 : vector<1x128xf32>
    %cst_54 = arith.constant 0.000000e+00 : f32
    %129 = vector.broadcast %cst_54 : f32 to vector<128x128xf32>
    %c17_i32_55 = arith.constant 17 : i32
    %130 = tpu.dynamic_rotate %1 by %c17_i32_55 dim 0 : vector<256x128xf32>, i32 -> vector<256x128xf32>
    %131 = arith.andi %20, %24 : vector<256x1xi1>
    %cst_56 = arith.constant 0.000000e+00 : f32
    %132 = vector.shape_cast %131 : vector<256x1xi1> to vector<256x1xi1>
    %133 = vector.broadcast %132 : vector<256x1xi1> to vector<256x128xi1>
    %134 = vector.broadcast %cst_56 : f32 to vector<256x128xf32>
    %135 = arith.select %133, %130, %134 : vector<256x128xi1>, vector<256x128xf32>
    %136 = vector.extract_strided_slice %135 {offsets = [128, 0], sizes = [128, 128], strides = [1, 1]} : vector<256x128xf32> to vector<128x128xf32>
    %c0_57 = arith.constant 0 : index
    %c0_58 = arith.constant 0 : index
    %c0_59 = arith.constant 0 : index
    %137 = vector.load %arg2[%c0_57, %c0_58, %c0_59] : memref<9x128x128xf32, #tpu.memory_space<vmem>>, vector<1x128x128xf32>
    %138 = vector.shape_cast %137 : vector<1x128x128xf32> to vector<128x128xf32>
    %cst_60 = arith.constant dense<0.000000e+00> : vector<128x128xf32>
    %139 = tpu.matmul %136, %138, %cst_60 {dimension_numbers = #tpu.dot_dimension_numbers<[1], [0], [0], [1], [0, 0, 1, 1], [], []>} : vector<128x128xf32>, vector<128x128xf32>, vector<128x128xf32> -> vector<128x128xf32>
    %140 = arith.addf %129, %139 : vector<128x128xf32>
    %c16_i32_61 = arith.constant 16 : i32
    %141 = tpu.dynamic_rotate %1 by %c16_i32_61 dim 0 : vector<256x128xf32>, i32 -> vector<256x128xf32>
    %cst_62 = arith.constant 0.000000e+00 : f32
    %142 = vector.shape_cast %20 : vector<256x1xi1> to vector<256x1xi1>
    %143 = vector.broadcast %142 : vector<256x1xi1> to vector<256x128xi1>
    %144 = vector.broadcast %cst_62 : f32 to vector<256x128xf32>
    %145 = arith.select %143, %141, %144 : vector<256x128xi1>, vector<256x128xf32>
    %146 = vector.extract_strided_slice %145 {offsets = [128, 0], sizes = [128, 128], strides = [1, 1]} : vector<256x128xf32> to vector<128x128xf32>
    %c1_63 = arith.constant 1 : index
    %c0_64 = arith.constant 0 : index
    %c0_65 = arith.constant 0 : index
    %147 = vector.load %arg2[%c1_63, %c0_64, %c0_65] : memref<9x128x128xf32, #tpu.memory_space<vmem>>, vector<1x128x128xf32>
    %148 = vector.shape_cast %147 : vector<1x128x128xf32> to vector<128x128xf32>
    %cst_66 = arith.constant dense<0.000000e+00> : vector<128x128xf32>
    %149 = tpu.matmul %146, %148, %cst_66 {dimension_numbers = #tpu.dot_dimension_numbers<[1], [0], [0], [1], [0, 0, 1, 1], [], []>} : vector<128x128xf32>, vector<128x128xf32>, vector<128x128xf32> -> vector<128x128xf32>
    %150 = arith.addf %140, %149 : vector<128x128xf32>
    %c15_i32_67 = arith.constant 15 : i32
    %151 = tpu.dynamic_rotate %1 by %c15_i32_67 dim 0 : vector<256x128xf32>, i32 -> vector<256x128xf32>
    %152 = arith.andi %20, %26 : vector<256x1xi1>
    %cst_68 = arith.constant 0.000000e+00 : f32
    %153 = vector.shape_cast %152 : vector<256x1xi1> to vector<256x1xi1>
    %154 = vector.broadcast %153 : vector<256x1xi1> to vector<256x128xi1>
    %155 = vector.broadcast %cst_68 : f32 to vector<256x128xf32>
    %156 = arith.select %154, %151, %155 : vector<256x128xi1>, vector<256x128xf32>
    %157 = vector.extract_strided_slice %156 {offsets = [128, 0], sizes = [128, 128], strides = [1, 1]} : vector<256x128xf32> to vector<128x128xf32>
    %c2_69 = arith.constant 2 : index
    %c0_70 = arith.constant 0 : index
    %c0_71 = arith.constant 0 : index
    %158 = vector.load %arg2[%c2_69, %c0_70, %c0_71] : memref<9x128x128xf32, #tpu.memory_space<vmem>>, vector<1x128x128xf32>
    %159 = vector.shape_cast %158 : vector<1x128x128xf32> to vector<128x128xf32>
    %cst_72 = arith.constant dense<0.000000e+00> : vector<128x128xf32>
    %160 = tpu.matmul %157, %159, %cst_72 {dimension_numbers = #tpu.dot_dimension_numbers<[1], [0], [0], [1], [0, 0, 1, 1], [], []>} : vector<128x128xf32>, vector<128x128xf32>, vector<128x128xf32> -> vector<128x128xf32>
    %161 = arith.addf %150, %160 : vector<128x128xf32>
    %c1_i32_73 = arith.constant 1 : i32
    %162 = tpu.dynamic_rotate %1 by %c1_i32_73 dim 0 : vector<256x128xf32>, i32 -> vector<256x128xf32>
    %cst_74 = arith.constant 0.000000e+00 : f32
    %163 = vector.shape_cast %24 : vector<256x1xi1> to vector<256x1xi1>
    %164 = vector.broadcast %163 : vector<256x1xi1> to vector<256x128xi1>
    %165 = vector.broadcast %cst_74 : f32 to vector<256x128xf32>
    %166 = arith.select %164, %162, %165 : vector<256x128xi1>, vector<256x128xf32>
    %167 = vector.extract_strided_slice %166 {offsets = [128, 0], sizes = [128, 128], strides = [1, 1]} : vector<256x128xf32> to vector<128x128xf32>
    %c3_75 = arith.constant 3 : index
    %c0_76 = arith.constant 0 : index
    %c0_77 = arith.constant 0 : index
    %168 = vector.load %arg2[%c3_75, %c0_76, %c0_77] : memref<9x128x128xf32, #tpu.memory_space<vmem>>, vector<1x128x128xf32>
    %169 = vector.shape_cast %168 : vector<1x128x128xf32> to vector<128x128xf32>
    %cst_78 = arith.constant dense<0.000000e+00> : vector<128x128xf32>
    %170 = tpu.matmul %167, %169, %cst_78 {dimension_numbers = #tpu.dot_dimension_numbers<[1], [0], [0], [1], [0, 0, 1, 1], [], []>} : vector<128x128xf32>, vector<128x128xf32>, vector<128x128xf32> -> vector<128x128xf32>
    %171 = arith.addf %161, %170 : vector<128x128xf32>
    %172 = vector.extract_strided_slice %1 {offsets = [128, 0], sizes = [128, 128], strides = [1, 1]} : vector<256x128xf32> to vector<128x128xf32>
    %c4_79 = arith.constant 4 : index
    %c0_80 = arith.constant 0 : index
    %c0_81 = arith.constant 0 : index
    %173 = vector.load %arg2[%c4_79, %c0_80, %c0_81] : memref<9x128x128xf32, #tpu.memory_space<vmem>>, vector<1x128x128xf32>
    %174 = vector.shape_cast %173 : vector<1x128x128xf32> to vector<128x128xf32>
    %cst_82 = arith.constant dense<0.000000e+00> : vector<128x128xf32>
    %175 = tpu.matmul %172, %174, %cst_82 {dimension_numbers = #tpu.dot_dimension_numbers<[1], [0], [0], [1], [0, 0, 1, 1], [], []>} : vector<128x128xf32>, vector<128x128xf32>, vector<128x128xf32> -> vector<128x128xf32>
    %176 = arith.addf %171, %175 : vector<128x128xf32>
    %c255_i32_83 = arith.constant 255 : i32
    %177 = tpu.dynamic_rotate %1 by %c255_i32_83 dim 0 : vector<256x128xf32>, i32 -> vector<256x128xf32>
    %cst_84 = arith.constant 0.000000e+00 : f32
    %178 = vector.shape_cast %26 : vector<256x1xi1> to vector<256x1xi1>
    %179 = vector.broadcast %178 : vector<256x1xi1> to vector<256x128xi1>
    %180 = vector.broadcast %cst_84 : f32 to vector<256x128xf32>
    %181 = arith.select %179, %177, %180 : vector<256x128xi1>, vector<256x128xf32>
    %182 = vector.extract_strided_slice %181 {offsets = [128, 0], sizes = [128, 128], strides = [1, 1]} : vector<256x128xf32> to vector<128x128xf32>
    %c5_85 = arith.constant 5 : index
    %c0_86 = arith.constant 0 : index
    %c0_87 = arith.constant 0 : index
    %183 = vector.load %arg2[%c5_85, %c0_86, %c0_87] : memref<9x128x128xf32, #tpu.memory_space<vmem>>, vector<1x128x128xf32>
    %184 = vector.shape_cast %183 : vector<1x128x128xf32> to vector<128x128xf32>
    %cst_88 = arith.constant dense<0.000000e+00> : vector<128x128xf32>
    %185 = tpu.matmul %182, %184, %cst_88 {dimension_numbers = #tpu.dot_dimension_numbers<[1], [0], [0], [1], [0, 0, 1, 1], [], []>} : vector<128x128xf32>, vector<128x128xf32>, vector<128x128xf32> -> vector<128x128xf32>
    %186 = arith.addf %176, %185 : vector<128x128xf32>
    %c241_i32_89 = arith.constant 241 : i32
    %187 = tpu.dynamic_rotate %1 by %c241_i32_89 dim 0 : vector<256x128xf32>, i32 -> vector<256x128xf32>
    %188 = arith.andi %22, %24 : vector<256x1xi1>
    %cst_90 = arith.constant 0.000000e+00 : f32
    %189 = vector.shape_cast %188 : vector<256x1xi1> to vector<256x1xi1>
    %190 = vector.broadcast %189 : vector<256x1xi1> to vector<256x128xi1>
    %191 = vector.broadcast %cst_90 : f32 to vector<256x128xf32>
    %192 = arith.select %190, %187, %191 : vector<256x128xi1>, vector<256x128xf32>
    %193 = vector.extract_strided_slice %192 {offsets = [128, 0], sizes = [128, 128], strides = [1, 1]} : vector<256x128xf32> to vector<128x128xf32>
    %c6_91 = arith.constant 6 : index
    %c0_92 = arith.constant 0 : index
    %c0_93 = arith.constant 0 : index
    %194 = vector.load %arg2[%c6_91, %c0_92, %c0_93] : memref<9x128x128xf32, #tpu.memory_space<vmem>>, vector<1x128x128xf32>
    %195 = vector.shape_cast %194 : vector<1x128x128xf32> to vector<128x128xf32>
    %cst_94 = arith.constant dense<0.000000e+00> : vector<128x128xf32>
    %196 = tpu.matmul %193, %195, %cst_94 {dimension_numbers = #tpu.dot_dimension_numbers<[1], [0], [0], [1], [0, 0, 1, 1], [], []>} : vector<128x128xf32>, vector<128x128xf32>, vector<128x128xf32> -> vector<128x128xf32>
    %197 = arith.addf %186, %196 : vector<128x128xf32>
    %c240_i32_95 = arith.constant 240 : i32
    %198 = tpu.dynamic_rotate %1 by %c240_i32_95 dim 0 : vector<256x128xf32>, i32 -> vector<256x128xf32>
    %cst_96 = arith.constant 0.000000e+00 : f32
    %199 = vector.shape_cast %22 : vector<256x1xi1> to vector<256x1xi1>
    %200 = vector.broadcast %199 : vector<256x1xi1> to vector<256x128xi1>
    %201 = vector.broadcast %cst_96 : f32 to vector<256x128xf32>
    %202 = arith.select %200, %198, %201 : vector<256x128xi1>, vector<256x128xf32>
    %203 = vector.extract_strided_slice %202 {offsets = [128, 0], sizes = [128, 128], strides = [1, 1]} : vector<256x128xf32> to vector<128x128xf32>
    %c7_97 = arith.constant 7 : index
    %c0_98 = arith.constant 0 : index
    %c0_99 = arith.constant 0 : index
    %204 = vector.load %arg2[%c7_97, %c0_98, %c0_99] : memref<9x128x128xf32, #tpu.memory_space<vmem>>, vector<1x128x128xf32>
    %205 = vector.shape_cast %204 : vector<1x128x128xf32> to vector<128x128xf32>
    %cst_100 = arith.constant dense<0.000000e+00> : vector<128x128xf32>
    %206 = tpu.matmul %203, %205, %cst_100 {dimension_numbers = #tpu.dot_dimension_numbers<[1], [0], [0], [1], [0, 0, 1, 1], [], []>} : vector<128x128xf32>, vector<128x128xf32>, vector<128x128xf32> -> vector<128x128xf32>
    %207 = arith.addf %197, %206 : vector<128x128xf32>
    %c239_i32_101 = arith.constant 239 : i32
    %208 = tpu.dynamic_rotate %1 by %c239_i32_101 dim 0 : vector<256x128xf32>, i32 -> vector<256x128xf32>
    %209 = arith.andi %22, %26 : vector<256x1xi1>
    %cst_102 = arith.constant 0.000000e+00 : f32
    %210 = vector.shape_cast %209 : vector<256x1xi1> to vector<256x1xi1>
    %211 = vector.broadcast %210 : vector<256x1xi1> to vector<256x128xi1>
    %212 = vector.broadcast %cst_102 : f32 to vector<256x128xf32>
    %213 = arith.select %211, %208, %212 : vector<256x128xi1>, vector<256x128xf32>
    %214 = vector.extract_strided_slice %213 {offsets = [128, 0], sizes = [128, 128], strides = [1, 1]} : vector<256x128xf32> to vector<128x128xf32>
    %c8_103 = arith.constant 8 : index
    %c0_104 = arith.constant 0 : index
    %c0_105 = arith.constant 0 : index
    %215 = vector.load %arg2[%c8_103, %c0_104, %c0_105] : memref<9x128x128xf32, #tpu.memory_space<vmem>>, vector<1x128x128xf32>
    %216 = vector.shape_cast %215 : vector<1x128x128xf32> to vector<128x128xf32>
    %cst_106 = arith.constant dense<0.000000e+00> : vector<128x128xf32>
    %217 = tpu.matmul %214, %216, %cst_106 {dimension_numbers = #tpu.dot_dimension_numbers<[1], [0], [0], [1], [0, 0, 1, 1], [], []>} : vector<128x128xf32>, vector<128x128xf32>, vector<128x128xf32> -> vector<128x128xf32>
    %218 = arith.addf %207, %217 : vector<128x128xf32>
    %c0_107 = arith.constant 0 : index
    %c128 = arith.constant 128 : index
    %c0_108 = arith.constant 0 : index
    %219 = vector.load %arg3[%c0_107, %c128, %c0_108] : memref<1x256x128xf32, #tpu.memory_space<vmem>>, vector<1x128x128xf32>
    %220 = vector.shape_cast %219 : vector<1x128x128xf32> to vector<128x128xf32>
    %221 = vector.shape_cast %218 : vector<128x128xf32> to vector<1x128x128xf32>
    tpu.vector_store %arg3[%c0_107, %c128, %c0_108], %221 {strides = array<i32>} : memref<1x256x128xf32, #tpu.memory_space<vmem>>, vector<1x128x128xf32>,
    %cst_109 = arith.constant dense<0.000000e+00> : vector<128xf32>
    %222 = vector.multi_reduction <add>, %218, %cst_109 [0] : vector<128x128xf32> to vector<128xf32>
    %223 = vector.shape_cast %222 : vector<128xf32> to vector<1x128xf32>
    %224 = arith.addf %124, %223 : vector<1x128xf32>
    %225 = arith.mulf %218, %218 : vector<128x128xf32>
    %cst_110 = arith.constant dense<0.000000e+00> : vector<128xf32>
    %226 = vector.multi_reduction <add>, %225, %cst_110 [0] : vector<128x128xf32> to vector<128xf32>
    %227 = vector.shape_cast %226 : vector<128xf32> to vector<1x128xf32>
    %228 = arith.addf %128, %227 : vector<1x128xf32>
    %c0_111 = arith.constant 0 : index
    %c0_112 = arith.constant 0 : index
    %c0_113 = arith.constant 0 : index
    %229 = vector.load %arg4[%c0_111, %c0_112, %c0_113] : memref<1x1x128xf32, #tpu.memory_space<vmem>>, vector<1x1x128xf32>
    %230 = vector.shape_cast %229 : vector<1x1x128xf32> to vector<1x128xf32>
    %231 = vector.shape_cast %224 : vector<1x128xf32> to vector<1x1x128xf32>
    tpu.vector_store %arg4[%c0_111, %c0_112, %c0_113], %231 {strides = array<i32>} : memref<1x1x128xf32, #tpu.memory_space<vmem>>, vector<1x1x128xf32>,
    %c0_114 = arith.constant 0 : index
    %c0_115 = arith.constant 0 : index
    %c0_116 = arith.constant 0 : index
    %232 = vector.load %arg5[%c0_114, %c0_115, %c0_116] : memref<1x1x128xf32, #tpu.memory_space<vmem>>, vector<1x1x128xf32>
    %233 = vector.shape_cast %232 : vector<1x1x128xf32> to vector<1x128xf32>
    %234 = vector.shape_cast %228 : vector<1x128xf32> to vector<1x1x128xf32>
    tpu.vector_store %arg5[%c0_114, %c0_115, %c0_116], %234 {strides = array<i32>} : memref<1x1x128xf32, #tpu.memory_space<vmem>>, vector<1x1x128xf32>,
    return
  }
  func.func @transform_0(%arg0: i32) -> (i32, i32, i32) {
    %c0_i32 = arith.constant 0 : i32
    %c0_i32_0 = arith.constant 0 : i32
    %c0_i32_1 = arith.constant 0 : i32
    return %arg0, %c0_i32, %c0_i32_0 : i32, i32, i32
  }
  func.func @transform_1(%arg0: i32) -> (i32, i32, i32) {
    %c0_i32 = arith.constant 0 : i32
    %c0_i32_0 = arith.constant 0 : i32
    %c0_i32_1 = arith.constant 0 : i32
    %c0_i32_2 = arith.constant 0 : i32
    return %c0_i32, %c0_i32_0, %c0_i32_1 : i32, i32, i32
  }
  func.func @transform_2(%arg0: i32) -> (i32, i32, i32) {
    %c0_i32 = arith.constant 0 : i32
    %c0_i32_0 = arith.constant 0 : i32
    %c0_i32_1 = arith.constant 0 : i32
    return %arg0, %c0_i32, %c0_i32_0 : i32, i32, i32
  }
  func.func @transform_3(%arg0: i32) -> (i32, i32, i32) {
    %c0_i32 = arith.constant 0 : i32
    %c0_i32_0 = arith.constant 0 : i32
    %c0_i32_1 = arith.constant 0 : i32
    return %arg0, %c0_i32, %c0_i32_0 : i32, i32, i32
  }
  func.func @transform_4(%arg0: i32) -> (i32, i32, i32) {
    %c0_i32 = arith.constant 0 : i32
    %c0_i32_0 = arith.constant 0 : i32
    %c0_i32_1 = arith.constant 0 : i32
    return %arg0, %c0_i32, %c0_i32_0 : i32, i32, i32
  }
}

module attributes {stable_mosaic.version = 11 : i64} {
  func.func @_conv3x3_stats_kernel(%arg0: i32, %arg1: memref<1x256x128xf32, #tpu.memory_space<vmem>>, %arg2: memref<1x128xf32, #tpu.memory_space<vmem>>, %arg3: memref<1x128xf32, #tpu.memory_space<vmem>>, %arg4: memref<9x128x128xf32, #tpu.memory_space<vmem>>, %arg5: memref<1x256x128xf32, #tpu.memory_space<vmem>>, %arg6: memref<1x1x128xf32, #tpu.memory_space<vmem>>, %arg7: memref<1x1x128xf32, #tpu.memory_space<vmem>>) attributes {dimension_semantics = [#tpu.dimension_semantics<parallel>], iteration_bounds = array<i64: 2>, scalar_prefetch = 0 : i64, scratch_operands = 0 : i64, tpu.core_type = #tpu.core_type<tc>, window_params = [{transform_indices = @transform_0, window_bounds = array<i64: 1, 256, 128>}, {pipeline_mode = #tpu.pipeline_mode<synchronous>, transform_indices = @transform_1, window_bounds = array<i64: 1, 128>}, {pipeline_mode = #tpu.pipeline_mode<synchronous>, transform_indices = @transform_2, window_bounds = array<i64: 1, 128>}, {pipeline_mode = #tpu.pipeline_mode<synchronous>, transform_indices = @transform_3, window_bounds = array<i64: 9, 128, 128>}, {transform_indices = @transform_4, window_bounds = array<i64: 1, 256, 128>}, {transform_indices = @transform_5, window_bounds = array<i64: 1, 1, 128>}, {transform_indices = @transform_6, window_bounds = array<i64: 1, 1, 128>}]} {
    %c0 = arith.constant 0 : index
    %c0_0 = arith.constant 0 : index
    %c0_1 = arith.constant 0 : index
    %0 = vector.load %arg1[%c0, %c0_0, %c0_1] : memref<1x256x128xf32, #tpu.memory_space<vmem>>, vector<1x256x128xf32>
    %1 = vector.shape_cast %0 : vector<1x256x128xf32> to vector<256x128xf32>
    %c0_2 = arith.constant 0 : index
    %c0_3 = arith.constant 0 : index
    %2 = vector.load %arg2[%c0_2, %c0_3] : memref<1x128xf32, #tpu.memory_space<vmem>>, vector<1x128xf32>
    %3 = vector.broadcast %2 : vector<1x128xf32> to vector<256x128xf32>
    %4 = arith.mulf %1, %3 : vector<256x128xf32>
    %c0_4 = arith.constant 0 : index
    %c0_5 = arith.constant 0 : index
    %5 = vector.load %arg3[%c0_4, %c0_5] : memref<1x128xf32, #tpu.memory_space<vmem>>, vector<1x128xf32>
    %6 = vector.broadcast %5 : vector<1x128xf32> to vector<256x128xf32>
    %7 = arith.addf %4, %6 : vector<256x128xf32>
    %cst = arith.constant 0.000000e+00 : f32
    %8 = vector.broadcast %cst : f32 to vector<256x128xf32>
    %9 = arith.maximumf %7, %8 : vector<256x128xf32>
    %10 = tpu.iota {dimensions = array<i32: 0>} : vector<256x1xi32>
    %c16_i32 = arith.constant 16 : i32
    %c0_i32 = arith.constant 0 : i32
    %11 = arith.cmpi eq, %c16_i32, %c0_i32 : i32
    %c1_i32 = arith.constant 1 : i32
    %12 = arith.select %11, %c1_i32, %c16_i32 : i32
    %13 = vector.broadcast %12 : i32 to vector<256x1xi32>
    %14 = arith.remsi %10, %13 : vector<256x1xi32>
    %c0_i32_6 = arith.constant 0 : i32
    %15 = vector.broadcast %c0_i32_6 : i32 to vector<256x1xi32>
    %16 = arith.cmpi ne, %14, %15 : vector<256x1xi32>
    %c0_i32_7 = arith.constant 0 : i32
    %17 = vector.broadcast %c0_i32_7 : i32 to vector<256x1xi32>
    %18 = arith.cmpi slt, %14, %17 : vector<256x1xi32>
    %c0_i32_8 = arith.constant 0 : i32
    %19 = arith.cmpi slt, %12, %c0_i32_8 : i32
    %20 = vector.broadcast %19 : i1 to vector<256x1xi1>
    %21 = vector.broadcast %20 : vector<256x1xi1> to vector<256x1xi1>
    %22 = arith.xori %18, %21 : vector<256x1xi1>
    %23 = arith.andi %22, %16 : vector<256x1xi1>
    %24 = vector.broadcast %12 : i32 to vector<256x1xi32>
    %25 = arith.addi %14, %24 : vector<256x1xi32>
    %26 = arith.select %23, %25, %14 : vector<256x1xi1>, vector<256x1xi32>
    %c16_i32_9 = arith.constant 16 : i32
    %27 = vector.broadcast %c16_i32_9 : i32 to vector<256x1xi32>
    %28 = arith.cmpi sge, %10, %27 : vector<256x1xi32>
    %c240_i32 = arith.constant 240 : i32
    %29 = vector.broadcast %c240_i32 : i32 to vector<256x1xi32>
    %30 = arith.cmpi slt, %10, %29 : vector<256x1xi32>
    %c1_i32_10 = arith.constant 1 : i32
    %31 = vector.broadcast %c1_i32_10 : i32 to vector<256x1xi32>
    %32 = arith.cmpi sge, %26, %31 : vector<256x1xi32>
    %c15_i32 = arith.constant 15 : i32
    %33 = vector.broadcast %c15_i32 : i32 to vector<256x1xi32>
    %34 = arith.cmpi slt, %26, %33 : vector<256x1xi32>
    %cst_11 = arith.constant 0.000000e+00 : f32
    %35 = vector.broadcast %cst_11 : f32 to vector<1x128xf32>
    %cst_12 = arith.constant 0.000000e+00 : f32
    %36 = vector.broadcast %cst_12 : f32 to vector<1x128xf32>
    %cst_13 = arith.constant 0.000000e+00 : f32
    %37 = vector.broadcast %cst_13 : f32 to vector<128x128xf32>
    %c17_i32 = arith.constant 17 : i32
    %38 = tpu.dynamic_rotate %9 by %c17_i32 dim 0 : vector<256x128xf32>, i32 -> vector<256x128xf32>
    %39 = arith.andi %28, %32 : vector<256x1xi1>
    %cst_14 = arith.constant 0.000000e+00 : f32
    %40 = vector.shape_cast %39 : vector<256x1xi1> to vector<256x1xi1>
    %41 = vector.broadcast %40 : vector<256x1xi1> to vector<256x128xi1>
    %42 = vector.broadcast %cst_14 : f32 to vector<256x128xf32>
    %43 = arith.select %41, %38, %42 : vector<256x128xi1>, vector<256x128xf32>
    %44 = vector.extract_strided_slice %43 {offsets = [0, 0], sizes = [128, 128], strides = [1, 1]} : vector<256x128xf32> to vector<128x128xf32>
    %c0_15 = arith.constant 0 : index
    %c0_16 = arith.constant 0 : index
    %c0_17 = arith.constant 0 : index
    %45 = vector.load %arg4[%c0_15, %c0_16, %c0_17] : memref<9x128x128xf32, #tpu.memory_space<vmem>>, vector<1x128x128xf32>
    %46 = vector.shape_cast %45 : vector<1x128x128xf32> to vector<128x128xf32>
    %cst_18 = arith.constant dense<0.000000e+00> : vector<128x128xf32>
    %47 = tpu.matmul %44, %46, %cst_18 {dimension_numbers = #tpu.dot_dimension_numbers<[1], [0], [0], [1], [0, 0, 1, 1], [], []>} : vector<128x128xf32>, vector<128x128xf32>, vector<128x128xf32> -> vector<128x128xf32>
    %48 = arith.addf %37, %47 : vector<128x128xf32>
    %c16_i32_19 = arith.constant 16 : i32
    %49 = tpu.dynamic_rotate %9 by %c16_i32_19 dim 0 : vector<256x128xf32>, i32 -> vector<256x128xf32>
    %cst_20 = arith.constant 0.000000e+00 : f32
    %50 = vector.shape_cast %28 : vector<256x1xi1> to vector<256x1xi1>
    %51 = vector.broadcast %50 : vector<256x1xi1> to vector<256x128xi1>
    %52 = vector.broadcast %cst_20 : f32 to vector<256x128xf32>
    %53 = arith.select %51, %49, %52 : vector<256x128xi1>, vector<256x128xf32>
    %54 = vector.extract_strided_slice %53 {offsets = [0, 0], sizes = [128, 128], strides = [1, 1]} : vector<256x128xf32> to vector<128x128xf32>
    %c1 = arith.constant 1 : index
    %c0_21 = arith.constant 0 : index
    %c0_22 = arith.constant 0 : index
    %55 = vector.load %arg4[%c1, %c0_21, %c0_22] : memref<9x128x128xf32, #tpu.memory_space<vmem>>, vector<1x128x128xf32>
    %56 = vector.shape_cast %55 : vector<1x128x128xf32> to vector<128x128xf32>
    %cst_23 = arith.constant dense<0.000000e+00> : vector<128x128xf32>
    %57 = tpu.matmul %54, %56, %cst_23 {dimension_numbers = #tpu.dot_dimension_numbers<[1], [0], [0], [1], [0, 0, 1, 1], [], []>} : vector<128x128xf32>, vector<128x128xf32>, vector<128x128xf32> -> vector<128x128xf32>
    %58 = arith.addf %48, %57 : vector<128x128xf32>
    %c15_i32_24 = arith.constant 15 : i32
    %59 = tpu.dynamic_rotate %9 by %c15_i32_24 dim 0 : vector<256x128xf32>, i32 -> vector<256x128xf32>
    %60 = arith.andi %28, %34 : vector<256x1xi1>
    %cst_25 = arith.constant 0.000000e+00 : f32
    %61 = vector.shape_cast %60 : vector<256x1xi1> to vector<256x1xi1>
    %62 = vector.broadcast %61 : vector<256x1xi1> to vector<256x128xi1>
    %63 = vector.broadcast %cst_25 : f32 to vector<256x128xf32>
    %64 = arith.select %62, %59, %63 : vector<256x128xi1>, vector<256x128xf32>
    %65 = vector.extract_strided_slice %64 {offsets = [0, 0], sizes = [128, 128], strides = [1, 1]} : vector<256x128xf32> to vector<128x128xf32>
    %c2 = arith.constant 2 : index
    %c0_26 = arith.constant 0 : index
    %c0_27 = arith.constant 0 : index
    %66 = vector.load %arg4[%c2, %c0_26, %c0_27] : memref<9x128x128xf32, #tpu.memory_space<vmem>>, vector<1x128x128xf32>
    %67 = vector.shape_cast %66 : vector<1x128x128xf32> to vector<128x128xf32>
    %cst_28 = arith.constant dense<0.000000e+00> : vector<128x128xf32>
    %68 = tpu.matmul %65, %67, %cst_28 {dimension_numbers = #tpu.dot_dimension_numbers<[1], [0], [0], [1], [0, 0, 1, 1], [], []>} : vector<128x128xf32>, vector<128x128xf32>, vector<128x128xf32> -> vector<128x128xf32>
    %69 = arith.addf %58, %68 : vector<128x128xf32>
    %c1_i32_29 = arith.constant 1 : i32
    %70 = tpu.dynamic_rotate %9 by %c1_i32_29 dim 0 : vector<256x128xf32>, i32 -> vector<256x128xf32>
    %cst_30 = arith.constant 0.000000e+00 : f32
    %71 = vector.shape_cast %32 : vector<256x1xi1> to vector<256x1xi1>
    %72 = vector.broadcast %71 : vector<256x1xi1> to vector<256x128xi1>
    %73 = vector.broadcast %cst_30 : f32 to vector<256x128xf32>
    %74 = arith.select %72, %70, %73 : vector<256x128xi1>, vector<256x128xf32>
    %75 = vector.extract_strided_slice %74 {offsets = [0, 0], sizes = [128, 128], strides = [1, 1]} : vector<256x128xf32> to vector<128x128xf32>
    %c3 = arith.constant 3 : index
    %c0_31 = arith.constant 0 : index
    %c0_32 = arith.constant 0 : index
    %76 = vector.load %arg4[%c3, %c0_31, %c0_32] : memref<9x128x128xf32, #tpu.memory_space<vmem>>, vector<1x128x128xf32>
    %77 = vector.shape_cast %76 : vector<1x128x128xf32> to vector<128x128xf32>
    %cst_33 = arith.constant dense<0.000000e+00> : vector<128x128xf32>
    %78 = tpu.matmul %75, %77, %cst_33 {dimension_numbers = #tpu.dot_dimension_numbers<[1], [0], [0], [1], [0, 0, 1, 1], [], []>} : vector<128x128xf32>, vector<128x128xf32>, vector<128x128xf32> -> vector<128x128xf32>
    %79 = arith.addf %69, %78 : vector<128x128xf32>
    %80 = vector.extract_strided_slice %9 {offsets = [0, 0], sizes = [128, 128], strides = [1, 1]} : vector<256x128xf32> to vector<128x128xf32>
    %c4 = arith.constant 4 : index
    %c0_34 = arith.constant 0 : index
    %c0_35 = arith.constant 0 : index
    %81 = vector.load %arg4[%c4, %c0_34, %c0_35] : memref<9x128x128xf32, #tpu.memory_space<vmem>>, vector<1x128x128xf32>
    %82 = vector.shape_cast %81 : vector<1x128x128xf32> to vector<128x128xf32>
    %cst_36 = arith.constant dense<0.000000e+00> : vector<128x128xf32>
    %83 = tpu.matmul %80, %82, %cst_36 {dimension_numbers = #tpu.dot_dimension_numbers<[1], [0], [0], [1], [0, 0, 1, 1], [], []>} : vector<128x128xf32>, vector<128x128xf32>, vector<128x128xf32> -> vector<128x128xf32>
    %84 = arith.addf %79, %83 : vector<128x128xf32>
    %c255_i32 = arith.constant 255 : i32
    %85 = tpu.dynamic_rotate %9 by %c255_i32 dim 0 : vector<256x128xf32>, i32 -> vector<256x128xf32>
    %cst_37 = arith.constant 0.000000e+00 : f32
    %86 = vector.shape_cast %34 : vector<256x1xi1> to vector<256x1xi1>
    %87 = vector.broadcast %86 : vector<256x1xi1> to vector<256x128xi1>
    %88 = vector.broadcast %cst_37 : f32 to vector<256x128xf32>
    %89 = arith.select %87, %85, %88 : vector<256x128xi1>, vector<256x128xf32>
    %90 = vector.extract_strided_slice %89 {offsets = [0, 0], sizes = [128, 128], strides = [1, 1]} : vector<256x128xf32> to vector<128x128xf32>
    %c5 = arith.constant 5 : index
    %c0_38 = arith.constant 0 : index
    %c0_39 = arith.constant 0 : index
    %91 = vector.load %arg4[%c5, %c0_38, %c0_39] : memref<9x128x128xf32, #tpu.memory_space<vmem>>, vector<1x128x128xf32>
    %92 = vector.shape_cast %91 : vector<1x128x128xf32> to vector<128x128xf32>
    %cst_40 = arith.constant dense<0.000000e+00> : vector<128x128xf32>
    %93 = tpu.matmul %90, %92, %cst_40 {dimension_numbers = #tpu.dot_dimension_numbers<[1], [0], [0], [1], [0, 0, 1, 1], [], []>} : vector<128x128xf32>, vector<128x128xf32>, vector<128x128xf32> -> vector<128x128xf32>
    %94 = arith.addf %84, %93 : vector<128x128xf32>
    %c241_i32 = arith.constant 241 : i32
    %95 = tpu.dynamic_rotate %9 by %c241_i32 dim 0 : vector<256x128xf32>, i32 -> vector<256x128xf32>
    %96 = arith.andi %30, %32 : vector<256x1xi1>
    %cst_41 = arith.constant 0.000000e+00 : f32
    %97 = vector.shape_cast %96 : vector<256x1xi1> to vector<256x1xi1>
    %98 = vector.broadcast %97 : vector<256x1xi1> to vector<256x128xi1>
    %99 = vector.broadcast %cst_41 : f32 to vector<256x128xf32>
    %100 = arith.select %98, %95, %99 : vector<256x128xi1>, vector<256x128xf32>
    %101 = vector.extract_strided_slice %100 {offsets = [0, 0], sizes = [128, 128], strides = [1, 1]} : vector<256x128xf32> to vector<128x128xf32>
    %c6 = arith.constant 6 : index
    %c0_42 = arith.constant 0 : index
    %c0_43 = arith.constant 0 : index
    %102 = vector.load %arg4[%c6, %c0_42, %c0_43] : memref<9x128x128xf32, #tpu.memory_space<vmem>>, vector<1x128x128xf32>
    %103 = vector.shape_cast %102 : vector<1x128x128xf32> to vector<128x128xf32>
    %cst_44 = arith.constant dense<0.000000e+00> : vector<128x128xf32>
    %104 = tpu.matmul %101, %103, %cst_44 {dimension_numbers = #tpu.dot_dimension_numbers<[1], [0], [0], [1], [0, 0, 1, 1], [], []>} : vector<128x128xf32>, vector<128x128xf32>, vector<128x128xf32> -> vector<128x128xf32>
    %105 = arith.addf %94, %104 : vector<128x128xf32>
    %c240_i32_45 = arith.constant 240 : i32
    %106 = tpu.dynamic_rotate %9 by %c240_i32_45 dim 0 : vector<256x128xf32>, i32 -> vector<256x128xf32>
    %cst_46 = arith.constant 0.000000e+00 : f32
    %107 = vector.shape_cast %30 : vector<256x1xi1> to vector<256x1xi1>
    %108 = vector.broadcast %107 : vector<256x1xi1> to vector<256x128xi1>
    %109 = vector.broadcast %cst_46 : f32 to vector<256x128xf32>
    %110 = arith.select %108, %106, %109 : vector<256x128xi1>, vector<256x128xf32>
    %111 = vector.extract_strided_slice %110 {offsets = [0, 0], sizes = [128, 128], strides = [1, 1]} : vector<256x128xf32> to vector<128x128xf32>
    %c7 = arith.constant 7 : index
    %c0_47 = arith.constant 0 : index
    %c0_48 = arith.constant 0 : index
    %112 = vector.load %arg4[%c7, %c0_47, %c0_48] : memref<9x128x128xf32, #tpu.memory_space<vmem>>, vector<1x128x128xf32>
    %113 = vector.shape_cast %112 : vector<1x128x128xf32> to vector<128x128xf32>
    %cst_49 = arith.constant dense<0.000000e+00> : vector<128x128xf32>
    %114 = tpu.matmul %111, %113, %cst_49 {dimension_numbers = #tpu.dot_dimension_numbers<[1], [0], [0], [1], [0, 0, 1, 1], [], []>} : vector<128x128xf32>, vector<128x128xf32>, vector<128x128xf32> -> vector<128x128xf32>
    %115 = arith.addf %105, %114 : vector<128x128xf32>
    %c239_i32 = arith.constant 239 : i32
    %116 = tpu.dynamic_rotate %9 by %c239_i32 dim 0 : vector<256x128xf32>, i32 -> vector<256x128xf32>
    %117 = arith.andi %30, %34 : vector<256x1xi1>
    %cst_50 = arith.constant 0.000000e+00 : f32
    %118 = vector.shape_cast %117 : vector<256x1xi1> to vector<256x1xi1>
    %119 = vector.broadcast %118 : vector<256x1xi1> to vector<256x128xi1>
    %120 = vector.broadcast %cst_50 : f32 to vector<256x128xf32>
    %121 = arith.select %119, %116, %120 : vector<256x128xi1>, vector<256x128xf32>
    %122 = vector.extract_strided_slice %121 {offsets = [0, 0], sizes = [128, 128], strides = [1, 1]} : vector<256x128xf32> to vector<128x128xf32>
    %c8 = arith.constant 8 : index
    %c0_51 = arith.constant 0 : index
    %c0_52 = arith.constant 0 : index
    %123 = vector.load %arg4[%c8, %c0_51, %c0_52] : memref<9x128x128xf32, #tpu.memory_space<vmem>>, vector<1x128x128xf32>
    %124 = vector.shape_cast %123 : vector<1x128x128xf32> to vector<128x128xf32>
    %cst_53 = arith.constant dense<0.000000e+00> : vector<128x128xf32>
    %125 = tpu.matmul %122, %124, %cst_53 {dimension_numbers = #tpu.dot_dimension_numbers<[1], [0], [0], [1], [0, 0, 1, 1], [], []>} : vector<128x128xf32>, vector<128x128xf32>, vector<128x128xf32> -> vector<128x128xf32>
    %126 = arith.addf %115, %125 : vector<128x128xf32>
    %c0_54 = arith.constant 0 : index
    %c0_55 = arith.constant 0 : index
    %c0_56 = arith.constant 0 : index
    %127 = vector.load %arg5[%c0_54, %c0_55, %c0_56] : memref<1x256x128xf32, #tpu.memory_space<vmem>>, vector<1x128x128xf32>
    %128 = vector.shape_cast %127 : vector<1x128x128xf32> to vector<128x128xf32>
    %129 = vector.shape_cast %126 : vector<128x128xf32> to vector<1x128x128xf32>
    tpu.vector_store %arg5[%c0_54, %c0_55, %c0_56], %129 {strides = array<i32>} : memref<1x256x128xf32, #tpu.memory_space<vmem>>, vector<1x128x128xf32>,
    %cst_57 = arith.constant dense<0.000000e+00> : vector<128xf32>
    %130 = vector.multi_reduction <add>, %126, %cst_57 [0] : vector<128x128xf32> to vector<128xf32>
    %131 = vector.shape_cast %130 : vector<128xf32> to vector<1x128xf32>
    %132 = arith.addf %35, %131 : vector<1x128xf32>
    %133 = arith.mulf %126, %126 : vector<128x128xf32>
    %cst_58 = arith.constant dense<0.000000e+00> : vector<128xf32>
    %134 = vector.multi_reduction <add>, %133, %cst_58 [0] : vector<128x128xf32> to vector<128xf32>
    %135 = vector.shape_cast %134 : vector<128xf32> to vector<1x128xf32>
    %136 = arith.addf %36, %135 : vector<1x128xf32>
    %cst_59 = arith.constant 0.000000e+00 : f32
    %137 = vector.broadcast %cst_59 : f32 to vector<128x128xf32>
    %c17_i32_60 = arith.constant 17 : i32
    %138 = tpu.dynamic_rotate %9 by %c17_i32_60 dim 0 : vector<256x128xf32>, i32 -> vector<256x128xf32>
    %139 = arith.andi %28, %32 : vector<256x1xi1>
    %cst_61 = arith.constant 0.000000e+00 : f32
    %140 = vector.shape_cast %139 : vector<256x1xi1> to vector<256x1xi1>
    %141 = vector.broadcast %140 : vector<256x1xi1> to vector<256x128xi1>
    %142 = vector.broadcast %cst_61 : f32 to vector<256x128xf32>
    %143 = arith.select %141, %138, %142 : vector<256x128xi1>, vector<256x128xf32>
    %144 = vector.extract_strided_slice %143 {offsets = [128, 0], sizes = [128, 128], strides = [1, 1]} : vector<256x128xf32> to vector<128x128xf32>
    %c0_62 = arith.constant 0 : index
    %c0_63 = arith.constant 0 : index
    %c0_64 = arith.constant 0 : index
    %145 = vector.load %arg4[%c0_62, %c0_63, %c0_64] : memref<9x128x128xf32, #tpu.memory_space<vmem>>, vector<1x128x128xf32>
    %146 = vector.shape_cast %145 : vector<1x128x128xf32> to vector<128x128xf32>
    %cst_65 = arith.constant dense<0.000000e+00> : vector<128x128xf32>
    %147 = tpu.matmul %144, %146, %cst_65 {dimension_numbers = #tpu.dot_dimension_numbers<[1], [0], [0], [1], [0, 0, 1, 1], [], []>} : vector<128x128xf32>, vector<128x128xf32>, vector<128x128xf32> -> vector<128x128xf32>
    %148 = arith.addf %137, %147 : vector<128x128xf32>
    %c16_i32_66 = arith.constant 16 : i32
    %149 = tpu.dynamic_rotate %9 by %c16_i32_66 dim 0 : vector<256x128xf32>, i32 -> vector<256x128xf32>
    %cst_67 = arith.constant 0.000000e+00 : f32
    %150 = vector.shape_cast %28 : vector<256x1xi1> to vector<256x1xi1>
    %151 = vector.broadcast %150 : vector<256x1xi1> to vector<256x128xi1>
    %152 = vector.broadcast %cst_67 : f32 to vector<256x128xf32>
    %153 = arith.select %151, %149, %152 : vector<256x128xi1>, vector<256x128xf32>
    %154 = vector.extract_strided_slice %153 {offsets = [128, 0], sizes = [128, 128], strides = [1, 1]} : vector<256x128xf32> to vector<128x128xf32>
    %c1_68 = arith.constant 1 : index
    %c0_69 = arith.constant 0 : index
    %c0_70 = arith.constant 0 : index
    %155 = vector.load %arg4[%c1_68, %c0_69, %c0_70] : memref<9x128x128xf32, #tpu.memory_space<vmem>>, vector<1x128x128xf32>
    %156 = vector.shape_cast %155 : vector<1x128x128xf32> to vector<128x128xf32>
    %cst_71 = arith.constant dense<0.000000e+00> : vector<128x128xf32>
    %157 = tpu.matmul %154, %156, %cst_71 {dimension_numbers = #tpu.dot_dimension_numbers<[1], [0], [0], [1], [0, 0, 1, 1], [], []>} : vector<128x128xf32>, vector<128x128xf32>, vector<128x128xf32> -> vector<128x128xf32>
    %158 = arith.addf %148, %157 : vector<128x128xf32>
    %c15_i32_72 = arith.constant 15 : i32
    %159 = tpu.dynamic_rotate %9 by %c15_i32_72 dim 0 : vector<256x128xf32>, i32 -> vector<256x128xf32>
    %160 = arith.andi %28, %34 : vector<256x1xi1>
    %cst_73 = arith.constant 0.000000e+00 : f32
    %161 = vector.shape_cast %160 : vector<256x1xi1> to vector<256x1xi1>
    %162 = vector.broadcast %161 : vector<256x1xi1> to vector<256x128xi1>
    %163 = vector.broadcast %cst_73 : f32 to vector<256x128xf32>
    %164 = arith.select %162, %159, %163 : vector<256x128xi1>, vector<256x128xf32>
    %165 = vector.extract_strided_slice %164 {offsets = [128, 0], sizes = [128, 128], strides = [1, 1]} : vector<256x128xf32> to vector<128x128xf32>
    %c2_74 = arith.constant 2 : index
    %c0_75 = arith.constant 0 : index
    %c0_76 = arith.constant 0 : index
    %166 = vector.load %arg4[%c2_74, %c0_75, %c0_76] : memref<9x128x128xf32, #tpu.memory_space<vmem>>, vector<1x128x128xf32>
    %167 = vector.shape_cast %166 : vector<1x128x128xf32> to vector<128x128xf32>
    %cst_77 = arith.constant dense<0.000000e+00> : vector<128x128xf32>
    %168 = tpu.matmul %165, %167, %cst_77 {dimension_numbers = #tpu.dot_dimension_numbers<[1], [0], [0], [1], [0, 0, 1, 1], [], []>} : vector<128x128xf32>, vector<128x128xf32>, vector<128x128xf32> -> vector<128x128xf32>
    %169 = arith.addf %158, %168 : vector<128x128xf32>
    %c1_i32_78 = arith.constant 1 : i32
    %170 = tpu.dynamic_rotate %9 by %c1_i32_78 dim 0 : vector<256x128xf32>, i32 -> vector<256x128xf32>
    %cst_79 = arith.constant 0.000000e+00 : f32
    %171 = vector.shape_cast %32 : vector<256x1xi1> to vector<256x1xi1>
    %172 = vector.broadcast %171 : vector<256x1xi1> to vector<256x128xi1>
    %173 = vector.broadcast %cst_79 : f32 to vector<256x128xf32>
    %174 = arith.select %172, %170, %173 : vector<256x128xi1>, vector<256x128xf32>
    %175 = vector.extract_strided_slice %174 {offsets = [128, 0], sizes = [128, 128], strides = [1, 1]} : vector<256x128xf32> to vector<128x128xf32>
    %c3_80 = arith.constant 3 : index
    %c0_81 = arith.constant 0 : index
    %c0_82 = arith.constant 0 : index
    %176 = vector.load %arg4[%c3_80, %c0_81, %c0_82] : memref<9x128x128xf32, #tpu.memory_space<vmem>>, vector<1x128x128xf32>
    %177 = vector.shape_cast %176 : vector<1x128x128xf32> to vector<128x128xf32>
    %cst_83 = arith.constant dense<0.000000e+00> : vector<128x128xf32>
    %178 = tpu.matmul %175, %177, %cst_83 {dimension_numbers = #tpu.dot_dimension_numbers<[1], [0], [0], [1], [0, 0, 1, 1], [], []>} : vector<128x128xf32>, vector<128x128xf32>, vector<128x128xf32> -> vector<128x128xf32>
    %179 = arith.addf %169, %178 : vector<128x128xf32>
    %180 = vector.extract_strided_slice %9 {offsets = [128, 0], sizes = [128, 128], strides = [1, 1]} : vector<256x128xf32> to vector<128x128xf32>
    %c4_84 = arith.constant 4 : index
    %c0_85 = arith.constant 0 : index
    %c0_86 = arith.constant 0 : index
    %181 = vector.load %arg4[%c4_84, %c0_85, %c0_86] : memref<9x128x128xf32, #tpu.memory_space<vmem>>, vector<1x128x128xf32>
    %182 = vector.shape_cast %181 : vector<1x128x128xf32> to vector<128x128xf32>
    %cst_87 = arith.constant dense<0.000000e+00> : vector<128x128xf32>
    %183 = tpu.matmul %180, %182, %cst_87 {dimension_numbers = #tpu.dot_dimension_numbers<[1], [0], [0], [1], [0, 0, 1, 1], [], []>} : vector<128x128xf32>, vector<128x128xf32>, vector<128x128xf32> -> vector<128x128xf32>
    %184 = arith.addf %179, %183 : vector<128x128xf32>
    %c255_i32_88 = arith.constant 255 : i32
    %185 = tpu.dynamic_rotate %9 by %c255_i32_88 dim 0 : vector<256x128xf32>, i32 -> vector<256x128xf32>
    %cst_89 = arith.constant 0.000000e+00 : f32
    %186 = vector.shape_cast %34 : vector<256x1xi1> to vector<256x1xi1>
    %187 = vector.broadcast %186 : vector<256x1xi1> to vector<256x128xi1>
    %188 = vector.broadcast %cst_89 : f32 to vector<256x128xf32>
    %189 = arith.select %187, %185, %188 : vector<256x128xi1>, vector<256x128xf32>
    %190 = vector.extract_strided_slice %189 {offsets = [128, 0], sizes = [128, 128], strides = [1, 1]} : vector<256x128xf32> to vector<128x128xf32>
    %c5_90 = arith.constant 5 : index
    %c0_91 = arith.constant 0 : index
    %c0_92 = arith.constant 0 : index
    %191 = vector.load %arg4[%c5_90, %c0_91, %c0_92] : memref<9x128x128xf32, #tpu.memory_space<vmem>>, vector<1x128x128xf32>
    %192 = vector.shape_cast %191 : vector<1x128x128xf32> to vector<128x128xf32>
    %cst_93 = arith.constant dense<0.000000e+00> : vector<128x128xf32>
    %193 = tpu.matmul %190, %192, %cst_93 {dimension_numbers = #tpu.dot_dimension_numbers<[1], [0], [0], [1], [0, 0, 1, 1], [], []>} : vector<128x128xf32>, vector<128x128xf32>, vector<128x128xf32> -> vector<128x128xf32>
    %194 = arith.addf %184, %193 : vector<128x128xf32>
    %c241_i32_94 = arith.constant 241 : i32
    %195 = tpu.dynamic_rotate %9 by %c241_i32_94 dim 0 : vector<256x128xf32>, i32 -> vector<256x128xf32>
    %196 = arith.andi %30, %32 : vector<256x1xi1>
    %cst_95 = arith.constant 0.000000e+00 : f32
    %197 = vector.shape_cast %196 : vector<256x1xi1> to vector<256x1xi1>
    %198 = vector.broadcast %197 : vector<256x1xi1> to vector<256x128xi1>
    %199 = vector.broadcast %cst_95 : f32 to vector<256x128xf32>
    %200 = arith.select %198, %195, %199 : vector<256x128xi1>, vector<256x128xf32>
    %201 = vector.extract_strided_slice %200 {offsets = [128, 0], sizes = [128, 128], strides = [1, 1]} : vector<256x128xf32> to vector<128x128xf32>
    %c6_96 = arith.constant 6 : index
    %c0_97 = arith.constant 0 : index
    %c0_98 = arith.constant 0 : index
    %202 = vector.load %arg4[%c6_96, %c0_97, %c0_98] : memref<9x128x128xf32, #tpu.memory_space<vmem>>, vector<1x128x128xf32>
    %203 = vector.shape_cast %202 : vector<1x128x128xf32> to vector<128x128xf32>
    %cst_99 = arith.constant dense<0.000000e+00> : vector<128x128xf32>
    %204 = tpu.matmul %201, %203, %cst_99 {dimension_numbers = #tpu.dot_dimension_numbers<[1], [0], [0], [1], [0, 0, 1, 1], [], []>} : vector<128x128xf32>, vector<128x128xf32>, vector<128x128xf32> -> vector<128x128xf32>
    %205 = arith.addf %194, %204 : vector<128x128xf32>
    %c240_i32_100 = arith.constant 240 : i32
    %206 = tpu.dynamic_rotate %9 by %c240_i32_100 dim 0 : vector<256x128xf32>, i32 -> vector<256x128xf32>
    %cst_101 = arith.constant 0.000000e+00 : f32
    %207 = vector.shape_cast %30 : vector<256x1xi1> to vector<256x1xi1>
    %208 = vector.broadcast %207 : vector<256x1xi1> to vector<256x128xi1>
    %209 = vector.broadcast %cst_101 : f32 to vector<256x128xf32>
    %210 = arith.select %208, %206, %209 : vector<256x128xi1>, vector<256x128xf32>
    %211 = vector.extract_strided_slice %210 {offsets = [128, 0], sizes = [128, 128], strides = [1, 1]} : vector<256x128xf32> to vector<128x128xf32>
    %c7_102 = arith.constant 7 : index
    %c0_103 = arith.constant 0 : index
    %c0_104 = arith.constant 0 : index
    %212 = vector.load %arg4[%c7_102, %c0_103, %c0_104] : memref<9x128x128xf32, #tpu.memory_space<vmem>>, vector<1x128x128xf32>
    %213 = vector.shape_cast %212 : vector<1x128x128xf32> to vector<128x128xf32>
    %cst_105 = arith.constant dense<0.000000e+00> : vector<128x128xf32>
    %214 = tpu.matmul %211, %213, %cst_105 {dimension_numbers = #tpu.dot_dimension_numbers<[1], [0], [0], [1], [0, 0, 1, 1], [], []>} : vector<128x128xf32>, vector<128x128xf32>, vector<128x128xf32> -> vector<128x128xf32>
    %215 = arith.addf %205, %214 : vector<128x128xf32>
    %c239_i32_106 = arith.constant 239 : i32
    %216 = tpu.dynamic_rotate %9 by %c239_i32_106 dim 0 : vector<256x128xf32>, i32 -> vector<256x128xf32>
    %217 = arith.andi %30, %34 : vector<256x1xi1>
    %cst_107 = arith.constant 0.000000e+00 : f32
    %218 = vector.shape_cast %217 : vector<256x1xi1> to vector<256x1xi1>
    %219 = vector.broadcast %218 : vector<256x1xi1> to vector<256x128xi1>
    %220 = vector.broadcast %cst_107 : f32 to vector<256x128xf32>
    %221 = arith.select %219, %216, %220 : vector<256x128xi1>, vector<256x128xf32>
    %222 = vector.extract_strided_slice %221 {offsets = [128, 0], sizes = [128, 128], strides = [1, 1]} : vector<256x128xf32> to vector<128x128xf32>
    %c8_108 = arith.constant 8 : index
    %c0_109 = arith.constant 0 : index
    %c0_110 = arith.constant 0 : index
    %223 = vector.load %arg4[%c8_108, %c0_109, %c0_110] : memref<9x128x128xf32, #tpu.memory_space<vmem>>, vector<1x128x128xf32>
    %224 = vector.shape_cast %223 : vector<1x128x128xf32> to vector<128x128xf32>
    %cst_111 = arith.constant dense<0.000000e+00> : vector<128x128xf32>
    %225 = tpu.matmul %222, %224, %cst_111 {dimension_numbers = #tpu.dot_dimension_numbers<[1], [0], [0], [1], [0, 0, 1, 1], [], []>} : vector<128x128xf32>, vector<128x128xf32>, vector<128x128xf32> -> vector<128x128xf32>
    %226 = arith.addf %215, %225 : vector<128x128xf32>
    %c0_112 = arith.constant 0 : index
    %c128 = arith.constant 128 : index
    %c0_113 = arith.constant 0 : index
    %227 = vector.load %arg5[%c0_112, %c128, %c0_113] : memref<1x256x128xf32, #tpu.memory_space<vmem>>, vector<1x128x128xf32>
    %228 = vector.shape_cast %227 : vector<1x128x128xf32> to vector<128x128xf32>
    %229 = vector.shape_cast %226 : vector<128x128xf32> to vector<1x128x128xf32>
    tpu.vector_store %arg5[%c0_112, %c128, %c0_113], %229 {strides = array<i32>} : memref<1x256x128xf32, #tpu.memory_space<vmem>>, vector<1x128x128xf32>,
    %cst_114 = arith.constant dense<0.000000e+00> : vector<128xf32>
    %230 = vector.multi_reduction <add>, %226, %cst_114 [0] : vector<128x128xf32> to vector<128xf32>
    %231 = vector.shape_cast %230 : vector<128xf32> to vector<1x128xf32>
    %232 = arith.addf %132, %231 : vector<1x128xf32>
    %233 = arith.mulf %226, %226 : vector<128x128xf32>
    %cst_115 = arith.constant dense<0.000000e+00> : vector<128xf32>
    %234 = vector.multi_reduction <add>, %233, %cst_115 [0] : vector<128x128xf32> to vector<128xf32>
    %235 = vector.shape_cast %234 : vector<128xf32> to vector<1x128xf32>
    %236 = arith.addf %136, %235 : vector<1x128xf32>
    %c0_116 = arith.constant 0 : index
    %c0_117 = arith.constant 0 : index
    %c0_118 = arith.constant 0 : index
    %237 = vector.load %arg6[%c0_116, %c0_117, %c0_118] : memref<1x1x128xf32, #tpu.memory_space<vmem>>, vector<1x1x128xf32>
    %238 = vector.shape_cast %237 : vector<1x1x128xf32> to vector<1x128xf32>
    %239 = vector.shape_cast %232 : vector<1x128xf32> to vector<1x1x128xf32>
    tpu.vector_store %arg6[%c0_116, %c0_117, %c0_118], %239 {strides = array<i32>} : memref<1x1x128xf32, #tpu.memory_space<vmem>>, vector<1x1x128xf32>,
    %c0_119 = arith.constant 0 : index
    %c0_120 = arith.constant 0 : index
    %c0_121 = arith.constant 0 : index
    %240 = vector.load %arg7[%c0_119, %c0_120, %c0_121] : memref<1x1x128xf32, #tpu.memory_space<vmem>>, vector<1x1x128xf32>
    %241 = vector.shape_cast %240 : vector<1x1x128xf32> to vector<1x128xf32>
    %242 = vector.shape_cast %236 : vector<1x128xf32> to vector<1x1x128xf32>
    tpu.vector_store %arg7[%c0_119, %c0_120, %c0_121], %242 {strides = array<i32>} : memref<1x1x128xf32, #tpu.memory_space<vmem>>, vector<1x1x128xf32>,
    return
  }
  func.func @transform_0(%arg0: i32) -> (i32, i32, i32) {
    %c0_i32 = arith.constant 0 : i32
    %c0_i32_0 = arith.constant 0 : i32
    %c0_i32_1 = arith.constant 0 : i32
    return %arg0, %c0_i32, %c0_i32_0 : i32, i32, i32
  }
  func.func @transform_1(%arg0: i32) -> (i32, i32) {
    %c0_i32 = arith.constant 0 : i32
    %c0_i32_0 = arith.constant 0 : i32
    %c0_i32_1 = arith.constant 0 : i32
    return %c0_i32, %c0_i32_0 : i32, i32
  }
  func.func @transform_2(%arg0: i32) -> (i32, i32) {
    %c0_i32 = arith.constant 0 : i32
    %c0_i32_0 = arith.constant 0 : i32
    %c0_i32_1 = arith.constant 0 : i32
    return %c0_i32, %c0_i32_0 : i32, i32
  }
  func.func @transform_3(%arg0: i32) -> (i32, i32, i32) {
    %c0_i32 = arith.constant 0 : i32
    %c0_i32_0 = arith.constant 0 : i32
    %c0_i32_1 = arith.constant 0 : i32
    %c0_i32_2 = arith.constant 0 : i32
    return %c0_i32, %c0_i32_0, %c0_i32_1 : i32, i32, i32
  }
  func.func @transform_4(%arg0: i32) -> (i32, i32, i32) {
    %c0_i32 = arith.constant 0 : i32
    %c0_i32_0 = arith.constant 0 : i32
    %c0_i32_1 = arith.constant 0 : i32
    return %arg0, %c0_i32, %c0_i32_0 : i32, i32, i32
  }
  func.func @transform_5(%arg0: i32) -> (i32, i32, i32) {
    %c0_i32 = arith.constant 0 : i32
    %c0_i32_0 = arith.constant 0 : i32
    %c0_i32_1 = arith.constant 0 : i32
    return %arg0, %c0_i32, %c0_i32_0 : i32, i32, i32
  }
  func.func @transform_6(%arg0: i32) -> (i32, i32, i32) {
    %c0_i32 = arith.constant 0 : i32
    %c0_i32_0 = arith.constant 0 : i32
    %c0_i32_1 = arith.constant 0 : i32
    return %arg0, %c0_i32, %c0_i32_0 : i32, i32, i32
  }
}

module attributes {stable_mosaic.version = 11 : i64} {
  func.func @_bn_relu_t_kernel(%arg0: i32, %arg1: memref<1x256x128xf32, #tpu.memory_space<vmem>>, %arg2: memref<8x1xf32, #tpu.memory_space<vmem>>, %arg3: memref<8x1xf32, #tpu.memory_space<vmem>>, %arg4: memref<1x8x256xf32, #tpu.memory_space<vmem>>) attributes {dimension_semantics = [#tpu.dimension_semantics<parallel>], iteration_bounds = array<i64: 2>, scalar_prefetch = 0 : i64, scratch_operands = 0 : i64, tpu.core_type = #tpu.core_type<tc>, window_params = [{transform_indices = @transform_0, window_bounds = array<i64: 1, 256, 128>}, {pipeline_mode = #tpu.pipeline_mode<synchronous>, transform_indices = @transform_1, window_bounds = array<i64: 8, 1>}, {pipeline_mode = #tpu.pipeline_mode<synchronous>, transform_indices = @transform_2, window_bounds = array<i64: 8, 1>}, {transform_indices = @transform_3, window_bounds = array<i64: 1, 8, 256>}]} {
    %c0 = arith.constant 0 : index
    %c0_0 = arith.constant 0 : index
    %c0_1 = arith.constant 0 : index
    %0 = vector.load %arg1[%c0, %c0_0, %c0_1] : memref<1x256x128xf32, #tpu.memory_space<vmem>>, vector<1x256x128xf32>
    %1 = vector.shape_cast %0 : vector<1x256x128xf32> to vector<256x128xf32>
    %2 = tpu.transpose %1, [1, 0] : vector<256x128xf32> -> vector<128x256xf32>
    %3 = vector.extract_strided_slice %2 {offsets = [0, 0], sizes = [8, 256], strides = [1, 1]} : vector<128x256xf32> to vector<8x256xf32>
    %c0_2 = arith.constant 0 : index
    %c0_3 = arith.constant 0 : index
    %4 = vector.load %arg2[%c0_2, %c0_3] : memref<8x1xf32, #tpu.memory_space<vmem>>, vector<8x1xf32>
    %5 = vector.broadcast %4 : vector<8x1xf32> to vector<8x256xf32>
    %6 = arith.mulf %3, %5 : vector<8x256xf32>
    %c0_4 = arith.constant 0 : index
    %c0_5 = arith.constant 0 : index
    %7 = vector.load %arg3[%c0_4, %c0_5] : memref<8x1xf32, #tpu.memory_space<vmem>>, vector<8x1xf32>
    %8 = vector.broadcast %7 : vector<8x1xf32> to vector<8x256xf32>
    %9 = arith.addf %6, %8 : vector<8x256xf32>
    %cst = arith.constant 0.000000e+00 : f32
    %10 = vector.broadcast %cst : f32 to vector<8x256xf32>
    %11 = arith.maximumf %9, %10 : vector<8x256xf32>
    %c0_6 = arith.constant 0 : index
    %c0_7 = arith.constant 0 : index
    %c0_8 = arith.constant 0 : index
    %12 = vector.load %arg4[%c0_6, %c0_7, %c0_8] : memref<1x8x256xf32, #tpu.memory_space<vmem>>, vector<1x8x256xf32>
    %13 = vector.shape_cast %12 : vector<1x8x256xf32> to vector<8x256xf32>
    %14 = vector.shape_cast %11 : vector<8x256xf32> to vector<1x8x256xf32>
    tpu.vector_store %arg4[%c0_6, %c0_7, %c0_8], %14 {strides = array<i32>} : memref<1x8x256xf32, #tpu.memory_space<vmem>>, vector<1x8x256xf32>,
    return
  }
  func.func @transform_0(%arg0: i32) -> (i32, i32, i32) {
    %c0_i32 = arith.constant 0 : i32
    %c0_i32_0 = arith.constant 0 : i32
    %c0_i32_1 = arith.constant 0 : i32
    return %arg0, %c0_i32, %c0_i32_0 : i32, i32, i32
  }
  func.func @transform_1(%arg0: i32) -> (i32, i32) {
    %c0_i32 = arith.constant 0 : i32
    %c0_i32_0 = arith.constant 0 : i32
    %c0_i32_1 = arith.constant 0 : i32
    return %c0_i32, %c0_i32_0 : i32, i32
  }
  func.func @transform_2(%arg0: i32) -> (i32, i32) {
    %c0_i32 = arith.constant 0 : i32
    %c0_i32_0 = arith.constant 0 : i32
    %c0_i32_1 = arith.constant 0 : i32
    return %c0_i32, %c0_i32_0 : i32, i32
  }
  func.func @transform_3(%arg0: i32) -> (i32, i32, i32) {
    %c0_i32 = arith.constant 0 : i32
    %c0_i32_0 = arith.constant 0 : i32
    %c0_i32_1 = arith.constant 0 : i32
    return %arg0, %c0_i32, %c0_i32_0 : i32, i32, i32
  }
}

</mosaic_0001>

<bundles_post_ra>
// kernel: double_conv_2d.5
= control target key start
LH: loop header
LB: loop body
LE: loop exit
PB: predicated region body
PF: predicated region fallthrough
CT: control target
= control target key end

     0   :  { %s395_s12 = smov 0   ;;  %s458_s0 = inlined_call_operand.vmem [shape: f32[2,256,128], index: 0, kind: input, shape index: {}]   ;;  %s459_s1 = inlined_call_operand.vmem [shape: f32[8,1], index: 1, kind: input, shape index: {}]   ;;  %s460_s2 = inlined_call_operand.vmem [shape: f32[8,1], index: 2, kind: input, shape index: {}]   ;;  %s461_s3 = inlined_call_operand.vmem [shape: f32[2,8,256], index: 3, kind: output, shape index: {}]  }
   0x1 LB: > { %s342_s13 = sadd.s32 4294967295, %s372_s12   ;;  %p346_p0 = scmp.ge.s32.totalorder %s372_s12, 1  ;;  %s372_s12 = sphi %s395_s12, %s13_s12  }
   0x2   : > { %p137_p1 = scmp.lt.s32.totalorder %s372_s12, 3 }
   0x4   : > { %p138_p2 = pnand %p346_p0, %p137_p1 }
   0x5   : > { %v267_v0 = vld [vmem:[%s459_s1] sm:$0xff] (!%p138_p2)  ;;  %p161_p3 = scmp.lt.s32.totalorder (!%p138_p2), %s342_s13, 1  ;;  %v374_v1 = vmov (!%p138_p2), 0  }
   0x6   : > { %141 = sbr.rel (%p138_p2) target bundleno = 188 (0xbc), region = 32  ;;  %364 = vset.pattern.permute.xlu1 (!%p138_p2), %v374_v1  ;;  %v275_v2 = vld [vmem:[%s460_s2] sm:$0xff] (!%p138_p2) }
   0x7   : > { %270 = vperm.xlu1 (!%p138_p2), %364, %v267_v0  }
   0xb   : > { %278 = vperm.xlu1 (!%p138_p2), %364, %v275_v2  }
   0xd   : > { %s463_s13 = smov (!%p161_p3, %s342_s13), 1 }
   0xe   : > { %s353_s18 = sshll.u32 %s463_s13, 8  ;;  %s354_s22 = sshll.u32 %s463_s13, 4 }
   0xf   : > { %s416_s21 = scalar_lea.vmem %s458_s0, %s353_s18  ;;  %s170_s25 = scalar_lea.vmem %s461_s3, %s354_s22 }
  0x10   : > { %v171_v3 = vld [vmem:[%s416_s21] sm:$0xff]  ;;  %v172_v4 = vld [vmem:[%s416_s21 + $0x8] sm:$0xff]  ;;  %v173_v5 = vld [vmem:[%s416_s21 + $0x10] sm:$0xff] }
  0x11   : > { %203 = vxpose.xlu0.b32.start [1/16] (narrow) %v171_v3, 8  ;;  %v174_v6 = vld [vmem:[%s416_s21 + $0x18] sm:$0xff]  ;;  %v175_v7 = vld [vmem:[%s416_s21 + $0x20] sm:$0xff]  ;;  %v176_v8 = vld [vmem:[%s416_s21 + $0x28] sm:$0xff] }
  0x12   : > { %v177_v9 = vld [vmem:[%s416_s21 + $0x30] sm:$0xff]  ;;  %v178_v10 = vld [vmem:[%s416_s21 + $0x38] sm:$0xff]  ;;  %v179_v11 = vld [vmem:[%s416_s21 + $0x40] sm:$0xff] }
  0x13   : > { %v180_v12 = vld [vmem:[%s416_s21 + $0x48] sm:$0xff]  ;;  %v187_v13 = vld [vmem:[%s416_s21 + $0x80] sm:$0xff]  ;;  %v181_v14 = vld [vmem:[%s416_s21 + $0x50] sm:$0xff] }
  0x14   : > { %v188_v15 = vld [vmem:[%s416_s21 + $0x88] sm:$0xff]  ;;  %v182_v16 = vld [vmem:[%s416_s21 + $0x58] sm:$0xff]  ;;  %v189_v17 = vld [vmem:[%s416_s21 + $0x90] sm:$0xff] }
  0x15   : > { %204 = vxpose.xlu0.b32.cont [2/16] (narrow) %v172_v4, 8  ;;  %v183_v18 = vld [vmem:[%s416_s21 + $0x60] sm:$0xff]  ;;  %v190_v19 = vld [vmem:[%s416_s21 + $0x98] sm:$0xff]  ;;  %v184_v20 = vld [vmem:[%s416_s21 + $0x68] sm:$0xff] }
  0x16   : > { %v191_v21 = vld [vmem:[%s416_s21 + $0xa0] sm:$0xff]  ;;  %v185_v22 = vld [vmem:[%s416_s21 + $0x70] sm:$0xff]  ;;  %v192_v23 = vld [vmem:[%s416_s21 + $0xa8] sm:$0xff] }
  0x17   : > { %v186_v24 = vld [vmem:[%s416_s21 + $0x78] sm:$0xff]  ;;  %v193_v25 = vld [vmem:[%s416_s21 + $0xb0] sm:$0xff]  ;;  %v195_v27 = vld [vmem:[%s416_s21 + $0xc0] sm:$0xff] }
  0x18   : > { %v194_v26 = vld [vmem:[%s416_s21 + $0xb8] sm:$0xff]  ;;  %v196_v28 = vld [vmem:[%s416_s21 + $0xc8] sm:$0xff]  ;;  %v197_v29 = vld [vmem:[%s416_s21 + $0xd0] sm:$0xff] }
  0x19   : > { %205 = vxpose.xlu0.b32.cont [3/16] (narrow) %v173_v5, 8  ;;  %v198_v30 = vld [vmem:[%s416_s21 + $0xd8] sm:$0xff]  ;;  %v199_v31 = vld [vmem:[%s416_s21 + $0xe0] sm:$0xff]  ;;  %v200_v32 = vld [vmem:[%s416_s21 + $0xe8] sm:$0xff] }
  0x1a   : > { %v201_v33 = vld [vmem:[%s416_s21 + $0xf0] sm:$0xff]  ;;  %v202_v34 = vld [vmem:[%s416_s21 + $0xf8] sm:$0xff] }
  0x1d   : > { %206 = vxpose.xlu0.b32.cont [4/16] (narrow) %v174_v6, 8 }
  0x21   : > { %207 = vxpose.xlu0.b32.cont [5/16] (narrow) %v175_v7, 8 }
  0x25   : > { %208 = vxpose.xlu0.b32.cont [6/16] (narrow) %v176_v8, 8 }
  0x29   : > { %209 = vxpose.xlu0.b32.cont [7/16] (narrow) %v177_v9, 8 }
  0x2d   : > { %210 = vxpose.xlu0.b32.cont [8/16] (narrow) %v178_v10, 8 }
  0x31   : > { %211 = vxpose.xlu0.b32.cont [9/16] (narrow) %v179_v11, 8 }
  0x34   : > { %235 = vxpose.xlu1.b32.start [1/16] (narrow) %v187_v13, 8 }
  0x35   : > { %212 = vxpose.xlu0.b32.cont [10/16] (narrow) %v180_v12, 8 }
  0x38   : > { %236 = vxpose.xlu1.b32.cont [2/16] (narrow) %v188_v15, 8 }
  0x39   : > { %213 = vxpose.xlu0.b32.cont [11/16] (narrow) %v181_v14, 8 }
  0x3c   : > { %237 = vxpose.xlu1.b32.cont [3/16] (narrow) %v189_v17, 8 }
  0x3d   : > { %214 = vxpose.xlu0.b32.cont [12/16] (narrow) %v182_v16, 8 }
  0x40   : > { %238 = vxpose.xlu1.b32.cont [4/16] (narrow) %v190_v19, 8 }
  0x41   : > { %215 = vxpose.xlu0.b32.cont [13/16] (narrow) %v183_v18, 8 }
  0x44   : > { %239 = vxpose.xlu1.b32.cont [5/16] (narrow) %v191_v21, 8 }
  0x45   : > { %216 = vxpose.xlu0.b32.cont [14/16] (narrow) %v184_v20, 8 }
  0x48   : > { %240 = vxpose.xlu1.b32.cont [6/16] (narrow) %v192_v23, 8 }
  0x49   : > { %217 = vxpose.xlu0.b32.cont [15/16] (narrow) %v185_v22, 8 }
  0x4c   : > { %241 = vxpose.xlu1.b32.cont [7/16] (narrow) %v193_v25, 8 }
  0x4d   : > { %218 = vxpose.xlu0.b32.end [16/16] (narrow) %v186_v24, 8 }
  0x50   : > { %242 = vxpose.xlu1.b32.cont [8/16] (narrow) %v194_v26, 8 }
  0x54   : > { %243 = vxpose.xlu1.b32.cont [9/16] (narrow) %v195_v27, 8 }
  0x58   : > { %244 = vxpose.xlu1.b32.cont [10/16] (narrow) %v196_v28, 8 }
  0x5c   : > { %245 = vxpose.xlu1.b32.cont [11/16] (narrow) %v197_v29, 8 }
  0x60   : > { %246 = vxpose.xlu1.b32.cont [12/16] (narrow) %v198_v30, 8 }
  0x64   : > { %247 = vxpose.xlu1.b32.cont [13/16] (narrow) %v199_v31, 8 }
  0x68   : > { %248 = vxpose.xlu1.b32.cont [14/16] (narrow) %v200_v32, 8 }
  0x6c   : > { %249 = vxpose.xlu1.b32.cont [15/16] (narrow) %v201_v33, 8 }
  0x70   : > { %250 = vxpose.xlu1.b32.end [16/16] (narrow) %v202_v34, 8 }
  0x76   : > { %365 = vset.pattern.permute.xlu0 %v374_v1 }
  0x86   : > { %v271_v35 = vpop.permute.xlu1 %270 }
  0x8a   : > { %v279_v38 = vpop.permute.xlu1 %278 }
  0x91   : > { %v219_v36 = vpop.trf.xlu0 }
  0x92   : > { %v273_v37 = vmul.f32 %v271_v35, %v219_v36 }
  0x94   : > { %v281_v39 = vadd.f32 %v279_v38, %v273_v37 }
  0x96   : > { %v283_v40 = vmax.f32 %v281_v39, 0.0 }
  0x98   : > { %285 = vst [vmem:[%s170_s25] sm:$0xff] %v283_v40 }
  0xb4   : > { %v251_v41 = vpop.trf.xlu1 }
  0xb5   : > { %v274_v42 = vmul.f32 %v271_v35, %v251_v41 }
  0xb7   : > { %v282_v43 = vadd.f32 %v279_v38, %v274_v42 }
  0xb9   : > { %v284_v44 = vmax.f32 %v282_v43, 0.0 }
  0xbb   : > { %286 = vst [vmem:[%s170_s25 + $0x8] sm:$0xff] %v284_v44 }
  0xbc PF: > { %s13_s12 = sadd.s32 1, %s372_s12  }
  0xbd   : > { %p10_p4 = scmp.ge.s32.totalorder %s13_s12, 4  }
  0xbf   :  { %12 = sbr.rel (!%p10_p4) target bundleno = 1 (0x1), region = 62 }

// kernel: double_conv_2d.3
= control target key start
LH: loop header
LB: loop body
LE: loop exit
PB: predicated region body
PF: predicated region fallthrough
CT: control target
= control target key end

     0   :  { %s8059_s15 = smov 0   ;;  %s9725_s0 = inlined_call_operand.vmem [shape: f32[2,256,128], index: 0, kind: input, shape index: {}]   ;;  %s9726_s1 = inlined_call_operand.vmem [shape: f32[9,128,128], index: 1, kind: input, shape index: {}]   ;;  %s9727_s2 = inlined_call_operand.vmem [shape: f32[2,256,128], index: 2, kind: output, shape index: {0}]   ;;  %s9728_s3 = inlined_call_operand.vmem [shape: f32[2,1,128], index: 3, kind: output, shape index: {1}]   ;;  %s9729_s4 = inlined_call_operand.vmem [shape: f32[2,1,128], index: 4, kind: output, shape index: {2}]  }
   0x1 LB: > { %s5207_s16 = sadd.s32 4294967295, %s8031_s15   ;;  %p5211_p0 = scmp.ge.s32.totalorder %s8031_s15, 1  ;;  %s8031_s15 = sphi %s8059_s15, %s15_s15  }
   0x2   : > { %p167_p1 = scmp.lt.s32.totalorder %s8031_s15, 3 }
   0x4   : > { %p168_p2 = pnand %p5211_p0, %p167_p1 }
   0x6   : > { %171 = sbr.rel (%p168_p2) target bundleno = 568 (0x238), region = 28 }
   0xd   : > { %v5216_v0 = vld [vmem:[%s9726_s1 + $0x80] sm:$0xff]  ;;  %v5217_v1 = vld [vmem:[%s9726_s1 + $0x88] sm:$0xff]  ;;  %v5218_v2 = vld [vmem:[%s9726_s1 + $0x90] sm:$0xff]  ;;  %p199_p3 = scmp.lt.s32.totalorder %s5207_s16, 1  ;;  %v9730_v5 = vmov 0.0   ;;  %v247_v56 = vlaneseq }
   0xe   : > { %v7152_v3 = vpack.c.bf16 %v5217_v1, %v5216_v0  ;;  %v5219_v4 = vld [vmem:[%s9726_s1 + $0x98] sm:$0xff]  ;;  %6176 = vmatprep.mubr.f32.mxu0 %v9730_v5  ;;  %v5220_v7 = vld [vmem:[%s9726_s1 + $0xa0] sm:$0xff]  ;;  %v5221_v8 = vld [vmem:[%s9726_s1 + $0xa8] sm:$0xff] }
   0xf   : > { %v7156_v6 = vpack.c.bf16 %v5219_v4, %v5218_v2  ;;  %s10212_s16 = smov (!%p199_p3, %s5207_s16), 1  ;;  %v7160_v9 = vpack.c.bf16 %v5221_v8, %v5220_v7  ;;  %v5222_v10 = vld [vmem:[%s9726_s1 + $0xb0] sm:$0xff]  ;;  %v5223_v11 = vld [vmem:[%s9726_s1 + $0xb8] sm:$0xff]  ;;  %v5224_v14 = vld [vmem:[%s9726_s1 + $0xc0] sm:$0xff]  ;;  %v8239_v0 = vshrl.u32 %v247_v56, 7 }
  0x10   : > { %7153 = vmatprep.subr.bf16.mxu0 %v7152_v3  ;;  %7441 = vmatprep.subr.bf16.mxu1 %v7152_v3  ;;  %s5566_s29 = sshll.u32 %s10212_s16, 8  ;;  %v7164_v13 = vpack.c.bf16 %v5223_v11, %v5222_v10  ;;  %v5225_v15 = vld [vmem:[%s9726_s1 + $0xc8] sm:$0xff]  ;;  %v5226_v17 = vld [vmem:[%s9726_s1 + $0xd0] sm:$0xff]  ;;  %v5227_v18 = vld [vmem:[%s9726_s1 + $0xd8] sm:$0xff]  ;;  %s214_s23 = scalar_lea.vmem %s9729_s4, %s10212_s16 }
  0x11   : > { %7155 = vmatpush3.bf16.msra.mxu0 %v7152_v3  ;;  %7443 = vmatpush3.bf16.msra.mxu1 %v7152_v3  ;;  %s8094_s6 = scalar_lea.vmem %s9725_s0, %s5566_s29  ;;  %v7168_v16 = vpack.c.bf16 %v5225_v15, %v5224_v14  ;;  %v7172_v19 = vpack.c.bf16 %v5227_v18, %v5226_v17  ;;  %v5228_v20 = vld [vmem:[%s9726_s1 + $0xe0] sm:$0xff]  ;;  %v5229_v21 = vld [vmem:[%s9726_s1 + $0xe8] sm:$0xff]  ;;  %v5230_v23 = vld [vmem:[%s9726_s1 + $0xf0] sm:$0xff]  ;;  %v266_v17 = vadd.s32 144, %v8239_v0  ;;  %vm9793_vm0 = vcmp.lt.s32.totalorder %v8239_v0, 1  ;;  %s9680_s19 = scalar_lea.vmem %s9727_s2, %s5566_s29 }
  0x12   : > { %7157 = vmatprep.subr.bf16.mxu0 %v7156_v6  ;;  %7445 = vmatprep.subr.bf16.mxu1 %v7156_v6  ;;  %v8103_v12 = vld [vmem:[%s8094_s6 + $0x70] sm:$0xff]  ;;  %v7176_v22 = vpack.c.bf16 %v5229_v21, %v5228_v20  ;;  %v5231_v24 = vld [vmem:[%s9726_s1 + $0xf8] sm:$0xff]  ;;  %v985_v26 = vld [vmem:[%s9726_s1] sm:$0xff] }
  0x13   : > { %6680 = vmatprep.mubr.f32.mxu1 %v8103_v12  ;;  %v7180_v25 = vpack.c.bf16 %v5231_v24, %v5230_v23  ;;  %v986_v27 = vld [vmem:[%s9726_s1 + $0x8] sm:$0xff]  ;;  %v987_v29 = vld [vmem:[%s9726_s1 + $0x10] sm:$0xff]  ;;  %v988_v30 = vld [vmem:[%s9726_s1 + $0x18] sm:$0xff]  ;;  %v806_v23 = vrot.slane %v8103_v12, 7 }
  0x14   : > { %v7184_v28 = vpack.c.bf16 %v986_v27, %v985_v26  ;;  %v8143_v31 = vld [vmem:[%s8094_s6 + $0x78] sm:$0xff]  ;;  %v8146_v32 = vld [vmem:[%s8094_s6] sm:$0xff]  ;;  %v7188_v34 = vpack.c.bf16 %v988_v30, %v987_v29  ;;  %v990_v36 = vld [vmem:[%s9726_s1 + $0x28] sm:$0xff]  ;;  %v410_v30 = vand.u32 15, %v266_v17 }
  0x15   : > { %7159 = vmatpush3.bf16.msra.mxu0 %v7156_v6  ;;  %7447 = vmatpush3.bf16.msra.mxu1 %v7156_v6  ;;  %v8149_v33 = vld [vmem:[%s8094_s6 + $0x80] sm:$0xff]  ;;  %v8160_v37 = vld [vmem:[%s8094_s6 + $0x8] sm:$0xff]  ;;  %v8168_v39 = vld [vmem:[%s8094_s6 + $0x10] sm:$0xff]  ;;  %v807_v26 = vrot.slane %v8143_v31, 7 }
  0x16   : > { %7161 = vmatprep.subr.bf16.mxu0 %v7160_v9  ;;  %7449 = vmatprep.subr.bf16.mxu1 %v7160_v9  ;;  %v989_v35 = vld [vmem:[%s9726_s1 + $0x20] sm:$0xff]  ;;  %v8163_v38 = vld [vmem:[%s8094_s6 + $0x88] sm:$0xff]  ;;  %v8171_v40 = vld [vmem:[%s8094_s6 + $0x90] sm:$0xff]  ;;  %vm8344_vm3 = vcmp.ge.s32.totalorder %v410_v30, 1 }
  0x17   : > { %v7192_v41 = vpack.c.bf16 %v990_v36, %v989_v35  ;;  %v991_v42 = vld [vmem:[%s9726_s1 + $0x30] sm:$0xff]  ;;  %v992_v43 = vld [vmem:[%s9726_s1 + $0x38] sm:$0xff]  ;;  %v8190_v46 = vld [vmem:[%s8094_s6 + $0x20] sm:$0xff]  ;;  %v792_v35 = vrot.slane %v8146_v32, 7  ;;  %v808_v36 = vrot.slane %v8149_v33, 7 }
  0x18   : > { %v8182_v44 = vld [vmem:[%s8094_s6 + $0x18] sm:$0xff]  ;;  %v8193_v47 = vld [vmem:[%s8094_s6 + $0xa0] sm:$0xff]  ;;  %v7196_v48 = vpack.c.bf16 %v992_v43, %v991_v42  ;;  %v994_v50 = vld [vmem:[%s9726_s1 + $0x48] sm:$0xff]  ;;  %v268_v42 = vadd.s32 160, %v8239_v0 }
  0x19   : > { %7163 = vmatpush3.bf16.msra.mxu0 %v7160_v9  ;;  %7451 = vmatpush3.bf16.msra.mxu1 %v7160_v9  ;;  %v8185_v45 = vld [vmem:[%s8094_s6 + $0x98] sm:$0xff]  ;;  %v993_v49 = vld [vmem:[%s9726_s1 + $0x40] sm:$0xff]  ;;  %v8204_v51 = vld [vmem:[%s8094_s6 + $0x28] sm:$0xff]  ;;  %v264_v9 = vadd.s32 128, %v8239_v0 }
  0x1a   : > { %7165 = vmatprep.subr.bf16.mxu0 %v7164_v13  ;;  %7453 = vmatprep.subr.bf16.mxu1 %v7164_v13  ;;  %v8207_v52 = vld [vmem:[%s8094_s6 + $0xa8] sm:$0xff]  ;;  %v8212_v53 = vld [vmem:[%s8094_s6 + $0x30] sm:$0xff]  ;;  %v7200_v55 = vpack.c.bf16 %v994_v50, %v993_v49  ;;  %v996_v58 = vld [vmem:[%s9726_s1 + $0x58] sm:$0xff] }
  0x1b   : > { %v8215_v54 = vld [vmem:[%s8094_s6 + $0xb0] sm:$0xff]  ;;  %v8226_v59 = vld [vmem:[%s8094_s6 + $0x38] sm:$0xff]  ;;  %v8234_v61 = vld [vmem:[%s8094_s6 + $0x40] sm:$0xff]  ;;  %v396_v21 = vand.u32 15, %v264_v9  ;;  %v8355_v9 = vsel %vm9793_vm0, %v807_v26, %v808_v36 }
  0x1c   : > { %v995_v57 = vld [vmem:[%s9726_s1 + $0x50] sm:$0xff]  ;;  %v8229_v60 = vld [vmem:[%s8094_s6 + $0xb8] sm:$0xff]  ;;  %v8237_v62 = vld [vmem:[%s8094_s6 + $0xc0] sm:$0xff]  ;;  %9907 = vst [vmem:[#allocation6_spill] sm:$0xff] %v8355_v9 }
  0x1d   : > { %7167 = vmatpush3.bf16.msra.mxu0 %v7164_v13  ;;  %7455 = vmatpush3.bf16.msra.mxu1 %v7164_v13  ;;  %v7204_v63 = vpack.c.bf16 %v996_v58, %v995_v57  ;;  %v997_v1 = vld [vmem:[%s9726_s1 + $0x60] sm:$0xff]  ;;  %v998_v2 = vld [vmem:[%s9726_s1 + $0x68] sm:$0xff]  ;;  %v8258_v6 = vld [vmem:[%s8094_s6 + $0x50] sm:$0xff]  ;;  %vm8316_vm1 = vcmp.ge.s32.totalorder %v396_v21, 1  ;;  %v809_v58 = vrot.slane %v8163_v38, 7  ;;  %v810_v21 = vrot.slane %v8171_v40, 7 }
  0x1e   : > { %7169 = vmatprep.subr.bf16.mxu0 %v7168_v16  ;;  %7457 = vmatprep.subr.bf16.mxu1 %v7168_v16  ;;  %v8250_v3 = vld [vmem:[%s8094_s6 + $0x48] sm:$0xff]  ;;  %v8261_v7 = vld [vmem:[%s8094_s6 + $0xd0] sm:$0xff]  ;;  %v7208_v8 = vpack.c.bf16 %v998_v2, %v997_v1  ;;  %v1000_v13 = vld [vmem:[%s9726_s1 + $0x78] sm:$0xff]  ;;  %v9904_v1 = vmov 0 }
  0x1f   : > { %v8253_v4 = vld [vmem:[%s8094_s6 + $0xc8] sm:$0xff]  ;;  %v999_v11 = vld [vmem:[%s9726_s1 + $0x70] sm:$0xff]  ;;  %v8276_v14 = vld [vmem:[%s8094_s6 + $0x58] sm:$0xff]  ;;  %v9905_v1 = vsel %vm8344_vm3, 4294967295, %v9904_v1 }
  0x20   : > { %v8267_v10 = vld [vmem:[%s8094_s6 + $0x68] sm:$0xff]  ;;  %v8279_v15 = vld [vmem:[%s8094_s6 + $0xd8] sm:$0xff]  ;;  %v8286_v18 = vld [vmem:[%s8094_s6 + $0x60] sm:$0xff]  ;;  %v7212_v20 = vpack.c.bf16 %v1000_v13, %v999_v11  ;;  %9906 = vst [vmem:[#allocation5_spill] sm:$0xff] %v9905_v1  ;;  %v424_v13 = vand.u32 15, %v268_v42  ;;  %v9909_v42 = vmov 0 }
  0x21   : > { %7171 = vmatpush3.bf16.msra.mxu0 %v7168_v16  ;;  %7459 = vmatpush3.bf16.msra.mxu1 %v7168_v16  ;;  %v250_v16 = vadd.s32 16, %v8239_v0  ;;  %v5239_v24 = vld [vmem:[%s9726_s1 + $0x100] sm:$0xff]  ;;  %v8304_v27 = vld [vmem:[%s8094_s6 + $0xf8] sm:$0xff]  ;;  %v5241_v56 = vld [vmem:[%s9726_s1 + $0x110] sm:$0xff] }
  0x22   : > { %7173 = vmatprep.subr.bf16.mxu0 %v7172_v19  ;;  %7461 = vmatprep.subr.bf16.mxu1 %v7172_v19  ;;  %v823_v50 = vrot.slane %v8304_v27, 7  ;;  %v5242_v57 = vld [vmem:[%s9726_s1 + $0x118] sm:$0xff]  ;;  %v5244_v30 = vld [vmem:[%s9726_s1 + $0x128] sm:$0xff]  ;;  %vm8402_vm5 = vcmp.ge.s32.totalorder %v424_v13, 1 }
  0x23   : > { %v298_v29 = vand.u32 15, %v250_v16  ;;  %v254_v16 = vadd.s32 48, %v8239_v0 }
  0x24   : > { %v8364_v17 = vsel %vm9793_vm0, %v823_v50, %v792_v35 }
  0x25   : > { %7175 = vmatpush3.bf16.msra.mxu0 %v7172_v19  ;;  %7463 = vmatpush3.bf16.msra.mxu1 %v7172_v19  ;;  %v8289_v19 = vld [vmem:[%s8094_s6 + $0xe0] sm:$0xff]  ;;  %vm8340_vm2 = vcmp.ge.s32.totalorder %v298_v29, 1 }
  0x26   : > { %7177 = vmatprep.subr.bf16.mxu0 %v7176_v22  ;;  %7465 = vmatprep.subr.bf16.mxu1 %v7176_v22  ;;  %v5243_v29 = vld [vmem:[%s9726_s1 + $0x120] sm:$0xff] }
  0x29   : > { %7179 = vmatpush3.bf16.msra.mxu0 %v7176_v22  ;;  %7467 = vmatpush3.bf16.msra.mxu1 %v7176_v22  ;;  %v9732_v22 = vrot.slane %v8267_v10, 7 }
  0x2a   : > { %7181 = vmatprep.subr.bf16.mxu0 %v7180_v25  ;;  %7469 = vmatprep.subr.bf16.mxu1 %v7180_v25 }
  0x2d   : > { %7183 = vmatpush3.bf16.msra.mxu0 %v7180_v25  ;;  %7471 = vmatpush3.bf16.msra.mxu1 %v7180_v25  ;;  %v5240_v25 = vld [vmem:[%s9726_s1 + $0x108] sm:$0xff] }
  0x2e   : > { %7185 = vmatprep.subr.bf16.mxu0 %v7184_v28  ;;  %7473 = vmatprep.subr.bf16.mxu1 %v7184_v28  ;;  %v7216_v49 = vpack.c.bf16 %v5240_v25, %v5239_v24  ;;  %v8369_v24 = vld [vmem:[%s8094_s6 + $0xf0] sm:$0xff]  ;;  %v8375_v25 = vsel %vm9793_vm0, %v808_v36, %v809_v58 }
  0x2f   : > { %9908 = vst [vmem:[#allocation7_spill] sm:$0xff] %v8375_v25 }
  0x30   : > { %6177 = vmatmul.mubr.f32.vlgmr.msra.gmra.mrb[0].mxu0 %v9730_v5  ;;  %6681 = vmatmul.mubr.f32.vlgmr.msra.gmra.mrb[0].mxu1 %v8143_v31 }
  0x31   : > { %7187 = vmatpush3.bf16.msra.mxu0 %v7184_v28  ;;  %7475 = vmatpush3.bf16.msra.mxu1 %v7184_v28  ;;  %v8307_v28 = vld [vmem:[%s8094_s6 + $0xe8] sm:$0xff] }
  0x32   : > { %6179 = vmatprep.mubr.f32.mxu0 %v8146_v32  ;;  %6683 = vmatprep.mubr.f32.mxu1 %v8149_v33 }
  0x33   : > { %7189 = vmatprep.subr.bf16.mxu0 %v7188_v34  ;;  %7477 = vmatprep.subr.bf16.mxu1 %v7188_v34 }
  0x34   : > { %6180 = vmatmul.mubr.f32.gmra.mrb[2].mxu0 %v8160_v37  ;;  %6684 = vmatmul.mubr.f32.gmra.mrb[2].mxu1 %v8163_v38 }
  0x35   : > { %7191 = vmatpush3.bf16.msra.mxu0 %v7188_v34  ;;  %7479 = vmatpush3.bf16.msra.mxu1 %v7188_v34  ;;  %v252_v34 = vadd.s32 32, %v8239_v0 }
  0x36   : > { %6182 = vmatprep.mubr.f32.mxu0 %v8168_v39  ;;  %6686 = vmatprep.mubr.f32.mxu1 %v8171_v40 }
  0x37   : > { %7193 = vmatprep.subr.bf16.mxu0 %v7192_v41  ;;  %7481 = vmatprep.subr.bf16.mxu1 %v7192_v41  ;;  %v312_v2 = vand.u32 15, %v252_v34  ;;  %v811_v34 = vrot.slane %v8185_v45, 7 }
  0x38   : > { %6183 = vmatmul.mubr.f32.gmra.mrb[4].mxu0 %v8182_v44  ;;  %6687 = vmatmul.mubr.f32.gmra.mrb[4].mxu1 %v8185_v45 }
  0x39   : > { %7195 = vmatpush3.bf16.msra.mxu0 %v7192_v41  ;;  %7483 = vmatpush3.bf16.msra.mxu1 %v7192_v41  ;;  %v793_v41 = vrot.slane %v8160_v37, 7  ;;  %vm8386_vm4 = vcmp.ge.s32.totalorder %v312_v2, 1  ;;  %v326_v2 = vand.u32 15, %v254_v16 }
  0x3a   : > { %6185 = vmatprep.mubr.f32.mxu0 %v8190_v46  ;;  %6689 = vmatprep.mubr.f32.mxu1 %v8193_v47  ;;  %v9910_v42 = vsel %vm8386_vm4, 4294967295, %v9909_v42 }
  0x3b   : > { %7197 = vmatprep.subr.bf16.mxu0 %v7196_v48  ;;  %7485 = vmatprep.subr.bf16.mxu1 %v7196_v48  ;;  %v8359_v11 = vsel %vm9793_vm0, %v792_v35, %v793_v41  ;;  %v9737_v35 = vrot.slane %v8369_v24, 7  ;;  %9911 = vst [vmem:[#allocation8_spill] sm:$0xff] %v9910_v42  ;;  %vm8447_vm6 = vcmp.ge.s32.totalorder %v326_v2, 1  ;;  %v9925_v42 = vmov 0 }
  0x3c   : > { %6186 = vmatmul.mubr.f32.gmra.mrb[6].mxu0 %v8204_v51  ;;  %6690 = vmatmul.mubr.f32.gmra.mrb[6].mxu1 %v8207_v52  ;;  %v274_v2 = vadd.s32 208, %v8239_v0 }
  0x3d   : > { %7199 = vmatpush3.bf16.msra.mxu0 %v7196_v48  ;;  %7487 = vmatpush3.bf16.msra.mxu1 %v7196_v48  ;;  %v8324_v48 = vsel %vm9793_vm0, %v9732_v22, %v806_v23  ;;  %v8415_v22 = vsel %vm9793_vm0, %v809_v58, %v810_v21  ;;  %v5245_v58 = vld [vmem:[%s9726_s1 + $0x130] sm:$0xff] }
  0x3e   : > { %6188 = vmatprep.mubr.f32.mxu0 %v8212_v53  ;;  %6692 = vmatprep.mubr.f32.mxu1 %v8215_v54  ;;  %9899 = vst [vmem:[#allocation2_spill] sm:$0xff] %v8324_v48  ;;  %9917 = vst [vmem:[#allocation12_spill] sm:$0xff] %v8415_v22 }
  0x3f   : > { %7201 = vmatprep.subr.bf16.mxu0 %v7200_v55  ;;  %7489 = vmatprep.subr.bf16.mxu1 %v7200_v55 }
  0x40   : > { %6189 = vmatmul.mubr.f32.gmra.mrb[8].mxu0 %v8226_v59  ;;  %6693 = vmatmul.mubr.f32.gmra.mrb[8].mxu1 %v8229_v60 }
  0x41   : > { %7203 = vmatpush3.bf16.msra.mxu0 %v7200_v55  ;;  %7491 = vmatpush3.bf16.msra.mxu1 %v7200_v55  ;;  %v8331_v55 = vsel %vm9793_vm0, %v806_v23, %v807_v26  ;;  %v270_v23 = vadd.s32 176, %v8239_v0  ;;  %v795_v26 = vrot.slane %v8182_v44, 7 }
  0x42   : > { %6191 = vmatprep.mubr.f32.mxu0 %v8234_v61  ;;  %6695 = vmatprep.mubr.f32.mxu1 %v8237_v62  ;;  %9900 = vst [vmem:[#allocation3_spill] sm:$0xff] %v8331_v55 }
  0x43   : > { %7205 = vmatprep.subr.bf16.mxu0 %v7204_v63  ;;  %7493 = vmatprep.subr.bf16.mxu1 %v7204_v63  ;;  %v438_v13 = vand.u32 15, %v270_v23  ;;  %v5246_v23 = vld [vmem:[%s9726_s1 + $0x138] sm:$0xff] }
  0x44   : > { %6192 = vmatmul.mubr.f32.gmra.mrb[10].mxu0 %v8250_v3  ;;  %6696 = vmatmul.mubr.f32.gmra.mrb[10].mxu1 %v8253_v4 }
  0x45   : > { %7207 = vmatpush3.bf16.msra.mxu0 %v7204_v63  ;;  %7495 = vmatpush3.bf16.msra.mxu1 %v7204_v63  ;;  %v9901_v63 = vmov 0  ;;  %vm8457_vm7 = vcmp.ge.s32.totalorder %v438_v13, 1  ;;  %v5247_v13 = vld [vmem:[%s9726_s1 + $0x140] sm:$0xff] }
  0x46   : > { %6194 = vmatprep.mubr.f32.mxu0 %v8258_v6  ;;  %6698 = vmatprep.mubr.f32.mxu1 %v8261_v7  ;;  %v9902_v63 = vsel %vm8340_vm2, 4294967295, %v9901_v63  ;;  %v9926_v42 = vsel %vm8457_vm7, 4294967295, %v9925_v42 }
  0x47   : > { %7209 = vmatprep.subr.bf16.mxu0 %v7208_v8  ;;  %7497 = vmatprep.subr.bf16.mxu1 %v7208_v8  ;;  %9903 = vst [vmem:[#allocation4_spill] sm:$0xff] %v9902_v63  ;;  %9927 = vst [vmem:[#allocation18_spill] sm:$0xff] %v9926_v42  ;;  %v9934_v42 = vmov 0 }
  0x48   : > { %6195 = vmatmul.mubr.f32.gmra.mrb[12].mxu0 %v8276_v14  ;;  %6699 = vmatmul.mubr.f32.gmra.mrb[12].mxu1 %v8279_v15 }
  0x49   : > { %7211 = vmatpush3.bf16.msra.mxu0 %v7208_v8  ;;  %7499 = vmatpush3.bf16.msra.mxu1 %v7208_v8  ;;  %v794_v8 = vrot.slane %v8168_v39, 7 }
  0x4a   : > { %6197 = vmatprep.mubr.f32.mxu0 %v8286_v18  ;;  %6701 = vmatprep.mubr.f32.mxu1 %v8289_v19 }
  0x4b   : > { %7213 = vmatprep.subr.bf16.mxu0 %v7212_v20  ;;  %7501 = vmatprep.subr.bf16.mxu1 %v7212_v20  ;;  %v8392_v36 = vsel %vm9793_vm0, %v793_v41, %v794_v8  ;;  %v812_v41 = vrot.slane %v8193_v47, 7  ;;  %v8422_v16 = vsel %vm9793_vm0, %v794_v8, %v795_v26 }
  0x4c   : > { %6198 = vmatmul.mubr.f32.gmra.mrb[14].mxu0 %v8267_v10  ;;  %6702 = vmatmul.mubr.f32.gmra.mrb[14].mxu1 %v8307_v28  ;;  %9912 = vst [vmem:[#allocation9_spill] sm:$0xff] %v8392_v36  ;;  %9918 = vst [vmem:[#allocation13_spill] sm:$0xff] %v8422_v16 }
  0x4d   : > { %7215 = vmatpush3.bf16.msra.mxu0 %v7212_v20  ;;  %7503 = vmatpush3.bf16.msra.mxu1 %v7212_v20  ;;  %v7220_v20 = vpack.c.bf16 %v5242_v57, %v5241_v56  ;;  %v796_v56 = vrot.slane %v8190_v46, 7  ;;  %v256_v57 = vadd.s32 64, %v8239_v0 }
  0x4e   : > { %6232 = vmatprep.mubr.f32.mxu0 %v9730_v5  ;;  %6736 = vmatprep.mubr.msk.f32.mxu1 %vm8316_vm1, %v8324_v48  ;;  %v272_v48 = vadd.s32 192, %v8239_v0 }
  0x4f   : > { %7217 = vmatprep.subr.bf16.mxu0 %v7216_v49  ;;  %7505 = vmatprep.subr.bf16.mxu1 %v7216_v49  ;;  %v8437_v8 = vsel %vm9793_vm0, %v795_v26, %v796_v56  ;;  %v814_v26 = vrot.slane %v8215_v54, 7 }
  0x50   : > { %6233 = vmatmul.mubr.f32.vlgmr.msra.gmra.mrb[0].mxu0 %v9730_v5  ;;  %6737 = vmatmul.mubr.f32.vlgmr.msra.gmra.mrb[0].mxu1 %v8331_v55  ;;  %v8411_v5 = vsel %vm9793_vm0, %v9737_v35, %v823_v50  ;;  %v7224_v55 = vpack.c.bf16 %v5244_v30, %v5243_v29  ;;  %v8426_v50 = vsel %vm9793_vm0, %v810_v21, %v811_v34  ;;  %v797_v35 = vrot.slane %v8204_v51, 7 }
  0x51   : > { %7219 = vmatpush3.bf16.msra.mxu0 %v7216_v49  ;;  %7507 = vmatpush3.bf16.msra.mxu1 %v7216_v49  ;;  %v9913_v49 = vmov 0  ;;  %9916 = vst [vmem:[#allocation11_spill] sm:$0xff] %v8411_v5  ;;  %9919 = vst [vmem:[#allocation14_spill] sm:$0xff] %v8426_v50  ;;  %v813_v29 = vrot.slane %v8207_v52, 7  ;;  %v340_v21 = vand.u32 15, %v256_v57  ;;  %v798_v30 = vrot.slane %v8212_v53, 7 }
  0x52   : > { %6235 = vmatprep.mubr.msk.f32.mxu0 %vm8340_vm2, %v8364_v17  ;;  %6739 = vmatprep.mubr.msk.f32.mxu1 %vm8344_vm3, %v8355_v9  ;;  %v9914_v49 = vsel %vm8402_vm5, 4294967295, %v9913_v49  ;;  %9920 = vst [vmem:[#allocation15_spill] sm:$0xff] %v8437_v8  ;;  %v9921_v5 = vmov 0  ;;  %v258_v57 = vadd.s32 80, %v8239_v0  ;;  %v452_v1 = vand.u32 15, %v272_v48  ;;  %v5248_v48 = vld [vmem:[%s9726_s1 + $0x148] sm:$0xff] }
  0x53   : > { %9915 = vst [vmem:[#allocation10_spill] sm:$0xff] %v9914_v49  ;;  %7221 = vmatprep.subr.bf16.mxu0 %v7220_v20  ;;  %7509 = vmatprep.subr.bf16.mxu1 %v7220_v20  ;;  %v9922_v5 = vsel %vm8447_vm6, 4294967295, %v9921_v5  ;;  %v7228_v49 = vpack.c.bf16 %v5246_v23, %v5245_v58  ;;  %v815_v58 = vrot.slane %v8229_v60, 7  ;;  %v8478_v23 = vsel %vm9793_vm0, %v812_v41, %v813_v29 }
  0x54   : > { %6236 = vmatmul.mubr.f32.gmra.mrb[2].mxu0 %v8359_v11  ;;  %6740 = vmatmul.mubr.f32.gmra.mrb[2].mxu1 %v8375_v25  ;;  %9923 = vst [vmem:[#allocation16_spill] sm:$0xff] %v9922_v5  ;;  %9929 = vst [vmem:[#allocation20_spill] sm:$0xff] %v8478_v23  ;;  %vm8480_vm8 = vcmp.ge.s32.totalorder %v340_v21, 1  ;;  %v816_v21 = vrot.slane %v8237_v62, 7  ;;  %v5250_v5 = vld [vmem:[%s9726_s1 + $0x158] sm:$0xff]  ;;  %vm8507_vm9 = vcmp.ge.s32.totalorder %v452_v1, 1 }
  0x55   : > { %7223 = vmatpush3.bf16.msra.mxu0 %v7220_v20  ;;  %7511 = vmatpush3.bf16.msra.mxu1 %v7220_v20  ;;  %v8453_v20 = vsel %vm9793_vm0, %v811_v34, %v812_v41  ;;  %v8466_v34 = vsel %vm9793_vm0, %v796_v56, %v797_v35  ;;  %v9930_v56 = vmov 0  ;;  %v354_v41 = vand.u32 15, %v258_v57 }
  0x56   : > { %6238 = vmatprep.mubr.msk.f32.mxu0 %vm8386_vm4, %v8392_v36  ;;  %6742 = vmatprep.mubr.msk.f32.mxu1 %vm8402_vm5, %v8415_v22  ;;  %9924 = vst [vmem:[#allocation17_spill] sm:$0xff] %v8453_v20  ;;  %9928 = vst [vmem:[#allocation19_spill] sm:$0xff] %v8466_v34  ;;  %v799_v22 = vrot.slane %v8226_v59, 7  ;;  %v9931_v56 = vsel %vm8480_vm8, 4294967295, %v9930_v56  ;;  %v9935_v42 = vsel %vm8507_vm9, 4294967295, %v9934_v42  ;;  %v466_v57 = vand.u32 15, %v274_v2 }
  0x57   : > { %7225 = vmatprep.subr.bf16.mxu0 %v7224_v55  ;;  %7513 = vmatprep.subr.bf16.mxu1 %v7224_v55  ;;  %9932 = vst [vmem:[#allocation21_spill] sm:$0xff] %v9931_v56  ;;  %9936 = vst [vmem:[#allocation23_spill] sm:$0xff] %v9935_v42  ;;  %v8520_v36 = vsel %vm9793_vm0, %v814_v26, %v815_v58  ;;  %v801_v1 = vrot.slane %v8250_v3, 7  ;;  %vm8535_vm10 = vcmp.ge.s32.totalorder %v354_v41, 1  ;;  %v818_v42 = vrot.slane %v8261_v7, 7  ;;  %v5251_v41 = vld [vmem:[%s9726_s1 + $0x160] sm:$0xff] }
  0x58   : > { %6239 = vmatmul.mubr.f32.gmra.mrb[4].mxu0 %v8422_v16  ;;  %6743 = vmatmul.mubr.f32.gmra.mrb[4].mxu1 %v8426_v50  ;;  %v8486_v50 = vsel %vm9793_vm0, %v797_v35, %v798_v30  ;;  %v800_v16 = vrot.slane %v8234_v61, 7  ;;  %v5249_v35 = vld [vmem:[%s9726_s1 + $0x150] sm:$0xff]  ;;  %v8516_v63 = vsel %vm9793_vm0, %v798_v30, %v799_v22  ;;  %9938 = vst [vmem:[#allocation25_spill] sm:$0xff] %v8520_v36  ;;  %v9939_v30 = vmov 0 }
  0x59   : > { %7227 = vmatpush3.bf16.msra.mxu0 %v7224_v55  ;;  %7515 = vmatpush3.bf16.msra.mxu1 %v7224_v55  ;;  %v8497_v55 = vsel %vm9793_vm0, %v813_v29, %v814_v26  ;;  %v7232_v29 = vpack.c.bf16 %v5248_v48, %v5247_v13  ;;  %9937 = vst [vmem:[#allocation24_spill] sm:$0xff] %v8516_v63  ;;  %v817_v48 = vrot.slane %v8253_v4, 7  ;;  %v9940_v30 = vsel %vm8535_vm10, 4294967295, %v9939_v30 }
  0x5a   : > { %6241 = vmatprep.mubr.msk.f32.mxu0 %vm8447_vm6, %v8437_v8  ;;  %6745 = vmatprep.mubr.msk.f32.mxu1 %vm8457_vm7, %v8453_v20  ;;  %9933 = vst [vmem:[#allocation22_spill] sm:$0xff] %v8497_v55  ;;  %v260_v8 = vadd.s32 96, %v8239_v0  ;;  %v276_v20 = vadd.s32 224, %v8239_v0  ;;  %v8525_v2 = vsel %vm9793_vm0, %v799_v22, %v800_v16  ;;  %v7236_v13 = vpack.c.bf16 %v5250_v5, %v5249_v35 }
  0x5b   : > { %7229 = vmatprep.subr.bf16.mxu0 %v7228_v49  ;;  %7517 = vmatprep.subr.bf16.mxu1 %v7228_v49  ;;  %9941 = vst [vmem:[#allocation26_spill] sm:$0xff] %v9940_v30  ;;  %v8541_v22 = vsel %vm9793_vm0, %v815_v58, %v816_v21  ;;  %vm8544_vm11 = vcmp.ge.s32.totalorder %v466_v57, 1  ;;  %v9943_v26 = vmov 0  ;;  %v5252_v58 = vld [vmem:[%s9726_s1 + $0x168] sm:$0xff]  ;;  %v8560_v57 = vsel %vm9793_vm0, %v800_v16, %v801_v1 }
  0x5c   : > { %6242 = vmatmul.mubr.f32.gmra.mrb[6].mxu0 %v8466_v34  ;;  %6746 = vmatmul.mubr.f32.gmra.mrb[6].mxu1 %v8478_v23  ;;  %v802_v23 = vrot.slane %v8258_v6, 7  ;;  %9942 = vst [vmem:[#allocation27_spill] sm:$0xff] %v8541_v22  ;;  %v368_v5 = vand.u32 15, %v260_v8  ;;  %v9944_v26 = vsel %vm8544_vm11, 4294967295, %v9943_v26  ;;  %v480_v35 = vand.u32 15, %v276_v20  ;;  %9946 = vst [vmem:[#allocation29_spill] sm:$0xff] %v8560_v57 }
  0x5d   : > { %7231 = vmatpush3.bf16.msra.mxu0 %v7228_v49  ;;  %7519 = vmatpush3.bf16.msra.mxu1 %v7228_v49  ;;  %v262_v49 = vadd.s32 112, %v8239_v0  ;;  %9945 = vst [vmem:[#allocation28_spill] sm:$0xff] %v9944_v26  ;;  %v278_v8 = vadd.s32 240, %v8239_v0  ;;  %v8564_v20 = vsel %vm9793_vm0, %v816_v21, %v817_v48  ;;  %v9948_v16 = vmov 0 }
  0x5e   : > { %6244 = vmatprep.mubr.msk.f32.mxu0 %vm8480_vm8, %v8486_v50  ;;  %6748 = vmatprep.mubr.msk.f32.mxu1 %vm8507_vm9, %v8497_v55  ;;  %9947 = vst [vmem:[#allocation30_spill] sm:$0xff] %v8564_v20  ;;  %v8568_v56 = vsel %vm9793_vm0, %v801_v1, %v802_v23  ;;  %v803_v55 = vrot.slane %v8276_v14, 7  ;;  %vm8578_vm12 = vcmp.ge.s32.totalorder %v368_v5, 1  ;;  %v7240_v21 = vpack.c.bf16 %v5252_v58, %v5251_v41  ;;  %v5253_v41 = vld [vmem:[%s9726_s1 + $0x170] sm:$0xff] }
  0x5f   : > { %7233 = vmatprep.subr.bf16.mxu0 %v7232_v29  ;;  %7521 = vmatprep.subr.bf16.mxu1 %v7232_v29  ;;  %v9949_v16 = vsel %vm8578_vm12, 4294967295, %v9948_v16  ;;  %v804_v1 = vrot.slane %v8286_v18, 7  ;;  %vm8583_vm13 = vcmp.ge.s32.totalorder %v480_v35, 1  ;;  %v8589_v30 = vsel %vm9793_vm0, %v817_v48, %v818_v42 }
  0x60   : > { %6245 = vmatmul.mubr.f32.gmra.mrb[8].mxu0 %v8516_v63  ;;  %6749 = vmatmul.mubr.f32.gmra.mrb[8].mxu1 %v8520_v36  ;;  %v819_v63 = vrot.slane %v8279_v15, 7  ;;  %9950 = vst [vmem:[#allocation31_spill] sm:$0xff] %v9949_v16  ;;  %v9951_v36 = vmov 0  ;;  %v494_v26 = vand.u32 15, %v278_v8  ;;  %v820_v5 = vrot.slane %v8289_v19, 7 }
  0x61   : > { %7235 = vmatpush3.bf16.msra.mxu0 %v7232_v29  ;;  %7523 = vmatpush3.bf16.msra.mxu1 %v7232_v29  ;;  %v382_v29 = vand.u32 15, %v262_v49  ;;  %v9952_v36 = vsel %vm8583_vm13, 4294967295, %v9951_v36  ;;  %v5254_v49 = vld [vmem:[%s9726_s1 + $0x178] sm:$0xff]  ;;  %v8604_v58 = vsel %vm9793_vm0, %v802_v23, %v803_v55  ;;  %v8623_v23 = vsel %vm9793_vm0, %v803_v55, %v804_v1 }
  0x62   : > { %6247 = vmatprep.mubr.msk.f32.mxu0 %vm8535_vm10, %v8525_v2  ;;  %6751 = vmatprep.mubr.msk.f32.mxu1 %vm8544_vm11, %v8541_v22  ;;  %9953 = vst [vmem:[#allocation32_spill] sm:$0xff] %v9952_v36  ;;  %9954 = vst [vmem:[#allocation33_spill] sm:$0xff] %v8604_v58  ;;  %v8608_v8 = vsel %vm9793_vm0, %v818_v42, %v819_v63  ;;  %v265_v22 = vadd.s32 136, %v8239_v0  ;;  %v9959_v42 = vrot.slane %v8267_v10, 7  ;;  %vm8631_vm15 = vcmp.ge.s32.totalorder %v494_v26, 1 }
  0x63   : > { %7237 = vmatprep.subr.bf16.mxu0 %v7236_v13  ;;  %7525 = vmatprep.subr.bf16.mxu1 %v7236_v13  ;;  %9955 = vst [vmem:[#allocation34_spill] sm:$0xff] %v8608_v8  ;;  %vm8617_vm14 = vcmp.ge.s32.totalorder %v382_v29, 1  ;;  %v7244_v35 = vpack.c.bf16 %v5254_v49, %v5253_v41  ;;  %v9960_v36 = vmov 0  ;;  %v8637_v29 = vsel %vm9793_vm0, %v819_v63, %v820_v5  ;;  %v5263_v41 = vld [vmem:[%s9726_s1 + $0x188] sm:$0xff]  ;;  %v10142_v43 = vld [vmem:[#allocation29_spill] sm:$0xff] }
  0x64   : > { %6248 = vmatmul.mubr.f32.gmra.mrb[10].mxu0 %v8560_v57  ;;  %6752 = vmatmul.mubr.f32.gmra.mrb[10].mxu1 %v8564_v20  ;;  %v8629_v48 = vsel %vm9793_vm0, %v804_v1, %v9959_v42  ;;  %v9961_v36 = vsel %vm8631_vm15, 4294967295, %v9960_v36  ;;  %v1419_v16 = vrot.slane %v8143_v31, 1  ;;  %v5262_v1 = vld [vmem:[%s9726_s1 + $0x180] sm:$0xff]  ;;  %v9963_v26 = vrot.slane %v8307_v28, 7 }
  0x65   : > { %7239 = vmatpush3.bf16.msra.mxu0 %v7236_v13  ;;  %7527 = vmatpush3.bf16.msra.mxu1 %v7236_v13  ;;  %v9956_v13 = vmov 0  ;;  %9962 = vst [vmem:[#allocation36_spill] sm:$0xff] %v9961_v36  ;;  %v9791_v31 = vrot.slane %v8369_v24, 1  ;;  %v1435_v49 = vrot.slane %v8304_v27, 1  ;;  %v403_v42 = vand.u32 15, %v265_v22 }
  0x66   : > { %6250 = vmatprep.mubr.msk.f32.mxu0 %vm8578_vm12, %v8568_v56  ;;  %6754 = vmatprep.mubr.msk.f32.mxu1 %vm8583_vm13, %v8589_v30  ;;  %v9957_v13 = vsel %vm8617_vm14, 4294967295, %v9956_v13  ;;  %v8653_v63 = vsel %vm9793_vm0, %v820_v5, %v9963_v26  ;;  %vm9802_vm13 = vcmp.lt.s32.totalorder %v8239_v0, 7  ;;  %v1404_v55 = vrot.slane %v8146_v32, 1 }
  0x67   : > { %9958 = vst [vmem:[#allocation35_spill] sm:$0xff] %v9957_v13  ;;  %7241 = vmatprep.subr.bf16.mxu0 %v7240_v21  ;;  %7529 = vmatprep.subr.bf16.mxu1 %v7240_v21  ;;  %9964 = vst [vmem:[#allocation37_spill] sm:$0xff] %v8653_v63  ;;  %v7248_v5 = vpack.c.bf16 %v5263_v41, %v5262_v1  ;;  %v1405_v27 = vrot.slane %v8160_v37, 1  ;;  %v8672_v32 = vsel %vm9802_vm13, %v9791_v31, %v1435_v49  ;;  %v5264_v37 = vld [vmem:[%s9726_s1 + $0x190] sm:$0xff]  ;;  %v5265_v41 = vld [vmem:[%s9726_s1 + $0x198] sm:$0xff]  ;;  %v9971_v36 = vmov 0 }
  0x68   : > { %6251 = vmatmul.mubr.f32.gmra.mrb[12].mxu0 %v8604_v58  ;;  %6755 = vmatmul.mubr.f32.gmra.mrb[12].mxu1 %v8608_v8  ;;  %v251_v58 = vadd.s32 24, %v8239_v0  ;;  %v267_v8 = vadd.s32 152, %v8239_v0  ;;  %9965 = vst [vmem:[#allocation38_spill] sm:$0xff] %v8672_v32  ;;  %v9966_v22 = vrot.slane %v8103_v12, 1  ;;  %v1421_v26 = vrot.slane %v8163_v38, 1 }
  0x69   : > { %7243 = vmatpush3.bf16.msra.mxu0 %v7240_v21  ;;  %7531 = vmatpush3.bf16.msra.mxu1 %v7240_v21  ;;  %v1406_v1 = vrot.slane %v8168_v39, 1  ;;  %v8690_v31 = vsel %vm9802_vm13, %v1435_v49, %v1404_v55  ;;  %v9969_v38 = vrot.slane %v8149_v33, 1  ;;  %v253_v32 = vadd.s32 40, %v8239_v0 }
  0x6a   : > { %6253 = vmatprep.mubr.msk.f32.mxu0 %vm8617_vm14, %v8623_v23  ;;  %6757 = vmatprep.mubr.msk.f32.mxu1 %vm8631_vm15, %v8637_v29  ;;  %v8678_v21 = vsel %vm9802_vm13, %v9966_v22, %v1419_v16  ;;  %9968 = vst [vmem:[#allocation40_spill] sm:$0xff] %v8690_v31  ;;  %v1422_v22 = vrot.slane %v8171_v40, 1  ;;  %vm8702_vm0 = vcmp.lt.s32.totalorder %v403_v42, 15  ;;  %v305_v49 = vand.u32 15, %v251_v58 }
  0x6b   : > { %7245 = vmatprep.subr.bf16.mxu0 %v7244_v35  ;;  %7533 = vmatprep.subr.bf16.mxu1 %v7244_v35  ;;  %9967 = vst [vmem:[#allocation39_spill] sm:$0xff] %v8678_v21  ;;  %v8698_v39 = vsel %vm9802_vm13, %v1419_v16, %v9969_v38  ;;  %v9972_v36 = vsel %vm8702_vm0, 4294967295, %v9971_v36  ;;  %v417_v31 = vand.u32 15, %v267_v8  ;;  %v269_v13 = vadd.s32 168, %v8239_v0 }
  0x6c   : > { %6254 = vmatmul.mubr.f32.gmra.mrb[14].mxu0 %v8629_v48  ;;  %6758 = vmatmul.mubr.f32.gmra.mrb[14].mxu1 %v8653_v63  ;;  %9970 = vst [vmem:[#allocation41_spill] sm:$0xff] %v8698_v39  ;;  %v9973_v63 = vmov 0.0   ;;  %v8711_v16 = vsel %vm9802_vm13, %v1404_v55, %v1405_v27  ;;  %v7252_v40 = vpack.c.bf16 %v5265_v41, %v5264_v37  ;;  %v1407_v38 = vrot.slane %v8182_v44, 1 }
  0x6d   : > { %7247 = vmatpush3.bf16.msra.mxu0 %v7244_v35  ;;  %7535 = vmatpush3.bf16.msra.mxu1 %v7244_v35  ;;  %v9974_v35 = vrot.slane %v8149_v33, 1  ;;  %v8722_v8 = vsel %vm9802_vm13, %v1405_v27, %v1406_v1  ;;  %v1423_v42 = vrot.slane %v8185_v45, 1  ;;  %v1408_v55 = vrot.slane %v8190_v46, 1  ;;  %v5266_v27 = vld [vmem:[%s9726_s1 + $0x1a0] sm:$0xff]  ;;  %v5267_v45 = vld [vmem:[%s9726_s1 + $0x1a8] sm:$0xff] }
  0x6e   : > { %6288 = vmatprep.mubr.f32.mxu0 %v9973_v63  ;;  %6792 = vmatprep.mubr.f32.mxu1 %v8678_v21  ;;  %v8732_v33 = vsel %vm9802_vm13, %v1421_v26, %v1422_v22  ;;  %v319_v44 = vand.u32 15, %v253_v32  ;;  %v1424_v46 = vrot.slane %v8193_v47, 1  ;;  %v255_v37 = vadd.s32 56, %v8239_v0 }
  0x6f   : > { %7249 = vmatprep.subr.bf16.mxu0 %v7248_v5  ;;  %7537 = vmatprep.subr.bf16.mxu1 %v7248_v5  ;;  %v8718_v58 = vsel %vm9802_vm13, %v9974_v35, %v1421_v26  ;;  %9976 = vst [vmem:[#allocation43_spill] sm:$0xff] %v8732_v33  ;;  %v9977_v41 = vmov 0  ;;  %vm8746_vm13 = vcmp.lt.s32.totalorder %v417_v31, 15  ;;  %v9979_v32 = vmov 0 }
  0x70   : > { %9975 = vst [vmem:[#allocation42_spill] sm:$0xff] %v8718_v58  ;;  %6289 = vmatmul.mubr.f32.vlgmr.msra.gmra.mrb[0].mxu0 %v9973_v63  ;;  %6793 = vmatmul.mubr.msk.f32.vlgmr.msra.gmra.mrb[0].mxu1 %vm8702_vm0, %v8698_v39  ;;  %vm8742_vm0 = vcmp.lt.s32.totalorder %v305_v49, 15  ;;  %v9980_v32 = vsel %vm8746_vm13, 4294967295, %v9979_v32  ;;  %v431_v26 = vand.u32 15, %v269_v13  ;;  %v271_v35 = vadd.s32 184, %v8239_v0 }
  0x71   : > { %7251 = vmatpush3.bf16.msra.mxu0 %v7248_v5  ;;  %7539 = vmatpush3.bf16.msra.mxu1 %v7248_v5  ;;  %v9978_v41 = vsel %vm8742_vm0, 4294967295, %v9977_v41  ;;  %9981 = vst [vmem:[#allocation44_spill] sm:$0xff] %v9980_v32  ;;  %vm9982_vm15 = vcmp.lt.s32.totalorder %v8239_v0, 7  ;;  %v1409_v5 = vrot.slane %v8204_v51, 1  ;;  %v1425_v49 = vrot.slane %v8207_v52, 1  ;;  %v5269_v51 = vld [vmem:[%s9726_s1 + $0x1b8] sm:$0xff] }
  0x72   : > { %6291 = vmatprep.mubr.f32.mxu0 %v8711_v16  ;;  %6795 = vmatprep.mubr.f32.mxu1 %v8718_v58  ;;  %v8755_v47 = vsel %vm9982_vm15, %v1406_v1, %v1407_v38  ;;  %vm9983_vm14 = vmmov %vm9982_vm15  ;;  %v7256_v63 = vpack.c.bf16 %v5267_v45, %v5266_v27  ;;  %v1410_v39 = vrot.slane %v8212_v53, 1  ;;  %v5268_v1 = vld [vmem:[%s9726_s1 + $0x1b0] sm:$0xff]  ;;  %v9985_v52 = vmov 0 }
  0x73   : > { %7253 = vmatprep.subr.bf16.mxu0 %v7252_v40  ;;  %7541 = vmatprep.subr.bf16.mxu1 %v7252_v40  ;;  %v8761_v31 = vsel %vm9983_vm14, %v1422_v22, %v1423_v42  ;;  %vm9984_vm12 = vmmov %vm9983_vm14  ;;  %v8786_v53 = vsel %vm9983_vm14, %v1423_v42, %v1424_v46  ;;  %v333_v22 = vand.u32 15, %v255_v37  ;;  %vm8789_vm15 = vcmp.lt.s32.totalorder %v431_v26, 15 }
  0x74   : > { %v8765_v13 = vsel %vm9984_vm12, %v1407_v38, %v1408_v55  ;;  %6292 = vmatmul.mubr.msk.f32.gmra.mrb[2].mxu0 %vm8742_vm0, %v8722_v8  ;;  %6796 = vmatmul.mubr.msk.f32.gmra.mrb[2].mxu1 %vm8746_vm13, %v8732_v33  ;;  %vm8780_vm12 = vcmp.lt.s32.totalorder %v319_v44, 15  ;;  %9988 = vst [vmem:[#allocation46_spill] sm:$0xff] %v8786_v53  ;;  %v1426_v38 = vrot.slane %v8215_v54, 1  ;;  %v9989_v27 = vmov 0  ;;  %vm9992_vm13 = vmmov %vm9983_vm14 }
  0x75   : > { %v9986_v52 = vsel %vm8780_vm12, 4294967295, %v9985_v52  ;;  %7255 = vmatpush3.bf16.msra.mxu0 %v7252_v40  ;;  %7543 = vmatpush3.bf16.msra.mxu1 %v7252_v40  ;;  %v9990_v27 = vsel %vm8789_vm15, 4294967295, %v9989_v27  ;;  %v445_v45 = vand.u32 15, %v271_v35  ;;  %v257_v21 = vadd.s32 72, %v8239_v0  ;;  %vm9993_vm0 = vmmov %vm9992_vm13 }
  0x76   : > { %9987 = vst [vmem:[#allocation45_spill] sm:$0xff] %v9986_v52  ;;  %9991 = vst [vmem:[#allocation47_spill] sm:$0xff] %v9990_v27  ;;  %v273_v44 = vadd.s32 200, %v8239_v0  ;;  %6294 = vmatprep.mubr.f32.mxu0 %v8755_v47  ;;  %6798 = vmatprep.mubr.f32.mxu1 %v8761_v31  ;;  %v8799_v42 = vsel %vm9983_vm14, %v1408_v55, %v1409_v5  ;;  %v8803_v54 = vsel %vm9992_vm13, %v1424_v46, %v1425_v49  ;;  %v9994_v55 = vmov 0 }
  0x77   : > { %v7260_v40 = vpack.c.bf16 %v5269_v51, %v5268_v1  ;;  %7257 = vmatprep.subr.bf16.mxu0 %v7256_v63  ;;  %7545 = vmatprep.subr.bf16.mxu1 %v7256_v63  ;;  %v8807_v37 = vsel %vm9993_vm0, %v1409_v5, %v1410_v39  ;;  %v1411_v26 = vrot.slane %v8226_v59, 1  ;;  %v1427_v35 = vrot.slane %v8229_v60, 1  ;;  %v5270_v60 = vld [vmem:[%s9726_s1 + $0x1c0] sm:$0xff]  ;;  %v5271_v5 = vld [vmem:[%s9726_s1 + $0x1c8] sm:$0xff]  ;;  %vm10010_vm11 = vmmov %vm9993_vm0 }
  0x78   : > { %v259_v32 = vadd.s32 88, %v8239_v0  ;;  %6295 = vmatmul.mubr.msk.f32.gmra.mrb[4].mxu0 %vm8780_vm12, %v8765_v13  ;;  %6799 = vmatmul.mubr.msk.f32.gmra.mrb[4].mxu1 %vm8789_vm15, %v8786_v53  ;;  %vm8818_vm13 = vcmp.lt.s32.totalorder %v333_v22, 15  ;;  %v8824_v46 = vsel %vm9993_vm0, %v1425_v49, %v1426_v38  ;;  %v1412_v59 = vrot.slane %v8234_v61, 1  ;;  %vm10000_vm15 = vmmov %vm9993_vm0 }
  0x79   : > { %v9995_v55 = vsel %vm8818_vm13, 4294967295, %v9994_v55  ;;  %v275_v1 = vadd.s32 216, %v8239_v0  ;;  %7259 = vmatpush3.bf16.msra.mxu0 %v7256_v63  ;;  %7547 = vmatpush3.bf16.msra.mxu1 %v7256_v63  ;;  %vm8834_vm14 = vcmp.lt.s32.totalorder %v445_v45, 15  ;;  %v9997_v51 = vmov 0  ;;  %vm10001_vm12 = vmmov %vm9993_vm0 }
  0x7a   : > { %9996 = vst [vmem:[#allocation48_spill] sm:$0xff] %v9995_v55  ;;  %v9998_v51 = vsel %vm8834_vm14, 4294967295, %v9997_v51  ;;  %v347_v49 = vand.u32 15, %v257_v21  ;;  %v459_v22 = vand.u32 15, %v273_v44  ;;  %v1428_v61 = vrot.slane %v8237_v62, 1  ;;  %6297 = vmatprep.mubr.f32.mxu0 %v8799_v42  ;;  %6801 = vmatprep.mubr.f32.mxu1 %v8803_v54 }
  0x7b   : > { %9999 = vst [vmem:[#allocation49_spill] sm:$0xff] %v9998_v51  ;;  %v1413_v27 = vrot.slane %v8250_v3, 1  ;;  %v1429_v52 = vrot.slane %v8253_v4, 1  ;;  %v1414_v53 = vrot.slane %v8258_v6, 1  ;;  %7261 = vmatprep.subr.bf16.mxu0 %v7260_v40  ;;  %7549 = vmatprep.subr.bf16.mxu1 %v7260_v40  ;;  %v8846_v63 = vsel %vm9993_vm0, %v1410_v39, %v1411_v26  ;;  %v5272_v4 = vld [vmem:[%s9726_s1 + $0x1d0] sm:$0xff]  ;;  %v5273_v6 = vld [vmem:[%s9726_s1 + $0x1d8] sm:$0xff] }
  0x7c   : > { %v8850_v21 = vsel %vm10000_vm15, %v1426_v38, %v1427_v35  ;;  %v7264_v62 = vpack.c.bf16 %v5271_v5, %v5270_v60  ;;  %v361_v45 = vand.u32 15, %v259_v32  ;;  %6298 = vmatmul.mubr.msk.f32.gmra.mrb[6].mxu0 %vm8818_vm13, %v8807_v37  ;;  %6802 = vmatmul.mubr.msk.f32.gmra.mrb[6].mxu1 %vm8834_vm14, %v8824_v46  ;;  %v8860_v3 = vsel %vm10001_vm12, %v1411_v26, %v1412_v59  ;;  %vm10008_vm14 = vmmov %vm9993_vm0 }
  0x7d   : > { %v473_v39 = vand.u32 15, %v275_v1  ;;  %v1430_v32 = vrot.slane %v8261_v7, 1  ;;  %v261_v38 = vadd.s32 104, %v8239_v0  ;;  %7263 = vmatpush3.bf16.msra.mxu0 %v7260_v40  ;;  %7551 = vmatpush3.bf16.msra.mxu1 %v7260_v40  ;;  %vm8870_vm15 = vcmp.lt.s32.totalorder %v347_v49, 15  ;;  %vm10009_vm13 = vmmov %vm9993_vm0 }
  0x7e   : > { %v10002_v44 = vmov 0  ;;  %vm8874_vm12 = vcmp.lt.s32.totalorder %v459_v22, 15  ;;  %v10005_v26 = vmov 0  ;;  %v8880_v60 = vsel %vm9993_vm0, %v1427_v35, %v1428_v61  ;;  %6300 = vmatprep.mubr.f32.mxu0 %v8846_v63  ;;  %6804 = vmatprep.mubr.f32.mxu1 %v8850_v21 }
  0x7f   : > { %v10003_v44 = vsel %vm8870_vm15, 4294967295, %v10002_v44  ;;  %v10006_v26 = vsel %vm8874_vm12, 4294967295, %v10005_v26  ;;  %v277_v5 = vadd.s32 232, %v8239_v0  ;;  %v8887_v7 = vsel %vm10008_vm14, %v1412_v59, %v1413_v27  ;;  %7265 = vmatprep.subr.bf16.mxu0 %v7264_v62  ;;  %7553 = vmatprep.subr.bf16.mxu1 %v7264_v62  ;;  %vm10017_vm14 = vmmov %vm10009_vm13 }
  0x80   : > { %10004 = vst [vmem:[#allocation50_spill] sm:$0xff] %v10003_v44  ;;  %10007 = vst [vmem:[#allocation51_spill] sm:$0xff] %v10006_v26  ;;  %v8891_v40 = vsel %vm10009_vm13, %v1428_v61, %v1429_v52  ;;  %v8895_v1 = vsel %vm10010_vm11, %v1413_v27, %v1414_v53  ;;  %vm8897_vm0 = vcmp.lt.s32.totalorder %v361_v45, 15  ;;  %v10011_v35 = vmov 0  ;;  %v5274_v61 = vld [vmem:[%s9726_s1 + $0x1e0] sm:$0xff]  ;;  %v5275_v27 = vld [vmem:[%s9726_s1 + $0x1e8] sm:$0xff]  ;;  %6301 = vmatmul.mubr.msk.f32.gmra.mrb[8].mxu0 %vm8870_vm15, %v8860_v3  ;;  %6805 = vmatmul.mubr.msk.f32.gmra.mrb[8].mxu1 %vm8874_vm12, %v8880_v60 }
  0x81   : > { %v10012_v35 = vsel %vm8897_vm0, 4294967295, %v10011_v35  ;;  %v7268_v49 = vpack.c.bf16 %v5273_v6, %v5272_v4  ;;  %v1415_v22 = vrot.slane %v8276_v14, 1  ;;  %v1431_v59 = vrot.slane %v8279_v15, 1  ;;  %7267 = vmatpush3.bf16.msra.mxu0 %v7264_v62  ;;  %7555 = vmatpush3.bf16.msra.mxu1 %v7264_v62 }
  0x82   : > { %10013 = vst [vmem:[#allocation52_spill] sm:$0xff] %v10012_v35  ;;  %vm8915_vm11 = vcmp.lt.s32.totalorder %v473_v39, 15  ;;  %v10014_v14 = vmov 0  ;;  %v8921_v15 = vsel %vm10009_vm13, %v1429_v52, %v1430_v32  ;;  %v375_v45 = vand.u32 15, %v261_v38  ;;  %6303 = vmatprep.mubr.f32.mxu0 %v8887_v7  ;;  %6807 = vmatprep.mubr.f32.mxu1 %v8891_v40 }
  0x83   : > { %v10015_v14 = vsel %vm8915_vm11, 4294967295, %v10014_v14  ;;  %v1416_v4 = vrot.slane %v8286_v18, 1  ;;  %v487_v6 = vand.u32 15, %v277_v5  ;;  %v1432_v44 = vrot.slane %v8289_v19, 1  ;;  %7269 = vmatprep.subr.bf16.mxu0 %v7268_v49  ;;  %7557 = vmatprep.subr.bf16.mxu1 %v7268_v49 }
  0x84   : > { %10016 = vst [vmem:[#allocation53_spill] sm:$0xff] %v10015_v14  ;;  %v263_v51 = vadd.s32 120, %v8239_v0  ;;  %v279_v26 = vadd.s32 248, %v8239_v0  ;;  %v7272_v39 = vpack.c.bf16 %v5275_v27, %v5274_v61  ;;  %v8931_v52 = vsel %vm10017_vm14, %v1414_v53, %v1415_v22  ;;  %6304 = vmatmul.mubr.msk.f32.gmra.mrb[10].mxu0 %vm8897_vm0, %v8895_v1  ;;  %6808 = vmatmul.mubr.msk.f32.gmra.mrb[10].mxu1 %vm8915_vm11, %v8921_v15  ;;  %vm10021_vm14 = vmmov %vm10009_vm13 }
  0x85   : > { %v8935_v18 = vsel %vm10009_vm13, %v1430_v32, %v1431_v59  ;;  %v1417_v19 = vrot.slane %v8267_v10, 1  ;;  %v1433_v62 = vrot.slane %v8307_v28, 1  ;;  %vm8945_vm12 = vcmp.lt.s32.totalorder %v375_v45, 15  ;;  %v5276_v10 = vld [vmem:[%s9726_s1 + $0x1f0] sm:$0xff]  ;;  %v5277_v32 = vld [vmem:[%s9726_s1 + $0x1f8] sm:$0xff]  ;;  %7271 = vmatpush3.bf16.msra.mxu0 %v7268_v49  ;;  %7559 = vmatpush3.bf16.msra.mxu1 %v7268_v49  ;;  %vm10025_vm11 = vmmov %vm10021_vm14 }
  0x86   : > { %v10018_v38 = vmov 0  ;;  %v8951_v53 = vsel %vm10021_vm14, %v1415_v22, %v1416_v4  ;;  %vm8959_vm13 = vcmp.lt.s32.totalorder %v487_v6, 15  ;;  %v10022_v5 = vmov 0  ;;  %6306 = vmatprep.mubr.f32.mxu0 %v8931_v52  ;;  %6810 = vmatprep.mubr.f32.mxu1 %v8935_v18  ;;  %vm10026_vm14 = vmmov %vm10025_vm11 }
  0x87   : > { %v10019_v38 = vsel %vm8945_vm12, 4294967295, %v10018_v38  ;;  %v10023_v5 = vsel %vm8959_vm13, 4294967295, %v10022_v5  ;;  %v8965_v61 = vsel %vm10025_vm11, %v1431_v59, %v1432_v44  ;;  %v389_v22 = vand.u32 15, %v263_v51  ;;  %7273 = vmatprep.subr.bf16.mxu0 %v7272_v39  ;;  %7561 = vmatprep.subr.bf16.mxu1 %v7272_v39  ;;  %vm10027_vm0 = vmmov %vm10025_vm11  ;;  %v5286_v51 = vld [vmem:[%s9726_s1 + $0x200] sm:$0xff] }
  0x88   : > { %10020 = vst [vmem:[#allocation54_spill] sm:$0xff] %v10019_v38  ;;  %10024 = vst [vmem:[#allocation55_spill] sm:$0xff] %v10023_v5  ;;  %v501_v27 = vand.u32 15, %v279_v26  ;;  %v8971_v45 = vsel %vm10026_vm14, %v1416_v4, %v1417_v19  ;;  %v8975_v49 = vsel %vm10027_vm0, %v1432_v44, %v1433_v62  ;;  %v7276_v6 = vpack.c.bf16 %v5277_v32, %v5276_v10  ;;  %v5287_v44 = vld [vmem:[%s9726_s1 + $0x208] sm:$0xff]  ;;  %v5354_v32 = vld [vmem:[%s9726_s1 + $0x3a0] sm:$0xff] }
  0x89   : > { %10028 = vst [vmem:[#allocation56_spill] sm:$0xff] %v8975_v49  ;;  %v284_v59 = vand.u32 15, %v8239_v0  ;;  %6307 = vmatmul.mubr.msk.f32.gmra.mrb[12].mxu0 %vm8945_vm12, %v8951_v53  ;;  %6811 = vmatmul.mubr.msk.f32.gmra.mrb[12].mxu1 %vm8959_vm13, %v8965_v61  ;;  %vm8990_vm0 = vcmp.lt.s32.totalorder %v389_v22, 15  ;;  %v10031_v4 = vrot.slane %v8103_v12, 1  ;;  %v10034_v5 = vrot.slane %v8369_v24, 1  ;;  %vm10035_vm13 = vmmov %vm10025_vm11  ;;  %v5290_v22 = vld [vmem:[%s9726_s1 + $0x220] sm:$0xff] }
  0x8a   : > { %7275 = vmatpush3.bf16.msra.mxu0 %v7272_v39  ;;  %7563 = vmatpush3.bf16.msra.mxu1 %v7272_v39  ;;  %vm9000_vm14 = vcmp.lt.s32.totalorder %v501_v27, 15  ;;  %v7280_v39 = vpack.c.bf16 %v5287_v44, %v5286_v51  ;;  %v5291_v27 = vld [vmem:[%s9726_s1 + $0x228] sm:$0xff]  ;;  %v10043_v44 = vld [vmem:[#allocation13_spill] sm:$0xff]  ;;  %v10049_v51 = vld [vmem:[#allocation20_spill] sm:$0xff] }
  0x8b   : > { %v8998_v10 = vsel %vm10025_vm11, %v1417_v19, %v10031_v4  ;;  %v9008_v38 = vsel %vm10035_vm13, %v1433_v62, %v10034_v5  ;;  %6309 = vmatprep.mubr.f32.mxu0 %v8971_v45  ;;  %6813 = vmatprep.mubr.f32.mxu1 %v8975_v49  ;;  %vm9012_vm12 = vcmp.ge.s32.totalorder %v284_v59, 1  ;;  %v5288_v19 = vld [vmem:[%s9726_s1 + $0x210] sm:$0xff]  ;;  %v5289_v62 = vld [vmem:[%s9726_s1 + $0x218] sm:$0xff]  ;;  %v10044_v4 = vld [vmem:[#allocation14_spill] sm:$0xff] }
  0x8c   : > { %10036 = vst [vmem:[#allocation57_spill] sm:$0xff] %v9008_v38  ;;  %7277 = vmatprep.subr.bf16.mxu0 %v7276_v6  ;;  %7565 = vmatprep.subr.bf16.mxu1 %v7276_v6  ;;  %v7284_v5 = vpack.c.bf16 %v5289_v62, %v5288_v19  ;;  %v10041_v59 = vld [vmem:[#allocation12_spill] sm:$0xff]  ;;  %v10045_v62 = vld [vmem:[#allocation15_spill] sm:$0xff] }
  0x8d   : > { %6310 = vmatmul.mubr.msk.f32.gmra.mrb[14].mxu0 %vm8990_vm0, %v8998_v10  ;;  %6814 = vmatmul.mubr.msk.f32.gmra.mrb[14].mxu1 %vm9000_vm14, %v9008_v38  ;;  %v5292_v19 = vld [vmem:[%s9726_s1 + $0x230] sm:$0xff]  ;;  %v5355_v12 = vld [vmem:[%s9726_s1 + $0x3a8] sm:$0xff] }
  0x8e   : > { %7279 = vmatpush3.bf16.msra.mxu0 %v7276_v6  ;;  %7567 = vmatpush3.bf16.msra.mxu1 %v7276_v6  ;;  %v5294_v6 = vld [vmem:[%s9726_s1 + $0x240] sm:$0xff] }
  0x8f   : > { %6344 = vmatprep.mubr.msk.f32.mxu0 %vm9012_vm12, %v8364_v17  ;;  %6848 = vmatprep.mubr.msk.f32.mxu1 %vm8316_vm1, %v8355_v9  ;;  %v10039_v17 = vld [vmem:[#allocation9_spill] sm:$0xff] }
  0x90   : > { %7281 = vmatprep.subr.bf16.mxu0 %v7280_v39  ;;  %7569 = vmatprep.subr.bf16.mxu1 %v7280_v39  ;;  %v10047_v9 = vld [vmem:[#allocation17_spill] sm:$0xff] }
  0x91   : > { %6345 = vmatmul.mubr.f32.vlgmr.msra.gmra.mrb[0].mxu0 %v8359_v11  ;;  %6849 = vmatmul.mubr.f32.vlgmr.msra.gmra.mrb[0].mxu1 %v8375_v25  ;;  %v7288_v11 = vpack.c.bf16 %v5291_v27, %v5290_v22  ;;  %v10051_v25 = vld [vmem:[#allocation22_spill] sm:$0xff]  ;;  %v10056_v22 = vld [vmem:[#allocation27_spill] sm:$0xff] }
  0x92   : > { %7283 = vmatpush3.bf16.msra.mxu0 %v7280_v39  ;;  %7571 = vmatpush3.bf16.msra.mxu1 %v7280_v39  ;;  %v5293_v39 = vld [vmem:[%s9726_s1 + $0x238] sm:$0xff] }
  0x93   : > { %6347 = vmatprep.mubr.msk.f32.mxu0 %vm8340_vm2, %v10039_v17  ;;  %6851 = vmatprep.mubr.msk.f32.mxu1 %vm8344_vm3, %v10041_v59  ;;  %v7292_v27 = vpack.c.bf16 %v5293_v39, %v5292_v19  ;;  %v10061_v19 = vld [vmem:[#allocation33_spill] sm:$0xff] }
  0x94   : > { %7285 = vmatprep.subr.bf16.mxu0 %v7284_v5  ;;  %7573 = vmatprep.subr.bf16.mxu1 %v7284_v5 }
  0x95   : > { %6348 = vmatmul.mubr.f32.gmra.mrb[2].mxu0 %v10043_v44  ;;  %6852 = vmatmul.mubr.f32.gmra.mrb[2].mxu1 %v10044_v4 }
  0x96   : > { %7287 = vmatpush3.bf16.msra.mxu0 %v7284_v5  ;;  %7575 = vmatpush3.bf16.msra.mxu1 %v7284_v5  ;;  %v5295_v5 = vld [vmem:[%s9726_s1 + $0x248] sm:$0xff] }
  0x97   : > { %6350 = vmatprep.mubr.msk.f32.mxu0 %vm8386_vm4, %v10045_v62  ;;  %6854 = vmatprep.mubr.msk.f32.mxu1 %vm8402_vm5, %v10047_v9  ;;  %v7296_v39 = vpack.c.bf16 %v5295_v5, %v5294_v6  ;;  %v5296_v9 = vld [vmem:[%s9726_s1 + $0x250] sm:$0xff]  ;;  %v10068_v6 = vrot.slane %v8307_v28, 7  ;;  %v10072_v28 = vld [vmem:[#allocation2_spill] sm:$0xff] }
  0x98   : > { %7289 = vmatprep.subr.bf16.mxu0 %v7288_v11  ;;  %7577 = vmatprep.subr.bf16.mxu1 %v7288_v11 }
  0x99   : > { %6351 = vmatmul.mubr.f32.gmra.mrb[4].mxu0 %v8466_v34  ;;  %6855 = vmatmul.mubr.f32.gmra.mrb[4].mxu1 %v10049_v51  ;;  %v10053_v51 = vld [vmem:[#allocation24_spill] sm:$0xff]  ;;  %v10054_v34 = vld [vmem:[#allocation25_spill] sm:$0xff] }
  0x9a   : > { %7291 = vmatpush3.bf16.msra.mxu0 %v7288_v11  ;;  %7579 = vmatpush3.bf16.msra.mxu1 %v7288_v11  ;;  %v5297_v11 = vld [vmem:[%s9726_s1 + $0x258] sm:$0xff] }
  0x9b   : > { %6353 = vmatprep.mubr.msk.f32.mxu0 %vm8447_vm6, %v8486_v50  ;;  %6857 = vmatprep.mubr.msk.f32.mxu1 %vm8457_vm7, %v10051_v25  ;;  %v7300_v5 = vpack.c.bf16 %v5297_v11, %v5296_v9  ;;  %v10059_v9 = vld [vmem:[#allocation28_spill] sm:$0xff] }
  0x9c   : > { %7293 = vmatprep.subr.bf16.mxu0 %v7292_v27  ;;  %7581 = vmatprep.subr.bf16.mxu1 %v7292_v27  ;;  %vm10060_vm13 = vnez %v10059_v9  ;;  %v10063_v9 = vld [vmem:[#allocation31_spill] sm:$0xff] }
  0x9d   : > { %6354 = vmatmul.mubr.f32.gmra.mrb[6].mxu0 %v10053_v51  ;;  %6858 = vmatmul.mubr.f32.gmra.mrb[6].mxu1 %v10054_v34  ;;  %v5298_v34 = vld [vmem:[%s9726_s1 + $0x260] sm:$0xff]  ;;  %vm10064_vm11 = vnez %v10063_v9  ;;  %v10078_v9 = vld [vmem:[#allocation11_spill] sm:$0xff] }
  0x9e   : > { %7295 = vmatpush3.bf16.msra.mxu0 %v7292_v27  ;;  %7583 = vmatpush3.bf16.msra.mxu1 %v7292_v27  ;;  %v5299_v27 = vld [vmem:[%s9726_s1 + $0x268] sm:$0xff] }
  0x9f   : > { %6356 = vmatprep.mubr.msk.f32.mxu0 %vm8480_vm8, %v8525_v2  ;;  %6860 = vmatprep.mubr.msk.f32.mxu1 %vm8507_vm9, %v10056_v22  ;;  %v7304_v11 = vpack.c.bf16 %v5299_v27, %v5298_v34  ;;  %v10065_v34 = vld [vmem:[#allocation32_spill] sm:$0xff]  ;;  %v10067_v27 = vrot.slane %v8369_v24, 7  ;;  %v5303_v24 = vld [vmem:[%s9726_s1 + $0x288] sm:$0xff] }
  0xa0   : > { %7297 = vmatprep.subr.bf16.mxu0 %v7296_v39  ;;  %7585 = vmatprep.subr.bf16.mxu1 %v7296_v39 }
  0xa1   : > { %6357 = vmatmul.mubr.f32.gmra.mrb[8].mxu0 %v8560_v57  ;;  %6861 = vmatmul.mubr.f32.gmra.mrb[8].mxu1 %v8564_v20  ;;  %v10062_v20 = vld [vmem:[#allocation34_spill] sm:$0xff]  ;;  %v5300_v57 = vld [vmem:[%s9726_s1 + $0x270] sm:$0xff] }
  0xa2   : > { %7299 = vmatpush3.bf16.msra.mxu0 %v7296_v39  ;;  %7587 = vmatpush3.bf16.msra.mxu1 %v7296_v39  ;;  %v5301_v39 = vld [vmem:[%s9726_s1 + $0x278] sm:$0xff] }
  0xa3   : > { %6359 = vmatprep.mubr.msk.f32.mxu0 %vm8535_vm10, %v8568_v56  ;;  %6863 = vmatprep.mubr.msk.f32.mxu1 %vm10060_vm13, %v8589_v30  ;;  %vm10066_vm13 = vnez %v10065_v34  ;;  %vm10069_vm10 = vcmp.lt.s32.totalorder %v8239_v0, 1  ;;  %v5302_v34 = vld [vmem:[%s9726_s1 + $0x280] sm:$0xff] }
  0xa4   : > { %7301 = vmatprep.subr.bf16.mxu0 %v7300_v5  ;;  %7589 = vmatprep.subr.bf16.mxu1 %v7300_v5 }
  0xa5   : > { %6360 = vmatmul.mubr.f32.gmra.mrb[10].mxu0 %v10061_v19  ;;  %6864 = vmatmul.mubr.f32.gmra.mrb[10].mxu1 %v10062_v20  ;;  %v9124_v20 = vsel %vm10069_vm10, %v10068_v6, %v10067_v27  ;;  %v7308_v19 = vpack.c.bf16 %v5301_v39, %v5300_v57  ;;  %v10073_v6 = vld [vmem:[#allocation35_spill] sm:$0xff]  ;;  %v10075_v57 = vld [vmem:[#allocation36_spill] sm:$0xff]  ;;  %v7312_v39 = vpack.c.bf16 %v5303_v24, %v5302_v34  ;;  %v9150_v34 = vld [vmem:[%s8094_s6 + $0x80] sm:$0xff] }
  0xa6   : > { %7303 = vmatpush3.bf16.msra.mxu0 %v7300_v5  ;;  %7591 = vmatpush3.bf16.msra.mxu1 %v7300_v5  ;;  %10070 = vst [vmem:[#allocation9_spill] sm:$0xff] %v9124_v20  ;;  %v10071_v5 = vld [vmem:[#allocation37_spill] sm:$0xff]  ;;  %vm10074_vm10 = vnez %v10073_v6  ;;  %v10077_v27 = vld [vmem:[#allocation3_spill] sm:$0xff]  ;;  %10079 = vst [vmem:[#allocation12_spill] sm:$0xff] %v9150_v34 }
  0xa7   : > { %6362 = vmatprep.mubr.msk.f32.mxu0 %vm10064_vm11, %v8623_v23  ;;  %6866 = vmatprep.mubr.msk.f32.mxu1 %vm10066_vm13, %v8637_v29  ;;  %vm10076_vm13 = vnez %v10075_v57  ;;  %v5305_v6 = vld [vmem:[%s9726_s1 + $0x298] sm:$0xff]  ;;  %v7993_v57 = vld [vmem:[%s8094_s6] sm:$0xff] }
  0xa8   : > { %7305 = vmatprep.subr.bf16.mxu0 %v7304_v11  ;;  %7593 = vmatprep.subr.bf16.mxu1 %v7304_v11 }
  0xa9   : > { %6363 = vmatmul.mubr.f32.gmra.mrb[12].mxu0 %v8629_v48  ;;  %6867 = vmatmul.mubr.f32.gmra.mrb[12].mxu1 %v10071_v5 }
  0xaa   : > { %7307 = vmatpush3.bf16.msra.mxu0 %v7304_v11  ;;  %7595 = vmatpush3.bf16.msra.mxu1 %v7304_v11  ;;  %v5304_v11 = vld [vmem:[%s9726_s1 + $0x290] sm:$0xff] }
  0xab   : > { %6365 = vmatprep.mubr.msk.f32.mxu0 %vm10074_vm10, %v10072_v28  ;;  %6869 = vmatprep.mubr.msk.f32.mxu1 %vm10076_vm13, %v9124_v20  ;;  %v7316_v24 = vpack.c.bf16 %v5305_v6, %v5304_v11  ;;  %v9165_v6 = vld [vmem:[%s8094_s6 + $0x10] sm:$0xff]  ;;  %v9310_v20 = vld [vmem:[%s8094_s6 + $0xf8] sm:$0xff]  ;;  %vm10107_vm10 = vnez %v9972_v36 }
  0xac   : > { %7309 = vmatprep.subr.bf16.mxu0 %v7308_v19  ;;  %7597 = vmatprep.subr.bf16.mxu1 %v7308_v19  ;;  %10081 = vst [vmem:[#allocation14_spill] sm:$0xff] %v9165_v6 }
  0xad   : > { %6366 = vmatmul.mubr.f32.gmra.mrb[14].mxu0 %v10077_v27  ;;  %6870 = vmatmul.mubr.f32.gmra.mrb[14].mxu1 %v10078_v9  ;;  %v7995_v9 = vld [vmem:[%s8094_s6 + $0x8] sm:$0xff] }
  0xae   : > { %7311 = vmatpush3.bf16.msra.mxu0 %v7308_v19  ;;  %7599 = vmatpush3.bf16.msra.mxu1 %v7308_v19  ;;  %v9155_v27 = vld [vmem:[%s8094_s6 + $0x88] sm:$0xff]  ;;  %v5306_v19 = vld [vmem:[%s9726_s1 + $0x2a0] sm:$0xff] }
  0xaf   : > { %6400 = vmatprep.mubr.f32.mxu0 %v7993_v57  ;;  %6904 = vmatprep.mubr.f32.mxu1 %v9150_v34  ;;  %10080 = vst [vmem:[#allocation13_spill] sm:$0xff] %v9155_v27  ;;  %v5307_v57 = vld [vmem:[%s9726_s1 + $0x2a8] sm:$0xff]  ;;  %v5308_v34 = vld [vmem:[%s9726_s1 + $0x2b0] sm:$0xff] }
  0xb0   : > { %7313 = vmatprep.subr.bf16.mxu0 %v7312_v39  ;;  %7601 = vmatprep.subr.bf16.mxu1 %v7312_v39  ;;  %v7320_v11 = vpack.c.bf16 %v5307_v57, %v5306_v19  ;;  %v9187_v19 = vld [vmem:[%s8094_s6 + $0x20] sm:$0xff] }
  0xb1   : > { %6401 = vmatmul.mubr.f32.vlgmr.msra.gmra.mrb[0].mxu0 %v7995_v9  ;;  %6905 = vmatmul.mubr.f32.vlgmr.msra.gmra.mrb[0].mxu1 %v9155_v27  ;;  %v9169_v9 = vld [vmem:[%s8094_s6 + $0x90] sm:$0xff]  ;;  %v9173_v27 = vld [vmem:[%s8094_s6 + $0x18] sm:$0xff]  ;;  %10085 = vst [vmem:[#allocation27_spill] sm:$0xff] %v9187_v19  ;;  %v9191_v57 = vld [vmem:[%s8094_s6 + $0xa0] sm:$0xff] }
  0xb2   : > { %7315 = vmatpush3.bf16.msra.mxu0 %v7312_v39  ;;  %7603 = vmatpush3.bf16.msra.mxu1 %v7312_v39  ;;  %10082 = vst [vmem:[#allocation15_spill] sm:$0xff] %v9169_v9  ;;  %10083 = vst [vmem:[#allocation22_spill] sm:$0xff] %v9173_v27  ;;  %v9177_v39 = vld [vmem:[%s8094_s6 + $0x98] sm:$0xff] }
  0xb3   : > { %6403 = vmatprep.mubr.f32.mxu0 %v9165_v6  ;;  %6907 = vmatprep.mubr.f32.mxu1 %v9169_v9  ;;  %10084 = vst [vmem:[#allocation24_spill] sm:$0xff] %v9177_v39  ;;  %v5309_v9 = vld [vmem:[%s9726_s1 + $0x2b8] sm:$0xff]  ;;  %10086 = vst [vmem:[#allocation37_spill] sm:$0xff] %v9191_v57 }
  0xb4   : > { %7317 = vmatprep.subr.bf16.mxu0 %v7316_v24  ;;  %7605 = vmatprep.subr.bf16.mxu1 %v7316_v24  ;;  %v9265_v6 = vld [vmem:[%s8094_s6 + $0xd8] sm:$0xff] }
  0xb5   : > { %6404 = vmatmul.mubr.f32.gmra.mrb[2].mxu0 %v9173_v27  ;;  %6908 = vmatmul.mubr.f32.gmra.mrb[2].mxu1 %v9177_v39  ;;  %v7324_v39 = vpack.c.bf16 %v5309_v9, %v5308_v34  ;;  %v9195_v27 = vld [vmem:[%s8094_s6 + $0x28] sm:$0xff]  ;;  %v9209_v34 = vld [vmem:[%s8094_s6 + $0x30] sm:$0xff]  ;;  %10100 = vst [vmem:[#allocation69_spill] sm:$0xff] %v9265_v6 }
  0xb6   : > { %7319 = vmatpush3.bf16.msra.mxu0 %v7316_v24  ;;  %7607 = vmatpush3.bf16.msra.mxu1 %v7316_v24  ;;  %10087 = vst [vmem:[#allocation2_spill] sm:$0xff] %v9195_v27  ;;  %v9199_v24 = vld [vmem:[%s8094_s6 + $0xa8] sm:$0xff]  ;;  %10089 = vst [vmem:[#allocation58_spill] sm:$0xff] %v9209_v34  ;;  %v9213_v9 = vld [vmem:[%s8094_s6 + $0xb0] sm:$0xff] }
  0xb7   : > { %6406 = vmatprep.mubr.f32.mxu0 %v9187_v19  ;;  %6910 = vmatprep.mubr.f32.mxu1 %v9191_v57  ;;  %10088 = vst [vmem:[#allocation36_spill] sm:$0xff] %v9199_v24  ;;  %v5310_v19 = vld [vmem:[%s9726_s1 + $0x2c0] sm:$0xff]  ;;  %v5311_v57 = vld [vmem:[%s9726_s1 + $0x2c8] sm:$0xff]  ;;  %10090 = vst [vmem:[#allocation59_spill] sm:$0xff] %v9213_v9 }
  0xb8   : > { %7321 = vmatprep.subr.bf16.mxu0 %v7320_v11  ;;  %7609 = vmatprep.subr.bf16.mxu1 %v7320_v11 }
  0xb9   : > { %6407 = vmatmul.mubr.f32.gmra.mrb[4].mxu0 %v9195_v27  ;;  %6911 = vmatmul.mubr.f32.gmra.mrb[4].mxu1 %v9199_v24  ;;  %v7328_v24 = vpack.c.bf16 %v5311_v57, %v5310_v19  ;;  %v9217_v27 = vld [vmem:[%s8094_s6 + $0x38] sm:$0xff]  ;;  %v9231_v19 = vld [vmem:[%s8094_s6 + $0x40] sm:$0xff] }
  0xba   : > { %7323 = vmatpush3.bf16.msra.mxu0 %v7320_v11  ;;  %7611 = vmatpush3.bf16.msra.mxu1 %v7320_v11  ;;  %10091 = vst [vmem:[#allocation60_spill] sm:$0xff] %v9217_v27  ;;  %v9221_v11 = vld [vmem:[%s8094_s6 + $0xb8] sm:$0xff]  ;;  %10093 = vst [vmem:[#allocation62_spill] sm:$0xff] %v9231_v19  ;;  %v9235_v57 = vld [vmem:[%s8094_s6 + $0xc0] sm:$0xff] }
  0xbb   : > { %6409 = vmatprep.mubr.f32.mxu0 %v9209_v34  ;;  %6913 = vmatprep.mubr.f32.mxu1 %v9213_v9  ;;  %10092 = vst [vmem:[#allocation61_spill] sm:$0xff] %v9221_v11  ;;  %v5312_v34 = vld [vmem:[%s9726_s1 + $0x2d0] sm:$0xff]  ;;  %v5313_v9 = vld [vmem:[%s9726_s1 + $0x2d8] sm:$0xff]  ;;  %10094 = vst [vmem:[#allocation63_spill] sm:$0xff] %v9235_v57 }
  0xbc   : > { %7325 = vmatprep.subr.bf16.mxu0 %v7324_v39  ;;  %7613 = vmatprep.subr.bf16.mxu1 %v7324_v39 }
  0xbd   : > { %6410 = vmatmul.mubr.f32.gmra.mrb[6].mxu0 %v9217_v27  ;;  %6914 = vmatmul.mubr.f32.gmra.mrb[6].mxu1 %v9221_v11  ;;  %v7332_v11 = vpack.c.bf16 %v5313_v9, %v5312_v34  ;;  %v9239_v27 = vld [vmem:[%s8094_s6 + $0x48] sm:$0xff]  ;;  %v9253_v34 = vld [vmem:[%s8094_s6 + $0x50] sm:$0xff] }
  0xbe   : > { %7327 = vmatpush3.bf16.msra.mxu0 %v7324_v39  ;;  %7615 = vmatpush3.bf16.msra.mxu1 %v7324_v39  ;;  %10095 = vst [vmem:[#allocation64_spill] sm:$0xff] %v9239_v27  ;;  %v9243_v39 = vld [vmem:[%s8094_s6 + $0xc8] sm:$0xff]  ;;  %10097 = vst [vmem:[#allocation66_spill] sm:$0xff] %v9253_v34  ;;  %v9257_v9 = vld [vmem:[%s8094_s6 + $0xd0] sm:$0xff] }
  0xbf   : > { %6412 = vmatprep.mubr.f32.mxu0 %v9231_v19  ;;  %6916 = vmatprep.mubr.f32.mxu1 %v9235_v57  ;;  %10096 = vst [vmem:[#allocation65_spill] sm:$0xff] %v9243_v39  ;;  %v5314_v19 = vld [vmem:[%s9726_s1 + $0x2e0] sm:$0xff]  ;;  %v5315_v57 = vld [vmem:[%s9726_s1 + $0x2e8] sm:$0xff]  ;;  %10098 = vst [vmem:[#allocation67_spill] sm:$0xff] %v9257_v9 }
  0xc0   : > { %7329 = vmatprep.subr.bf16.mxu0 %v7328_v24  ;;  %7617 = vmatprep.subr.bf16.mxu1 %v7328_v24 }
  0xc1   : > { %6413 = vmatmul.mubr.f32.gmra.mrb[8].mxu0 %v9239_v27  ;;  %6917 = vmatmul.mubr.f32.gmra.mrb[8].mxu1 %v9243_v39  ;;  %v7336_v39 = vpack.c.bf16 %v5315_v57, %v5314_v19  ;;  %v9261_v27 = vld [vmem:[%s8094_s6 + $0x58] sm:$0xff]  ;;  %v249_v19 = vadd.s32 8, %v8239_v0  ;;  %v9276_v57 = vld [vmem:[%s8094_s6 + $0x60] sm:$0xff] }
  0xc2   : > { %7331 = vmatpush3.bf16.msra.mxu0 %v7328_v24  ;;  %7619 = vmatpush3.bf16.msra.mxu1 %v7328_v24  ;;  %10099 = vst [vmem:[#allocation68_spill] sm:$0xff] %v9261_v27  ;;  %v5316_v24 = vld [vmem:[%s9726_s1 + $0x2f0] sm:$0xff]  ;;  %10101 = vst [vmem:[#allocation70_spill] sm:$0xff] %v9276_v57  ;;  %v5326_v0 = vld [vmem:[%s9726_s1 + $0x300] sm:$0xff] }
  0xc3   : > { %6415 = vmatprep.mubr.f32.mxu0 %v9253_v34  ;;  %6919 = vmatprep.mubr.f32.mxu1 %v9257_v9  ;;  %v5317_v9 = vld [vmem:[%s9726_s1 + $0x2f8] sm:$0xff]  ;;  %v9284_v34 = vld [vmem:[%s8094_s6 + $0x68] sm:$0xff] }
  0xc4   : > { %7333 = vmatprep.subr.bf16.mxu0 %v7332_v11  ;;  %7621 = vmatprep.subr.bf16.mxu1 %v7332_v11  ;;  %10103 = vst [vmem:[#allocation72_spill] sm:$0xff] %v9284_v34 }
  0xc5   : > { %6416 = vmatmul.mubr.f32.gmra.mrb[10].mxu0 %v9261_v27  ;;  %6920 = vmatmul.mubr.f32.gmra.mrb[10].mxu1 %v9265_v6  ;;  %v9280_v27 = vld [vmem:[%s8094_s6 + $0xe0] sm:$0xff]  ;;  %v7340_v6 = vpack.c.bf16 %v5317_v9, %v5316_v24  ;;  %v291_v9 = vand.u32 15, %v249_v19  ;;  %v9298_v24 = vld [vmem:[%s8094_s6 + $0x70] sm:$0xff]  ;;  %v5329_v19 = vld [vmem:[%s9726_s1 + $0x318] sm:$0xff] }
  0xc6   : > { %7335 = vmatpush3.bf16.msra.mxu0 %v7332_v11  ;;  %7623 = vmatpush3.bf16.msra.mxu1 %v7332_v11  ;;  %10102 = vst [vmem:[#allocation71_spill] sm:$0xff] %v9280_v27  ;;  %v9288_v11 = vld [vmem:[%s8094_s6 + $0xe8] sm:$0xff] }
  0xc7   : > { %6418 = vmatprep.mubr.f32.mxu0 %v9276_v57  ;;  %6922 = vmatprep.mubr.f32.mxu1 %v9280_v27  ;;  %10104 = vst [vmem:[#allocation73_spill] sm:$0xff] %v9288_v11  ;;  %v5327_v27 = vld [vmem:[%s9726_s1 + $0x308] sm:$0xff]  ;;  %v9306_v57 = vld [vmem:[%s8094_s6 + $0x78] sm:$0xff]  ;;  %vm9319_vm13 = vcmp.lt.s32.totalorder %v291_v9, 15  ;;  %v10109_v9 = vld [vmem:[#allocation46_spill] sm:$0xff] }
  0xc8   : > { %7337 = vmatprep.subr.bf16.mxu0 %v7336_v39  ;;  %7625 = vmatprep.subr.bf16.mxu1 %v7336_v39 }
  0xc9   : > { %6419 = vmatmul.mubr.f32.gmra.mrb[12].mxu0 %v9284_v34  ;;  %6923 = vmatmul.mubr.f32.gmra.mrb[12].mxu1 %v9288_v11  ;;  %v9302_v34 = vld [vmem:[%s8094_s6 + $0xf0] sm:$0xff]  ;;  %v7344_v11 = vpack.c.bf16 %v5327_v27, %v5326_v0  ;;  %v10105_v27 = vmov 0  ;;  %s211_s6 = scalar_lea.vmem %s9728_s3, %s10212_s16 }
  0xca   : > { %7339 = vmatpush3.bf16.msra.mxu0 %v7336_v39  ;;  %7627 = vmatpush3.bf16.msra.mxu1 %v7336_v39  ;;  %v5328_v39 = vld [vmem:[%s9726_s1 + $0x310] sm:$0xff]  ;;  %v10106_v27 = vsel %vm9319_vm13, 4294967295, %v10105_v27 }
  0xcb   : > { %6421 = vmatprep.mubr.f32.mxu0 %v9298_v24  ;;  %6925 = vmatprep.mubr.f32.mxu1 %v9302_v34  ;;  %v7348_v0 = vpack.c.bf16 %v5329_v19, %v5328_v39  ;;  %v10110_v39 = vld [vmem:[#allocation44_spill] sm:$0xff] }
  0xcc   : > { %7341 = vmatprep.subr.bf16.mxu0 %v7340_v6  ;;  %7629 = vmatprep.subr.bf16.mxu1 %v7340_v6  ;;  %v5332_v19 = vld [vmem:[%s9726_s1 + $0x330] sm:$0xff] }
  0xcd   : > { %6422 = vmatmul.mubr.f32.gmra.mrb[14].mxu0 %v9306_v57  ;;  %6926 = vmatmul.mubr.f32.gmra.mrb[14].mxu1 %v9310_v20 }
  0xce   : > { %7343 = vmatpush3.bf16.msra.mxu0 %v7340_v6  ;;  %7631 = vmatpush3.bf16.msra.mxu1 %v7340_v6  ;;  %v5330_v6 = vld [vmem:[%s9726_s1 + $0x320] sm:$0xff] }
  0xcf   : > { %6456 = vmatprep.mubr.f32.mxu0 %v8711_v16  ;;  %6960 = vmatprep.mubr.f32.mxu1 %v8718_v58  ;;  %v5331_v16 = vld [vmem:[%s9726_s1 + $0x328] sm:$0xff]  ;;  %v5334_v58 = vld [vmem:[%s9726_s1 + $0x340] sm:$0xff] }
  0xd0   : > { %7345 = vmatprep.subr.bf16.mxu0 %v7344_v11  ;;  %7633 = vmatprep.subr.bf16.mxu1 %v7344_v11 }
  0xd1   : > { %6457 = vmatmul.mubr.msk.f32.vlgmr.msra.gmra.mrb[0].mxu0 %vm9319_vm13, %v8722_v8  ;;  %6961 = vmatmul.mubr.msk.f32.vlgmr.msra.gmra.mrb[0].mxu1 %vm10107_vm10, %v8732_v33  ;;  %v7352_v8 = vpack.c.bf16 %v5331_v16, %v5330_v6  ;;  %vm10108_vm10 = vnez %v9978_v41  ;;  %vm10111_vm13 = vnez %v10110_v39  ;;  %v10112_v16 = vld [vmem:[#allocation45_spill] sm:$0xff]  ;;  %v10114_v33 = vld [vmem:[#allocation47_spill] sm:$0xff] }
  0xd2   : > { %7347 = vmatpush3.bf16.msra.mxu0 %v7344_v11  ;;  %7635 = vmatpush3.bf16.msra.mxu1 %v7344_v11  ;;  %v5333_v11 = vld [vmem:[%s9726_s1 + $0x338] sm:$0xff] }
  0xd3   : > { %6459 = vmatprep.mubr.f32.mxu0 %v8755_v47  ;;  %6963 = vmatprep.mubr.f32.mxu1 %v8761_v31  ;;  %v7356_v6 = vpack.c.bf16 %v5333_v11, %v5332_v19  ;;  %v10117_v11 = vld [vmem:[#allocation49_spill] sm:$0xff] }
  0xd4   : > { %7349 = vmatprep.subr.bf16.mxu0 %v7348_v0  ;;  %7637 = vmatprep.subr.bf16.mxu1 %v7348_v0 }
  0xd5   : > { %6460 = vmatmul.mubr.msk.f32.gmra.mrb[2].mxu0 %vm10108_vm10, %v8765_v13  ;;  %6964 = vmatmul.mubr.msk.f32.gmra.mrb[2].mxu1 %vm10111_vm13, %v10109_v9  ;;  %vm10113_vm13 = vnez %v10112_v16  ;;  %vm10115_vm10 = vnez %v10114_v33  ;;  %v5336_v33 = vld [vmem:[%s9726_s1 + $0x350] sm:$0xff] }
  0xd6   : > { %7351 = vmatpush3.bf16.msra.mxu0 %v7348_v0  ;;  %7639 = vmatpush3.bf16.msra.mxu1 %v7348_v0  ;;  %v5335_v0 = vld [vmem:[%s9726_s1 + $0x348] sm:$0xff] }
  0xd7   : > { %6462 = vmatprep.mubr.f32.mxu0 %v8799_v42  ;;  %6966 = vmatprep.mubr.f32.mxu1 %v8803_v54  ;;  %v7360_v19 = vpack.c.bf16 %v5335_v0, %v5334_v58  ;;  %v10119_v0 = vld [vmem:[#allocation50_spill] sm:$0xff] }
  0xd8   : > { %7353 = vmatprep.subr.bf16.mxu0 %v7352_v8  ;;  %7641 = vmatprep.subr.bf16.mxu1 %v7352_v8 }
  0xd9   : > { %6463 = vmatmul.mubr.msk.f32.gmra.mrb[4].mxu0 %vm10113_vm13, %v8807_v37  ;;  %6967 = vmatmul.mubr.msk.f32.gmra.mrb[4].mxu1 %vm10115_vm10, %v8824_v46  ;;  %vm10116_vm10 = vnez %v9995_v55  ;;  %vm10118_vm13 = vnez %v10117_v11  ;;  %v10120_v11 = vld [vmem:[#allocation51_spill] sm:$0xff]  ;;  %v5338_v55 = vld [vmem:[%s9726_s1 + $0x360] sm:$0xff] }
  0xda   : > { %7355 = vmatpush3.bf16.msra.mxu0 %v7352_v8  ;;  %7643 = vmatpush3.bf16.msra.mxu1 %v7352_v8  ;;  %v5337_v8 = vld [vmem:[%s9726_s1 + $0x358] sm:$0xff] }
  0xdb   : > { %6465 = vmatprep.mubr.f32.mxu0 %v8846_v63  ;;  %6969 = vmatprep.mubr.f32.mxu1 %v8850_v21  ;;  %v7364_v58 = vpack.c.bf16 %v5337_v8, %v5336_v33  ;;  %v5340_v8 = vld [vmem:[%s9726_s1 + $0x370] sm:$0xff] }
  0xdc   : > { %7357 = vmatprep.subr.bf16.mxu0 %v7356_v6  ;;  %7645 = vmatprep.subr.bf16.mxu1 %v7356_v6 }
  0xdd   : > { %6466 = vmatmul.mubr.msk.f32.gmra.mrb[6].mxu0 %vm10116_vm10, %v8860_v3  ;;  %6970 = vmatmul.mubr.msk.f32.gmra.mrb[6].mxu1 %vm10118_vm13, %v8880_v60  ;;  %vm10121_vm13 = vnez %v10120_v11 }
  0xde   : > { %7359 = vmatpush3.bf16.msra.mxu0 %v7356_v6  ;;  %7647 = vmatpush3.bf16.msra.mxu1 %v7356_v6  ;;  %v5339_v6 = vld [vmem:[%s9726_s1 + $0x368] sm:$0xff] }
  0xdf   : > { %6468 = vmatprep.mubr.f32.mxu0 %v8887_v7  ;;  %6972 = vmatprep.mubr.f32.mxu1 %v8891_v40  ;;  %v7368_v33 = vpack.c.bf16 %v5339_v6, %v5338_v55  ;;  %v10124_v6 = vld [vmem:[#allocation54_spill] sm:$0xff] }
  0xe0   : > { %7361 = vmatprep.subr.bf16.mxu0 %v7360_v19  ;;  %7649 = vmatprep.subr.bf16.mxu1 %v7360_v19 }
  0xe1   : > { %6469 = vmatmul.mubr.msk.f32.gmra.mrb[8].mxu0 %vm8870_vm15, %v8895_v1  ;;  %6973 = vmatmul.mubr.msk.f32.gmra.mrb[8].mxu1 %vm10121_vm13, %v8921_v15  ;;  %vm10122_vm13 = vnez %v10012_v35  ;;  %vm10123_vm15 = vnez %v10015_v14  ;;  %v10126_v14 = vld [vmem:[#allocation55_spill] sm:$0xff]  ;;  %v5350_v35 = vld [vmem:[%s9726_s1 + $0x380] sm:$0xff] }
  0xe2   : > { %7363 = vmatpush3.bf16.msra.mxu0 %v7360_v19  ;;  %7651 = vmatpush3.bf16.msra.mxu1 %v7360_v19  ;;  %v5341_v19 = vld [vmem:[%s9726_s1 + $0x378] sm:$0xff] }
  0xe3   : > { %6471 = vmatprep.mubr.f32.mxu0 %v8931_v52  ;;  %6975 = vmatprep.mubr.f32.mxu1 %v8935_v18  ;;  %v7372_v55 = vpack.c.bf16 %v5341_v19, %v5340_v8  ;;  %v10129_v8 = vld [vmem:[#allocation38_spill] sm:$0xff] }
  0xe4   : > { %7365 = vmatprep.subr.bf16.mxu0 %v7364_v58  ;;  %7653 = vmatprep.subr.bf16.mxu1 %v7364_v58 }
  0xe5   : > { %6472 = vmatmul.mubr.msk.f32.gmra.mrb[10].mxu0 %vm10122_vm13, %v8951_v53  ;;  %6976 = vmatmul.mubr.msk.f32.gmra.mrb[10].mxu1 %vm10123_vm15, %v8965_v61  ;;  %vm10125_vm15 = vnez %v10124_v6  ;;  %vm10127_vm13 = vnez %v10126_v14  ;;  %v10130_v6 = vld [vmem:[#allocation41_spill] sm:$0xff]  ;;  %v10131_v14 = vld [vmem:[#allocation40_spill] sm:$0xff] }
  0xe6   : > { %7367 = vmatpush3.bf16.msra.mxu0 %v7364_v58  ;;  %7655 = vmatpush3.bf16.msra.mxu1 %v7364_v58  ;;  %v5351_v58 = vld [vmem:[%s9726_s1 + $0x388] sm:$0xff] }
  0xe7   : > { %6474 = vmatprep.mubr.f32.mxu0 %v8971_v45  ;;  %6978 = vmatprep.mubr.f32.mxu1 %v8975_v49  ;;  %v10128_v49 = vld [vmem:[#allocation39_spill] sm:$0xff]  ;;  %v7376_v19 = vpack.c.bf16 %v5351_v58, %v5350_v35  ;;  %v5357_v58 = vld [vmem:[%s9726_s1 + $0x3b8] sm:$0xff] }
  0xe8   : > { %7369 = vmatprep.subr.bf16.mxu0 %v7368_v33  ;;  %7657 = vmatprep.subr.bf16.mxu1 %v7368_v33 }
  0xe9   : > { %6475 = vmatmul.mubr.msk.f32.gmra.mrb[12].mxu0 %vm10125_vm15, %v8998_v10  ;;  %6979 = vmatmul.mubr.msk.f32.gmra.mrb[12].mxu1 %vm10127_vm13, %v9008_v38  ;;  %v5352_v38 = vld [vmem:[%s9726_s1 + $0x390] sm:$0xff] }
  0xea   : > { %7371 = vmatpush3.bf16.msra.mxu0 %v7368_v33  ;;  %7659 = vmatpush3.bf16.msra.mxu1 %v7368_v33  ;;  %v5353_v33 = vld [vmem:[%s9726_s1 + $0x398] sm:$0xff] }
  0xeb   : > { %6477 = vmatprep.mubr.f32.mxu0 %v10128_v49  ;;  %6981 = vmatprep.mubr.f32.mxu1 %v10129_v8  ;;  %v7380_v35 = vpack.c.bf16 %v5353_v33, %v5352_v38  ;;  %v5360_v38 = vld [vmem:[%s9726_s1 + $0x3d0] sm:$0xff] }
  0xec   : > { %7373 = vmatprep.subr.bf16.mxu0 %v7372_v55  ;;  %7661 = vmatprep.subr.bf16.mxu1 %v7372_v55 }
  0xed   : > { %6478 = vmatmul.mubr.msk.f32.gmra.mrb[14].mxu0 %vm8990_vm0, %v10130_v6  ;;  %6982 = vmatmul.mubr.msk.f32.gmra.mrb[14].mxu1 %vm9000_vm14, %v10131_v14 }
  0xee   : > { %7375 = vmatpush3.bf16.msra.mxu0 %v7372_v55  ;;  %7663 = vmatpush3.bf16.msra.mxu1 %v7372_v55  ;;  %v5356_v55 = vld [vmem:[%s9726_s1 + $0x3b0] sm:$0xff] }
  0xef   : > { %6512 = vmatprep.mubr.msk.f32.mxu0 %vm9012_vm12, %v10039_v17  ;;  %7016 = vmatprep.mubr.msk.f32.mxu1 %vm8316_vm1, %v10041_v59  ;;  %v10133_v17 = vld [vmem:[#allocation17_spill] sm:$0xff]  ;;  %v7384_v59 = vpack.c.bf16 %v5355_v12, %v5354_v32  ;;  %v7388_v33 = vpack.c.bf16 %v5357_v58, %v5356_v55  ;;  %v5358_v12 = vld [vmem:[%s9726_s1 + $0x3c0] sm:$0xff] }
  0xf0   : > { %7377 = vmatprep.subr.bf16.mxu0 %v7376_v19  ;;  %7665 = vmatprep.subr.bf16.mxu1 %v7376_v19  ;;  %v10139_v32 = vld [vmem:[#allocation25_spill] sm:$0xff]  ;;  %v10147_v55 = vld [vmem:[#allocation34_spill] sm:$0xff] }
  0xf1   : > { %6513 = vmatmul.mubr.f32.vlgmr.msra.gmra.mrb[0].mxu0 %v10043_v44  ;;  %7017 = vmatmul.mubr.f32.vlgmr.msra.gmra.mrb[0].mxu1 %v10044_v4  ;;  %v10135_v44 = vld [vmem:[#allocation19_spill] sm:$0xff]  ;;  %v10136_v4 = vld [vmem:[#allocation20_spill] sm:$0xff]  ;;  %v5362_v58 = vld [vmem:[%s9726_s1 + $0x3e0] sm:$0xff] }
  0xf2   : > { %7379 = vmatpush3.bf16.msra.mxu0 %v7376_v19  ;;  %7667 = vmatpush3.bf16.msra.mxu1 %v7376_v19 }
  0xf3   : > { %6515 = vmatprep.mubr.msk.f32.mxu0 %vm8340_vm2, %v10045_v62  ;;  %7019 = vmatprep.mubr.msk.f32.mxu1 %vm8344_vm3, %v10133_v17  ;;  %v10143_v17 = vld [vmem:[#allocation30_spill] sm:$0xff]  ;;  %v5363_v62 = vld [vmem:[%s9726_s1 + $0x3e8] sm:$0xff] }
  0xf4   : > { %7381 = vmatprep.subr.bf16.mxu0 %v7380_v35  ;;  %7669 = vmatprep.subr.bf16.mxu1 %v7380_v35  ;;  %v7400_v19 = vpack.c.bf16 %v5363_v62, %v5362_v58  ;;  %v10166_v58 = vld [vmem:[#allocation24_spill] sm:$0xff]  ;;  %v5370_v62 = vld [vmem:[%s9726_s1 + $0x420] sm:$0xff] }
  0xf5   : > { %6516 = vmatmul.mubr.f32.gmra.mrb[2].mxu0 %v10135_v44  ;;  %7020 = vmatmul.mubr.f32.gmra.mrb[2].mxu1 %v10136_v4  ;;  %v10146_v4 = vld [vmem:[#allocation33_spill] sm:$0xff] }
  0xf6   : > { %7383 = vmatpush3.bf16.msra.mxu0 %v7380_v35  ;;  %7671 = vmatpush3.bf16.msra.mxu1 %v7380_v35  ;;  %v5359_v35 = vld [vmem:[%s9726_s1 + $0x3c8] sm:$0xff] }
  0xf7   : > { %6518 = vmatprep.mubr.msk.f32.mxu0 %vm8386_vm4, %v8486_v50  ;;  %7022 = vmatprep.mubr.msk.f32.mxu1 %vm8402_vm5, %v10051_v25  ;;  %v5366_v50 = vld [vmem:[%s9726_s1 + $0x400] sm:$0xff]  ;;  %v5367_v25 = vld [vmem:[%s9726_s1 + $0x408] sm:$0xff]  ;;  %vm10189_vm5 = vnez %v10106_v27 }
  0xf8   : > { %7385 = vmatprep.subr.bf16.mxu0 %v7384_v59  ;;  %7673 = vmatprep.subr.bf16.mxu1 %v7384_v59 }
  0xf9   : > { %6519 = vmatmul.mubr.f32.gmra.mrb[4].mxu0 %v10053_v51  ;;  %7023 = vmatmul.mubr.f32.gmra.mrb[4].mxu1 %v10139_v32  ;;  %v7392_v51 = vpack.c.bf16 %v5359_v35, %v5358_v12  ;;  %v5365_v32 = vld [vmem:[%s9726_s1 + $0x3f8] sm:$0xff]  ;;  %v10154_v12 = vld [vmem:[#allocation32_spill] sm:$0xff]  ;;  %v10157_v35 = vld [vmem:[#allocation11_spill] sm:$0xff] }
  0xfa   : > { %7387 = vmatpush3.bf16.msra.mxu0 %v7384_v59  ;;  %7675 = vmatpush3.bf16.msra.mxu1 %v7384_v59  ;;  %v5361_v59 = vld [vmem:[%s9726_s1 + $0x3d8] sm:$0xff]  ;;  %vm10155_vm3 = vnez %v10154_v12 }
  0xfb   : > { %6521 = vmatprep.mubr.msk.f32.mxu0 %vm8447_vm6, %v8525_v2  ;;  %7025 = vmatprep.mubr.msk.f32.mxu1 %vm8457_vm7, %v10056_v22  ;;  %v7396_v44 = vpack.c.bf16 %v5361_v59, %v5360_v38  ;;  %v10162_v38 = vld [vmem:[#allocation7_spill] sm:$0xff]  ;;  %v5368_v59 = vld [vmem:[%s9726_s1 + $0x410] sm:$0xff]  ;;  %v5369_v2 = vld [vmem:[%s9726_s1 + $0x418] sm:$0xff]  ;;  %vm10190_vm6 = vnez %v9972_v36  ;;  %vm10191_vm7 = vnez %v9978_v41 }
  0xfc   : > { %7389 = vmatprep.subr.bf16.mxu0 %v7388_v33  ;;  %7677 = vmatprep.subr.bf16.mxu1 %v7388_v33  ;;  %v10163_v22 = vld [vmem:[#allocation14_spill] sm:$0xff]  ;;  %v5373_v12 = vld [vmem:[%s9726_s1 + $0x438] sm:$0xff]  ;;  %v10194_v36 = vld [vmem:[#allocation47_spill] sm:$0xff] }
  0xfd   : > { %6522 = vmatmul.mubr.f32.gmra.mrb[6].mxu0 %v10142_v43  ;;  %7026 = vmatmul.mubr.f32.gmra.mrb[6].mxu1 %v10143_v17  ;;  %v10161_v43 = vmov 0.0   ;;  %v7408_v17 = vpack.c.bf16 %v5367_v25, %v5366_v50  ;;  %v10173_v50 = vld [vmem:[#allocation60_spill] sm:$0xff]  ;;  %v10174_v25 = vld [vmem:[#allocation61_spill] sm:$0xff]  ;;  %vm10195_vm12 = vnez %v10194_v36 }
  0xfe   : > { %7391 = vmatpush3.bf16.msra.mxu0 %v7388_v33  ;;  %7679 = vmatpush3.bf16.msra.mxu1 %v7388_v33  ;;  %v5364_v33 = vld [vmem:[%s9726_s1 + $0x3f0] sm:$0xff]  ;;  %v10197_v41 = vld [vmem:[#allocation49_spill] sm:$0xff] }
  0xff   : > { %6524 = vmatprep.mubr.msk.f32.mxu0 %vm8480_vm8, %v8568_v56  ;;  %7028 = vmatprep.mubr.msk.f32.mxu1 %vm8507_vm9, %v8589_v30  ;;  %v10148_v56 = vld [vmem:[#allocation26_spill] sm:$0xff]  ;;  %v10150_v30 = vld [vmem:[#allocation28_spill] sm:$0xff]  ;;  %vm10192_vm8 = vnez %v10110_v39  ;;  %vm10193_vm9 = vnez %v10112_v16  ;;  %vm10198_vm14 = vnez %v10197_v41 }
 0x100   : > { %7393 = vmatprep.subr.bf16.mxu0 %v7392_v51  ;;  %7681 = vmatprep.subr.bf16.mxu1 %v7392_v51  ;;  %vm10149_vm1 = vnez %v10148_v56  ;;  %vm10151_vm2 = vnez %v10150_v30  ;;  %v5371_v56 = vld [vmem:[%s9726_s1 + $0x428] sm:$0xff] }
 0x101   : > { %6525 = vmatmul.mubr.f32.gmra.mrb[8].mxu0 %v10146_v4  ;;  %7029 = vmatmul.mubr.f32.gmra.mrb[8].mxu1 %v10147_v55  ;;  %v7412_v4 = vpack.c.bf16 %v5369_v2, %v5368_v59  ;;  %v10165_v55 = vld [vmem:[#allocation22_spill] sm:$0xff]  ;;  %v10167_v30 = vld [vmem:[#allocation27_spill] sm:$0xff]  ;;  %v10177_v2 = vld [vmem:[#allocation64_spill] sm:$0xff] }
 0x102   : > { %7395 = vmatpush3.bf16.msra.mxu0 %v7392_v51  ;;  %7683 = vmatpush3.bf16.msra.mxu1 %v7392_v51  ;;  %v10159_v51 = vld [vmem:[#allocation35_spill] sm:$0xff] }
 0x103   : > { %6527 = vmatprep.mubr.msk.f32.mxu0 %vm10149_vm1, %v8623_v23  ;;  %7031 = vmatprep.mubr.msk.f32.mxu1 %vm10151_vm2, %v8637_v29  ;;  %v10153_v29 = vld [vmem:[#allocation9_spill] sm:$0xff]  ;;  %vm10160_vm4 = vnez %v10159_v51  ;;  %v10170_v23 = vld [vmem:[#allocation36_spill] sm:$0xff]  ;;  %v5375_v51 = vld [vmem:[%s9726_s1 + $0x448] sm:$0xff]  ;;  %vm10200_vm1 = vnez %v10120_v11 }
 0x104   : > { %7397 = vmatprep.subr.bf16.mxu0 %v7396_v44  ;;  %7685 = vmatprep.subr.bf16.mxu1 %v7396_v44 }
 0x105   : > { %6528 = vmatmul.mubr.f32.gmra.mrb[10].mxu0 %v8629_v48  ;;  %7032 = vmatmul.mubr.f32.gmra.mrb[10].mxu1 %v10071_v5  ;;  %v7404_v48 = vpack.c.bf16 %v5365_v32, %v5364_v33  ;;  %v10156_v5 = vld [vmem:[#allocation3_spill] sm:$0xff]  ;;  %v7416_v33 = vpack.c.bf16 %v5371_v56, %v5370_v62  ;;  %v10169_v32 = vld [vmem:[#allocation2_spill] sm:$0xff]  ;;  %v10181_v56 = vld [vmem:[#allocation68_spill] sm:$0xff] }
 0x106   : > { %7399 = vmatpush3.bf16.msra.mxu0 %v7396_v44  ;;  %7687 = vmatpush3.bf16.msra.mxu1 %v7396_v44  ;;  %v10164_v44 = vld [vmem:[#allocation15_spill] sm:$0xff] }
 0x107   : > { %6530 = vmatprep.mubr.msk.f32.mxu0 %vm10064_vm11, %v10072_v28  ;;  %7034 = vmatprep.mubr.msk.f32.mxu1 %vm10155_vm3, %v10153_v29  ;;  %v10158_v28 = vld [vmem:[#allocation6_spill] sm:$0xff]  ;;  %v5372_v29 = vld [vmem:[%s9726_s1 + $0x430] sm:$0xff]  ;;  %vm10199_vm11 = vnez %v10119_v0 }
 0x108   : > { %7401 = vmatprep.subr.bf16.mxu0 %v7400_v19  ;;  %7689 = vmatprep.subr.bf16.mxu1 %v7400_v19 }
 0x109   : > { %6531 = vmatmul.mubr.f32.gmra.mrb[12].mxu0 %v10156_v5  ;;  %7035 = vmatmul.mubr.f32.gmra.mrb[12].mxu1 %v10157_v35  ;;  %v10172_v5 = vld [vmem:[#allocation59_spill] sm:$0xff]  ;;  %v7420_v35 = vpack.c.bf16 %v5373_v12, %v5372_v29  ;;  %v10185_v12 = vld [vmem:[#allocation72_spill] sm:$0xff] }
 0x10a   : > { %7403 = vmatpush3.bf16.msra.mxu0 %v7400_v19  ;;  %7691 = vmatpush3.bf16.msra.mxu1 %v7400_v19  ;;  %v10168_v19 = vld [vmem:[#allocation37_spill] sm:$0xff] }
 0x10b   : > { %6533 = vmatprep.mubr.msk.f32.mxu0 %vm10160_vm4, %v10158_v28  ;;  %7037 = vmatprep.mubr.f32.mxu1 %v10161_v43  ;;  %v5374_v28 = vld [vmem:[%s9726_s1 + $0x440] sm:$0xff] }
 0x10c   : > { %7405 = vmatprep.subr.bf16.mxu0 %v7404_v48  ;;  %7693 = vmatprep.subr.bf16.mxu1 %v7404_v48  ;;  %v7424_v59 = vpack.c.bf16 %v5375_v51, %v5374_v28  ;;  %v10188_v28 = vld [vmem:[#allocation13_spill] sm:$0xff] }
 0x10d   : > { %6534 = vmatmul.mubr.f32.gmra.mrb[14].mxu0 %v10162_v38  ;;  %7038 = vmatmul.mubr.f32.gmra.mrb[14].mxu1 %v10161_v43  ;;  %v10176_v38 = vld [vmem:[#allocation63_spill] sm:$0xff] }
 0x10e   : > { %7407 = vmatpush3.bf16.msra.mxu0 %v7404_v48  ;;  %7695 = vmatpush3.bf16.msra.mxu1 %v7404_v48  ;;  %v10171_v48 = vld [vmem:[#allocation58_spill] sm:$0xff] }
 0x10f   : > { %6568 = vmatprep.mubr.f32.mxu0 %v10163_v22  ;;  %7072 = vmatprep.mubr.f32.mxu1 %v10164_v44  ;;  %v10178_v22 = vld [vmem:[#allocation65_spill] sm:$0xff]  ;;  %v5376_v44 = vld [vmem:[%s9726_s1 + $0x450] sm:$0xff] }
 0x110   : > { %7409 = vmatprep.subr.bf16.mxu0 %v7408_v17  ;;  %7697 = vmatprep.subr.bf16.mxu1 %v7408_v17 }
 0x111   : > { %6569 = vmatmul.mubr.f32.vlgmr.msra.gmra.mrb[0].mxu0 %v10165_v55  ;;  %7073 = vmatmul.mubr.f32.vlgmr.msra.gmra.mrb[0].mxu1 %v10166_v58  ;;  %v10179_v55 = vld [vmem:[#allocation66_spill] sm:$0xff]  ;;  %v10180_v58 = vld [vmem:[#allocation67_spill] sm:$0xff] }
 0x112   : > { %7411 = vmatpush3.bf16.msra.mxu0 %v7408_v17  ;;  %7699 = vmatpush3.bf16.msra.mxu1 %v7408_v17  ;;  %v10175_v17 = vld [vmem:[#allocation62_spill] sm:$0xff] }
 0x113   : > { %6571 = vmatprep.mubr.f32.mxu0 %v10167_v30  ;;  %7075 = vmatprep.mubr.f32.mxu1 %v10168_v19  ;;  %v10182_v30 = vld [vmem:[#allocation69_spill] sm:$0xff]  ;;  %v5378_v19 = vld [vmem:[%s9726_s1 + $0x460] sm:$0xff] }
 0x114   : > { %7413 = vmatprep.subr.bf16.mxu0 %v7412_v4  ;;  %7701 = vmatprep.subr.bf16.mxu1 %v7412_v4 }
 0x115   : > { %6572 = vmatmul.mubr.f32.gmra.mrb[2].mxu0 %v10169_v32  ;;  %7076 = vmatmul.mubr.f32.gmra.mrb[2].mxu1 %v10170_v23  ;;  %v10183_v32 = vld [vmem:[#allocation70_spill] sm:$0xff]  ;;  %v10184_v23 = vld [vmem:[#allocation71_spill] sm:$0xff] }
 0x116   : > { %7415 = vmatpush3.bf16.msra.mxu0 %v7412_v4  ;;  %7703 = vmatpush3.bf16.msra.mxu1 %v7412_v4  ;;  %v5377_v4 = vld [vmem:[%s9726_s1 + $0x458] sm:$0xff] }
 0x117   : > { %6574 = vmatprep.mubr.f32.mxu0 %v10171_v48  ;;  %7078 = vmatprep.mubr.f32.mxu1 %v10172_v5  ;;  %v7428_v62 = vpack.c.bf16 %v5377_v4, %v5376_v44  ;;  %v10186_v48 = vld [vmem:[#allocation73_spill] sm:$0xff]  ;;  %v5380_v5 = vld [vmem:[%s9726_s1 + $0x470] sm:$0xff] }
 0x118   : > { %7417 = vmatprep.subr.bf16.mxu0 %v7416_v33  ;;  %7705 = vmatprep.subr.bf16.mxu1 %v7416_v33 }
 0x119   : > { %6575 = vmatmul.mubr.f32.gmra.mrb[4].mxu0 %v10173_v50  ;;  %7079 = vmatmul.mubr.f32.gmra.mrb[4].mxu1 %v10174_v25  ;;  %v10187_v25 = vld [vmem:[#allocation12_spill] sm:$0xff] }
 0x11a   : > { %7419 = vmatpush3.bf16.msra.mxu0 %v7416_v33  ;;  %7707 = vmatpush3.bf16.msra.mxu1 %v7416_v33  ;;  %v5379_v33 = vld [vmem:[%s9726_s1 + $0x468] sm:$0xff] }
 0x11b   : > { %6577 = vmatprep.mubr.f32.mxu0 %v10175_v17  ;;  %7081 = vmatprep.mubr.f32.mxu1 %v10176_v38  ;;  %v7432_v29 = vpack.c.bf16 %v5379_v33, %v5378_v19 }
 0x11c   : > { %7421 = vmatprep.subr.bf16.mxu0 %v7420_v35  ;;  %7709 = vmatprep.subr.bf16.mxu1 %v7420_v35 }
 0x11d   : > { %6578 = vmatmul.mubr.f32.gmra.mrb[6].mxu0 %v10177_v2  ;;  %7082 = vmatmul.mubr.f32.gmra.mrb[6].mxu1 %v10178_v22 }
 0x11e   : > { %7423 = vmatpush3.bf16.msra.mxu0 %v7420_v35  ;;  %7711 = vmatpush3.bf16.msra.mxu1 %v7420_v35  ;;  %v5381_v35 = vld [vmem:[%s9726_s1 + $0x478] sm:$0xff] }
 0x11f   : > { %6580 = vmatprep.mubr.f32.mxu0 %v10179_v55  ;;  %7084 = vmatprep.mubr.f32.mxu1 %v10180_v58  ;;  %v7436_v50 = vpack.c.bf16 %v5381_v35, %v5380_v5 }
 0x120   : > { %7425 = vmatprep.subr.bf16.mxu0 %v7424_v59  ;;  %7713 = vmatprep.subr.bf16.mxu1 %v7424_v59 }
 0x121   : > { %6581 = vmatmul.mubr.f32.gmra.mrb[8].mxu0 %v10181_v56  ;;  %7085 = vmatmul.mubr.f32.gmra.mrb[8].mxu1 %v10182_v30 }
 0x122   : > { %7427 = vmatpush3.bf16.msra.mxu0 %v7424_v59  ;;  %7715 = vmatpush3.bf16.msra.mxu1 %v7424_v59 }
 0x123   : > { %6583 = vmatprep.mubr.f32.mxu0 %v10183_v32  ;;  %7087 = vmatprep.mubr.f32.mxu1 %v10184_v23 }
 0x124   : > { %7429 = vmatprep.subr.bf16.mxu0 %v7428_v62  ;;  %7717 = vmatprep.subr.bf16.mxu1 %v7428_v62 }
 0x125   : > { %6584 = vmatmul.mubr.f32.gmra.mrb[10].mxu0 %v10185_v12  ;;  %7088 = vmatmul.mubr.f32.gmra.mrb[10].mxu1 %v10186_v48 }
 0x126   : > { %7431 = vmatpush3.bf16.msra.mxu0 %v7428_v62  ;;  %7719 = vmatpush3.bf16.msra.mxu1 %v7428_v62 }
 0x127   : > { %6586 = vmatprep.mubr.f32.mxu0 %v9298_v24  ;;  %7090 = vmatprep.mubr.f32.mxu1 %v9302_v34 }
 0x128   : > { %7433 = vmatprep.subr.bf16.mxu0 %v7432_v29  ;;  %7721 = vmatprep.subr.bf16.mxu1 %v7432_v29 }
 0x129   : > { %6587 = vmatmul.mubr.f32.gmra.mrb[12].mxu0 %v9306_v57  ;;  %7091 = vmatmul.mubr.f32.gmra.mrb[12].mxu1 %v9310_v20 }
 0x12a   : > { %7435 = vmatpush3.bf16.msra.mxu0 %v7432_v29  ;;  %7723 = vmatpush3.bf16.msra.mxu1 %v7432_v29 }
 0x12b   : > { %6589 = vmatprep.mubr.f32.mxu0 %v10187_v25  ;;  %7093 = vmatprep.mubr.f32.mxu1 %v10161_v43 }
 0x12c   : > { %7437 = vmatprep.subr.bf16.mxu0 %v7436_v50  ;;  %7725 = vmatprep.subr.bf16.mxu1 %v7436_v50 }
 0x12d   : > { %6590 = vmatmul.mubr.f32.gmra.mrb[14].mxu0 %v10188_v28  ;;  %7094 = vmatmul.mubr.f32.gmra.mrb[14].mxu1 %v10161_v43 }
 0x12e   : > { %7439 = vmatpush3.bf16.msra.mxu0 %v7436_v50  ;;  %7727 = vmatpush3.bf16.msra.mxu1 %v7436_v50 }
 0x12f   : > { %6624 = vmatprep.mubr.f32.mxu0 %v8755_v47  ;;  %7128 = vmatprep.mubr.f32.mxu1 %v8761_v31  ;;  %v10201_v47 = vld [vmem:[#allocation56_spill] sm:$0xff] }
 0x130   : > { %v10202_v31 = vld [vmem:[#allocation52_spill] sm:$0xff] }
 0x131   : > { %6625 = vmatmul.mubr.msk.f32.vlgmr.msra.gmra.mrb[0].mxu0 %vm10189_vm5, %v8765_v13  ;;  %7129 = vmatmul.mubr.msk.f32.vlgmr.msra.gmra.mrb[0].mxu1 %vm10190_vm6, %v10109_v9  ;;  %v10204_v13 = vld [vmem:[#allocation57_spill] sm:$0xff] }
 0x132   : > { %6627 = vmatprep.mubr.f32.mxu0 %v8799_v42  ;;  %7131 = vmatprep.mubr.f32.mxu1 %v8803_v54  ;;  %v10205_v42 = vld [vmem:[#allocation53_spill] sm:$0xff] }
 0x133   : > { %vm10206_vm2 = vnez %v10205_v42 }
 0x135   : > { %6628 = vmatmul.mubr.msk.f32.gmra.mrb[2].mxu0 %vm10191_vm7, %v8807_v37  ;;  %7132 = vmatmul.mubr.msk.f32.gmra.mrb[2].mxu1 %vm10192_vm8, %v8824_v46  ;;  %v10209_v46 = vld [vmem:[#allocation42_spill] sm:$0xff] }
 0x136   : > { %6630 = vmatprep.mubr.f32.mxu0 %v8846_v63  ;;  %7134 = vmatprep.mubr.f32.mxu1 %v8850_v21  ;;  %v10210_v63 = vld [vmem:[#allocation43_spill] sm:$0xff] }
 0x139   : > { %6631 = vmatmul.mubr.msk.f32.gmra.mrb[4].mxu0 %vm10193_vm9, %v8860_v3  ;;  %7135 = vmatmul.mubr.msk.f32.gmra.mrb[4].mxu1 %vm10195_vm12, %v8880_v60 }
 0x13a   : > { %6633 = vmatprep.mubr.f32.mxu0 %v8887_v7  ;;  %7137 = vmatprep.mubr.f32.mxu1 %v8891_v40 }
 0x13d   : > { %6634 = vmatmul.mubr.msk.f32.gmra.mrb[6].mxu0 %vm10116_vm10, %v8895_v1  ;;  %7138 = vmatmul.mubr.msk.f32.gmra.mrb[6].mxu1 %vm10198_vm14, %v8921_v15  ;;  %vm10203_vm10 = vnez %v10202_v31 }
 0x13e   : > { %6636 = vmatprep.mubr.f32.mxu0 %v8931_v52  ;;  %7140 = vmatprep.mubr.f32.mxu1 %v8935_v18 }
 0x141   : > { %6637 = vmatmul.mubr.msk.f32.gmra.mrb[8].mxu0 %vm10199_vm11, %v8951_v53  ;;  %7141 = vmatmul.mubr.msk.f32.gmra.mrb[8].mxu1 %vm10200_vm1, %v8965_v61 }
 0x142   : > { %6639 = vmatprep.mubr.f32.mxu0 %v8971_v45  ;;  %7143 = vmatprep.mubr.f32.mxu1 %v10201_v47 }
 0x145   : > { %6640 = vmatmul.mubr.msk.f32.gmra.mrb[10].mxu0 %vm10203_vm10, %v8998_v10  ;;  %7144 = vmatmul.mubr.msk.f32.gmra.mrb[10].mxu1 %vm10206_vm2, %v10204_v13 }
 0x146   : > { %6642 = vmatprep.mubr.f32.mxu0 %v10128_v49  ;;  %7146 = vmatprep.mubr.f32.mxu1 %v10129_v8 }
 0x149   : > { %6643 = vmatmul.mubr.msk.f32.gmra.mrb[12].mxu0 %vm10125_vm15, %v10130_v6  ;;  %7147 = vmatmul.mubr.msk.f32.gmra.mrb[12].mxu1 %vm10127_vm13, %v10131_v14 }
 0x14a   : > { %6645 = vmatprep.mubr.f32.mxu0 %v10209_v46  ;;  %7149 = vmatprep.mubr.f32.mxu1 %v10161_v43 }
 0x14d   : > { %6646 = vmatmul.mubr.msk.f32.gmra.mrb[14].mxu0 %vm8990_vm0, %v10210_v63  ;;  %7150 = vmatmul.mubr.f32.gmra.mrb[14].mxu1 %v10161_v43 }
 0x204   : > { %v6626_v21 = vpop.f32.mrb[0].mxu0  ;;  %v7130_v3 = vpop.f32.mrb[0].mxu1 }
 0x205   : > { %3388 = vst [vmem:[%s9680_s19 + $0x8] sm:$0xff] %v6626_v21  ;;  %v3426_v60 = vmul.f32 %v6626_v21, %v6626_v21  ;;  %5025 = vst [vmem:[%s9680_s19 + $0x88] sm:$0xff] %v7130_v3  ;;  %v5063_v7 = vmul.f32 %v7130_v3, %v7130_v3  ;;  %v3292_v40 = vpop.f32.mrb[1].mxu0  ;;  %v4929_v1 = vpop.f32.mrb[1].mxu1 }
 0x206   : > { %3387 = vst [vmem:[%s9680_s19] sm:$0xff] %v3292_v40  ;;  %v3403_v14 = vadd.f32 %v6626_v21, %v3292_v40  ;;  %v3425_v15 = vmul.f32 %v3292_v40, %v3292_v40  ;;  %5024 = vst [vmem:[%s9680_s19 + $0x80] sm:$0xff] %v4929_v1  ;;  %v5040_v52 = vadd.f32 %v7130_v3, %v4929_v1 }
 0x207   : > { %v5062_v18 = vmul.f32 %v4929_v1, %v4929_v1 }
 0x208   : > { %v3441_v53 = vadd.f32 %v3426_v60, %v3425_v15  ;;  %v6629_v45 = vpop.f32.mrb[2].mxu0  ;;  %v7133_v49 = vpop.f32.mrb[2].mxu1 }
 0x209   : > { %v5078_v61 = vadd.f32 %v5063_v7, %v5062_v18  ;;  %3390 = vst [vmem:[%s9680_s19 + $0x18] sm:$0xff] %v6629_v45  ;;  %5027 = vst [vmem:[%s9680_s19 + $0x98] sm:$0xff] %v7133_v49  ;;  %v3302_v26 = vpop.f32.mrb[3].mxu0  ;;  %v4939_v10 = vpop.f32.mrb[3].mxu1  ;;  %v3428_v9 = vmul.f32 %v6629_v45, %v6629_v45  ;;  %v5065_v43 = vmul.f32 %v7133_v49, %v7133_v49 }
 0x20a   : > { %3389 = vst [vmem:[%s9680_s19 + $0x10] sm:$0xff] %v3302_v26  ;;  %v3404_v34 = vadd.f32 %v3403_v14, %v3302_v26  ;;  %v3427_v57 = vmul.f32 %v3302_v26, %v3302_v26  ;;  %5026 = vst [vmem:[%s9680_s19 + $0x90] sm:$0xff] %v4939_v10  ;;  %v5041_v24 = vadd.f32 %v5040_v52, %v4939_v10 }
 0x20b   : > { %v5064_v27 = vmul.f32 %v4939_v10, %v4939_v10 }
 0x20c   : > { %v3442_v39 = vadd.f32 %v3441_v53, %v3427_v57  ;;  %v6632_v11 = vpop.f32.mrb[4].mxu0  ;;  %v7136_v0 = vpop.f32.mrb[4].mxu1  ;;  %v3405_v6 = vadd.f32 %v6629_v45, %v3404_v34  ;;  %v5042_v8 = vadd.f32 %v7133_v49, %v5041_v24 }
 0x20d   : > { %v5079_v16 = vadd.f32 %v5078_v61, %v5064_v27  ;;  %3392 = vst [vmem:[%s9680_s19 + $0x28] sm:$0xff] %v6632_v11  ;;  %5029 = vst [vmem:[%s9680_s19 + $0xa8] sm:$0xff] %v7136_v0  ;;  %v3312_v51 = vpop.f32.mrb[5].mxu0  ;;  %v4949_v17 = vpop.f32.mrb[5].mxu1  ;;  %v3430_v55 = vmul.f32 %v6632_v11, %v6632_v11  ;;  %v5067_v33 = vmul.f32 %v7136_v0, %v7136_v0 }
 0x20e   : > { %3391 = vst [vmem:[%s9680_s19 + $0x20] sm:$0xff] %v3312_v51  ;;  %v3406_v38 = vadd.f32 %v3405_v6, %v3312_v51  ;;  %v3429_v59 = vmul.f32 %v3312_v51, %v3312_v51  ;;  %v3443_v2 = vadd.f32 %v3442_v39, %v3428_v9  ;;  %5028 = vst [vmem:[%s9680_s19 + $0xa0] sm:$0xff] %v4949_v17 }
 0x20f   : > { %v5043_v22 = vadd.f32 %v5042_v8, %v4949_v17  ;;  %v5066_v44 = vmul.f32 %v4949_v17, %v4949_v17  ;;  %v5080_v4 = vadd.f32 %v5079_v16, %v5065_v43 }
 0x210   : > { %v3444_v58 = vadd.f32 %v3443_v2, %v3429_v59  ;;  %v6635_v62 = vpop.f32.mrb[6].mxu0  ;;  %v7139_v56 = vpop.f32.mrb[6].mxu1  ;;  %v3407_v30 = vadd.f32 %v6632_v11, %v3406_v38 }
 0x211   : > { %v5044_v19 = vadd.f32 %v7136_v0, %v5043_v22  ;;  %v5081_v32 = vadd.f32 %v5080_v4, %v5066_v44  ;;  %3394 = vst [vmem:[%s9680_s19 + $0x38] sm:$0xff] %v6635_v62  ;;  %5031 = vst [vmem:[%s9680_s19 + $0xb8] sm:$0xff] %v7139_v56  ;;  %v3322_v23 = vpop.f32.mrb[7].mxu0  ;;  %v4959_v29 = vpop.f32.mrb[7].mxu1  ;;  %v3432_v28 = vmul.f32 %v6635_v62, %v6635_v62 }
 0x212   : > { %3393 = vst [vmem:[%s9680_s19 + $0x30] sm:$0xff] %v3322_v23  ;;  %v3408_v12 = vadd.f32 %v3407_v30, %v3322_v23  ;;  %v3431_v48 = vmul.f32 %v3322_v23, %v3322_v23  ;;  %v3445_v5 = vadd.f32 %v3444_v58, %v3430_v55  ;;  %5030 = vst [vmem:[%s9680_s19 + $0xb0] sm:$0xff] %v4959_v29 }
 0x213   : > { %v5045_v35 = vadd.f32 %v5044_v19, %v4959_v29  ;;  %v5068_v50 = vmul.f32 %v4959_v29, %v4959_v29  ;;  %v5082_v25 = vadd.f32 %v5081_v32, %v5067_v33  ;;  %v5069_v13 = vmul.f32 %v7139_v56, %v7139_v56 }
 0x214   : > { %v3446_v36 = vadd.f32 %v3445_v5, %v3431_v48  ;;  %v6638_v20 = vpop.f32.mrb[8].mxu0  ;;  %v7142_v41 = vpop.f32.mrb[8].mxu1  ;;  %v3409_v47 = vadd.f32 %v6635_v62, %v3408_v12 }
 0x215   : > { %v5046_v31 = vadd.f32 %v7139_v56, %v5045_v35  ;;  %v5083_v42 = vadd.f32 %v5082_v25, %v5068_v50  ;;  %3396 = vst [vmem:[%s9680_s19 + $0x48] sm:$0xff] %v6638_v20  ;;  %5033 = vst [vmem:[%s9680_s19 + $0xc8] sm:$0xff] %v7142_v41  ;;  %v3332_v54 = vpop.f32.mrb[9].mxu0  ;;  %v4969_v37 = vpop.f32.mrb[9].mxu1  ;;  %v3434_v40 = vmul.f32 %v6638_v20, %v6638_v20 }
 0x216   : > { %3395 = vst [vmem:[%s9680_s19 + $0x40] sm:$0xff] %v3332_v54  ;;  %v3410_v46 = vadd.f32 %v3409_v47, %v3332_v54  ;;  %v3433_v63 = vmul.f32 %v3332_v54, %v3332_v54  ;;  %v3447_v21 = vadd.f32 %v3446_v36, %v3432_v28  ;;  %5032 = vst [vmem:[%s9680_s19 + $0xc0] sm:$0xff] %v4969_v37 }
 0x217   : > { %v5047_v3 = vadd.f32 %v5046_v31, %v4969_v37  ;;  %v5070_v60 = vmul.f32 %v4969_v37, %v4969_v37  ;;  %v5084_v7 = vadd.f32 %v5083_v42, %v5069_v13  ;;  %v5071_v53 = vmul.f32 %v7142_v41, %v7142_v41 }
 0x218   : > { %v3448_v1 = vadd.f32 %v3447_v21, %v3433_v63  ;;  %v6641_v14 = vpop.f32.mrb[10].mxu0  ;;  %v7145_v15 = vpop.f32.mrb[10].mxu1  ;;  %v3411_v52 = vadd.f32 %v6638_v20, %v3410_v46 }
 0x219   : > { %v5048_v18 = vadd.f32 %v7142_v41, %v5047_v3  ;;  %v5085_v61 = vadd.f32 %v5084_v7, %v5070_v60  ;;  %3398 = vst [vmem:[%s9680_s19 + $0x58] sm:$0xff] %v6641_v14  ;;  %5035 = vst [vmem:[%s9680_s19 + $0xd8] sm:$0xff] %v7145_v15  ;;  %v3342_v45 = vpop.f32.mrb[11].mxu0  ;;  %v4979_v49 = vpop.f32.mrb[11].mxu1  ;;  %v3436_v9 = vmul.f32 %v6641_v14, %v6641_v14 }
 0x21a   : > { %3397 = vst [vmem:[%s9680_s19 + $0x50] sm:$0xff] %v3342_v45  ;;  %v3412_v26 = vadd.f32 %v3411_v52, %v3342_v45  ;;  %v3435_v10 = vmul.f32 %v3342_v45, %v3342_v45  ;;  %v3449_v34 = vadd.f32 %v3448_v1, %v3434_v40  ;;  %5034 = vst [vmem:[%s9680_s19 + $0xd0] sm:$0xff] %v4979_v49 }
 0x21b   : > { %v5049_v57 = vadd.f32 %v5048_v18, %v4979_v49  ;;  %v5072_v24 = vmul.f32 %v4979_v49, %v4979_v49  ;;  %v5086_v27 = vadd.f32 %v5085_v61, %v5071_v53  ;;  %v5073_v8 = vmul.f32 %v7145_v15, %v7145_v15 }
 0x21c   : > { %v3450_v39 = vadd.f32 %v3449_v34, %v3435_v10  ;;  %v6644_v16 = vpop.f32.mrb[12].mxu0  ;;  %v7148_v11 = vpop.f32.mrb[12].mxu1  ;;  %v3413_v0 = vadd.f32 %v6641_v14, %v3412_v26 }
 0x21d   : > { %v5050_v6 = vadd.f32 %v7145_v15, %v5049_v57  ;;  %v5087_v43 = vadd.f32 %v5086_v27, %v5072_v24  ;;  %3400 = vst [vmem:[%s9680_s19 + $0x68] sm:$0xff] %v6644_v16  ;;  %5037 = vst [vmem:[%s9680_s19 + $0xe8] sm:$0xff] %v7148_v11  ;;  %v3352_v51 = vpop.f32.mrb[13].mxu0  ;;  %v4989_v17 = vpop.f32.mrb[13].mxu1  ;;  %v3438_v55 = vmul.f32 %v6644_v16, %v6644_v16 }
 0x21e   : > { %3399 = vst [vmem:[%s9680_s19 + $0x60] sm:$0xff] %v3352_v51  ;;  %v3414_v38 = vadd.f32 %v3413_v0, %v3352_v51  ;;  %v3437_v59 = vmul.f32 %v3352_v51, %v3352_v51  ;;  %v3451_v2 = vadd.f32 %v3450_v39, %v3436_v9  ;;  %5036 = vst [vmem:[%s9680_s19 + $0xe0] sm:$0xff] %v4989_v17 }
 0x21f   : > { %v5051_v22 = vadd.f32 %v5050_v6, %v4989_v17  ;;  %v5074_v44 = vmul.f32 %v4989_v17, %v4989_v17  ;;  %v5088_v4 = vadd.f32 %v5087_v43, %v5073_v8  ;;  %v5075_v33 = vmul.f32 %v7148_v11, %v7148_v11 }
 0x220   : > { %v3452_v58 = vadd.f32 %v3451_v2, %v3437_v59  ;;  %v6647_v62 = vpop.f32.mrb[14].mxu0  ;;  %v7151_v56 = vpop.f32.mrb[14].mxu1  ;;  %v3415_v30 = vadd.f32 %v6644_v16, %v3414_v38 }
 0x221   : > { %v5052_v19 = vadd.f32 %v7148_v11, %v5051_v22  ;;  %v5089_v32 = vadd.f32 %v5088_v4, %v5074_v44  ;;  %3402 = vst [vmem:[%s9680_s19 + $0x78] sm:$0xff] %v6647_v62  ;;  %5039 = vst [vmem:[%s9680_s19 + $0xf8] sm:$0xff] %v7151_v56  ;;  %v3362_v23 = vpop.f32.mrb[15].mxu0  ;;  %v4999_v29 = vpop.f32.mrb[15].mxu1  ;;  %v3440_v28 = vmul.f32 %v6647_v62, %v6647_v62 }
 0x222   : > { %3401 = vst [vmem:[%s9680_s19 + $0x70] sm:$0xff] %v3362_v23  ;;  %v3416_v12 = vadd.f32 %v3415_v30, %v3362_v23  ;;  %v3439_v48 = vmul.f32 %v3362_v23, %v3362_v23  ;;  %v3453_v5 = vadd.f32 %v3452_v58, %v3438_v55  ;;  %5038 = vst [vmem:[%s9680_s19 + $0xf0] sm:$0xff] %v4999_v29 }
 0x223   : > { %v5053_v35 = vadd.f32 %v5052_v19, %v4999_v29  ;;  %v5076_v50 = vmul.f32 %v4999_v29, %v4999_v29  ;;  %v5090_v25 = vadd.f32 %v5089_v32, %v5075_v33  ;;  %v5077_v47 = vmul.f32 %v7151_v56, %v7151_v56 }
 0x224   : > { %v3417_v36 = vadd.f32 %v6647_v62, %v3416_v12  ;;  %v3454_v20 = vadd.f32 %v3453_v5, %v3439_v48 }
 0x225   : > { %v5054_v41 = vadd.f32 %v7151_v56, %v5053_v35  ;;  %v5091_v31 = vadd.f32 %v5090_v25, %v5076_v50 }
 0x226   : > { %v3418_v13 = vrot.slane %v3417_v36, 4  ;;  %v3455_v42 = vadd.f32 %v3454_v20, %v3440_v28 }
 0x227   : > { %v5055_v54 = vrot.slane %v5054_v41, 4  ;;  %v5092_v37 = vadd.f32 %v5091_v31, %v5077_v47 }
 0x228   : > { %v3419_v46 = vadd.f32 %v3418_v13, %v3417_v36  ;;  %v3456_v63 = vrot.slane %v3455_v42, 4 }
 0x229   : > { %v5056_v21 = vadd.f32 %v5055_v54, %v5054_v41  ;;  %v5093_v3 = vrot.slane %v5092_v37, 4 }
 0x22a   : > { %v3420_v60 = vrot.slane %v3419_v46, 2  ;;  %v3457_v7 = vadd.f32 %v3456_v63, %v3455_v42 }
 0x22b   : > { %v5057_v40 = vrot.slane %v5056_v21, 2  ;;  %v5094_v1 = vadd.f32 %v5093_v3, %v5092_v37 }
 0x22c   : > { %v3421_v14 = vadd.f32 %v3420_v60, %v3419_v46  ;;  %v3458_v15 = vrot.slane %v3457_v7, 2 }
 0x22d   : > { %v5058_v52 = vadd.f32 %v5057_v40, %v5056_v21  ;;  %v5095_v18 = vrot.slane %v5094_v1, 2 }
 0x22e   : > { %v3422_v53 = vrot.slane %v3421_v14, 1  ;;  %v3459_v61 = vadd.f32 %v3458_v15, %v3457_v7 }
 0x22f   : > { %v5059_v45 = vrot.slane %v5058_v52, 1  ;;  %v5096_v49 = vadd.f32 %v5095_v18, %v5094_v1 }
 0x230   : > { %v3423_v26 = vadd.f32 %v3422_v53, %v3421_v14  ;;  %v3460_v10 = vrot.slane %v3459_v61, 1 }
 0x231   : > { %v5060_v34 = vadd.f32 %v5059_v45, %v5058_v52  ;;  %v5097_v57 = vrot.slane %v5096_v49, 1 }
 0x232   : > { %v3461_v24 = vadd.f32 %v3460_v10, %v3459_v61 }
 0x233   : > { %v5061_v27 = vadd.f32 %v5060_v34, %v3423_v26  ;;  %v5098_v9 = vadd.f32 %v5097_v57, %v5096_v49 }
 0x235   : > { %5100 = vst [vmem:[%s211_s6] sm:$0x1] %v5061_v27  ;;  %v5099_v39 = vadd.f32 %v5098_v9, %v3461_v24 }
 0x237   : > { %5101 = vst [vmem:[%s214_s23] sm:$0x1] %v5099_v39 }
 0x238 PF: > { %s15_s15 = sadd.s32 1, %s8031_s15  }
 0x239   : > { %p12_p4 = scmp.ge.s32.totalorder %s15_s15, 4  }
 0x23b   :  { %14 = sbr.rel (!%p12_p4) target bundleno = 1 (0x1), region = 90 }

// kernel: double_conv_2d.4
= control target key start
LH: loop header
LB: loop body
LE: loop exit
PB: predicated region body
PF: predicated region fallthrough
CT: control target
= control target key end

     0   :  { %s8203_s21 = smov 0   ;;  %s9853_s0 = inlined_call_operand.vmem [shape: f32[2,256,128], index: 0, kind: input, shape index: {}]   ;;  %s9854_s1 = inlined_call_operand.vmem [shape: f32[1,128], index: 1, kind: input, shape index: {}]   ;;  %s9855_s2 = inlined_call_operand.vmem [shape: f32[1,128], index: 2, kind: input, shape index: {}]   ;;  %s9856_s3 = inlined_call_operand.vmem [shape: f32[9,128,128], index: 3, kind: input, shape index: {}]   ;;  %s9857_s4 = inlined_call_operand.vmem [shape: f32[2,256,128], index: 4, kind: output, shape index: {0}]   ;;  %s9858_s5 = inlined_call_operand.vmem [shape: f32[2,1,128], index: 5, kind: output, shape index: {1}]   ;;  %s9859_s6 = inlined_call_operand.vmem [shape: f32[2,1,128], index: 6, kind: output, shape index: {2}]  }
   0x1 LB: > { %s5371_s22 = sadd.s32 4294967295, %s8165_s21   ;;  %p5375_p0 = scmp.ge.s32.totalorder %s8165_s21, 1  ;;  %s8165_s21 = sphi %s8203_s21, %s17_s21  }
   0x2   : > { %p217_p1 = scmp.lt.s32.totalorder %s8165_s21, 3 }
   0x4   : > { %p218_p2 = pnand %p5375_p0, %p217_p1 }
   0x6   : > { %221 = sbr.rel (%p218_p2) target bundleno = 570 (0x23a), region = 36 }
   0xd   : > { %v5382_v0 = vld [vmem:[%s9856_s3 + $0x80] sm:$0xff]  ;;  %v5383_v1 = vld [vmem:[%s9856_s3 + $0x88] sm:$0xff]  ;;  %v5384_v2 = vld [vmem:[%s9856_s3 + $0x90] sm:$0xff]  ;;  %p253_p3 = scmp.lt.s32.totalorder %s5371_s22, 1  ;;  %v9860_v5 = vmov 0.0  }
   0xe   : > { %v7318_v3 = vpack.c.bf16 %v5383_v1, %v5382_v0  ;;  %v5385_v4 = vld [vmem:[%s9856_s3 + $0x98] sm:$0xff]  ;;  %6342 = vmatprep.mubr.f32.mxu0 %v9860_v5  ;;  %v5386_v7 = vld [vmem:[%s9856_s3 + $0xa0] sm:$0xff]  ;;  %v5387_v8 = vld [vmem:[%s9856_s3 + $0xa8] sm:$0xff] }
   0xf   : > { %v7322_v6 = vpack.c.bf16 %v5385_v4, %v5384_v2  ;;  %s10412_s22 = smov (!%p253_p3, %s5371_s22), 1  ;;  %v7326_v9 = vpack.c.bf16 %v5387_v8, %v5386_v7  ;;  %v5388_v10 = vld [vmem:[%s9856_s3 + $0xb0] sm:$0xff]  ;;  %v8246_v11 = vld [vmem:[%s9854_s1] ss:$0 sm:$0xff]  ;;  %v5389_v12 = vld [vmem:[%s9856_s3 + $0xb8] sm:$0xff] }
  0x10   : > { %7319 = vmatprep.subr.bf16.mxu0 %v7318_v3  ;;  %7607 = vmatprep.subr.bf16.mxu1 %v7318_v3  ;;  %s5732_s11 = sshll.u32 %s10412_s22, 8  ;;  %v8255_v14 = vld [vmem:[%s9855_s2] ss:$0 sm:$0xff]  ;;  %v7330_v16 = vpack.c.bf16 %v5389_v12, %v5388_v10  ;;  %v5391_v19 = vld [vmem:[%s9856_s3 + $0xc8] sm:$0xff]  ;;  %v5392_v22 = vld [vmem:[%s9856_s3 + $0xd0] sm:$0xff]  ;;  %s265_s7 = scalar_lea.vmem %s9858_s5, %s10412_s22 }
  0x11   : > { %7321 = vmatpush3.bf16.msra.mxu0 %v7318_v3  ;;  %7609 = vmatpush3.bf16.msra.mxu1 %v7318_v3  ;;  %s8241_s16 = scalar_lea.vmem %s9853_s0, %s5732_s11  ;;  %v5390_v18 = vld [vmem:[%s9856_s3 + $0xc0] sm:$0xff]  ;;  %v5393_v23 = vld [vmem:[%s9856_s3 + $0xd8] sm:$0xff]  ;;  %v5395_v26 = vld [vmem:[%s9856_s3 + $0xe8] sm:$0xff]  ;;  %s9808_s29 = scalar_lea.vmem %s9857_s4, %s5732_s11 }
  0x12   : > { %7323 = vmatprep.subr.bf16.mxu0 %v7322_v6  ;;  %7611 = vmatprep.subr.bf16.mxu1 %v7322_v6  ;;  %v283_v13 = vld [vmem:[%s8241_s16 + $0x70] sm:$0xff]  ;;  %v7334_v21 = vpack.c.bf16 %v5391_v19, %v5390_v18  ;;  %v7338_v24 = vpack.c.bf16 %v5393_v23, %v5392_v22  ;;  %v5394_v25 = vld [vmem:[%s9856_s3 + $0xe0] sm:$0xff]  ;;  %v284_v27 = vld [vmem:[%s8241_s16 + $0x78] sm:$0xff]  ;;  %s268_s10 = scalar_lea.vmem %s9859_s6, %s10412_s22 }
  0x13   : > { %v322_v15 = vmul.f32 %v8246_v11, %v283_v13  ;;  %v7342_v28 = vpack.c.bf16 %v5395_v26, %v5394_v25  ;;  %v5396_v29 = vld [vmem:[%s9856_s3 + $0xf0] sm:$0xff]  ;;  %v5397_v30 = vld [vmem:[%s9856_s3 + $0xf8] sm:$0xff]  ;;  %v269_v31 = vld [vmem:[%s8241_s16] sm:$0xff]  ;;  %v323_v33 = vmul.f32 %v8246_v11, %v284_v27 }
  0x14   : > { %v285_v32 = vld [vmem:[%s8241_s16 + $0x80] sm:$0xff]  ;;  %v270_v34 = vld [vmem:[%s8241_s16 + $0x8] sm:$0xff]  ;;  %v7346_v36 = vpack.c.bf16 %v5397_v30, %v5396_v29  ;;  %v308_v39 = vmul.f32 %v8246_v11, %v269_v31  ;;  %v271_v41 = vld [vmem:[%s8241_s16 + $0x10] sm:$0xff] }
  0x15   : > { %7325 = vmatpush3.bf16.msra.mxu0 %v7322_v6  ;;  %7613 = vmatpush3.bf16.msra.mxu1 %v7322_v6  ;;  %v361_v17 = vadd.f32 %v8255_v14, %v322_v15  ;;  %v286_v35 = vld [vmem:[%s8241_s16 + $0x88] sm:$0xff]  ;;  %v1149_v37 = vld [vmem:[%s9856_s3] sm:$0xff]  ;;  %v324_v40 = vmul.f32 %v8246_v11, %v285_v32  ;;  %v309_v42 = vmul.f32 %v8246_v11, %v270_v34  ;;  %v287_v43 = vld [vmem:[%s8241_s16 + $0x90] sm:$0xff] }
  0x16   : > { %7327 = vmatprep.subr.bf16.mxu0 %v7326_v9  ;;  %7615 = vmatprep.subr.bf16.mxu1 %v7326_v9  ;;  %v1150_v38 = vld [vmem:[%s9856_s3 + $0x8] sm:$0xff]  ;;  %v362_v44 = vadd.f32 %v8255_v14, %v323_v33  ;;  %v325_v45 = vmul.f32 %v8246_v11, %v286_v35  ;;  %v272_v46 = vld [vmem:[%s8241_s16 + $0x18] sm:$0xff]  ;;  %v310_v48 = vmul.f32 %v8246_v11, %v271_v41  ;;  %v273_v53 = vld [vmem:[%s8241_s16 + $0x20] sm:$0xff] }
  0x17   : > { %v8265_v20 = vmax.f32 %v361_v17, 0.0  ;;  %v7350_v47 = vpack.c.bf16 %v1150_v38, %v1149_v37  ;;  %v288_v49 = vld [vmem:[%s8241_s16 + $0x98] sm:$0xff]  ;;  %v347_v50 = vadd.f32 %v8255_v14, %v308_v39  ;;  %v363_v51 = vadd.f32 %v8255_v14, %v324_v40  ;;  %v289_v56 = vld [vmem:[%s8241_s16 + $0xa0] sm:$0xff]  ;;  %v1151_v58 = vld [vmem:[%s9856_s3 + $0x10] sm:$0xff] }
  0x18   : > { %v326_v52 = vmul.f32 %v8246_v11, %v287_v43  ;;  %v348_v54 = vadd.f32 %v8255_v14, %v309_v42  ;;  %v311_v55 = vmul.f32 %v8246_v11, %v272_v46  ;;  %v8315_v57 = vmax.f32 %v362_v44, 0.0  ;;  %v1152_v59 = vld [vmem:[%s9856_s3 + $0x18] sm:$0xff]  ;;  %v274_v0 = vld [vmem:[%s8241_s16 + $0x28] sm:$0xff]  ;;  %v275_v10 = vld [vmem:[%s8241_s16 + $0x30] sm:$0xff] }
  0x19   : > { %10058 = vst [vmem:[#allocation2_spill] sm:$0xff] %v8265_v20  ;;  %7329 = vmatpush3.bf16.msra.mxu0 %v7326_v9  ;;  %7617 = vmatpush3.bf16.msra.mxu1 %v7326_v9  ;;  %v364_v60 = vadd.f32 %v8255_v14, %v325_v45  ;;  %v327_v61 = vmul.f32 %v8246_v11, %v288_v49  ;;  %v290_v1 = vld [vmem:[%s8241_s16 + $0xa8] sm:$0xff]  ;;  %v8329_v2 = vmax.f32 %v347_v50, 0.0  ;;  %v8331_v3 = vmax.f32 %v363_v51, 0.0  ;;  %v291_v12 = vld [vmem:[%s8241_s16 + $0xb0] sm:$0xff]  ;;  %v1153_v15 = vld [vmem:[%s9856_s3 + $0x20] sm:$0xff] }
  0x1a   : > { %7331 = vmatprep.subr.bf16.mxu0 %v7330_v16  ;;  %7619 = vmatprep.subr.bf16.mxu1 %v7330_v16  ;;  %10059 = vst [vmem:[#allocation3_spill] sm:$0xff] %v8315_v57  ;;  %v349_v62 = vadd.f32 %v8255_v14, %v310_v48  ;;  %v312_v63 = vmul.f32 %v8246_v11, %v273_v53  ;;  %v8335_v7 = vmax.f32 %v348_v54, 0.0  ;;  %v277_v29 = vld [vmem:[%s8241_s16 + $0x40] sm:$0xff]  ;;  %v1156_v37 = vld [vmem:[%s9856_s3 + $0x38] sm:$0xff]  ;;  %v278_v40 = vld [vmem:[%s8241_s16 + $0x48] sm:$0xff] }
  0x1b   : > { %6846 = vmatprep.mubr.f32.mxu1 %v8265_v20  ;;  %10060 = vst [vmem:[#allocation4_spill] sm:$0xff] %v8329_v2  ;;  %10061 = vst [vmem:[#allocation5_spill] sm:$0xff] %v8331_v3  ;;  %v365_v4 = vadd.f32 %v8255_v14, %v326_v52  ;;  %v328_v6 = vmul.f32 %v8246_v11, %v289_v56  ;;  %v7354_v8 = vpack.c.bf16 %v1152_v59, %v1151_v58  ;;  %v293_v33 = vld [vmem:[%s8241_s16 + $0xc0] sm:$0xff]  ;;  %v294_v43 = vld [vmem:[%s8241_s16 + $0xc8] sm:$0xff] }
  0x1c   : > { %10062 = vst [vmem:[#allocation6_spill] sm:$0xff] %v8335_v7  ;;  %v350_v9 = vadd.f32 %v8255_v14, %v311_v55  ;;  %v8342_v13 = vmax.f32 %v364_v60, 0.0  ;;  %v366_v17 = vadd.f32 %v8255_v14, %v327_v61  ;;  %v313_v18 = vmul.f32 %v8246_v11, %v274_v0  ;;  %v279_v48 = vld [vmem:[%s8241_s16 + $0x50] sm:$0xff]  ;;  %v1157_v55 = vld [vmem:[%s9856_s3 + $0x40] sm:$0xff]  ;;  %v1158_v56 = vld [vmem:[%s9856_s3 + $0x48] sm:$0xff] }
  0x1d   : > { %7333 = vmatpush3.bf16.msra.mxu0 %v7330_v16  ;;  %7621 = vmatpush3.bf16.msra.mxu1 %v7330_v16  ;;  %v1154_v16 = vld [vmem:[%s9856_s3 + $0x28] sm:$0xff]  ;;  %v329_v19 = vmul.f32 %v8246_v11, %v290_v1  ;;  %v8354_v22 = vmax.f32 %v349_v62, 0.0  ;;  %v351_v23 = vadd.f32 %v8255_v14, %v312_v63  ;;  %v8360_v25 = vmax.f32 %v365_v4, 0.0  ;;  %v295_v52 = vld [vmem:[%s8241_s16 + $0xd0] sm:$0xff]  ;;  %v280_v63 = vld [vmem:[%s8241_s16 + $0x58] sm:$0xff] }
  0x1e   : > { %7335 = vmatprep.subr.bf16.mxu0 %v7334_v21  ;;  %7623 = vmatprep.subr.bf16.mxu1 %v7334_v21  ;;  %10063 = vst [vmem:[#allocation7_spill] sm:$0xff] %v8342_v13  ;;  %v367_v26 = vadd.f32 %v8255_v14, %v328_v6  ;;  %v314_v27 = vmul.f32 %v8246_v11, %v275_v10  ;;  %v8366_v30 = vmax.f32 %v350_v9, 0.0  ;;  %v8372_v34 = vmax.f32 %v366_v17, 0.0  ;;  %v282_v60 = vld [vmem:[%s8241_s16 + $0x68] sm:$0xff]  ;;  %v296_v0 = vld [vmem:[%s8241_s16 + $0xd8] sm:$0xff]  ;;  %v297_v17 = vld [vmem:[%s8241_s16 + $0xe0] sm:$0xff] }
  0x1f   : > { %10064 = vst [vmem:[#allocation8_spill] sm:$0xff] %v8354_v22  ;;  %10065 = vst [vmem:[#allocation9_spill] sm:$0xff] %v8360_v25  ;;  %v7358_v31 = vpack.c.bf16 %v1154_v16, %v1153_v15  ;;  %v352_v35 = vadd.f32 %v8255_v14, %v313_v18  ;;  %v368_v38 = vadd.f32 %v8255_v14, %v329_v19  ;;  %v8384_v41 = vmax.f32 %v351_v23, 0.0  ;;  %v281_v16 = vld [vmem:[%s8241_s16 + $0x60] sm:$0xff]  ;;  %v1160_v23 = vld [vmem:[%s9856_s3 + $0x58] sm:$0xff] }
  0x20   : > { %10066 = vst [vmem:[#allocation10_spill] sm:$0xff] %v8372_v34  ;;  %v316_v42 = vmul.f32 %v8246_v11, %v277_v29  ;;  %v8390_v44 = vmax.f32 %v367_v26, 0.0  ;;  %v353_v45 = vadd.f32 %v8255_v14, %v314_v27  ;;  %v317_v51 = vmul.f32 %v8246_v11, %v278_v40 }
  0x21   : > { %7337 = vmatpush3.bf16.msra.mxu0 %v7334_v21  ;;  %7625 = vmatpush3.bf16.msra.mxu1 %v7334_v21  ;;  %v276_v21 = vld [vmem:[%s8241_s16 + $0x38] sm:$0xff]  ;;  %10067 = vst [vmem:[#allocation11_spill] sm:$0xff] %v8384_v41  ;;  %v8401_v53 = vmax.f32 %v352_v35, 0.0  ;;  %v8403_v54 = vmax.f32 %v368_v38, 0.0  ;;  %v333_v59 = vmul.f32 %v8246_v11, %v294_v43  ;;  %v318_v62 = vmul.f32 %v8246_v11, %v279_v48  ;;  %v1162_v48 = vld [vmem:[%s9856_s3 + $0x68] sm:$0xff] }
  0x22   : > { %7339 = vmatprep.subr.bf16.mxu0 %v7338_v24  ;;  %7627 = vmatprep.subr.bf16.mxu1 %v7338_v24  ;;  %v315_v32 = vmul.f32 %v8246_v11, %v276_v21  ;;  %v355_v61 = vadd.f32 %v8255_v14, %v316_v42  ;;  %v411_v1 = vlaneseq  ;;  %v8420_v4 = vmax.f32 %v353_v45, 0.0  ;;  %v1159_v21 = vld [vmem:[%s9856_s3 + $0x50] sm:$0xff] }
  0x23   : > { %v334_v9 = vmul.f32 %v8246_v11, %v295_v52  ;;  %v356_v15 = vadd.f32 %v8255_v14, %v317_v51  ;;  %v321_v18 = vmul.f32 %v8246_v11, %v282_v60  ;;  %v319_v26 = vmul.f32 %v8246_v11, %v280_v63 }
  0x24   : > { %v354_v50 = vadd.f32 %v8255_v14, %v315_v32  ;;  %v335_v27 = vmul.f32 %v8246_v11, %v296_v0  ;;  %v8446_v29 = vmax.f32 %v355_v61, 0.0  ;;  %v298_v32 = vld [vmem:[%s8241_s16 + $0xe8] sm:$0xff]  ;;  %v336_v38 = vmul.f32 %v8246_v11, %v297_v17  ;;  %v1163_v0 = vld [vmem:[%s9856_s3 + $0x70] sm:$0xff] }
  0x25   : > { %7341 = vmatpush3.bf16.msra.mxu0 %v7338_v24  ;;  %7629 = vmatpush3.bf16.msra.mxu1 %v7338_v24  ;;  %v292_v24 = vld [vmem:[%s8241_s16 + $0xb8] sm:$0xff]  ;;  %v7370_v40 = vpack.c.bf16 %v1160_v23, %v1159_v21  ;;  %v360_v42 = vadd.f32 %v8255_v14, %v321_v18  ;;  %v970_v23 = vrot.slane %v8265_v20, 7 }
  0x26   : > { %7343 = vmatprep.subr.bf16.mxu0 %v7342_v28  ;;  %7631 = vmatprep.subr.bf16.mxu1 %v7342_v28  ;;  %v331_v39 = vmul.f32 %v8246_v11, %v292_v24  ;;  %v8426_v10 = vmax.f32 %v354_v50, 0.0  ;;  %v372_v24 = vadd.f32 %v8255_v14, %v333_v59  ;;  %v337_v50 = vmul.f32 %v8246_v11, %v298_v32 }
  0x27   : > { %v8485_v60 = vmax.f32 %v360_v42, 0.0  ;;  %v971_v32 = vrot.slane %v8315_v57, 7 }
  0x28   : > { %v370_v58 = vadd.f32 %v8255_v14, %v331_v39  ;;  %v8459_v39 = vmax.f32 %v356_v15, 0.0  ;;  %v8465_v45 = vmax.f32 %v372_v24, 0.0 }
  0x29   : > { %7345 = vmatpush3.bf16.msra.mxu0 %v7342_v28  ;;  %7633 = vmatpush3.bf16.msra.mxu1 %v7342_v28  ;;  %v330_v28 = vmul.f32 %v8246_v11, %v291_v12  ;;  %v7366_v12 = vpack.c.bf16 %v1158_v56, %v1157_v55  ;;  %10068 = vst [vmem:[#allocation12_spill] sm:$0xff] %v8485_v60  ;;  %v9863_v21 = vrot.slane %v8485_v60, 7 }
  0x2a   : > { %7347 = vmatprep.subr.bf16.mxu0 %v7346_v36  ;;  %7635 = vmatprep.subr.bf16.mxu1 %v7346_v36  ;;  %v8434_v19 = vmax.f32 %v370_v58, 0.0  ;;  %v375_v58 = vadd.f32 %v8255_v14, %v336_v38 }
  0x2b   : > { %v369_v46 = vadd.f32 %v8255_v14, %v330_v28  ;;  %v300_v28 = vld [vmem:[%s8241_s16 + $0xf8] sm:$0xff] }
  0x2c   : > { %v339_v43 = vmul.f32 %v8246_v11, %v300_v28  ;;  %v8506_v15 = vmax.f32 %v375_v58, 0.0  ;;  %v5406_v28 = vld [vmem:[%s9856_s3 + $0x108] sm:$0xff] }
  0x2d   : > { %7349 = vmatpush3.bf16.msra.mxu0 %v7346_v36  ;;  %7637 = vmatpush3.bf16.msra.mxu1 %v7346_v36  ;;  %v1155_v36 = vld [vmem:[%s9856_s3 + $0x30] sm:$0xff]  ;;  %v8422_v6 = vmax.f32 %v369_v46, 0.0  ;;  %v358_v46 = vadd.f32 %v8255_v14, %v319_v26 }
  0x2e   : > { %7351 = vmatprep.subr.bf16.mxu0 %v7350_v47  ;;  %7639 = vmatprep.subr.bf16.mxu1 %v7350_v47  ;;  %v7362_v49 = vpack.c.bf16 %v1156_v37, %v1155_v36  ;;  %v373_v36 = vadd.f32 %v8255_v14, %v334_v9  ;;  %v320_v37 = vmul.f32 %v8246_v11, %v281_v16 }
  0x2f   : > { %v378_v61 = vadd.f32 %v8255_v14, %v339_v43 }
  0x30   : > { %6343 = vmatmul.mubr.f32.vlgmr.msra.gmra.mrb[0].mxu0 %v9860_v5  ;;  %6847 = vmatmul.mubr.f32.vlgmr.msra.gmra.mrb[0].mxu1 %v8315_v57  ;;  %v8481_v55 = vmax.f32 %v373_v36, 0.0  ;;  %v359_v56 = vadd.f32 %v8255_v14, %v320_v37  ;;  %v10071_v37 = vmov 0 }
  0x31   : > { %7353 = vmatpush3.bf16.msra.mxu0 %v7350_v47  ;;  %7641 = vmatpush3.bf16.msra.mxu1 %v7350_v47  ;;  %v332_v47 = vmul.f32 %v8246_v11, %v293_v33  ;;  %v8450_v33 = vshrl.u32 %v411_v1, 7  ;;  %v1164_v1 = vld [vmem:[%s9856_s3 + $0x78] sm:$0xff]  ;;  %v8511_v24 = vmax.f32 %v378_v61, 0.0 }
  0x32   : > { %6345 = vmatprep.mubr.f32.mxu0 %v8329_v2  ;;  %6849 = vmatprep.mubr.f32.mxu1 %v8331_v3  ;;  %v7378_v18 = vpack.c.bf16 %v1164_v1, %v1163_v0  ;;  %v958_v0 = vrot.slane %v8354_v22, 7  ;;  %v10079_v1 = vmov 0 }
  0x33   : > { %7355 = vmatprep.subr.bf16.mxu0 %v7354_v8  ;;  %7643 = vmatprep.subr.bf16.mxu1 %v7354_v8  ;;  %v428_v51 = vadd.s32 128, %v8450_v33  ;;  %v414_v9 = vadd.s32 16, %v8450_v33  ;;  %v430_v17 = vadd.s32 144, %v8450_v33  ;;  %10069 = vst [vmem:[#allocation13_spill] sm:$0xff] %v8511_v24  ;;  %vm9945_vm0 = vcmp.lt.s32.totalorder %v8450_v33, 1 }
  0x34   : > { %6346 = vmatmul.mubr.f32.gmra.mrb[2].mxu0 %v8335_v7  ;;  %6850 = vmatmul.mubr.f32.gmra.mrb[2].mxu1 %v8342_v13  ;;  %v416_v36 = vadd.s32 32, %v8450_v33  ;;  %v432_v42 = vadd.s32 160, %v8450_v33  ;;  %v8538_v43 = vsel %vm9945_vm0, %v9863_v21, %v970_v23  ;;  %v8557_v58 = vsel %vm9945_vm0, %v970_v23, %v971_v32 }
  0x35   : > { %7357 = vmatpush3.bf16.msra.mxu0 %v7354_v8  ;;  %7645 = vmatpush3.bf16.msra.mxu1 %v7354_v8  ;;  %v371_v8 = vadd.f32 %v8255_v14, %v332_v47  ;;  %v1161_v47 = vld [vmem:[%s9856_s3 + $0x60] sm:$0xff]  ;;  %v560_v16 = vand.u32 15, %v428_v51  ;;  %v574_v38 = vand.u32 15, %v430_v17  ;;  %10074 = vst [vmem:[#allocation16_spill] sm:$0xff] %v8538_v43  ;;  %v10075_v51 = vmov 0  ;;  %10078 = vst [vmem:[#allocation18_spill] sm:$0xff] %v8557_v58 }
  0x36   : > { %6348 = vmatprep.mubr.f32.mxu0 %v8354_v22  ;;  %6852 = vmatprep.mubr.f32.mxu1 %v8360_v25  ;;  %v7374_v59 = vpack.c.bf16 %v1162_v48, %v1161_v47  ;;  %v956_v47 = vrot.slane %v8329_v2, 7  ;;  %v9862_v48 = vrot.slane %v8511_v24, 7  ;;  %v476_v61 = vand.u32 15, %v416_v36  ;;  %v5410_v17 = vld [vmem:[%s9856_s3 + $0x128] sm:$0xff] }
  0x37   : > { %7359 = vmatprep.subr.bf16.mxu0 %v7358_v31  ;;  %7647 = vmatprep.subr.bf16.mxu1 %v7358_v31  ;;  %v8454_v35 = vmax.f32 %v371_v8, 0.0  ;;  %v376_v8 = vadd.f32 %v8255_v14, %v337_v50  ;;  %vm8528_vm1 = vcmp.ge.s32.totalorder %v560_v16, 1  ;;  %v5408_v50 = vld [vmem:[%s9856_s3 + $0x118] sm:$0xff]  ;;  %vm8565_vm3 = vcmp.ge.s32.totalorder %v574_v38, 1  ;;  %v5409_v16 = vld [vmem:[%s9856_s3 + $0x120] sm:$0xff] }
  0x38   : > { %6349 = vmatmul.mubr.f32.gmra.mrb[4].mxu0 %v8366_v30  ;;  %6853 = vmatmul.mubr.f32.gmra.mrb[4].mxu1 %v8372_v34  ;;  %v10072_v37 = vsel %vm8528_vm1, 4294967295, %v10071_v37  ;;  %v10080_v1 = vsel %vm8565_vm3, 4294967295, %v10079_v1  ;;  %v8584_v23 = vsel %vm9945_vm0, %v9862_v48, %v956_v47  ;;  %v959_v36 = vrot.slane %v8366_v30, 7 }
  0x39   : > { %7361 = vmatpush3.bf16.msra.mxu0 %v7358_v31  ;;  %7649 = vmatpush3.bf16.msra.mxu1 %v7358_v31  ;;  %v357_v31 = vadd.f32 %v8255_v14, %v318_v62  ;;  %v8490_v62 = vmax.f32 %v358_v46, 0.0  ;;  %v8515_v26 = vmax.f32 %v376_v8, 0.0  ;;  %10073 = vst [vmem:[#allocation15_spill] sm:$0xff] %v10072_v37  ;;  %10081 = vst [vmem:[#allocation19_spill] sm:$0xff] %v10080_v1  ;;  %v975_v38 = vrot.slane %v8372_v34, 7  ;;  %v5460_v37 = vld [vmem:[%s9856_s3 + $0x240] sm:$0xff] }
  0x3a   : > { %6351 = vmatprep.mubr.f32.mxu0 %v8384_v41  ;;  %6855 = vmatprep.mubr.f32.mxu1 %v8390_v44  ;;  %vm8600_vm4 = vcmp.ge.s32.totalorder %v476_v61, 1  ;;  %v976_v61 = vrot.slane %v8390_v44, 7  ;;  %v436_v21 = vadd.s32 192, %v8450_v33  ;;  %v962_v1 = vrot.slane %v8420_v4, 7 }
  0x3b   : > { %7363 = vmatprep.subr.bf16.mxu0 %v7362_v49  ;;  %7651 = vmatprep.subr.bf16.mxu1 %v7362_v49  ;;  %v8479_v52 = vmax.f32 %v357_v31, 0.0  ;;  %10070 = vst [vmem:[#allocation14_spill] sm:$0xff] %v8515_v26  ;;  %v462_v31 = vand.u32 15, %v414_v9 }
  0x3c   : > { %6352 = vmatmul.mubr.f32.gmra.mrb[6].mxu0 %v8401_v53  ;;  %6856 = vmatmul.mubr.f32.gmra.mrb[6].mxu1 %v8403_v54 }
  0x3d   : > { %7365 = vmatpush3.bf16.msra.mxu0 %v7362_v49  ;;  %7653 = vmatpush3.bf16.msra.mxu1 %v7362_v49  ;;  %v374_v49 = vadd.f32 %v8255_v14, %v335_v27  ;;  %v5405_v27 = vld [vmem:[%s9856_s3 + $0x100] sm:$0xff]  ;;  %vm8550_vm2 = vcmp.ge.s32.totalorder %v462_v31, 1  ;;  %v434_v31 = vadd.s32 176, %v8450_v33 }
  0x3e   : > { %6354 = vmatprep.mubr.f32.mxu0 %v8420_v4  ;;  %6858 = vmatprep.mubr.f32.mxu1 %v8422_v6  ;;  %v7382_v46 = vpack.c.bf16 %v5406_v28, %v5405_v27  ;;  %v10076_v51 = vsel %vm8550_vm2, 4294967295, %v10075_v51  ;;  %v588_v27 = vand.u32 15, %v432_v42  ;;  %v974_v28 = vrot.slane %v8360_v25, 7 }
  0x3f   : > { %7367 = vmatprep.subr.bf16.mxu0 %v7366_v12  ;;  %7655 = vmatprep.subr.bf16.mxu1 %v7366_v12  ;;  %v8492_v63 = vmax.f32 %v374_v49, 0.0  ;;  %v5407_v49 = vld [vmem:[%s9856_s3 + $0x110] sm:$0xff]  ;;  %10077 = vst [vmem:[#allocation17_spill] sm:$0xff] %v10076_v51  ;;  %v602_v48 = vand.u32 15, %v434_v31  ;;  %v977_v31 = vrot.slane %v8403_v54, 7  ;;  %v422_v51 = vadd.s32 80, %v8450_v33 }
  0x40   : > { %6355 = vmatmul.mubr.f32.gmra.mrb[8].mxu0 %v8426_v10  ;;  %6859 = vmatmul.mubr.f32.gmra.mrb[8].mxu1 %v8434_v19  ;;  %v7386_v9 = vpack.c.bf16 %v5408_v50, %v5407_v49  ;;  %v10084_v49 = vmov 0  ;;  %vm8623_vm5 = vcmp.ge.s32.totalorder %v588_v27, 1  ;;  %v8640_v27 = vsel %vm9945_vm0, %v974_v28, %v975_v38 }
  0x41   : > { %7369 = vmatpush3.bf16.msra.mxu0 %v7366_v12  ;;  %7657 = vmatpush3.bf16.msra.mxu1 %v7366_v12  ;;  %v8504_v12 = vmax.f32 %v359_v56, 0.0  ;;  %v957_v56 = vrot.slane %v8335_v7, 7  ;;  %v10085_v49 = vsel %vm8600_vm4, 4294967295, %v10084_v49  ;;  %10093 = vst [vmem:[#allocation27_spill] sm:$0xff] %v8640_v27  ;;  %vm8664_vm7 = vcmp.ge.s32.totalorder %v602_v48, 1 }
  0x42   : > { %6357 = vmatprep.mubr.f32.mxu0 %v8446_v29  ;;  %6861 = vmatprep.mubr.f32.mxu1 %v8454_v35  ;;  %10086 = vst [vmem:[#allocation22_spill] sm:$0xff] %v10085_v49  ;;  %v5413_v49 = vld [vmem:[%s9856_s3 + $0x140] sm:$0xff] }
  0x43   : > { %7371 = vmatprep.subr.bf16.mxu0 %v7370_v40  ;;  %7659 = vmatprep.subr.bf16.mxu1 %v7370_v40  ;;  %v8606_v50 = vsel %vm9945_vm0, %v957_v56, %v958_v0 }
  0x44   : > { %6358 = vmatmul.mubr.f32.gmra.mrb[10].mxu0 %v8459_v39  ;;  %6862 = vmatmul.mubr.f32.gmra.mrb[10].mxu1 %v8465_v45  ;;  %10087 = vst [vmem:[#allocation23_spill] sm:$0xff] %v8606_v50 }
  0x45   : > { %7373 = vmatpush3.bf16.msra.mxu0 %v7370_v40  ;;  %7661 = vmatpush3.bf16.msra.mxu1 %v7370_v40  ;;  %v972_v40 = vrot.slane %v8331_v3, 7 }
  0x46   : > { %6360 = vmatprep.mubr.f32.mxu0 %v8479_v52  ;;  %6864 = vmatprep.mubr.f32.mxu1 %v8481_v55 }
  0x47   : > { %7375 = vmatprep.subr.bf16.mxu0 %v7374_v59  ;;  %7663 = vmatprep.subr.bf16.mxu1 %v7374_v59  ;;  %v8571_v8 = vsel %vm9945_vm0, %v971_v32, %v972_v40  ;;  %v8592_v32 = vsel %vm9945_vm0, %v956_v47, %v957_v56  ;;  %v7390_v47 = vpack.c.bf16 %v5410_v17, %v5409_v16  ;;  %v5412_v56 = vld [vmem:[%s9856_s3 + $0x138] sm:$0xff]  ;;  %v420_v16 = vadd.s32 64, %v8450_v33 }
  0x48   : > { %6361 = vmatmul.mubr.f32.gmra.mrb[12].mxu0 %v8490_v62  ;;  %6865 = vmatmul.mubr.f32.gmra.mrb[12].mxu1 %v8492_v63  ;;  %10082 = vst [vmem:[#allocation20_spill] sm:$0xff] %v8571_v8  ;;  %v10088_v17 = vmov 0 }
  0x49   : > { %7377 = vmatpush3.bf16.msra.mxu0 %v7374_v59  ;;  %7665 = vmatpush3.bf16.msra.mxu1 %v7374_v59  ;;  %v973_v59 = vrot.slane %v8342_v13, 7  ;;  %v10089_v17 = vsel %vm8623_vm5, 4294967295, %v10088_v17 }
  0x4a   : > { %6363 = vmatprep.mubr.f32.mxu0 %v8504_v12  ;;  %6867 = vmatprep.mubr.f32.mxu1 %v8506_v15  ;;  %10090 = vst [vmem:[#allocation24_spill] sm:$0xff] %v10089_v17  ;;  %v616_v17 = vand.u32 15, %v436_v21  ;;  %v963_v21 = vrot.slane %v8426_v10, 7 }
  0x4b   : > { %7379 = vmatprep.subr.bf16.mxu0 %v7378_v18  ;;  %7667 = vmatprep.subr.bf16.mxu1 %v7378_v18  ;;  %v8598_v42 = vsel %vm9945_vm0, %v972_v40, %v973_v59  ;;  %v960_v40 = vrot.slane %v8384_v41, 7 }
  0x4c   : > { %6364 = vmatmul.mubr.f32.gmra.mrb[14].mxu0 %v8485_v60  ;;  %6868 = vmatmul.mubr.f32.gmra.mrb[14].mxu1 %v8515_v26  ;;  %10083 = vst [vmem:[#allocation21_spill] sm:$0xff] %v8598_v42  ;;  %vm8711_vm9 = vcmp.ge.s32.totalorder %v616_v17, 1 }
  0x4d   : > { %7381 = vmatpush3.bf16.msra.mxu0 %v7378_v18  ;;  %7669 = vmatpush3.bf16.msra.mxu1 %v7378_v18  ;;  %v418_v18 = vadd.s32 48, %v8450_v33 }
  0x4e   : > { %6398 = vmatprep.mubr.f32.mxu0 %v9860_v5  ;;  %6902 = vmatprep.mubr.msk.f32.mxu1 %vm8528_vm1, %v8538_v43  ;;  %v961_v43 = vrot.slane %v8401_v53, 7 }
  0x4f   : > { %7383 = vmatprep.subr.bf16.mxu0 %v7382_v46  ;;  %7671 = vmatprep.subr.bf16.mxu1 %v7382_v46 }
  0x50   : > { %6399 = vmatmul.mubr.f32.vlgmr.msra.gmra.mrb[0].mxu0 %v9860_v5  ;;  %6903 = vmatmul.mubr.f32.vlgmr.msra.gmra.mrb[0].mxu1 %v8557_v58  ;;  %v5411_v5 = vld [vmem:[%s9856_s3 + $0x130] sm:$0xff]  ;;  %v8636_v58 = vsel %vm9945_vm0, %v958_v0, %v959_v36  ;;  %v10094_v0 = vmov 0  ;;  %v8680_v48 = vsel %vm9945_vm0, %v960_v40, %v961_v43 }
  0x51   : > { %7385 = vmatpush3.bf16.msra.mxu0 %v7382_v46  ;;  %7673 = vmatpush3.bf16.msra.mxu1 %v7382_v46  ;;  %v490_v46 = vand.u32 15, %v418_v18  ;;  %v8629_v18 = vsel %vm9945_vm0, %v973_v59, %v974_v28  ;;  %10092 = vst [vmem:[#allocation26_spill] sm:$0xff] %v8636_v58  ;;  %v7394_v59 = vpack.c.bf16 %v5412_v56, %v5411_v5  ;;  %v504_v28 = vand.u32 15, %v420_v16 }
  0x52   : > { %6401 = vmatprep.mubr.msk.f32.mxu0 %vm8550_vm2, %v8584_v23  ;;  %6905 = vmatprep.mubr.msk.f32.mxu1 %vm8565_vm3, %v8571_v8  ;;  %10091 = vst [vmem:[#allocation25_spill] sm:$0xff] %v8629_v18  ;;  %v8658_v5 = vsel %vm9945_vm0, %v959_v36, %v960_v40  ;;  %v10099_v56 = vmov 0  ;;  %v5414_v36 = vld [vmem:[%s9856_s3 + $0x148] sm:$0xff]  ;;  %10102 = vst [vmem:[#allocation32_spill] sm:$0xff] %v8680_v48  ;;  %v979_v16 = vrot.slane %v8434_v19, 7 }
  0x53   : > { %7387 = vmatprep.subr.bf16.mxu0 %v7386_v9  ;;  %7675 = vmatprep.subr.bf16.mxu1 %v7386_v9  ;;  %vm8652_vm6 = vcmp.ge.s32.totalorder %v490_v46, 1  ;;  %10097 = vst [vmem:[#allocation29_spill] sm:$0xff] %v8658_v5  ;;  %v10100_v56 = vsel %vm8664_vm7, 4294967295, %v10099_v56  ;;  %v978_v46 = vrot.slane %v8422_v6, 7  ;;  %vm8699_vm8 = vcmp.ge.s32.totalorder %v504_v28, 1 }
  0x54   : > { %6402 = vmatmul.mubr.f32.gmra.mrb[2].mxu0 %v8592_v32  ;;  %6906 = vmatmul.mubr.f32.gmra.mrb[2].mxu1 %v8598_v42  ;;  %v10095_v0 = vsel %vm8652_vm6, 4294967295, %v10094_v0  ;;  %10101 = vst [vmem:[#allocation31_spill] sm:$0xff] %v10100_v56  ;;  %v7398_v40 = vpack.c.bf16 %v5414_v36, %v5413_v49  ;;  %v10108_v28 = vmov 0  ;;  %v440_v56 = vadd.s32 224, %v8450_v33  ;;  %v299_v42 = vld [vmem:[%s8241_s16 + $0xf0] sm:$0xff] }
  0x55   : > { %7389 = vmatpush3.bf16.msra.mxu0 %v7386_v9  ;;  %7677 = vmatpush3.bf16.msra.mxu1 %v7386_v9  ;;  %10096 = vst [vmem:[#allocation28_spill] sm:$0xff] %v10095_v0  ;;  %v8662_v9 = vsel %vm9945_vm0, %v975_v38, %v976_v61  ;;  %v438_v38 = vadd.s32 208, %v8450_v33  ;;  %v424_v0 = vadd.s32 96, %v8450_v33  ;;  %v10109_v28 = vsel %vm8711_vm9, 4294967295, %v10108_v28 }
  0x56   : > { %6404 = vmatprep.mubr.msk.f32.mxu0 %vm8600_vm4, %v8606_v50  ;;  %6908 = vmatprep.mubr.msk.f32.mxu1 %vm8623_vm5, %v8629_v18  ;;  %10098 = vst [vmem:[#allocation30_spill] sm:$0xff] %v8662_v9  ;;  %v8686_v18 = vsel %vm9945_vm0, %v976_v61, %v977_v31  ;;  %v8690_v50 = vsel %vm9945_vm0, %v961_v43, %v962_v1  ;;  %v980_v61 = vrot.slane %v8454_v35, 7  ;;  %v5415_v43 = vld [vmem:[%s9856_s3 + $0x150] sm:$0xff]  ;;  %10110 = vst [vmem:[#allocation36_spill] sm:$0xff] %v10109_v28  ;;  %v10118_v28 = vmov 0 }
  0x57   : > { %7391 = vmatprep.subr.bf16.mxu0 %v7390_v47  ;;  %7679 = vmatprep.subr.bf16.mxu1 %v7390_v47  ;;  %10103 = vst [vmem:[#allocation33_spill] sm:$0xff] %v8686_v18  ;;  %10104 = vst [vmem:[#allocation34_spill] sm:$0xff] %v8690_v50  ;;  %v8717_v49 = vsel %vm9945_vm0, %v977_v31, %v978_v46  ;;  %v630_v36 = vand.u32 15, %v438_v38  ;;  %v8728_v17 = vsel %vm9945_vm0, %v978_v46, %v979_v16  ;;  %v10114_v31 = vmov 0 }
  0x58   : > { %6405 = vmatmul.mubr.f32.gmra.mrb[4].mxu0 %v8636_v58  ;;  %6909 = vmatmul.mubr.f32.gmra.mrb[4].mxu1 %v8640_v27  ;;  %v518_v58 = vand.u32 15, %v422_v51  ;;  %v964_v27 = vrot.slane %v8446_v29, 7  ;;  %v5416_v51 = vld [vmem:[%s9856_s3 + $0x158] sm:$0xff]  ;;  %10111 = vst [vmem:[#allocation37_spill] sm:$0xff] %v8717_v49  ;;  %10113 = vst [vmem:[#allocation39_spill] sm:$0xff] %v8728_v17  ;;  %v966_v46 = vrot.slane %v8479_v52, 7 }
  0x59   : > { %7393 = vmatpush3.bf16.msra.mxu0 %v7390_v47  ;;  %7681 = vmatpush3.bf16.msra.mxu1 %v7390_v47  ;;  %v10105_v47 = vmov 0  ;;  %vm8758_vm11 = vcmp.ge.s32.totalorder %v630_v36, 1 }
  0x5a   : > { %6407 = vmatprep.mubr.msk.f32.mxu0 %vm8652_vm6, %v8658_v5  ;;  %6911 = vmatprep.mubr.msk.f32.mxu1 %vm8664_vm7, %v8662_v9  ;;  %v10106_v47 = vsel %vm8699_vm8, 4294967295, %v10105_v47  ;;  %v8724_v9 = vsel %vm9945_vm0, %v962_v1, %v963_v21  ;;  %v965_v5 = vrot.slane %v8459_v39, 7  ;;  %vm8731_vm10 = vcmp.ge.s32.totalorder %v518_v58, 1 }
  0x5b   : > { %10107 = vst [vmem:[#allocation35_spill] sm:$0xff] %v10106_v47  ;;  %7395 = vmatprep.subr.bf16.mxu0 %v7394_v59  ;;  %7683 = vmatprep.subr.bf16.mxu1 %v7394_v59  ;;  %10112 = vst [vmem:[#allocation38_spill] sm:$0xff] %v8724_v9  ;;  %v10115_v31 = vsel %vm8731_vm10, 4294967295, %v10114_v31  ;;  %v8737_v38 = vsel %vm9945_vm0, %v963_v21, %v964_v27  ;;  %v981_v1 = vrot.slane %v8465_v45, 7  ;;  %v5417_v21 = vld [vmem:[%s9856_s3 + $0x160] sm:$0xff]  ;;  %v10119_v28 = vsel %vm8758_vm11, 4294967295, %v10118_v28 }
  0x5c   : > { %6408 = vmatmul.mubr.f32.gmra.mrb[6].mxu0 %v8680_v48  ;;  %6912 = vmatmul.mubr.f32.gmra.mrb[6].mxu1 %v8686_v18  ;;  %10116 = vst [vmem:[#allocation40_spill] sm:$0xff] %v10115_v31  ;;  %v7402_v18 = vpack.c.bf16 %v5416_v51, %v5415_v43  ;;  %v8748_v58 = vsel %vm9945_vm0, %v979_v16, %v980_v61  ;;  %v5418_v43 = vld [vmem:[%s9856_s3 + $0x168] sm:$0xff]  ;;  %v426_v51 = vadd.s32 112, %v8450_v33  ;;  %10120 = vst [vmem:[#allocation42_spill] sm:$0xff] %v10119_v28 }
  0x5d   : > { %7397 = vmatpush3.bf16.msra.mxu0 %v7394_v59  ;;  %7685 = vmatpush3.bf16.msra.mxu1 %v7394_v59  ;;  %10117 = vst [vmem:[#allocation41_spill] sm:$0xff] %v8748_v58  ;;  %v532_v59 = vand.u32 15, %v424_v0  ;;  %v644_v0 = vand.u32 15, %v440_v56  ;;  %v982_v16 = vrot.slane %v8481_v55, 7  ;;  %v442_v47 = vadd.s32 240, %v8450_v33 }
  0x5e   : > { %6410 = vmatprep.mubr.msk.f32.mxu0 %vm8699_vm8, %v8690_v50  ;;  %6914 = vmatprep.mubr.msk.f32.mxu1 %vm8711_vm9, %v8717_v49  ;;  %v967_v49 = vrot.slane %v8490_v62, 7  ;;  %v983_v50 = vrot.slane %v8492_v63, 7  ;;  %v968_v48 = vrot.slane %v8504_v12, 7  ;;  %v8772_v56 = vsel %vm9945_vm0, %v964_v27, %v965_v5 }
  0x5f   : > { %7399 = vmatprep.subr.bf16.mxu0 %v7398_v40  ;;  %7687 = vmatprep.subr.bf16.mxu1 %v7398_v40  ;;  %v8776_v36 = vsel %vm9945_vm0, %v980_v61, %v981_v1  ;;  %vm8784_vm12 = vcmp.ge.s32.totalorder %v532_v59, 1  ;;  %v8790_v27 = vsel %vm9945_vm0, %v965_v5, %v966_v46  ;;  %v984_v61 = vrot.slane %v8506_v15, 7 }
  0x60   : > { %6411 = vmatmul.mubr.f32.gmra.mrb[8].mxu0 %v8724_v9  ;;  %6915 = vmatmul.mubr.f32.gmra.mrb[8].mxu1 %v8728_v17  ;;  %v7406_v9 = vpack.c.bf16 %v5418_v43, %v5417_v21  ;;  %v10121_v17 = vmov 0  ;;  %v5419_v21 = vld [vmem:[%s9856_s3 + $0x170] sm:$0xff]  ;;  %v5420_v43 = vld [vmem:[%s9856_s3 + $0x178] sm:$0xff]  ;;  %vm8799_vm13 = vcmp.ge.s32.totalorder %v644_v0, 1  ;;  %v10124_v59 = vmov 0 }
  0x61   : > { %7401 = vmatpush3.bf16.msra.mxu0 %v7398_v40  ;;  %7689 = vmatpush3.bf16.msra.mxu1 %v7398_v40  ;;  %v10122_v17 = vsel %vm8784_vm12, 4294967295, %v10121_v17  ;;  %v546_v40 = vand.u32 15, %v426_v51  ;;  %v10125_v59 = vsel %vm8799_vm13, 4294967295, %v10124_v59  ;;  %v8805_v5 = vsel %vm9945_vm0, %v981_v1, %v982_v16 }
  0x62   : > { %6413 = vmatprep.mubr.msk.f32.mxu0 %vm8731_vm10, %v8737_v38  ;;  %6917 = vmatprep.mubr.msk.f32.mxu1 %vm8758_vm11, %v8748_v58  ;;  %10123 = vst [vmem:[#allocation43_spill] sm:$0xff] %v10122_v17  ;;  %10126 = vst [vmem:[#allocation44_spill] sm:$0xff] %v10125_v59  ;;  %v658_v51 = vand.u32 15, %v442_v47  ;;  %v338_v28 = vmul.f32 %v8246_v11, %v299_v42  ;;  %v8812_v31 = vsel %vm9945_vm0, %v966_v46, %v967_v49 }
  0x63   : > { %7403 = vmatprep.subr.bf16.mxu0 %v7402_v18  ;;  %7691 = vmatprep.subr.bf16.mxu1 %v7402_v18  ;;  %10127 = vst [vmem:[#allocation45_spill] sm:$0xff] %v8812_v31  ;;  %v8816_v0 = vsel %vm9945_vm0, %v982_v16, %v983_v50  ;;  %v8820_v58 = vsel %vm9945_vm0, %v967_v49, %v968_v48  ;;  %v429_v42 = vadd.s32 136, %v8450_v33  ;;  %vm8831_vm14 = vcmp.ge.s32.totalorder %v546_v40, 1  ;;  %v5428_v16 = vld [vmem:[%s9856_s3 + $0x180] sm:$0xff] }
  0x64   : > { %6414 = vmatmul.mubr.f32.gmra.mrb[10].mxu0 %v8772_v56  ;;  %6918 = vmatmul.mubr.f32.gmra.mrb[10].mxu1 %v8776_v36  ;;  %10128 = vst [vmem:[#allocation46_spill] sm:$0xff] %v8816_v0  ;;  %10129 = vst [vmem:[#allocation47_spill] sm:$0xff] %v8820_v58  ;;  %v7410_v47 = vpack.c.bf16 %v5420_v43, %v5419_v21  ;;  %v377_v1 = vadd.f32 %v8255_v14, %v338_v28  ;;  %v10130_v49 = vmov 0  ;;  %v1583_v14 = vrot.slane %v8315_v57, 1 }
  0x65   : > { %7405 = vmatpush3.bf16.msra.mxu0 %v7402_v18  ;;  %7693 = vmatpush3.bf16.msra.mxu1 %v7402_v18  ;;  %v10131_v49 = vsel %vm8831_vm14, 4294967295, %v10130_v49  ;;  %v8837_v18 = vsel %vm9945_vm0, %v983_v50, %v984_v61  ;;  %vm8841_vm15 = vcmp.ge.s32.totalorder %v658_v51, 1  ;;  %v10134_v28 = vmov 0  ;;  %v5429_v50 = vld [vmem:[%s9856_s3 + $0x188] sm:$0xff] }
  0x66   : > { %6416 = vmatprep.mubr.msk.f32.mxu0 %vm8784_vm12, %v8790_v27  ;;  %6920 = vmatprep.mubr.msk.f32.mxu1 %vm8799_vm13, %v8805_v5  ;;  %10132 = vst [vmem:[#allocation48_spill] sm:$0xff] %v10131_v49  ;;  %10133 = vst [vmem:[#allocation49_spill] sm:$0xff] %v8837_v18  ;;  %v10135_v28 = vsel %vm8841_vm15, 4294967295, %v10134_v28  ;;  %vm9957_vm13 = vcmp.lt.s32.totalorder %v8450_v33, 7  ;;  %v1584_v40 = vrot.slane %v8331_v3, 1  ;;  %v8853_v21 = vmax.f32 %v377_v1, 0.0 }
  0x67   : > { %7407 = vmatprep.subr.bf16.mxu0 %v7406_v9  ;;  %7695 = vmatprep.subr.bf16.mxu1 %v7406_v9  ;;  %10136 = vst [vmem:[#allocation50_spill] sm:$0xff] %v10135_v28  ;;  %v10138_v43 = vrot.slane %v8485_v60, 7  ;;  %v1568_v46 = vrot.slane %v8329_v2, 1  ;;  %v1569_v11 = vrot.slane %v8335_v7, 1  ;;  %v415_v57 = vadd.s32 24, %v8450_v33  ;;  %v5430_v7 = vld [vmem:[%s9856_s3 + $0x190] sm:$0xff] }
  0x68   : > { %10137 = vst [vmem:[#allocation51_spill] sm:$0xff] %v8853_v21  ;;  %6417 = vmatmul.mubr.f32.gmra.mrb[12].mxu0 %v8812_v31  ;;  %6921 = vmatmul.mubr.f32.gmra.mrb[12].mxu1 %v8816_v0  ;;  %v10139_v1 = vrot.slane %v8515_v26, 7  ;;  %v567_v59 = vand.u32 15, %v429_v42  ;;  %v431_v17 = vadd.s32 152, %v8450_v33  ;;  %v1585_v42 = vrot.slane %v8342_v13, 1 }
  0x69   : > { %v8861_v51 = vsel %vm9945_vm0, %v968_v48, %v10138_v43  ;;  %7409 = vmatpush3.bf16.msra.mxu0 %v7406_v9  ;;  %7697 = vmatpush3.bf16.msra.mxu1 %v7406_v9  ;;  %v10141_v9 = vrot.slane %v8265_v20, 1  ;;  %v1570_v48 = vrot.slane %v8354_v22, 1  ;;  %v8911_v22 = vsel %vm9957_vm13, %v1568_v46, %v1569_v11 }
  0x6a   : > { %v8870_v3 = vsel %vm9945_vm0, %v984_v61, %v10139_v1  ;;  %6419 = vmatprep.mubr.msk.f32.mxu0 %vm8831_vm14, %v8820_v58  ;;  %6923 = vmatprep.mubr.msk.f32.mxu1 %vm8841_vm15, %v8837_v18  ;;  %v7414_v61 = vpack.c.bf16 %v5429_v50, %v5428_v16  ;;  %v8889_v1 = vsel %vm9957_vm13, %v1583_v14, %v1584_v40  ;;  %v10144_v16 = vrot.slane %v8511_v24, 7 }
  0x6b   : > { %10140 = vst [vmem:[#allocation52_spill] sm:$0xff] %v8870_v3  ;;  %v8884_v43 = vsel %vm9957_vm13, %v10141_v9, %v1583_v14  ;;  %7411 = vmatprep.subr.bf16.mxu0 %v7410_v47  ;;  %7699 = vmatprep.subr.bf16.mxu1 %v7410_v47  ;;  %10143 = vst [vmem:[#allocation54_spill] sm:$0xff] %v8889_v1  ;;  %v5431_v9 = vld [vmem:[%s9856_s3 + $0x198] sm:$0xff]  ;;  %v10145_v50 = vrot.slane %v8853_v21, 7  ;;  %v1599_v14 = vrot.slane %v8511_v24, 1  ;;  %v469_v2 = vand.u32 15, %v415_v57 }
  0x6c   : > { %10142 = vst [vmem:[#allocation53_spill] sm:$0xff] %v8884_v43  ;;  %6420 = vmatmul.mubr.f32.gmra.mrb[14].mxu0 %v8861_v51  ;;  %6924 = vmatmul.mubr.f32.gmra.mrb[14].mxu1 %v8870_v3  ;;  %10147 = vst [vmem:[#allocation56_spill] sm:$0xff] %v8911_v22  ;;  %v417_v28 = vadd.s32 40, %v8450_v33  ;;  %vm8915_vm15 = vcmp.lt.s32.totalorder %v567_v59, 15  ;;  %v1586_v24 = vrot.slane %v8360_v25, 1  ;;  %v10151_v3 = vmov 0.0  }
  0x6d   : > { %v8904_v13 = vsel %vm9945_vm0, %v10145_v50, %v10144_v16  ;;  %7413 = vmatpush3.bf16.msra.mxu0 %v7410_v47  ;;  %7701 = vmatpush3.bf16.msra.mxu1 %v7410_v47  ;;  %v10148_v16 = vmov 0  ;;  %v581_v50 = vand.u32 15, %v431_v17  ;;  %v8925_v57 = vsel %vm9957_vm13, %v1584_v40, %v1585_v42 }
  0x6e   : > { %10146 = vst [vmem:[#allocation55_spill] sm:$0xff] %v8904_v13  ;;  %v10149_v16 = vsel %vm8915_vm15, 4294967295, %v10148_v16  ;;  %v433_v13 = vadd.s32 168, %v8450_v33  ;;  %6454 = vmatprep.mubr.f32.mxu0 %v10151_v3  ;;  %6958 = vmatprep.mubr.f32.mxu1 %v8884_v43  ;;  %10152 = vst [vmem:[#allocation58_spill] sm:$0xff] %v8925_v57  ;;  %v7418_v49 = vpack.c.bf16 %v5431_v9, %v5430_v7  ;;  %v1571_v47 = vrot.slane %v8366_v30, 1  ;;  %v5432_v7 = vld [vmem:[%s9856_s3 + $0x1a0] sm:$0xff] }
  0x6f   : > { %10150 = vst [vmem:[#allocation57_spill] sm:$0xff] %v10149_v16  ;;  %v10153_v59 = vrot.slane %v8853_v21, 1  ;;  %7415 = vmatprep.subr.bf16.mxu0 %v7414_v61  ;;  %7703 = vmatprep.subr.bf16.mxu1 %v7414_v61  ;;  %v8936_v25 = vsel %vm9957_vm13, %v1569_v11, %v1570_v48  ;;  %v1587_v43 = vrot.slane %v8372_v34, 1  ;;  %v1572_v40 = vrot.slane %v8384_v41, 1  ;;  %v5433_v9 = vld [vmem:[%s9856_s3 + $0x1a8] sm:$0xff] }
  0x70   : > { %10155 = vst [vmem:[#allocation60_spill] sm:$0xff] %v8936_v25  ;;  %6455 = vmatmul.mubr.f32.vlgmr.msra.gmra.mrb[0].mxu0 %v10151_v3  ;;  %6959 = vmatmul.mubr.msk.f32.vlgmr.msra.gmra.mrb[0].mxu1 %vm8915_vm15, %v8889_v1  ;;  %vm8954_vm0 = vcmp.lt.s32.totalorder %v469_v2, 15  ;;  %v10157_v11 = vmov 0  ;;  %v1588_v41 = vrot.slane %v8390_v44, 1  ;;  %v419_v34 = vadd.s32 56, %v8450_v33 }
  0x71   : > { %v8932_v17 = vsel %vm9957_vm13, %v10153_v59, %v1599_v14  ;;  %v8948_v59 = vsel %vm9957_vm13, %v1599_v14, %v1568_v46  ;;  %v10158_v11 = vsel %vm8954_vm0, 4294967295, %v10157_v11  ;;  %7417 = vmatpush3.bf16.msra.mxu0 %v7414_v61  ;;  %7705 = vmatpush3.bf16.msra.mxu1 %v7414_v61  ;;  %vm8960_vm14 = vcmp.lt.s32.totalorder %v581_v50, 15 }
  0x72   : > { %10154 = vst [vmem:[#allocation59_spill] sm:$0xff] %v8932_v17  ;;  %10156 = vst [vmem:[#allocation61_spill] sm:$0xff] %v8948_v59  ;;  %v483_v17 = vand.u32 15, %v417_v28  ;;  %v10160_v46 = vmov 0  ;;  %v8966_v14 = vsel %vm9957_vm13, %v1585_v42, %v1586_v24  ;;  %v595_v3 = vand.u32 15, %v433_v13  ;;  %6457 = vmatprep.mubr.f32.mxu0 %v8911_v22  ;;  %6961 = vmatprep.mubr.f32.mxu1 %v8925_v57 }
  0x73   : > { %10159 = vst [vmem:[#allocation62_spill] sm:$0xff] %v10158_v11  ;;  %v10161_v46 = vsel %vm8960_vm14, 4294967295, %v10160_v46  ;;  %10163 = vst [vmem:[#allocation64_spill] sm:$0xff] %v8966_v14  ;;  %v435_v2 = vadd.s32 184, %v8450_v33  ;;  %v8973_v28 = vsel %vm9957_vm13, %v1570_v48, %v1571_v47  ;;  %v7422_v61 = vpack.c.bf16 %v5433_v9, %v5432_v7  ;;  %7419 = vmatprep.subr.bf16.mxu0 %v7418_v49  ;;  %v5434_v48 = vld [vmem:[%s9856_s3 + $0x1b0] sm:$0xff]  ;;  %v5435_v7 = vld [vmem:[%s9856_s3 + $0x1b8] sm:$0xff] }
  0x74   : > { %10162 = vst [vmem:[#allocation63_spill] sm:$0xff] %v10161_v46  ;;  %10164 = vst [vmem:[#allocation65_spill] sm:$0xff] %v8973_v28  ;;  %v1573_v50 = vrot.slane %v8401_v53, 1  ;;  %7707 = vmatprep.subr.bf16.mxu1 %v7418_v49  ;;  %v8978_v42 = vsel %vm9957_vm13, %v1586_v24, %v1587_v43  ;;  %v8982_v13 = vsel %vm9957_vm13, %v1571_v47, %v1572_v40  ;;  %v1589_v59 = vrot.slane %v8403_v54, 1 }
  0x75   : > { %10165 = vst [vmem:[#allocation66_spill] sm:$0xff] %v8978_v42  ;;  %10166 = vst [vmem:[#allocation67_spill] sm:$0xff] %v8982_v13  ;;  %v1574_v1 = vrot.slane %v8420_v4, 1  ;;  %6458 = vmatmul.mubr.msk.f32.gmra.mrb[2].mxu0 %vm8954_vm0, %v8936_v25  ;;  %6962 = vmatmul.mubr.msk.f32.gmra.mrb[2].mxu1 %vm8960_vm14, %v8966_v14  ;;  %vm8998_vm13 = vcmp.lt.s32.totalorder %v483_v17, 15  ;;  %v10167_v24 = vmov 0  ;;  %vm10170_vm15 = vcmp.lt.s32.totalorder %v8450_v33, 7 }
  0x76   : > { %v10168_v24 = vsel %vm8998_vm13, 4294967295, %v10167_v24  ;;  %v9004_v47 = vsel %vm10170_vm15, %v1587_v43, %v1588_v41  ;;  %v497_v9 = vand.u32 15, %v419_v34  ;;  %v1590_v16 = vrot.slane %v8422_v6, 1  ;;  %7421 = vmatpush3.bf16.msra.mxu0 %v7418_v49  ;;  %7709 = vmatpush3.bf16.msra.mxu1 %v7418_v49  ;;  %vm10176_vm14 = vmmov %vm10170_vm15 }
  0x77   : > { %10169 = vst [vmem:[#allocation68_spill] sm:$0xff] %v10168_v24  ;;  %10171 = vst [vmem:[#allocation69_spill] sm:$0xff] %v9004_v47  ;;  %vm9007_vm12 = vcmp.lt.s32.totalorder %v595_v3, 15  ;;  %v10172_v11 = vmov 0  ;;  %v609_v25 = vand.u32 15, %v435_v2  ;;  %v421_v46 = vadd.s32 72, %v8450_v33  ;;  %6460 = vmatprep.mubr.f32.mxu0 %v8973_v28  ;;  %6964 = vmatprep.mubr.f32.mxu1 %v8978_v42 }
  0x78   : > { %v10173_v11 = vsel %vm9007_vm12, 4294967295, %v10172_v11  ;;  %v437_v17 = vadd.s32 200, %v8450_v33  ;;  %v9017_v34 = vsel %vm10170_vm15, %v1572_v40, %v1573_v50  ;;  %v7426_v43 = vpack.c.bf16 %v5435_v7, %v5434_v48  ;;  %7423 = vmatprep.subr.bf16.mxu0 %v7422_v61  ;;  %7711 = vmatprep.subr.bf16.mxu1 %v7422_v61  ;;  %vm10178_vm0 = vmmov %vm10176_vm14  ;;  %v5437_v48 = vld [vmem:[%s9856_s3 + $0x1c8] sm:$0xff] }
  0x79   : > { %10174 = vst [vmem:[#allocation70_spill] sm:$0xff] %v10173_v11  ;;  %10175 = vst [vmem:[#allocation71_spill] sm:$0xff] %v9017_v34  ;;  %v1575_v49 = vrot.slane %v8426_v10, 1  ;;  %v9022_v3 = vsel %vm10176_vm14, %v1588_v41, %v1589_v59  ;;  %v9026_v2 = vsel %vm10178_vm0, %v1573_v50, %v1574_v1  ;;  %v1591_v28 = vrot.slane %v8434_v19, 1  ;;  %6461 = vmatmul.mubr.msk.f32.gmra.mrb[4].mxu0 %vm8998_vm13, %v8982_v13  ;;  %v5436_v50 = vld [vmem:[%s9856_s3 + $0x1c0] sm:$0xff] }
  0x7a   : > { %10177 = vst [vmem:[#allocation72_spill] sm:$0xff] %v9022_v3  ;;  %10179 = vst [vmem:[#allocation73_spill] sm:$0xff] %v9026_v2  ;;  %v1576_v42 = vrot.slane %v8446_v29, 1  ;;  %6965 = vmatmul.mubr.msk.f32.gmra.mrb[4].mxu1 %vm9007_vm12, %v9004_v47  ;;  %vm9036_vm15 = vcmp.lt.s32.totalorder %v497_v9, 15  ;;  %v10180_v40 = vmov 0  ;;  %v423_v7 = vadd.s32 88, %v8450_v33  ;;  %7425 = vmatpush3.bf16.msra.mxu0 %v7422_v61 }
  0x7b   : > { %v10181_v40 = vsel %vm9036_vm15, 4294967295, %v10180_v40  ;;  %vm10183_vm14 = vmmov %vm10178_vm0  ;;  %v439_v11 = vadd.s32 216, %v8450_v33  ;;  %7713 = vmatpush3.bf16.msra.mxu1 %v7422_v61  ;;  %vm9052_vm0 = vcmp.lt.s32.totalorder %v609_v25, 15  ;;  %v10185_v9 = vmov 0  ;;  %6463 = vmatprep.mubr.f32.mxu0 %v9017_v34  ;;  %v5439_v34 = vld [vmem:[%s9856_s3 + $0x1d8] sm:$0xff] }
  0x7c   : > { %10182 = vst [vmem:[#allocation74_spill] sm:$0xff] %v10181_v40  ;;  %v9042_v41 = vsel %vm10183_vm14, %v1589_v59, %v1590_v16  ;;  %v10186_v9 = vsel %vm9052_vm0, 4294967295, %v10185_v9  ;;  %v511_v59 = vand.u32 15, %v421_v46  ;;  %v623_v24 = vand.u32 15, %v437_v17  ;;  %6967 = vmatprep.mubr.f32.mxu1 %v9022_v3  ;;  %7427 = vmatprep.subr.bf16.mxu0 %v7426_v43  ;;  %vm10189_vm12 = vmmov %vm10183_vm14 }
  0x7d   : > { %10184 = vst [vmem:[#allocation75_spill] sm:$0xff] %v9042_v41  ;;  %10187 = vst [vmem:[#allocation76_spill] sm:$0xff] %v10186_v9  ;;  %v1592_v47 = vrot.slane %v8454_v35, 1  ;;  %v9061_v13 = vsel %vm10183_vm14, %v1574_v1, %v1575_v49  ;;  %v1577_v14 = vrot.slane %v8459_v39, 1  ;;  %v1593_v61 = vrot.slane %v8465_v45, 1  ;;  %7715 = vmatprep.subr.bf16.mxu1 %v7426_v43  ;;  %v5438_v1 = vld [vmem:[%s9856_s3 + $0x1d0] sm:$0xff]  ;;  %6464 = vmatmul.mubr.msk.f32.gmra.mrb[6].mxu0 %vm9036_vm15, %v9026_v2 }
  0x7e   : > { %10188 = vst [vmem:[#allocation77_spill] sm:$0xff] %v9061_v13  ;;  %v9067_v25 = vsel %vm10189_vm12, %v1590_v16, %v1591_v28  ;;  %vm10191_vm13 = vmmov %vm10189_vm12  ;;  %v7430_v17 = vpack.c.bf16 %v5437_v48, %v5436_v50  ;;  %v1578_v3 = vrot.slane %v8479_v52, 1  ;;  %6968 = vmatmul.mubr.msk.f32.gmra.mrb[6].mxu1 %vm9052_vm0, %v9042_v41  ;;  %v525_v16 = vand.u32 15, %v423_v7  ;;  %7429 = vmatpush3.bf16.msra.mxu0 %v7426_v43 }
  0x7f   : > { %10190 = vst [vmem:[#allocation78_spill] sm:$0xff] %v9067_v25  ;;  %v9071_v46 = vsel %vm10191_vm13, %v1575_v49, %v1576_v42  ;;  %v637_v49 = vand.u32 15, %v439_v11  ;;  %v1594_v50 = vrot.slane %v8481_v55, 1  ;;  %v425_v48 = vadd.s32 104, %v8450_v33  ;;  %7717 = vmatpush3.bf16.msra.mxu1 %v7426_v43  ;;  %6466 = vmatprep.mubr.f32.mxu0 %v9061_v13  ;;  %vm10200_vm0 = vmmov %vm10183_vm14 }
  0x80   : > { %10192 = vst [vmem:[#allocation79_spill] sm:$0xff] %v9071_v46  ;;  %vm9088_vm12 = vcmp.lt.s32.totalorder %v511_v59, 15  ;;  %v10193_v57 = vmov 0  ;;  %vm9092_vm13 = vcmp.lt.s32.totalorder %v623_v24, 15  ;;  %v10196_v22 = vmov 0  ;;  %6970 = vmatprep.mubr.f32.mxu1 %v9067_v25  ;;  %vm10201_vm15 = vmmov %vm10200_vm0  ;;  %7431 = vmatprep.subr.bf16.mxu0 %v7430_v17 }
  0x81   : > { %v10194_v57 = vsel %vm9088_vm12, 4294967295, %v10193_v57  ;;  %v10197_v22 = vsel %vm9092_vm13, 4294967295, %v10196_v22  ;;  %v9098_v9 = vsel %vm10183_vm14, %v1591_v28, %v1592_v47  ;;  %v441_v11 = vadd.s32 232, %v8450_v33  ;;  %7719 = vmatprep.subr.bf16.mxu1 %v7430_v17  ;;  %vm10202_vm14 = vmmov %vm10200_vm0  ;;  %6467 = vmatmul.mubr.msk.f32.gmra.mrb[8].mxu0 %vm9088_vm12, %v9071_v46 }
  0x82   : > { %10195 = vst [vmem:[#allocation80_spill] sm:$0xff] %v10194_v57  ;;  %10198 = vst [vmem:[#allocation81_spill] sm:$0xff] %v10197_v22  ;;  %v9105_v43 = vsel %vm10200_vm0, %v1576_v42, %v1577_v14  ;;  %v9109_v24 = vsel %vm10201_vm15, %v1592_v47, %v1593_v61  ;;  %v7434_v7 = vpack.c.bf16 %v5439_v34, %v5438_v1  ;;  %v1579_v59 = vrot.slane %v8490_v62, 1  ;;  %v5440_v42 = vld [vmem:[%s9856_s3 + $0x1e0] sm:$0xff]  ;;  %v5441_v47 = vld [vmem:[%s9856_s3 + $0x1e8] sm:$0xff] }
  0x83   : > { %10199 = vst [vmem:[#allocation82_spill] sm:$0xff] %v9098_v9  ;;  %v9113_v28 = vsel %vm10202_vm14, %v1577_v14, %v1578_v3  ;;  %v1595_v40 = vrot.slane %v8492_v63, 1  ;;  %v1580_v25 = vrot.slane %v8504_v12, 1  ;;  %6971 = vmatmul.mubr.msk.f32.gmra.mrb[8].mxu1 %vm9092_vm13, %v9098_v9  ;;  %vm9130_vm15 = vcmp.lt.s32.totalorder %v525_v16, 15  ;;  %7433 = vmatpush3.bf16.msra.mxu0 %v7430_v17  ;;  %vm10210_vm13 = vmmov %vm10202_vm14 }
  0x84   : > { %v10203_v14 = vmov 0  ;;  %vm9134_vm0 = vcmp.lt.s32.totalorder %v637_v49, 15  ;;  %v10206_v34 = vmov 0  ;;  %v9140_v1 = vsel %vm10202_vm14, %v1593_v61, %v1594_v50  ;;  %7721 = vmatpush3.bf16.msra.mxu1 %v7430_v17  ;;  %6469 = vmatprep.mubr.f32.mxu0 %v9105_v43 }
  0x85   : > { %v10204_v14 = vsel %vm9130_vm15, 4294967295, %v10203_v14  ;;  %v10207_v34 = vsel %vm9134_vm0, 4294967295, %v10206_v34  ;;  %10209 = vst [vmem:[#allocation85_spill] sm:$0xff] %v9140_v1  ;;  %v539_v13 = vand.u32 15, %v425_v48  ;;  %v651_v57 = vand.u32 15, %v441_v11  ;;  %6973 = vmatprep.mubr.f32.mxu1 %v9109_v24  ;;  %7435 = vmatprep.subr.bf16.mxu0 %v7434_v7 }
  0x86   : > { %10205 = vst [vmem:[#allocation83_spill] sm:$0xff] %v10204_v14  ;;  %10208 = vst [vmem:[#allocation84_spill] sm:$0xff] %v10207_v34  ;;  %v1596_v46 = vrot.slane %v8506_v15, 1  ;;  %v427_v22 = vadd.s32 120, %v8450_v33  ;;  %v443_v16 = vadd.s32 248, %v8450_v33  ;;  %v7438_v49 = vpack.c.bf16 %v5441_v47, %v5440_v42  ;;  %7723 = vmatprep.subr.bf16.mxu1 %v7434_v7  ;;  %6470 = vmatmul.mubr.msk.f32.gmra.mrb[10].mxu0 %vm9130_vm15, %v9113_v28  ;;  %v5443_v47 = vld [vmem:[%s9856_s3 + $0x1f8] sm:$0xff] }
  0x87   : > { %v9149_v61 = vsel %vm10202_vm14, %v1578_v3, %v1579_v59  ;;  %v9153_v17 = vsel %vm10210_vm13, %v1594_v50, %v1595_v40  ;;  %v1581_v48 = vrot.slane %v8485_v60, 1  ;;  %v1597_v11 = vrot.slane %v8515_v26, 1  ;;  %6974 = vmatmul.mubr.msk.f32.gmra.mrb[10].mxu1 %vm9134_vm0, %v9140_v1  ;;  %vm10214_vm14 = vmmov %vm10210_vm13  ;;  %v5442_v50 = vld [vmem:[%s9856_s3 + $0x1f0] sm:$0xff]  ;;  %7437 = vmatpush3.bf16.msra.mxu0 %v7434_v7 }
  0x88   : > { %vm9163_vm12 = vcmp.lt.s32.totalorder %v539_v13, 15  ;;  %v10211_v42 = vmov 0  ;;  %v9169_v3 = vsel %vm10214_vm14, %v1579_v59, %v1580_v25  ;;  %7725 = vmatpush3.bf16.msra.mxu1 %v7434_v7  ;;  %vm9177_vm13 = vcmp.lt.s32.totalorder %v651_v57, 15  ;;  %vm10218_vm0 = vmmov %vm10214_vm14  ;;  %6472 = vmatprep.mubr.f32.mxu0 %v9149_v61 }
  0x89   : > { %v10212_v42 = vsel %vm9163_vm12, 4294967295, %v10211_v42  ;;  %v10215_v34 = vmov 0  ;;  %v9183_v13 = vsel %vm10218_vm0, %v1595_v40, %v1596_v46  ;;  %v553_v59 = vand.u32 15, %v427_v22  ;;  %6976 = vmatprep.mubr.f32.mxu1 %v9153_v17  ;;  %7439 = vmatprep.subr.bf16.mxu0 %v7438_v49  ;;  %vm10219_vm14 = vmmov %vm10218_vm0  ;;  %v5452_v22 = vld [vmem:[%s9856_s3 + $0x200] sm:$0xff] }
  0x8a   : > { %10213 = vst [vmem:[#allocation86_spill] sm:$0xff] %v10212_v42  ;;  %v10216_v34 = vsel %vm9177_vm13, 4294967295, %v10215_v34  ;;  %v665_v14 = vand.u32 15, %v443_v16  ;;  %7727 = vmatprep.subr.bf16.mxu1 %v7438_v49  ;;  %v9189_v1 = vsel %vm10219_vm14, %v1580_v25, %v1581_v48  ;;  %vm10220_vm15 = vmmov %vm10218_vm0  ;;  %v7442_v7 = vpack.c.bf16 %v5443_v47, %v5442_v50  ;;  %6473 = vmatmul.mubr.msk.f32.gmra.mrb[12].mxu0 %vm9163_vm12, %v9169_v3  ;;  %v5453_v25 = vld [vmem:[%s9856_s3 + $0x208] sm:$0xff] }
  0x8b   : > { %10217 = vst [vmem:[#allocation87_spill] sm:$0xff] %v10216_v34  ;;  %v9193_v57 = vsel %vm10220_vm15, %v1596_v46, %v1597_v11  ;;  %v448_v40 = vand.u32 15, %v8450_v33  ;;  %6977 = vmatmul.mubr.msk.f32.gmra.mrb[12].mxu1 %vm9177_vm13, %v9183_v13  ;;  %7441 = vmatpush3.bf16.msra.mxu0 %v7438_v49  ;;  %vm9208_vm15 = vcmp.lt.s32.totalorder %v553_v59, 15  ;;  %v10222_v46 = vmov 0  ;;  %vm10229_vm13 = vmmov %vm10218_vm0  ;;  %v10233_v59 = vld [vmem:[#allocation21_spill] sm:$0xff] }
  0x8c   : > { %10221 = vst [vmem:[#allocation88_spill] sm:$0xff] %v9193_v57  ;;  %7729 = vmatpush3.bf16.msra.mxu1 %v7438_v49  ;;  %v10223_v46 = vsel %vm9208_vm15, 4294967295, %v10222_v46  ;;  %v10225_v16 = vrot.slane %v8265_v20, 1  ;;  %vm9218_vm14 = vcmp.lt.s32.totalorder %v665_v14, 15  ;;  %v10228_v34 = vrot.slane %v8853_v21, 1  ;;  %6475 = vmatprep.mubr.f32.mxu0 %v9189_v1  ;;  %v5521_v49 = vld [vmem:[%s9856_s3 + $0x3a8] sm:$0xff] }
  0x8d   : > { %10224 = vst [vmem:[#allocation89_spill] sm:$0xff] %v10223_v46  ;;  %6979 = vmatprep.mubr.f32.mxu1 %v9193_v57  ;;  %7443 = vmatprep.subr.bf16.mxu0 %v7442_v7  ;;  %vm9230_vm12 = vcmp.ge.s32.totalorder %v448_v40, 1  ;;  %v7446_v14 = vpack.c.bf16 %v5453_v25, %v5452_v22  ;;  %v5456_v40 = vld [vmem:[%s9856_s3 + $0x220] sm:$0xff]  ;;  %v10236_v25 = vld [vmem:[#allocation25_spill] sm:$0xff]  ;;  %v10332_v46 = vld [vmem:[#allocation27_spill] sm:$0xff] }
  0x8e   : > { %v9216_v50 = vsel %vm10218_vm0, %v1581_v48, %v10225_v16  ;;  %v9226_v42 = vsel %vm10229_vm13, %v1597_v11, %v10228_v34  ;;  %7731 = vmatprep.subr.bf16.mxu1 %v7442_v7  ;;  %v5454_v34 = vld [vmem:[%s9856_s3 + $0x210] sm:$0xff]  ;;  %v5455_v48 = vld [vmem:[%s9856_s3 + $0x218] sm:$0xff]  ;;  %v10242_v22 = vld [vmem:[#allocation30_spill] sm:$0xff] }
  0x8f   : > { %10230 = vst [vmem:[#allocation90_spill] sm:$0xff] %v9226_v42  ;;  %6476 = vmatmul.mubr.msk.f32.gmra.mrb[14].mxu0 %vm9208_vm15, %v9216_v50  ;;  %6980 = vmatmul.mubr.msk.f32.gmra.mrb[14].mxu1 %vm9218_vm14, %v9226_v42  ;;  %v7450_v11 = vpack.c.bf16 %v5455_v48, %v5454_v34  ;;  %v10238_v34 = vld [vmem:[#allocation26_spill] sm:$0xff]  ;;  %v10239_v48 = vld [vmem:[#allocation27_spill] sm:$0xff] }
  0x90   : > { %7445 = vmatpush3.bf16.msra.mxu0 %v7442_v7  ;;  %7733 = vmatpush3.bf16.msra.mxu1 %v7442_v7  ;;  %v5457_v7 = vld [vmem:[%s9856_s3 + $0x228] sm:$0xff]  ;;  %v10246_v16 = vld [vmem:[#allocation34_spill] sm:$0xff] }
  0x91   : > { %6510 = vmatprep.mubr.msk.f32.mxu0 %vm9230_vm12, %v8584_v23  ;;  %7014 = vmatprep.mubr.msk.f32.mxu1 %vm8528_vm1, %v8571_v8  ;;  %v10234_v23 = vld [vmem:[#allocation23_spill] sm:$0xff]  ;;  %v10240_v8 = vld [vmem:[#allocation29_spill] sm:$0xff] }
  0x92   : > { %7447 = vmatprep.subr.bf16.mxu0 %v7446_v14  ;;  %7735 = vmatprep.subr.bf16.mxu1 %v7446_v14 }
  0x93   : > { %6511 = vmatmul.mubr.f32.vlgmr.msra.gmra.mrb[0].mxu0 %v8592_v32  ;;  %7015 = vmatmul.mubr.f32.vlgmr.msra.gmra.mrb[0].mxu1 %v10233_v59  ;;  %v7454_v32 = vpack.c.bf16 %v5457_v7, %v5456_v40  ;;  %v5458_v59 = vld [vmem:[%s9856_s3 + $0x230] sm:$0xff]  ;;  %v10253_v40 = vld [vmem:[#allocation41_spill] sm:$0xff] }
  0x94   : > { %7449 = vmatpush3.bf16.msra.mxu0 %v7446_v14  ;;  %7737 = vmatpush3.bf16.msra.mxu1 %v7446_v14  ;;  %v5459_v14 = vld [vmem:[%s9856_s3 + $0x238] sm:$0xff] }
  0x95   : > { %6513 = vmatprep.mubr.msk.f32.mxu0 %vm8550_vm2, %v10234_v23  ;;  %7017 = vmatprep.mubr.msk.f32.mxu1 %vm8565_vm3, %v10236_v25  ;;  %v7458_v7 = vpack.c.bf16 %v5459_v14, %v5458_v59  ;;  %v5466_v59 = vld [vmem:[%s9856_s3 + $0x270] sm:$0xff] }
  0x96   : > { %7451 = vmatprep.subr.bf16.mxu0 %v7450_v11  ;;  %7739 = vmatprep.subr.bf16.mxu1 %v7450_v11 }
  0x97   : > { %6514 = vmatmul.mubr.f32.gmra.mrb[2].mxu0 %v10238_v34  ;;  %7018 = vmatmul.mubr.f32.gmra.mrb[2].mxu1 %v10239_v48  ;;  %v10244_v48 = vld [vmem:[#allocation32_spill] sm:$0xff]  ;;  %v10245_v34 = vld [vmem:[#allocation33_spill] sm:$0xff] }
  0x98   : > { %7453 = vmatpush3.bf16.msra.mxu0 %v7450_v11  ;;  %7741 = vmatpush3.bf16.msra.mxu1 %v7450_v11  ;;  %v5461_v11 = vld [vmem:[%s9856_s3 + $0x248] sm:$0xff] }
  0x99   : > { %6516 = vmatprep.mubr.msk.f32.mxu0 %vm8600_vm4, %v10240_v8  ;;  %7020 = vmatprep.mubr.msk.f32.mxu1 %vm8623_vm5, %v10242_v22  ;;  %v10248_v22 = vld [vmem:[#allocation37_spill] sm:$0xff]  ;;  %v7462_v14 = vpack.c.bf16 %v5461_v11, %v5460_v37  ;;  %v5462_v8 = vld [vmem:[%s9856_s3 + $0x250] sm:$0xff]  ;;  %v10262_v37 = vrot.slane %v8515_v26, 7 }
  0x9a   : > { %7455 = vmatprep.subr.bf16.mxu0 %v7454_v32  ;;  %7743 = vmatprep.subr.bf16.mxu1 %v7454_v32 }
  0x9b   : > { %6517 = vmatmul.mubr.f32.gmra.mrb[4].mxu0 %v10244_v48  ;;  %7021 = vmatmul.mubr.f32.gmra.mrb[4].mxu1 %v10245_v34  ;;  %v10250_v34 = vld [vmem:[#allocation38_spill] sm:$0xff]  ;;  %v10251_v48 = vld [vmem:[#allocation39_spill] sm:$0xff] }
  0x9c   : > { %7457 = vmatpush3.bf16.msra.mxu0 %v7454_v32  ;;  %7745 = vmatpush3.bf16.msra.mxu1 %v7454_v32  ;;  %v5463_v32 = vld [vmem:[%s9856_s3 + $0x258] sm:$0xff] }
  0x9d   : > { %6519 = vmatprep.mubr.msk.f32.mxu0 %vm8652_vm6, %v10246_v16  ;;  %7023 = vmatprep.mubr.msk.f32.mxu1 %vm8664_vm7, %v10248_v22  ;;  %v7466_v11 = vpack.c.bf16 %v5463_v32, %v5462_v8  ;;  %v10257_v8 = vld [vmem:[#allocation43_spill] sm:$0xff] }
  0x9e   : > { %7459 = vmatprep.subr.bf16.mxu0 %v7458_v7  ;;  %7747 = vmatprep.subr.bf16.mxu1 %v7458_v7  ;;  %vm10258_vm13 = vnez %v10257_v8  ;;  %v5469_v8 = vld [vmem:[%s9856_s3 + $0x288] sm:$0xff] }
  0x9f   : > { %6520 = vmatmul.mubr.f32.gmra.mrb[6].mxu0 %v10250_v34  ;;  %7024 = vmatmul.mubr.f32.gmra.mrb[6].mxu1 %v10251_v48  ;;  %v5464_v48 = vld [vmem:[%s9856_s3 + $0x260] sm:$0xff] }
  0xa0   : > { %7461 = vmatpush3.bf16.msra.mxu0 %v7458_v7  ;;  %7749 = vmatpush3.bf16.msra.mxu1 %v7458_v7  ;;  %v5465_v7 = vld [vmem:[%s9856_s3 + $0x268] sm:$0xff] }
  0xa1   : > { %6522 = vmatprep.mubr.msk.f32.mxu0 %vm8699_vm8, %v8737_v38  ;;  %7026 = vmatprep.mubr.msk.f32.mxu1 %vm8711_vm9, %v10253_v40  ;;  %v7470_v32 = vpack.c.bf16 %v5465_v7, %v5464_v48  ;;  %v10259_v48 = vld [vmem:[#allocation44_spill] sm:$0xff]  ;;  %v10261_v7 = vrot.slane %v8853_v21, 7 }
  0xa2   : > { %7463 = vmatprep.subr.bf16.mxu0 %v7462_v14  ;;  %7751 = vmatprep.subr.bf16.mxu1 %v7462_v14  ;;  %vm10260_vm0 = vnez %v10259_v48  ;;  %v5468_v48 = vld [vmem:[%s9856_s3 + $0x280] sm:$0xff] }
  0xa3   : > { %6523 = vmatmul.mubr.f32.gmra.mrb[8].mxu0 %v8772_v56  ;;  %7027 = vmatmul.mubr.f32.gmra.mrb[8].mxu1 %v8776_v36 }
  0xa4   : > { %7465 = vmatpush3.bf16.msra.mxu0 %v7462_v14  ;;  %7753 = vmatpush3.bf16.msra.mxu1 %v7462_v14  ;;  %v5467_v14 = vld [vmem:[%s9856_s3 + $0x278] sm:$0xff] }
  0xa5   : > { %6525 = vmatprep.mubr.msk.f32.mxu0 %vm8731_vm10, %v8790_v27  ;;  %7029 = vmatprep.mubr.msk.f32.mxu1 %vm8758_vm11, %v8805_v5  ;;  %vm10263_vm11 = vcmp.lt.s32.totalorder %v8450_v33, 1 }
  0xa6   : > { %7467 = vmatprep.subr.bf16.mxu0 %v7466_v11  ;;  %7755 = vmatprep.subr.bf16.mxu1 %v7466_v11 }
  0xa7   : > { %6526 = vmatmul.mubr.f32.gmra.mrb[10].mxu0 %v8812_v31  ;;  %7030 = vmatmul.mubr.f32.gmra.mrb[10].mxu1 %v8816_v0  ;;  %v9342_v0 = vsel %vm10263_vm11, %v10262_v37, %v10261_v7  ;;  %v7474_v31 = vpack.c.bf16 %v5467_v14, %v5466_v59  ;;  %v10269_v59 = vld [vmem:[#allocation50_spill] sm:$0xff]  ;;  %v7478_v37 = vpack.c.bf16 %v5469_v8, %v5468_v48  ;;  %v10272_v7 = vld [vmem:[#allocation55_spill] sm:$0xff] }
  0xa8   : > { %7469 = vmatpush3.bf16.msra.mxu0 %v7466_v11  ;;  %7757 = vmatpush3.bf16.msra.mxu1 %v7466_v11  ;;  %10264 = vst [vmem:[#allocation23_spill] sm:$0xff] %v9342_v0  ;;  %v10265_v11 = vld [vmem:[#allocation52_spill] sm:$0xff]  ;;  %vm10270_vm11 = vnez %v10269_v59  ;;  %v10271_v14 = vld [vmem:[#allocation18_spill] sm:$0xff]  ;;  %v10274_v59 = vld [vmem:[#allocation5_spill] sm:$0xff] }
  0xa9   : > { %6528 = vmatprep.mubr.msk.f32.mxu0 %vm10258_vm13, %v8820_v58  ;;  %7032 = vmatprep.mubr.msk.f32.mxu1 %vm10260_vm0, %v8837_v18  ;;  %v10266_v18 = vld [vmem:[#allocation16_spill] sm:$0xff]  ;;  %v10275_v48 = vld [vmem:[#allocation6_spill] sm:$0xff] }
  0xaa   : > { %7471 = vmatprep.subr.bf16.mxu0 %v7470_v32  ;;  %7759 = vmatprep.subr.bf16.mxu1 %v7470_v32  ;;  %v10267_v58 = vld [vmem:[#allocation48_spill] sm:$0xff] }
  0xab   : > { %6529 = vmatmul.mubr.f32.gmra.mrb[12].mxu0 %v8861_v51  ;;  %7033 = vmatmul.mubr.f32.gmra.mrb[12].mxu1 %v10265_v11  ;;  %vm10268_vm0 = vnez %v10267_v58  ;;  %v5470_v11 = vld [vmem:[%s9856_s3 + $0x290] sm:$0xff] }
  0xac   : > { %7473 = vmatpush3.bf16.msra.mxu0 %v7470_v32  ;;  %7761 = vmatpush3.bf16.msra.mxu1 %v7470_v32  ;;  %v5471_v32 = vld [vmem:[%s9856_s3 + $0x298] sm:$0xff]  ;;  %v10273_v58 = vld [vmem:[#allocation4_spill] sm:$0xff] }
  0xad   : > { %6531 = vmatprep.mubr.msk.f32.mxu0 %vm10268_vm0, %v10266_v18  ;;  %7035 = vmatprep.mubr.msk.f32.mxu1 %vm10270_vm11, %v9342_v0  ;;  %v7482_v8 = vpack.c.bf16 %v5471_v32, %v5470_v11  ;;  %v5473_v0 = vld [vmem:[%s9856_s3 + $0x2a8] sm:$0xff]  ;;  %v10279_v32 = vld [vmem:[#allocation10_spill] sm:$0xff] }
  0xae   : > { %7475 = vmatprep.subr.bf16.mxu0 %v7474_v31  ;;  %7763 = vmatprep.subr.bf16.mxu1 %v7474_v31 }
  0xaf   : > { %6532 = vmatmul.mubr.f32.gmra.mrb[14].mxu0 %v10271_v14  ;;  %7036 = vmatmul.mubr.f32.gmra.mrb[14].mxu1 %v10272_v7  ;;  %v10276_v7 = vld [vmem:[#allocation7_spill] sm:$0xff]  ;;  %v5472_v14 = vld [vmem:[%s9856_s3 + $0x2a0] sm:$0xff] }
  0xb0   : > { %7477 = vmatpush3.bf16.msra.mxu0 %v7474_v31  ;;  %7765 = vmatpush3.bf16.msra.mxu1 %v7474_v31  ;;  %v10277_v31 = vld [vmem:[#allocation8_spill] sm:$0xff]  ;;  %v7486_v11 = vpack.c.bf16 %v5473_v0, %v5472_v14  ;;  %v5476_v14 = vld [vmem:[%s9856_s3 + $0x2c0] sm:$0xff] }
  0xb1   : > { %6566 = vmatprep.mubr.f32.mxu0 %v10273_v58  ;;  %7070 = vmatprep.mubr.f32.mxu1 %v10274_v59  ;;  %v10278_v58 = vld [vmem:[#allocation9_spill] sm:$0xff]  ;;  %v5477_v59 = vld [vmem:[%s9856_s3 + $0x2c8] sm:$0xff] }
  0xb2   : > { %7479 = vmatprep.subr.bf16.mxu0 %v7478_v37  ;;  %7767 = vmatprep.subr.bf16.mxu1 %v7478_v37 }
  0xb3   : > { %6567 = vmatmul.mubr.f32.vlgmr.msra.gmra.mrb[0].mxu0 %v10275_v48  ;;  %7071 = vmatmul.mubr.f32.vlgmr.msra.gmra.mrb[0].mxu1 %v10276_v7  ;;  %v5474_v48 = vld [vmem:[%s9856_s3 + $0x2b0] sm:$0xff]  ;;  %v5475_v7 = vld [vmem:[%s9856_s3 + $0x2b8] sm:$0xff] }
  0xb4   : > { %7481 = vmatpush3.bf16.msra.mxu0 %v7478_v37  ;;  %7769 = vmatpush3.bf16.msra.mxu1 %v7478_v37  ;;  %v10280_v37 = vld [vmem:[#allocation11_spill] sm:$0xff]  ;;  %v7490_v0 = vpack.c.bf16 %v5475_v7, %v5474_v48  ;;  %v7494_v7 = vpack.c.bf16 %v5477_v59, %v5476_v14  ;;  %v5479_v48 = vld [vmem:[%s9856_s3 + $0x2d8] sm:$0xff] }
  0xb5   : > { %6569 = vmatprep.mubr.f32.mxu0 %v10277_v31  ;;  %7073 = vmatprep.mubr.f32.mxu1 %v10278_v58  ;;  %v5481_v14 = vld [vmem:[%s9856_s3 + $0x2e8] sm:$0xff] }
  0xb6   : > { %7483 = vmatprep.subr.bf16.mxu0 %v7482_v8  ;;  %7771 = vmatprep.subr.bf16.mxu1 %v7482_v8 }
  0xb7   : > { %6570 = vmatmul.mubr.f32.gmra.mrb[2].mxu0 %v8366_v30  ;;  %7074 = vmatmul.mubr.f32.gmra.mrb[2].mxu1 %v10279_v32 }
  0xb8   : > { %7485 = vmatpush3.bf16.msra.mxu0 %v7482_v8  ;;  %7773 = vmatpush3.bf16.msra.mxu1 %v7482_v8  ;;  %v5478_v8 = vld [vmem:[%s9856_s3 + $0x2d0] sm:$0xff] }
  0xb9   : > { %6572 = vmatprep.mubr.f32.mxu0 %v10280_v37  ;;  %7076 = vmatprep.mubr.f32.mxu1 %v8390_v44  ;;  %v7498_v59 = vpack.c.bf16 %v5479_v48, %v5478_v8  ;;  %v5482_v8 = vld [vmem:[%s9856_s3 + $0x2f0] sm:$0xff]  ;;  %v5483_v48 = vld [vmem:[%s9856_s3 + $0x2f8] sm:$0xff] }
  0xba   : > { %7487 = vmatprep.subr.bf16.mxu0 %v7486_v11  ;;  %7775 = vmatprep.subr.bf16.mxu1 %v7486_v11 }
  0xbb   : > { %6573 = vmatmul.mubr.f32.gmra.mrb[4].mxu0 %v8401_v53  ;;  %7077 = vmatmul.mubr.f32.gmra.mrb[4].mxu1 %v8403_v54 }
  0xbc   : > { %7489 = vmatpush3.bf16.msra.mxu0 %v7486_v11  ;;  %7777 = vmatpush3.bf16.msra.mxu1 %v7486_v11  ;;  %v5480_v11 = vld [vmem:[%s9856_s3 + $0x2e0] sm:$0xff] }
  0xbd   : > { %6575 = vmatprep.mubr.f32.mxu0 %v8420_v4  ;;  %7079 = vmatprep.mubr.f32.mxu1 %v8422_v6 }
  0xbe   : > { %7491 = vmatprep.subr.bf16.mxu0 %v7490_v0  ;;  %7779 = vmatprep.subr.bf16.mxu1 %v7490_v0 }
  0xbf   : > { %6576 = vmatmul.mubr.f32.gmra.mrb[6].mxu0 %v8426_v10  ;;  %7080 = vmatmul.mubr.f32.gmra.mrb[6].mxu1 %v8434_v19 }
  0xc0   : > { %7493 = vmatpush3.bf16.msra.mxu0 %v7490_v0  ;;  %7781 = vmatpush3.bf16.msra.mxu1 %v7490_v0  ;;  %v7502_v0 = vpack.c.bf16 %v5481_v14, %v5480_v11  ;;  %v7506_v11 = vpack.c.bf16 %v5483_v48, %v5482_v8  ;;  %v5492_v14 = vld [vmem:[%s9856_s3 + $0x300] sm:$0xff]  ;;  %v10281_v48 = vld [vmem:[#allocation3_spill] sm:$0xff] }
  0xc1   : > { %6578 = vmatprep.mubr.f32.mxu0 %v8446_v29  ;;  %7082 = vmatprep.mubr.f32.mxu1 %v8454_v35 }
  0xc2   : > { %7495 = vmatprep.subr.bf16.mxu0 %v7494_v7  ;;  %7783 = vmatprep.subr.bf16.mxu1 %v7494_v7 }
  0xc3   : > { %6579 = vmatmul.mubr.f32.gmra.mrb[8].mxu0 %v8459_v39  ;;  %7083 = vmatmul.mubr.f32.gmra.mrb[8].mxu1 %v8465_v45 }
  0xc4   : > { %7497 = vmatpush3.bf16.msra.mxu0 %v7494_v7  ;;  %7785 = vmatpush3.bf16.msra.mxu1 %v7494_v7  ;;  %v413_v7 = vadd.s32 8, %v8450_v33 }
  0xc5   : > { %6581 = vmatprep.mubr.f32.mxu0 %v8479_v52  ;;  %7085 = vmatprep.mubr.f32.mxu1 %v8481_v55 }
  0xc6   : > { %7499 = vmatprep.subr.bf16.mxu0 %v7498_v59  ;;  %7787 = vmatprep.subr.bf16.mxu1 %v7498_v59  ;;  %v455_v33 = vand.u32 15, %v413_v7  ;;  %v10283_v7 = vmov 0 }
  0xc7   : > { %6582 = vmatmul.mubr.f32.gmra.mrb[10].mxu0 %v8490_v62  ;;  %7086 = vmatmul.mubr.f32.gmra.mrb[10].mxu1 %v8492_v63 }
  0xc8   : > { %7501 = vmatpush3.bf16.msra.mxu0 %v7498_v59  ;;  %7789 = vmatpush3.bf16.msra.mxu1 %v7498_v59  ;;  %v5493_v59 = vld [vmem:[%s9856_s3 + $0x308] sm:$0xff]  ;;  %vm9447_vm11 = vcmp.lt.s32.totalorder %v455_v33, 15  ;;  %v10292_v33 = vld [vmem:[#allocation65_spill] sm:$0xff] }
  0xc9   : > { %6584 = vmatprep.mubr.f32.mxu0 %v8504_v12  ;;  %7088 = vmatprep.mubr.f32.mxu1 %v8506_v15  ;;  %v7510_v8 = vpack.c.bf16 %v5493_v59, %v5492_v14  ;;  %v10284_v7 = vsel %vm9447_vm11, 4294967295, %v10283_v7  ;;  %v10287_v14 = vld [vmem:[#allocation58_spill] sm:$0xff] }
  0xca   : > { %7503 = vmatprep.subr.bf16.mxu0 %v7502_v0  ;;  %7791 = vmatprep.subr.bf16.mxu1 %v7502_v0  ;;  %10285 = vst [vmem:[#allocation25_spill] sm:$0xff] %v10284_v7  ;;  %v5498_v7 = vld [vmem:[%s9856_s3 + $0x330] sm:$0xff] }
  0xcb   : > { %6585 = vmatmul.mubr.f32.gmra.mrb[12].mxu0 %v8485_v60  ;;  %7089 = vmatmul.mubr.f32.gmra.mrb[12].mxu1 %v8515_v26  ;;  %v10282_v26 = vld [vmem:[#allocation13_spill] sm:$0xff]  ;;  %v5494_v60 = vld [vmem:[%s9856_s3 + $0x310] sm:$0xff] }
  0xcc   : > { %7505 = vmatpush3.bf16.msra.mxu0 %v7502_v0  ;;  %7793 = vmatpush3.bf16.msra.mxu1 %v7502_v0  ;;  %v5495_v0 = vld [vmem:[%s9856_s3 + $0x318] sm:$0xff] }
  0xcd   : > { %6587 = vmatprep.mubr.f32.mxu0 %v8265_v20  ;;  %7091 = vmatprep.mubr.f32.mxu1 %v8853_v21  ;;  %v10286_v21 = vld [vmem:[#allocation56_spill] sm:$0xff]  ;;  %v7514_v59 = vpack.c.bf16 %v5495_v0, %v5494_v60  ;;  %v10290_v20 = vld [vmem:[#allocation57_spill] sm:$0xff]  ;;  %v10293_v60 = vld [vmem:[#allocation66_spill] sm:$0xff] }
  0xce   : > { %7507 = vmatprep.subr.bf16.mxu0 %v7506_v11  ;;  %7795 = vmatprep.subr.bf16.mxu1 %v7506_v11  ;;  %vm10291_vm0 = vnez %v10290_v20  ;;  %v10294_v0 = vld [vmem:[#allocation67_spill] sm:$0xff] }
  0xcf   : > { %6588 = vmatmul.mubr.f32.gmra.mrb[14].mxu0 %v10281_v48  ;;  %7092 = vmatmul.mubr.f32.gmra.mrb[14].mxu1 %v10282_v26  ;;  %v10288_v26 = vld [vmem:[#allocation60_spill] sm:$0xff]  ;;  %v10298_v20 = vld [vmem:[#allocation63_spill] sm:$0xff] }
  0xd0   : > { %7509 = vmatpush3.bf16.msra.mxu0 %v7506_v11  ;;  %7797 = vmatpush3.bf16.msra.mxu1 %v7506_v11  ;;  %v10289_v48 = vld [vmem:[#allocation64_spill] sm:$0xff]  ;;  %v5496_v11 = vld [vmem:[%s9856_s3 + $0x320] sm:$0xff] }
  0xd1   : > { %6622 = vmatprep.mubr.f32.mxu0 %v10286_v21  ;;  %7126 = vmatprep.mubr.f32.mxu1 %v10287_v14  ;;  %v5497_v21 = vld [vmem:[%s9856_s3 + $0x328] sm:$0xff]  ;;  %v10295_v14 = vld [vmem:[#allocation62_spill] sm:$0xff] }
  0xd2   : > { %7511 = vmatprep.subr.bf16.mxu0 %v7510_v8  ;;  %7799 = vmatprep.subr.bf16.mxu1 %v7510_v8 }
  0xd3   : > { %6623 = vmatmul.mubr.msk.f32.vlgmr.msra.gmra.mrb[0].mxu0 %vm9447_vm11, %v10288_v26  ;;  %7127 = vmatmul.mubr.msk.f32.vlgmr.msra.gmra.mrb[0].mxu1 %vm10291_vm0, %v10289_v48  ;;  %v7518_v26 = vpack.c.bf16 %v5497_v21, %v5496_v11  ;;  %vm10296_vm0 = vnez %v10295_v14  ;;  %v10297_v48 = vld [vmem:[#allocation69_spill] sm:$0xff]  ;;  %vm10299_vm11 = vnez %v10298_v20  ;;  %v10301_v11 = vld [vmem:[#allocation72_spill] sm:$0xff]  ;;  %v10304_v14 = vld [vmem:[#allocation70_spill] sm:$0xff] }
  0xd4   : > { %7513 = vmatpush3.bf16.msra.mxu0 %v7510_v8  ;;  %7801 = vmatpush3.bf16.msra.mxu1 %v7510_v8  ;;  %v5499_v8 = vld [vmem:[%s9856_s3 + $0x338] sm:$0xff]  ;;  %v10302_v20 = vld [vmem:[#allocation68_spill] sm:$0xff] }
  0xd5   : > { %6625 = vmatprep.mubr.f32.mxu0 %v10292_v33  ;;  %7129 = vmatprep.mubr.f32.mxu1 %v10293_v60  ;;  %v10300_v60 = vld [vmem:[#allocation71_spill] sm:$0xff]  ;;  %v7522_v21 = vpack.c.bf16 %v5499_v8, %v5498_v7  ;;  %v10307_v7 = vld [vmem:[#allocation78_spill] sm:$0xff] }
  0xd6   : > { %7515 = vmatprep.subr.bf16.mxu0 %v7514_v59  ;;  %7803 = vmatprep.subr.bf16.mxu1 %v7514_v59 }
  0xd7   : > { %6626 = vmatmul.mubr.msk.f32.gmra.mrb[2].mxu0 %vm10296_vm0, %v10294_v0  ;;  %7130 = vmatmul.mubr.msk.f32.gmra.mrb[2].mxu1 %vm10299_vm11, %v10297_v48  ;;  %vm10303_vm11 = vnez %v10302_v20  ;;  %vm10305_vm0 = vnez %v10304_v14  ;;  %v5500_v48 = vld [vmem:[%s9856_s3 + $0x340] sm:$0xff]  ;;  %v10308_v20 = vld [vmem:[#allocation79_spill] sm:$0xff] }
  0xd8   : > { %7517 = vmatpush3.bf16.msra.mxu0 %v7514_v59  ;;  %7805 = vmatpush3.bf16.msra.mxu1 %v7514_v59  ;;  %v5501_v59 = vld [vmem:[%s9856_s3 + $0x348] sm:$0xff]  ;;  %v10309_v14 = vld [vmem:[#allocation74_spill] sm:$0xff] }
  0xd9   : > { %6628 = vmatprep.mubr.f32.mxu0 %v10300_v60  ;;  %7132 = vmatprep.mubr.f32.mxu1 %v10301_v11  ;;  %v10306_v11 = vld [vmem:[#allocation77_spill] sm:$0xff]  ;;  %v7526_v8 = vpack.c.bf16 %v5501_v59, %v5500_v48  ;;  %v10313_v59 = vld [vmem:[#allocation80_spill] sm:$0xff] }
  0xda   : > { %7519 = vmatprep.subr.bf16.mxu0 %v7518_v26  ;;  %7807 = vmatprep.subr.bf16.mxu1 %v7518_v26 }
  0xdb   : > { %6629 = vmatmul.mubr.msk.f32.gmra.mrb[4].mxu0 %vm10303_vm11, %v9026_v2  ;;  %7133 = vmatmul.mubr.msk.f32.gmra.mrb[4].mxu1 %vm10305_vm0, %v9042_v41  ;;  %vm10310_vm0 = vnez %v10309_v14  ;;  %v10311_v41 = vld [vmem:[#allocation76_spill] sm:$0xff]  ;;  %v10316_v14 = vld [vmem:[#allocation81_spill] sm:$0xff] }
  0xdc   : > { %7521 = vmatpush3.bf16.msra.mxu0 %v7518_v26  ;;  %7809 = vmatpush3.bf16.msra.mxu1 %v7518_v26  ;;  %vm10312_vm11 = vnez %v10311_v41  ;;  %v5502_v2 = vld [vmem:[%s9856_s3 + $0x350] sm:$0xff]  ;;  %v5503_v26 = vld [vmem:[%s9856_s3 + $0x358] sm:$0xff] }
  0xdd   : > { %6631 = vmatprep.mubr.f32.mxu0 %v10306_v11  ;;  %7135 = vmatprep.mubr.f32.mxu1 %v10307_v7  ;;  %v7530_v48 = vpack.c.bf16 %v5503_v26, %v5502_v2  ;;  %v10315_v41 = vld [vmem:[#allocation85_spill] sm:$0xff]  ;;  %v10318_v26 = vld [vmem:[#allocation83_spill] sm:$0xff] }
  0xde   : > { %7523 = vmatprep.subr.bf16.mxu0 %v7522_v21  ;;  %7811 = vmatprep.subr.bf16.mxu1 %v7522_v21 }
  0xdf   : > { %6632 = vmatmul.mubr.msk.f32.gmra.mrb[6].mxu0 %vm10310_vm0, %v10308_v20  ;;  %7136 = vmatmul.mubr.msk.f32.gmra.mrb[6].mxu1 %vm10312_vm11, %v9098_v9  ;;  %vm10314_vm11 = vnez %v10313_v59  ;;  %vm10317_vm0 = vnez %v10316_v14  ;;  %v5504_v9 = vld [vmem:[%s9856_s3 + $0x360] sm:$0xff]  ;;  %v10320_v14 = vld [vmem:[#allocation84_spill] sm:$0xff] }
  0xe0   : > { %7525 = vmatpush3.bf16.msra.mxu0 %v7522_v21  ;;  %7813 = vmatpush3.bf16.msra.mxu1 %v7522_v21  ;;  %v5505_v21 = vld [vmem:[%s9856_s3 + $0x368] sm:$0xff]  ;;  %v5506_v59 = vld [vmem:[%s9856_s3 + $0x370] sm:$0xff] }
  0xe1   : > { %6634 = vmatprep.mubr.f32.mxu0 %v9105_v43  ;;  %7138 = vmatprep.mubr.f32.mxu1 %v9109_v24  ;;  %v7534_v2 = vpack.c.bf16 %v5505_v21, %v5504_v9  ;;  %v10322_v21 = vld [vmem:[#allocation86_spill] sm:$0xff] }
  0xe2   : > { %7527 = vmatprep.subr.bf16.mxu0 %v7526_v8  ;;  %7815 = vmatprep.subr.bf16.mxu1 %v7526_v8 }
  0xe3   : > { %6635 = vmatmul.mubr.msk.f32.gmra.mrb[8].mxu0 %vm10314_vm11, %v9113_v28  ;;  %7139 = vmatmul.mubr.msk.f32.gmra.mrb[8].mxu1 %vm10317_vm0, %v10315_v41  ;;  %vm10319_vm0 = vnez %v10318_v26  ;;  %vm10321_vm11 = vnez %v10320_v14  ;;  %v10324_v14 = vld [vmem:[#allocation87_spill] sm:$0xff]  ;;  %v5516_v26 = vld [vmem:[%s9856_s3 + $0x380] sm:$0xff] }
  0xe4   : > { %7529 = vmatpush3.bf16.msra.mxu0 %v7526_v8  ;;  %7817 = vmatpush3.bf16.msra.mxu1 %v7526_v8  ;;  %v5507_v8 = vld [vmem:[%s9856_s3 + $0x378] sm:$0xff] }
  0xe5   : > { %6637 = vmatprep.mubr.f32.mxu0 %v9149_v61  ;;  %7141 = vmatprep.mubr.f32.mxu1 %v9153_v17  ;;  %v7538_v9 = vpack.c.bf16 %v5507_v8, %v5506_v59  ;;  %v10327_v59 = vld [vmem:[#allocation59_spill] sm:$0xff] }
  0xe6   : > { %7531 = vmatprep.subr.bf16.mxu0 %v7530_v48  ;;  %7819 = vmatprep.subr.bf16.mxu1 %v7530_v48 }
  0xe7   : > { %6638 = vmatmul.mubr.msk.f32.gmra.mrb[10].mxu0 %vm10319_vm0, %v9169_v3  ;;  %7142 = vmatmul.mubr.msk.f32.gmra.mrb[10].mxu1 %vm10321_vm11, %v9183_v13  ;;  %vm10323_vm11 = vnez %v10322_v21  ;;  %vm10325_vm0 = vnez %v10324_v14  ;;  %v10328_v21 = vld [vmem:[#allocation54_spill] sm:$0xff]  ;;  %v10329_v14 = vld [vmem:[#allocation61_spill] sm:$0xff] }
  0xe8   : > { %7533 = vmatpush3.bf16.msra.mxu0 %v7530_v48  ;;  %7821 = vmatpush3.bf16.msra.mxu1 %v7530_v48  ;;  %v5517_v48 = vld [vmem:[%s9856_s3 + $0x388] sm:$0xff] }
  0xe9   : > { %6640 = vmatprep.mubr.f32.mxu0 %v9189_v1  ;;  %7144 = vmatprep.mubr.f32.mxu1 %v9193_v57  ;;  %v10326_v57 = vld [vmem:[#allocation53_spill] sm:$0xff]  ;;  %v7542_v8 = vpack.c.bf16 %v5517_v48, %v5516_v26  ;;  %v10331_v48 = vld [vmem:[#allocation26_spill] sm:$0xff] }
  0xea   : > { %7535 = vmatprep.subr.bf16.mxu0 %v7534_v2  ;;  %7823 = vmatprep.subr.bf16.mxu1 %v7534_v2  ;;  %v10338_v26 = vld [vmem:[#allocation33_spill] sm:$0xff] }
  0xeb   : > { %6641 = vmatmul.mubr.msk.f32.gmra.mrb[12].mxu0 %vm10323_vm11, %v9216_v50  ;;  %7145 = vmatmul.mubr.msk.f32.gmra.mrb[12].mxu1 %vm10325_vm0, %v9226_v42  ;;  %v5518_v42 = vld [vmem:[%s9856_s3 + $0x390] sm:$0xff] }
  0xec   : > { %7537 = vmatpush3.bf16.msra.mxu0 %v7534_v2  ;;  %7825 = vmatpush3.bf16.msra.mxu1 %v7534_v2  ;;  %v5519_v2 = vld [vmem:[%s9856_s3 + $0x398] sm:$0xff] }
  0xed   : > { %6643 = vmatprep.mubr.f32.mxu0 %v10326_v57  ;;  %7147 = vmatprep.mubr.f32.mxu1 %v10327_v59  ;;  %v7546_v47 = vpack.c.bf16 %v5519_v2, %v5518_v42  ;;  %v10337_v2 = vld [vmem:[#allocation32_spill] sm:$0xff] }
  0xee   : > { %7539 = vmatprep.subr.bf16.mxu0 %v7538_v9  ;;  %7827 = vmatprep.subr.bf16.mxu1 %v7538_v9  ;;  %v5526_v42 = vld [vmem:[%s9856_s3 + $0x3d0] sm:$0xff] }
  0xef   : > { %6644 = vmatmul.mubr.msk.f32.gmra.mrb[14].mxu0 %vm9208_vm15, %v10328_v21  ;;  %7148 = vmatmul.mubr.msk.f32.gmra.mrb[14].mxu1 %vm9218_vm14, %v10329_v14  ;;  %v5520_v14 = vld [vmem:[%s9856_s3 + $0x3a0] sm:$0xff] }
  0xf0   : > { %7541 = vmatpush3.bf16.msra.mxu0 %v7538_v9  ;;  %7829 = vmatpush3.bf16.msra.mxu1 %v7538_v9  ;;  %v10341_v9 = vld [vmem:[#allocation39_spill] sm:$0xff] }
  0xf1   : > { %6678 = vmatprep.mubr.msk.f32.mxu0 %vm9230_vm12, %v10234_v23  ;;  %7182 = vmatprep.mubr.msk.f32.mxu1 %vm8528_vm1, %v10236_v25  ;;  %v10333_v23 = vld [vmem:[#allocation29_spill] sm:$0xff]  ;;  %v10335_v25 = vld [vmem:[#allocation30_spill] sm:$0xff] }
  0xf2   : > { %7543 = vmatprep.subr.bf16.mxu0 %v7542_v8  ;;  %7831 = vmatprep.subr.bf16.mxu1 %v7542_v8 }
  0xf3   : > { %6679 = vmatmul.mubr.f32.vlgmr.msra.gmra.mrb[0].mxu0 %v10331_v48  ;;  %7183 = vmatmul.mubr.f32.vlgmr.msra.gmra.mrb[0].mxu1 %v10332_v46  ;;  %v7550_v46 = vpack.c.bf16 %v5521_v49, %v5520_v14  ;;  %v5522_v48 = vld [vmem:[%s9856_s3 + $0x3b0] sm:$0xff] }
  0xf4   : > { %7545 = vmatpush3.bf16.msra.mxu0 %v7542_v8  ;;  %7833 = vmatpush3.bf16.msra.mxu1 %v7542_v8  ;;  %v5523_v8 = vld [vmem:[%s9856_s3 + $0x3b8] sm:$0xff] }
  0xf5   : > { %6681 = vmatprep.mubr.msk.f32.mxu0 %vm8550_vm2, %v10333_v23  ;;  %7185 = vmatprep.mubr.msk.f32.mxu1 %vm8565_vm3, %v10335_v25  ;;  %v7554_v49 = vpack.c.bf16 %v5523_v8, %v5522_v48  ;;  %v5524_v25 = vld [vmem:[%s9856_s3 + $0x3c0] sm:$0xff]  ;;  %v5529_v48 = vld [vmem:[%s9856_s3 + $0x3e8] sm:$0xff] }
  0xf6   : > { %7547 = vmatprep.subr.bf16.mxu0 %v7546_v47  ;;  %7835 = vmatprep.subr.bf16.mxu1 %v7546_v47  ;;  %v10351_v23 = vld [vmem:[#allocation42_spill] sm:$0xff] }
  0xf7   : > { %6682 = vmatmul.mubr.f32.gmra.mrb[2].mxu0 %v10337_v2  ;;  %7186 = vmatmul.mubr.f32.gmra.mrb[2].mxu1 %v10338_v26  ;;  %v10347_v2 = vld [vmem:[#allocation46_spill] sm:$0xff]  ;;  %vm10352_vm1 = vnez %v10351_v23  ;;  %v10371_v23 = vld [vmem:[#allocation5_spill] sm:$0xff] }
  0xf8   : > { %7549 = vmatpush3.bf16.msra.mxu0 %v7546_v47  ;;  %7837 = vmatpush3.bf16.msra.mxu1 %v7546_v47  ;;  %v5525_v47 = vld [vmem:[%s9856_s3 + $0x3c8] sm:$0xff]  ;;  %v5528_v26 = vld [vmem:[%s9856_s3 + $0x3e0] sm:$0xff] }
  0xf9   : > { %6684 = vmatprep.mubr.msk.f32.mxu0 %vm8600_vm4, %v10246_v16  ;;  %7188 = vmatprep.mubr.msk.f32.mxu1 %vm8623_vm5, %v10248_v22  ;;  %v7566_v14 = vpack.c.bf16 %v5529_v48, %v5528_v26  ;;  %v10355_v16 = vld [vmem:[#allocation23_spill] sm:$0xff]  ;;  %v10356_v22 = vld [vmem:[#allocation44_spill] sm:$0xff]  ;;  %v5535_v48 = vld [vmem:[%s9856_s3 + $0x418] sm:$0xff] }
  0xfa   : > { %7551 = vmatprep.subr.bf16.mxu0 %v7550_v46  ;;  %7839 = vmatprep.subr.bf16.mxu1 %v7550_v46  ;;  %vm10357_vm2 = vnez %v10356_v22  ;;  %v5534_v26 = vld [vmem:[%s9856_s3 + $0x410] sm:$0xff]  ;;  %v5536_v8 = vld [vmem:[%s9856_s3 + $0x420] sm:$0xff]  ;;  %v10380_v22 = vld [vmem:[#allocation73_spill] sm:$0xff] }
  0xfb   : > { %6685 = vmatmul.mubr.f32.gmra.mrb[4].mxu0 %v10250_v34  ;;  %7189 = vmatmul.mubr.f32.gmra.mrb[4].mxu1 %v10341_v9  ;;  %v7558_v34 = vpack.c.bf16 %v5525_v47, %v5524_v25  ;;  %v5530_v9 = vld [vmem:[%s9856_s3 + $0x3f0] sm:$0xff]  ;;  %v5531_v25 = vld [vmem:[%s9856_s3 + $0x3f8] sm:$0xff] }
  0xfc   : > { %7553 = vmatpush3.bf16.msra.mxu0 %v7550_v46  ;;  %7841 = vmatpush3.bf16.msra.mxu1 %v7550_v46  ;;  %v5527_v46 = vld [vmem:[%s9856_s3 + $0x3d8] sm:$0xff] }
  0xfd   : > { %6687 = vmatprep.mubr.msk.f32.mxu0 %vm8652_vm6, %v8737_v38  ;;  %7191 = vmatprep.mubr.msk.f32.mxu1 %vm8664_vm7, %v10253_v40  ;;  %v5533_v38 = vld [vmem:[%s9856_s3 + $0x408] sm:$0xff]  ;;  %v10361_v40 = vld [vmem:[#allocation48_spill] sm:$0xff]  ;;  %v10377_v47 = vld [vmem:[#allocation57_spill] sm:$0xff] }
  0xfe   : > { %7555 = vmatprep.subr.bf16.mxu0 %v7554_v49  ;;  %7843 = vmatprep.subr.bf16.mxu1 %v7554_v49  ;;  %vm10362_vm3 = vnez %v10361_v40  ;;  %vm10378_vm5 = vnez %v10377_v47 }
  0xff   : > { %6688 = vmatmul.mubr.f32.gmra.mrb[6].mxu0 %v8772_v56  ;;  %7192 = vmatmul.mubr.f32.gmra.mrb[6].mxu1 %v8776_v36  ;;  %v7562_v56 = vpack.c.bf16 %v5527_v46, %v5526_v42  ;;  %v10346_v36 = vld [vmem:[#allocation45_spill] sm:$0xff]  ;;  %v10359_v42 = vld [vmem:[#allocation55_spill] sm:$0xff]  ;;  %v5532_v46 = vld [vmem:[%s9856_s3 + $0x400] sm:$0xff] }
 0x100   : > { %7557 = vmatpush3.bf16.msra.mxu0 %v7554_v49  ;;  %7845 = vmatpush3.bf16.msra.mxu1 %v7554_v49  ;;  %v10353_v49 = vld [vmem:[#allocation52_spill] sm:$0xff] }
 0x101   : > { %6690 = vmatprep.mubr.msk.f32.mxu0 %vm8699_vm8, %v8790_v27  ;;  %7194 = vmatprep.mubr.msk.f32.mxu1 %vm8711_vm9, %v8805_v5  ;;  %v10348_v27 = vld [vmem:[#allocation47_spill] sm:$0xff]  ;;  %v10350_v5 = vld [vmem:[#allocation49_spill] sm:$0xff] }
 0x102   : > { %7559 = vmatprep.subr.bf16.mxu0 %v7558_v34  ;;  %7847 = vmatprep.subr.bf16.mxu1 %v7558_v34 }
 0x103   : > { %6691 = vmatmul.mubr.f32.gmra.mrb[8].mxu0 %v10346_v36  ;;  %7195 = vmatmul.mubr.f32.gmra.mrb[8].mxu1 %v10347_v2  ;;  %v7574_v36 = vpack.c.bf16 %v5533_v38, %v5532_v46  ;;  %v10364_v2 = vld [vmem:[#allocation21_spill] sm:$0xff]  ;;  %v10391_v46 = vld [vmem:[#allocation74_spill] sm:$0xff] }
 0x104   : > { %7561 = vmatpush3.bf16.msra.mxu0 %v7558_v34  ;;  %7849 = vmatpush3.bf16.msra.mxu1 %v7558_v34  ;;  %v10358_v34 = vld [vmem:[#allocation18_spill] sm:$0xff] }
 0x105   : > { %6693 = vmatprep.mubr.msk.f32.mxu0 %vm8731_vm10, %v10348_v27  ;;  %7197 = vmatprep.mubr.msk.f32.mxu1 %vm10352_vm1, %v10350_v5  ;;  %v7578_v27 = vpack.c.bf16 %v5535_v48, %v5534_v26  ;;  %v5537_v5 = vld [vmem:[%s9856_s3 + $0x428] sm:$0xff]  ;;  %vm10392_vm10 = vnez %v10391_v46 }
 0x106   : > { %7563 = vmatprep.subr.bf16.mxu0 %v7562_v56  ;;  %7851 = vmatprep.subr.bf16.mxu1 %v7562_v56 }
 0x107   : > { %6694 = vmatmul.mubr.f32.gmra.mrb[10].mxu0 %v8861_v51  ;;  %7198 = vmatmul.mubr.f32.gmra.mrb[10].mxu1 %v10353_v49  ;;  %v7570_v51 = vpack.c.bf16 %v5531_v25, %v5530_v9  ;;  %v10373_v49 = vld [vmem:[#allocation66_spill] sm:$0xff]  ;;  %v10374_v9 = vld [vmem:[#allocation25_spill] sm:$0xff] }
 0x108   : > { %7565 = vmatpush3.bf16.msra.mxu0 %v7562_v56  ;;  %7853 = vmatpush3.bf16.msra.mxu1 %v7562_v56  ;;  %v10363_v56 = vmov 0.0   ;;  %vm10375_vm4 = vnez %v10374_v9  ;;  %v10376_v25 = vld [vmem:[#allocation69_spill] sm:$0xff] }
 0x109   : > { %6696 = vmatprep.mubr.msk.f32.mxu0 %vm10258_vm13, %v10266_v18  ;;  %7200 = vmatprep.mubr.msk.f32.mxu1 %vm10357_vm2, %v10355_v16  ;;  %v10360_v18 = vld [vmem:[#allocation20_spill] sm:$0xff] }
 0x10a   : > { %7567 = vmatprep.subr.bf16.mxu0 %v7566_v14  ;;  %7855 = vmatprep.subr.bf16.mxu1 %v7566_v14  ;;  %v10379_v16 = vld [vmem:[#allocation72_spill] sm:$0xff] }
 0x10b   : > { %6697 = vmatmul.mubr.f32.gmra.mrb[12].mxu0 %v10358_v34  ;;  %7201 = vmatmul.mubr.f32.gmra.mrb[12].mxu1 %v10359_v42  ;;  %v10383_v34 = vld [vmem:[#allocation75_spill] sm:$0xff]  ;;  %v10388_v42 = vld [vmem:[#allocation82_spill] sm:$0xff] }
 0x10c   : > { %7569 = vmatpush3.bf16.msra.mxu0 %v7566_v14  ;;  %7857 = vmatpush3.bf16.msra.mxu1 %v7566_v14  ;;  %v10372_v14 = vld [vmem:[#allocation7_spill] sm:$0xff] }
 0x10d   : > { %6699 = vmatprep.mubr.msk.f32.mxu0 %vm10362_vm3, %v10360_v18  ;;  %7203 = vmatprep.mubr.f32.mxu1 %v10363_v56 }
 0x10e   : > { %7571 = vmatprep.subr.bf16.mxu0 %v7570_v51  ;;  %7859 = vmatprep.subr.bf16.mxu1 %v7570_v51 }
 0x10f   : > { %6700 = vmatmul.mubr.f32.gmra.mrb[14].mxu0 %v10364_v2  ;;  %7204 = vmatmul.mubr.f32.gmra.mrb[14].mxu1 %v10363_v56 }
 0x110   : > { %7573 = vmatpush3.bf16.msra.mxu0 %v7570_v51  ;;  %7861 = vmatpush3.bf16.msra.mxu1 %v7570_v51  ;;  %v10381_v51 = vld [vmem:[#allocation62_spill] sm:$0xff] }
 0x111   : > { %6734 = vmatprep.mubr.f32.mxu0 %v10277_v31  ;;  %7238 = vmatprep.mubr.f32.mxu1 %v10278_v58  ;;  %v7582_v31 = vpack.c.bf16 %v5537_v5, %v5536_v8  ;;  %v5539_v58 = vld [vmem:[%s9856_s3 + $0x438] sm:$0xff]  ;;  %vm10382_vm6 = vnez %v10381_v51 }
 0x112   : > { %7575 = vmatprep.subr.bf16.mxu0 %v7574_v36  ;;  %7863 = vmatprep.subr.bf16.mxu1 %v7574_v36 }
 0x113   : > { %6735 = vmatmul.mubr.f32.vlgmr.msra.gmra.mrb[0].mxu0 %v8366_v30  ;;  %7239 = vmatmul.mubr.f32.vlgmr.msra.gmra.mrb[0].mxu1 %v10279_v32  ;;  %v5538_v30 = vld [vmem:[%s9856_s3 + $0x430] sm:$0xff]  ;;  %v10369_v32 = vld [vmem:[#allocation3_spill] sm:$0xff] }
 0x114   : > { %7577 = vmatpush3.bf16.msra.mxu0 %v7574_v36  ;;  %7865 = vmatpush3.bf16.msra.mxu1 %v7574_v36 }
 0x115   : > { %6737 = vmatprep.mubr.f32.mxu0 %v10280_v37  ;;  %7241 = vmatprep.mubr.f32.mxu1 %v8390_v44  ;;  %v7586_v44 = vpack.c.bf16 %v5539_v58, %v5538_v30  ;;  %v10370_v37 = vld [vmem:[#allocation13_spill] sm:$0xff] }
 0x116   : > { %7579 = vmatprep.subr.bf16.mxu0 %v7578_v27  ;;  %7867 = vmatprep.subr.bf16.mxu1 %v7578_v27 }
 0x117   : > { %6738 = vmatmul.mubr.f32.gmra.mrb[2].mxu0 %v8401_v53  ;;  %7242 = vmatmul.mubr.f32.gmra.mrb[2].mxu1 %v8403_v54  ;;  %v5540_v53 = vld [vmem:[%s9856_s3 + $0x440] sm:$0xff]  ;;  %v5541_v54 = vld [vmem:[%s9856_s3 + $0x448] sm:$0xff] }
 0x118   : > { %7581 = vmatpush3.bf16.msra.mxu0 %v7578_v27  ;;  %7869 = vmatpush3.bf16.msra.mxu1 %v7578_v27 }
 0x119   : > { %6740 = vmatprep.mubr.f32.mxu0 %v8420_v4  ;;  %7244 = vmatprep.mubr.f32.mxu1 %v8422_v6  ;;  %v7590_v4 = vpack.c.bf16 %v5541_v54, %v5540_v53  ;;  %v5542_v6 = vld [vmem:[%s9856_s3 + $0x450] sm:$0xff] }
 0x11a   : > { %7583 = vmatprep.subr.bf16.mxu0 %v7582_v31  ;;  %7871 = vmatprep.subr.bf16.mxu1 %v7582_v31 }
 0x11b   : > { %6741 = vmatmul.mubr.f32.gmra.mrb[4].mxu0 %v8426_v10  ;;  %7245 = vmatmul.mubr.f32.gmra.mrb[4].mxu1 %v8434_v19  ;;  %v5543_v10 = vld [vmem:[%s9856_s3 + $0x458] sm:$0xff] }
 0x11c   : > { %7585 = vmatpush3.bf16.msra.mxu0 %v7582_v31  ;;  %7873 = vmatpush3.bf16.msra.mxu1 %v7582_v31  ;;  %v7594_v19 = vpack.c.bf16 %v5543_v10, %v5542_v6 }
 0x11d   : > { %6743 = vmatprep.mubr.f32.mxu0 %v8446_v29  ;;  %7247 = vmatprep.mubr.f32.mxu1 %v8454_v35  ;;  %v5544_v29 = vld [vmem:[%s9856_s3 + $0x460] sm:$0xff]  ;;  %v5545_v35 = vld [vmem:[%s9856_s3 + $0x468] sm:$0xff] }
 0x11e   : > { %7587 = vmatprep.subr.bf16.mxu0 %v7586_v44  ;;  %7875 = vmatprep.subr.bf16.mxu1 %v7586_v44 }
 0x11f   : > { %6744 = vmatmul.mubr.f32.gmra.mrb[6].mxu0 %v8459_v39  ;;  %7248 = vmatmul.mubr.f32.gmra.mrb[6].mxu1 %v8465_v45  ;;  %v7598_v39 = vpack.c.bf16 %v5545_v35, %v5544_v29  ;;  %v10365_v45 = vld [vmem:[#allocation12_spill] sm:$0xff] }
 0x120   : > { %7589 = vmatpush3.bf16.msra.mxu0 %v7586_v44  ;;  %7877 = vmatpush3.bf16.msra.mxu1 %v7586_v44 }
 0x121   : > { %6746 = vmatprep.mubr.f32.mxu0 %v8479_v52  ;;  %7250 = vmatprep.mubr.f32.mxu1 %v8481_v55  ;;  %v10366_v52 = vld [vmem:[#allocation14_spill] sm:$0xff]  ;;  %v5546_v55 = vld [vmem:[%s9856_s3 + $0x470] sm:$0xff] }
 0x122   : > { %7591 = vmatprep.subr.bf16.mxu0 %v7590_v4  ;;  %7879 = vmatprep.subr.bf16.mxu1 %v7590_v4 }
 0x123   : > { %6747 = vmatmul.mubr.f32.gmra.mrb[8].mxu0 %v8490_v62  ;;  %7251 = vmatmul.mubr.f32.gmra.mrb[8].mxu1 %v8492_v63  ;;  %v5547_v62 = vld [vmem:[%s9856_s3 + $0x478] sm:$0xff]  ;;  %v10367_v63 = vld [vmem:[#allocation2_spill] sm:$0xff] }
 0x124   : > { %7593 = vmatpush3.bf16.msra.mxu0 %v7590_v4  ;;  %7881 = vmatpush3.bf16.msra.mxu1 %v7590_v4 }
 0x125   : > { %6749 = vmatprep.mubr.f32.mxu0 %v8504_v12  ;;  %7253 = vmatprep.mubr.f32.mxu1 %v8506_v15  ;;  %v10368_v12 = vld [vmem:[#allocation51_spill] sm:$0xff]  ;;  %v7602_v15 = vpack.c.bf16 %v5547_v62, %v5546_v55 }
 0x126   : > { %7595 = vmatprep.subr.bf16.mxu0 %v7594_v19  ;;  %7883 = vmatprep.subr.bf16.mxu1 %v7594_v19 }
 0x127   : > { %6750 = vmatmul.mubr.f32.gmra.mrb[10].mxu0 %v10365_v45  ;;  %7254 = vmatmul.mubr.f32.gmra.mrb[10].mxu1 %v10366_v52 }
 0x128   : > { %7597 = vmatpush3.bf16.msra.mxu0 %v7594_v19  ;;  %7885 = vmatpush3.bf16.msra.mxu1 %v7594_v19 }
 0x129   : > { %6752 = vmatprep.mubr.f32.mxu0 %v10367_v63  ;;  %7256 = vmatprep.mubr.f32.mxu1 %v10368_v12 }
 0x12a   : > { %7599 = vmatprep.subr.bf16.mxu0 %v7598_v39  ;;  %7887 = vmatprep.subr.bf16.mxu1 %v7598_v39 }
 0x12b   : > { %6753 = vmatmul.mubr.f32.gmra.mrb[12].mxu0 %v10369_v32  ;;  %7257 = vmatmul.mubr.f32.gmra.mrb[12].mxu1 %v10370_v37 }
 0x12c   : > { %7601 = vmatpush3.bf16.msra.mxu0 %v7598_v39  ;;  %7889 = vmatpush3.bf16.msra.mxu1 %v7598_v39 }
 0x12d   : > { %6755 = vmatprep.mubr.f32.mxu0 %v10371_v23  ;;  %7259 = vmatprep.mubr.f32.mxu1 %v10363_v56 }
 0x12e   : > { %7603 = vmatprep.subr.bf16.mxu0 %v7602_v15  ;;  %7891 = vmatprep.subr.bf16.mxu1 %v7602_v15 }
 0x12f   : > { %6756 = vmatmul.mubr.f32.gmra.mrb[14].mxu0 %v10372_v14  ;;  %7260 = vmatmul.mubr.f32.gmra.mrb[14].mxu1 %v10363_v56 }
 0x130   : > { %7605 = vmatpush3.bf16.msra.mxu0 %v7602_v15  ;;  %7893 = vmatpush3.bf16.msra.mxu1 %v7602_v15 }
 0x131   : > { %6790 = vmatprep.mubr.f32.mxu0 %v10292_v33  ;;  %7294 = vmatprep.mubr.f32.mxu1 %v10373_v49  ;;  %v10384_v33 = vld [vmem:[#allocation63_spill] sm:$0xff] }
 0x132   : > { %vm10385_vm7 = vnez %v10384_v33 }
 0x133   : > { %6791 = vmatmul.mubr.msk.f32.vlgmr.msra.gmra.mrb[0].mxu0 %vm10375_vm4, %v10294_v0  ;;  %7295 = vmatmul.mubr.msk.f32.vlgmr.msra.gmra.mrb[0].mxu1 %vm10378_vm5, %v10376_v25  ;;  %v10386_v0 = vld [vmem:[#allocation68_spill] sm:$0xff] }
 0x134   : > { %6793 = vmatprep.mubr.f32.mxu0 %v10300_v60  ;;  %7297 = vmatprep.mubr.f32.mxu1 %v10379_v16  ;;  %vm10387_vm8 = vnez %v10386_v0  ;;  %v10389_v60 = vld [vmem:[#allocation70_spill] sm:$0xff] }
 0x135   : > { %vm10390_vm9 = vnez %v10389_v60 }
 0x137   : > { %6794 = vmatmul.mubr.msk.f32.gmra.mrb[2].mxu0 %vm10382_vm6, %v10380_v22  ;;  %7298 = vmatmul.mubr.msk.f32.gmra.mrb[2].mxu1 %vm10385_vm7, %v10383_v34 }
 0x138   : > { %6796 = vmatprep.mubr.f32.mxu0 %v10306_v11  ;;  %7300 = vmatprep.mubr.f32.mxu1 %v10307_v7  ;;  %v10393_v11 = vld [vmem:[#allocation76_spill] sm:$0xff] }
 0x139   : > { %vm10394_vm12 = vnez %v10393_v11 }
 0x13b   : > { %6797 = vmatmul.mubr.msk.f32.gmra.mrb[4].mxu0 %vm10387_vm8, %v10308_v20  ;;  %7301 = vmatmul.mubr.msk.f32.gmra.mrb[4].mxu1 %vm10390_vm9, %v10388_v42  ;;  %v10395_v20 = vld [vmem:[#allocation80_spill] sm:$0xff] }
 0x13c   : > { %6799 = vmatprep.mubr.f32.mxu0 %v9105_v43  ;;  %7303 = vmatprep.mubr.f32.mxu1 %v9109_v24  ;;  %vm10396_vm14 = vnez %v10395_v20  ;;  %v10397_v43 = vld [vmem:[#allocation81_spill] sm:$0xff]  ;;  %v10399_v24 = vld [vmem:[#allocation88_spill] sm:$0xff] }
 0x13d   : > { %vm10398_vm13 = vnez %v10397_v43 }
 0x13f   : > { %6800 = vmatmul.mubr.msk.f32.gmra.mrb[6].mxu0 %vm10392_vm10, %v9113_v28  ;;  %7304 = vmatmul.mubr.msk.f32.gmra.mrb[6].mxu1 %vm10394_vm12, %v10315_v41  ;;  %v10400_v28 = vld [vmem:[#allocation83_spill] sm:$0xff]  ;;  %v10402_v41 = vld [vmem:[#allocation90_spill] sm:$0xff] }
 0x140   : > { %6802 = vmatprep.mubr.f32.mxu0 %v9149_v61  ;;  %7306 = vmatprep.mubr.f32.mxu1 %v9153_v17  ;;  %vm10401_vm1 = vnez %v10400_v28  ;;  %v10403_v61 = vld [vmem:[#allocation84_spill] sm:$0xff] }
 0x141   : > { %vm10404_vm2 = vnez %v10403_v61 }
 0x143   : > { %6803 = vmatmul.mubr.msk.f32.gmra.mrb[8].mxu0 %vm10396_vm14, %v9169_v3  ;;  %7307 = vmatmul.mubr.msk.f32.gmra.mrb[8].mxu1 %vm10398_vm13, %v9183_v13  ;;  %v10406_v3 = vld [vmem:[#allocation61_spill] sm:$0xff]  ;;  %v10408_v13 = vld [vmem:[#allocation58_spill] sm:$0xff] }
 0x144   : > { %6805 = vmatprep.mubr.f32.mxu0 %v9189_v1  ;;  %7309 = vmatprep.mubr.f32.mxu1 %v10399_v24 }
 0x147   : > { %6806 = vmatmul.mubr.msk.f32.gmra.mrb[10].mxu0 %vm10401_vm1, %v9216_v50  ;;  %7310 = vmatmul.mubr.msk.f32.gmra.mrb[10].mxu1 %vm10404_vm2, %v10402_v41  ;;  %v10409_v50 = vld [vmem:[#allocation64_spill] sm:$0xff] }
 0x148   : > { %6808 = vmatprep.mubr.f32.mxu0 %v10326_v57  ;;  %7312 = vmatprep.mubr.f32.mxu1 %v10327_v59 }
 0x14b   : > { %6809 = vmatmul.mubr.msk.f32.gmra.mrb[12].mxu0 %vm10323_vm11, %v10328_v21  ;;  %7313 = vmatmul.mubr.msk.f32.gmra.mrb[12].mxu1 %vm10325_vm0, %v10406_v3 }
 0x14c   : > { %6811 = vmatprep.mubr.f32.mxu0 %v10408_v13  ;;  %7315 = vmatprep.mubr.f32.mxu1 %v10363_v56 }
 0x14f   : > { %6812 = vmatmul.mubr.msk.f32.gmra.mrb[14].mxu0 %vm9208_vm15, %v10409_v50  ;;  %7316 = vmatmul.mubr.f32.gmra.mrb[14].mxu1 %v10363_v56 }
 0x206   : > { %v6792_v57 = vpop.f32.mrb[0].mxu0  ;;  %v7296_v21 = vpop.f32.mrb[0].mxu1 }
 0x207   : > { %3552 = vst [vmem:[%s9808_s29 + $0x8] sm:$0xff] %v6792_v57  ;;  %v3590_v59 = vmul.f32 %v6792_v57, %v6792_v57  ;;  %5189 = vst [vmem:[%s9808_s29 + $0x88] sm:$0xff] %v7296_v21  ;;  %v5227_v38 = vmul.f32 %v7296_v21, %v7296_v21  ;;  %v3456_v18 = vpop.f32.mrb[1].mxu0  ;;  %v5093_v40 = vpop.f32.mrb[1].mxu1 }
 0x208   : > { %3551 = vst [vmem:[%s9808_s29] sm:$0xff] %v3456_v18  ;;  %v3567_v56 = vadd.f32 %v6792_v57, %v3456_v18  ;;  %v3589_v36 = vmul.f32 %v3456_v18, %v3456_v18  ;;  %5188 = vst [vmem:[%s9808_s29 + $0x80] sm:$0xff] %v5093_v40  ;;  %v5204_v2 = vadd.f32 %v7296_v21, %v5093_v40 }
 0x209   : > { %v5226_v26 = vmul.f32 %v5093_v40, %v5093_v40 }
 0x20a   : > { %v3605_v48 = vadd.f32 %v3590_v59, %v3589_v36  ;;  %v6795_v8 = vpop.f32.mrb[2].mxu0  ;;  %v7299_v5 = vpop.f32.mrb[2].mxu1 }
 0x20b   : > { %v5242_v27 = vadd.f32 %v5227_v38, %v5226_v26  ;;  %3554 = vst [vmem:[%s9808_s29 + $0x18] sm:$0xff] %v6795_v8  ;;  %5191 = vst [vmem:[%s9808_s29 + $0x98] sm:$0xff] %v7299_v5  ;;  %v3466_v31 = vpop.f32.mrb[3].mxu0  ;;  %v5103_v30 = vpop.f32.mrb[3].mxu1  ;;  %v3592_v4 = vmul.f32 %v6795_v8, %v6795_v8  ;;  %v5229_v45 = vmul.f32 %v7299_v5, %v7299_v5 }
 0x20c   : > { %3553 = vst [vmem:[%s9808_s29 + $0x10] sm:$0xff] %v3466_v31  ;;  %v3568_v58 = vadd.f32 %v3567_v56, %v3466_v31  ;;  %v3591_v44 = vmul.f32 %v3466_v31, %v3466_v31  ;;  %5190 = vst [vmem:[%s9808_s29 + $0x90] sm:$0xff] %v5103_v30  ;;  %v5205_v53 = vadd.f32 %v5204_v2, %v5103_v30 }
 0x20d   : > { %v5228_v54 = vmul.f32 %v5103_v30, %v5103_v30 }
 0x20e   : > { %v3606_v6 = vadd.f32 %v3605_v48, %v3591_v44  ;;  %v6798_v19 = vpop.f32.mrb[4].mxu0  ;;  %v7302_v29 = vpop.f32.mrb[4].mxu1  ;;  %v3569_v35 = vadd.f32 %v6795_v8, %v3568_v58  ;;  %v5206_v39 = vadd.f32 %v7299_v5, %v5205_v53 }
 0x20f   : > { %v5243_v10 = vadd.f32 %v5242_v27, %v5228_v54  ;;  %3556 = vst [vmem:[%s9808_s29 + $0x28] sm:$0xff] %v6798_v19  ;;  %5193 = vst [vmem:[%s9808_s29 + $0xa8] sm:$0xff] %v7302_v29  ;;  %v3476_v52 = vpop.f32.mrb[5].mxu0  ;;  %v5113_v55 = vpop.f32.mrb[5].mxu1  ;;  %v3594_v23 = vmul.f32 %v6798_v19, %v6798_v19  ;;  %v5231_v16 = vmul.f32 %v7302_v29, %v7302_v29 }
 0x210   : > { %3555 = vst [vmem:[%s9808_s29 + $0x20] sm:$0xff] %v3476_v52  ;;  %v3570_v62 = vadd.f32 %v3569_v35, %v3476_v52  ;;  %v3593_v63 = vmul.f32 %v3476_v52, %v3476_v52  ;;  %v3607_v12 = vadd.f32 %v3606_v6, %v3592_v4  ;;  %5192 = vst [vmem:[%s9808_s29 + $0xa0] sm:$0xff] %v5113_v55 }
 0x211   : > { %v5207_v15 = vadd.f32 %v5206_v39, %v5113_v55  ;;  %v5230_v32 = vmul.f32 %v5113_v55, %v5113_v55  ;;  %v5244_v37 = vadd.f32 %v5243_v10, %v5229_v45 }
 0x212   : > { %v3608_v14 = vadd.f32 %v3607_v12, %v3593_v63  ;;  %v6801_v49 = vpop.f32.mrb[6].mxu0  ;;  %v7305_v9 = vpop.f32.mrb[6].mxu1  ;;  %v3571_v25 = vadd.f32 %v6798_v19, %v3570_v62 }
 0x213   : > { %v5208_v47 = vadd.f32 %v7302_v29, %v5207_v15  ;;  %v5245_v22 = vadd.f32 %v5244_v37, %v5230_v32  ;;  %3558 = vst [vmem:[%s9808_s29 + $0x38] sm:$0xff] %v6801_v49  ;;  %5195 = vst [vmem:[%s9808_s29 + $0xb8] sm:$0xff] %v7305_v9  ;;  %v3486_v51 = vpop.f32.mrb[7].mxu0  ;;  %v5123_v34 = vpop.f32.mrb[7].mxu1  ;;  %v3596_v20 = vmul.f32 %v6801_v49, %v6801_v49 }
 0x214   : > { %3557 = vst [vmem:[%s9808_s29 + $0x30] sm:$0xff] %v3486_v51  ;;  %v3572_v33 = vadd.f32 %v3571_v25, %v3486_v51  ;;  %v3595_v0 = vmul.f32 %v3486_v51, %v3486_v51  ;;  %v3609_v42 = vadd.f32 %v3608_v14, %v3594_v23  ;;  %5194 = vst [vmem:[%s9808_s29 + $0xb0] sm:$0xff] %v5123_v34 }
 0x215   : > { %v5209_v60 = vadd.f32 %v5208_v47, %v5123_v34  ;;  %v5232_v46 = vmul.f32 %v5123_v34, %v5123_v34  ;;  %v5246_v11 = vadd.f32 %v5245_v22, %v5231_v16  ;;  %v5233_v17 = vmul.f32 %v7305_v9, %v7305_v9 }
 0x216   : > { %v3610_v43 = vadd.f32 %v3609_v42, %v3595_v0  ;;  %v6804_v24 = vpop.f32.mrb[8].mxu0  ;;  %v7308_v28 = vpop.f32.mrb[8].mxu1  ;;  %v3573_v41 = vadd.f32 %v6801_v49, %v3572_v33 }
 0x217   : > { %v5210_v61 = vadd.f32 %v7305_v9, %v5209_v60  ;;  %v5247_v3 = vadd.f32 %v5246_v11, %v5232_v46  ;;  %3560 = vst [vmem:[%s9808_s29 + $0x48] sm:$0xff] %v6804_v24  ;;  %5197 = vst [vmem:[%s9808_s29 + $0xc8] sm:$0xff] %v7308_v28  ;;  %v3496_v1 = vpop.f32.mrb[9].mxu0  ;;  %v5133_v13 = vpop.f32.mrb[9].mxu1  ;;  %v3598_v18 = vmul.f32 %v6804_v24, %v6804_v24 }
 0x218   : > { %3559 = vst [vmem:[%s9808_s29 + $0x40] sm:$0xff] %v3496_v1  ;;  %v3574_v50 = vadd.f32 %v3573_v41, %v3496_v1  ;;  %v3597_v7 = vmul.f32 %v3496_v1, %v3496_v1  ;;  %v3611_v57 = vadd.f32 %v3610_v43, %v3596_v20  ;;  %5196 = vst [vmem:[%s9808_s29 + $0xc0] sm:$0xff] %v5133_v13 }
 0x219   : > { %v5211_v21 = vadd.f32 %v5210_v61, %v5133_v13  ;;  %v5234_v59 = vmul.f32 %v5133_v13, %v5133_v13  ;;  %v5248_v38 = vadd.f32 %v5247_v3, %v5233_v17  ;;  %v5235_v48 = vmul.f32 %v7308_v28, %v7308_v28 }
 0x21a   : > { %v3612_v40 = vadd.f32 %v3611_v57, %v3597_v7  ;;  %v6807_v56 = vpop.f32.mrb[10].mxu0  ;;  %v7311_v36 = vpop.f32.mrb[10].mxu1  ;;  %v3575_v2 = vadd.f32 %v6804_v24, %v3574_v50 }
 0x21b   : > { %v5212_v26 = vadd.f32 %v7308_v28, %v5211_v21  ;;  %v5249_v27 = vadd.f32 %v5248_v38, %v5234_v59  ;;  %3562 = vst [vmem:[%s9808_s29 + $0x58] sm:$0xff] %v6807_v56  ;;  %5199 = vst [vmem:[%s9808_s29 + $0xd8] sm:$0xff] %v7311_v36  ;;  %v3506_v8 = vpop.f32.mrb[11].mxu0  ;;  %v5143_v5 = vpop.f32.mrb[11].mxu1  ;;  %v3600_v4 = vmul.f32 %v6807_v56, %v6807_v56 }
 0x21c   : > { %3561 = vst [vmem:[%s9808_s29 + $0x50] sm:$0xff] %v3506_v8  ;;  %v3576_v31 = vadd.f32 %v3575_v2, %v3506_v8  ;;  %v3599_v30 = vmul.f32 %v3506_v8, %v3506_v8  ;;  %v3613_v58 = vadd.f32 %v3612_v40, %v3598_v18  ;;  %5198 = vst [vmem:[%s9808_s29 + $0xd0] sm:$0xff] %v5143_v5 }
 0x21d   : > { %v5213_v44 = vadd.f32 %v5212_v26, %v5143_v5  ;;  %v5236_v53 = vmul.f32 %v5143_v5, %v5143_v5  ;;  %v5250_v54 = vadd.f32 %v5249_v27, %v5235_v48  ;;  %v5237_v39 = vmul.f32 %v7311_v36, %v7311_v36 }
 0x21e   : > { %v3614_v6 = vadd.f32 %v3613_v58, %v3599_v30  ;;  %v6810_v10 = vpop.f32.mrb[12].mxu0  ;;  %v7314_v19 = vpop.f32.mrb[12].mxu1  ;;  %v3577_v29 = vadd.f32 %v6807_v56, %v3576_v31 }
 0x21f   : > { %v5214_v35 = vadd.f32 %v7311_v36, %v5213_v44  ;;  %v5251_v45 = vadd.f32 %v5250_v54, %v5236_v53  ;;  %3564 = vst [vmem:[%s9808_s29 + $0x68] sm:$0xff] %v6810_v10  ;;  %5201 = vst [vmem:[%s9808_s29 + $0xe8] sm:$0xff] %v7314_v19  ;;  %v3516_v52 = vpop.f32.mrb[13].mxu0  ;;  %v5153_v55 = vpop.f32.mrb[13].mxu1  ;;  %v3602_v23 = vmul.f32 %v6810_v10, %v6810_v10 }
 0x220   : > { %3563 = vst [vmem:[%s9808_s29 + $0x60] sm:$0xff] %v3516_v52  ;;  %v3578_v62 = vadd.f32 %v3577_v29, %v3516_v52  ;;  %v3601_v63 = vmul.f32 %v3516_v52, %v3516_v52  ;;  %v3615_v12 = vadd.f32 %v3614_v6, %v3600_v4  ;;  %5200 = vst [vmem:[%s9808_s29 + $0xe0] sm:$0xff] %v5153_v55 }
 0x221   : > { %v5215_v15 = vadd.f32 %v5214_v35, %v5153_v55  ;;  %v5238_v32 = vmul.f32 %v5153_v55, %v5153_v55  ;;  %v5252_v37 = vadd.f32 %v5251_v45, %v5237_v39  ;;  %v5239_v16 = vmul.f32 %v7314_v19, %v7314_v19 }
 0x222   : > { %v3616_v14 = vadd.f32 %v3615_v12, %v3601_v63  ;;  %v6813_v49 = vpop.f32.mrb[14].mxu0  ;;  %v7317_v9 = vpop.f32.mrb[14].mxu1  ;;  %v3579_v25 = vadd.f32 %v6810_v10, %v3578_v62 }
 0x223   : > { %v5216_v47 = vadd.f32 %v7314_v19, %v5215_v15  ;;  %v5253_v22 = vadd.f32 %v5252_v37, %v5238_v32  ;;  %3566 = vst [vmem:[%s9808_s29 + $0x78] sm:$0xff] %v6813_v49  ;;  %5203 = vst [vmem:[%s9808_s29 + $0xf8] sm:$0xff] %v7317_v9  ;;  %v3526_v51 = vpop.f32.mrb[15].mxu0  ;;  %v5163_v34 = vpop.f32.mrb[15].mxu1  ;;  %v3604_v20 = vmul.f32 %v6813_v49, %v6813_v49 }
 0x224   : > { %3565 = vst [vmem:[%s9808_s29 + $0x70] sm:$0xff] %v3526_v51  ;;  %v3580_v33 = vadd.f32 %v3579_v25, %v3526_v51  ;;  %v3603_v0 = vmul.f32 %v3526_v51, %v3526_v51  ;;  %v3617_v42 = vadd.f32 %v3616_v14, %v3602_v23  ;;  %5202 = vst [vmem:[%s9808_s29 + $0xf0] sm:$0xff] %v5163_v34 }
 0x225   : > { %v5217_v60 = vadd.f32 %v5216_v47, %v5163_v34  ;;  %v5240_v46 = vmul.f32 %v5163_v34, %v5163_v34  ;;  %v5254_v11 = vadd.f32 %v5253_v22, %v5239_v16  ;;  %v5241_v41 = vmul.f32 %v7317_v9, %v7317_v9 }
 0x226   : > { %v3581_v43 = vadd.f32 %v6813_v49, %v3580_v33  ;;  %v3618_v24 = vadd.f32 %v3617_v42, %v3603_v0 }
 0x227   : > { %v5218_v28 = vadd.f32 %v7317_v9, %v5217_v60  ;;  %v5255_v61 = vadd.f32 %v5254_v11, %v5240_v46 }
 0x228   : > { %v3582_v17 = vrot.slane %v3581_v43, 4  ;;  %v3619_v3 = vadd.f32 %v3618_v24, %v3604_v20 }
 0x229   : > { %v5219_v1 = vrot.slane %v5218_v28, 4  ;;  %v5256_v13 = vadd.f32 %v5255_v61, %v5241_v41 }
 0x22a   : > { %v3583_v50 = vadd.f32 %v3582_v17, %v3581_v43  ;;  %v3620_v7 = vrot.slane %v3619_v3, 4 }
 0x22b   : > { %v5220_v57 = vadd.f32 %v5219_v1, %v5218_v28  ;;  %v5257_v21 = vrot.slane %v5256_v13, 4 }
 0x22c   : > { %v3584_v59 = vrot.slane %v3583_v50, 2  ;;  %v3621_v38 = vadd.f32 %v3620_v7, %v3619_v3 }
 0x22d   : > { %v5221_v18 = vrot.slane %v5220_v57, 2  ;;  %v5258_v40 = vadd.f32 %v5257_v21, %v5256_v13 }
 0x22e   : > { %v3585_v56 = vadd.f32 %v3584_v59, %v3583_v50  ;;  %v3622_v36 = vrot.slane %v3621_v38, 2 }
 0x22f   : > { %v5222_v2 = vadd.f32 %v5221_v18, %v5220_v57  ;;  %v5259_v26 = vrot.slane %v5258_v40, 2 }
 0x230   : > { %v3586_v48 = vrot.slane %v3585_v56, 1  ;;  %v3623_v27 = vadd.f32 %v3622_v36, %v3621_v38 }
 0x231   : > { %v5223_v8 = vrot.slane %v5222_v2, 1  ;;  %v5260_v5 = vadd.f32 %v5259_v26, %v5258_v40 }
 0x232   : > { %v3587_v31 = vadd.f32 %v3586_v48, %v3585_v56  ;;  %v3624_v30 = vrot.slane %v3623_v27, 1 }
 0x233   : > { %v5224_v58 = vadd.f32 %v5223_v8, %v5222_v2  ;;  %v5261_v44 = vrot.slane %v5260_v5, 1 }
 0x234   : > { %v3625_v53 = vadd.f32 %v3624_v30, %v3623_v27 }
 0x235   : > { %v5225_v54 = vadd.f32 %v5224_v58, %v3587_v31  ;;  %v5262_v4 = vadd.f32 %v5261_v44, %v5260_v5 }
 0x237   : > { %5264 = vst [vmem:[%s265_s7] sm:$0x1] %v5225_v54  ;;  %v5263_v6 = vadd.f32 %v5262_v4, %v3625_v53 }
 0x239   : > { %5265 = vst [vmem:[%s268_s10] sm:$0x1] %v5263_v6 }
 0x23a PF: > { %s17_s21 = sadd.s32 1, %s8165_s21  }
 0x23b   : > { %p14_p4 = scmp.ge.s32.totalorder %s17_s21, 4  }
 0x23d   :  { %16 = sbr.rel (!%p14_p4) target bundleno = 1 (0x1), region = 98 }

</bundles_post_ra>
